<compile_context>
chip_gen: v7x
topology: tpu7x:2x2x1
jax: 0.10.0
libtpu: 0.0.40
codegen_flags: <defaults>
</compile_context>

<pallas_src>
import functools

import jax
import jax.numpy as jnp
from jax import lax
from jax.experimental import pallas as pl
from jax.experimental.pallas import tpu as pltpu


def _swish(x):
    return x * jax.nn.sigmoid(x)


# --------------------------------------------------------------------------
# Fused MixBlock kernel (single grid step, whole batch folded into the block)
# --------------------------------------------------------------------------
def _mixblock_kernel(x_ref, w_exp_ref, b_exp_ref, w_dw_ref, b_dw_ref,
                     w_se1_ref, b_se1_ref, w_se2_ref, b_se2_ref,
                     w_proj_ref, b_proj_ref, o_ref, buf_ref,
                     *, N, H, W, K, LM):
    HW = H * W
    pad = K // 2
    Cexp = w_exp_ref.shape[0]
    bufw = buf_ref.shape[1]

    # Zero only the halo margins, once; the interior is fully overwritten per image.
    buf_ref[:, :LM] = jnp.zeros((Cexp, LM), jnp.float32)
    buf_ref[:, LM + HW:bufw] = jnp.zeros((Cexp, bufw - LM - HW), jnp.float32)

    w_exp_t = w_exp_ref[...]        # (Cexp, Cin)
    b_exp = b_exp_ref[...]          # (Cexp, 1)
    w_dw = w_dw_ref[...]            # (Cexp, K*K)
    b_dw = b_dw_ref[...]            # (Cexp, 1)
    w_se1 = w_se1_ref[...]          # (Cexp, Cse)
    b_se1 = b_se1_ref[...]          # (1, Cse)
    w_se2_ct = w_se2_ref[...]       # (Cexp, Cse)  (= w_se2.T)
    b_se2 = b_se2_ref[...]          # (Cexp, 1)
    w_proj_t = w_proj_ref[...]      # (Cout, Cexp)
    b_proj = b_proj_ref[...]        # (Cout, 1)

    # Within-row validity masks (one per kw), hoisted out of the image/tap loops.
    # Row (h) overflow reads the zeroed halo margins of buf_ref, so no h-mask is needed.
    hw_idx = lax.broadcasted_iota(jnp.int32, (1, HW), 1)
    if (W & (W - 1)) == 0:
        w_idx = hw_idx & (W - 1)
    else:
        w_idx = hw_idx - (hw_idx // W) * W
    col_masks = [(w_idx + (kw - pad) >= 0) & (w_idx + (kw - pad) < W)
                 for kw in range(K)]

    for n in range(N):
        x = x_ref[n]                                        # (Cin, HW): expand input AND skip
        # ---- 1) expand 1x1 conv (BN scale folded) + bias + swish ----
        y = jnp.dot(w_exp_t, x, preferred_element_type=jnp.float32)
        y = _swish(y + b_exp)                               # (Cexp, HW)

        # ---- 2) MDConv depthwise (scale folded) + bias + swish ----
        buf_ref[:, LM:LM + HW] = y                          # lane-aligned interior store
        acc = jnp.zeros((Cexp, HW), jnp.float32)
        for kh in range(K):
            for kw in range(K):
                s = (kh - pad) * W + (kw - pad)
                tap = buf_ref[:, LM + s:LM + s + HW]        # (Cexp, HW) static lane slice
                wt = w_dw[:, kh * K + kw:kh * K + kw + 1]   # (Cexp, 1)
                acc = acc + jnp.where(col_masks[kw], tap, 0.0) * wt
        yd = _swish(acc + b_dw)                             # (Cexp, HW)

        # ---- 3) squeeze-and-excite: tiny bottleneck kept off the MXU ----
        m_col = jnp.sum(yd, axis=1, keepdims=True) * (1.0 / HW)             # (Cexp, 1)
        s1 = _swish(jnp.sum(w_se1 * m_col, axis=0, keepdims=True) + b_se1)  # (1, Cse)
        gate = jax.nn.sigmoid(
            jnp.sum(w_se2_ct * s1, axis=1, keepdims=True) + b_se2)          # (Cexp, 1)
        yg = yd * gate                                                      # (Cexp, HW)

        # ---- 4) project 1x1 (scale folded) + bias + identity skip; lane-dense store ----
        out = jnp.dot(w_proj_t, yg, preferred_element_type=jnp.float32) + b_proj + x
        o_ref[n] = out.astype(o_ref.dtype)


# --------------------------------------------------------------------------
# Parameter construction (deterministic, synthetic)
# --------------------------------------------------------------------------
def _fold_bn(key, c, eps=1e-5):
    k1, k2, k3, k4 = jax.random.split(key, 4)
    gamma = 1.0 + 0.1 * jax.random.normal(k1, (c,), jnp.float32)
    beta = 0.1 * jax.random.normal(k2, (c,), jnp.float32)
    mean = 0.1 * jax.random.normal(k3, (c,), jnp.float32)
    var = 1.0 + 0.1 * jnp.abs(jax.random.normal(k4, (c,), jnp.float32))
    scale = gamma / jnp.sqrt(var + eps)
    bias = beta - mean * scale
    return scale.reshape(1, c), bias.reshape(1, c)


def _split_channels(c, n):
    base = [c // n] * n
    base[0] += c - sum(base)
    return base


def make_mixblock_params(key, *, in_ch, out_ch, expand_ratio, dw_ksizes, se_ratio):
    c_exp = in_ch * expand_ratio
    c_se = int(c_exp * se_ratio)
    k_max = max(dw_ksizes)
    keys = jax.random.split(key, 12)
    p = {}
    # expand 1x1 conv + BN
    p["w_exp"] = 0.1 * jax.random.normal(keys[0], (in_ch, c_exp), jnp.float32)
    p["s_exp"], p["b_exp"] = _fold_bn(keys[1], c_exp)
    # MDConv: per-group kernels embedded centered in a (k_max, k_max, c_exp) weight
    splits = _split_channels(c_exp, len(dw_ksizes))
    w_dw = jnp.zeros((k_max, k_max, c_exp), jnp.float32)
    cstart = 0
    for i, (k, cg) in enumerate(zip(dw_ksizes, splits)):
        wg = 0.1 * jax.random.normal(keys[2 + i], (k, k, cg), jnp.float32)
        off = (k_max - k) // 2
        w_dw = w_dw.at[off:off + k, off:off + k, cstart:cstart + cg].set(wg)
        cstart += cg
    p["w_dw"] = w_dw
    p["s_dw"], p["b_dw"] = _fold_bn(keys[5], c_exp)
    # SE
    p["w_se1"] = 0.1 * jax.random.normal(keys[6], (c_exp, c_se), jnp.float32)
    p["b_se1"] = 0.1 * jax.random.normal(keys[7], (1, c_se), jnp.float32)
    p["w_se2"] = 0.1 * jax.random.normal(keys[8], (c_se, c_exp), jnp.float32)
    p["b_se2"] = 0.1 * jax.random.normal(keys[9], (1, c_exp), jnp.float32)
    # project 1x1 conv + BN
    p["w_proj"] = 0.1 * jax.random.normal(keys[10], (c_exp, out_ch), jnp.float32)
    p["s_proj"], p["b_proj"] = _fold_bn(keys[11], out_ch)
    p["k_max"] = k_max
    return p


# --------------------------------------------------------------------------
# Public wrapper: NCHW in, NCHW out (PyTorch convention), single fused pallas_call
# --------------------------------------------------------------------------
def mixblock_forward(x_nchw, p):
    N, Cin, H, W = x_nchw.shape
    K = int(p["k_max"])
    Cexp = p["w_exp"].shape[1]
    Cout = p["w_proj"].shape[1]
    Cse = p["w_se1"].shape[1]
    assert Cin == Cout, "identity skip path requires in_ch == out_ch"
    HW = H * W
    pad = K // 2

    # Lane-aligned halo margin for the flat depthwise buffer.
    margin = pad * W + pad
    LM = ((margin + 127) // 128) * 128
    bufw = LM + HW + LM

    # NCHW-flat input: used for both the expand matmul (channel-major) and the skip add.
    x_chw = x_nchw.astype(jnp.float32).reshape(N, Cin, HW)

    # Fold BN scales and pre-transpose everything to channel-major (once, host-side).
    w_exp_t = (p["w_exp"] * p["s_exp"]).T.astype(jnp.float32)              # (Cexp, Cin)
    b_exp_c = p["b_exp"].T.astype(jnp.float32)                             # (Cexp, 1)
    w_dw_f = p["w_dw"] * p["s_dw"].reshape(1, 1, Cexp)
    w_dw_cm = jnp.transpose(w_dw_f, (2, 0, 1)).reshape(Cexp, K * K)        # (Cexp, K*K)
    b_dw_c = p["b_dw"].T.astype(jnp.float32)                               # (Cexp, 1)
    w_se1 = p["w_se1"].astype(jnp.float32)                                 # (Cexp, Cse)
    b_se1_r = p["b_se1"].astype(jnp.float32)                               # (1, Cse)
    w_se2_ct = p["w_se2"].T.astype(jnp.float32)                            # (Cexp, Cse)
    b_se2_c = p["b_se2"].T.astype(jnp.float32)                             # (Cexp, 1)
    w_proj_t = (p["w_proj"] * p["s_proj"]).T.astype(jnp.float32)           # (Cout, Cexp)
    b_proj_c = p["b_proj"].T.astype(jnp.float32)                           # (Cout, 1)

    out = pl.pallas_call(
        functools.partial(_mixblock_kernel, N=N, H=H, W=W, K=K, LM=LM),
        out_shape=jax.ShapeDtypeStruct((N, Cout, HW), jnp.float32),
        grid=(1,),
        in_specs=[
            pl.BlockSpec((N, Cin, HW), lambda i: (0, 0, 0)),     # x, NCHW-flat
            pl.BlockSpec((Cexp, Cin), lambda i: (0, 0)),         # expand weight^T (folded)
            pl.BlockSpec((Cexp, 1), lambda i: (0, 0)),           # expand bias (column)
            pl.BlockSpec((Cexp, K * K), lambda i: (0, 0)),       # depthwise weight, channel-major
            pl.BlockSpec((Cexp, 1), lambda i: (0, 0)),           # depthwise bias (column)
            pl.BlockSpec((Cexp, Cse), lambda i: (0, 0)),         # SE reduce weight
            pl.BlockSpec((1, Cse), lambda i: (0, 0)),            # SE reduce bias (row)
            pl.BlockSpec((Cexp, Cse), lambda i: (0, 0)),         # SE expand weight^T
            pl.BlockSpec((Cexp, 1), lambda i: (0, 0)),           # SE expand bias (column)
            pl.BlockSpec((Cout, Cexp), lambda i: (0, 0)),        # project weight^T (folded)
            pl.BlockSpec((Cout, 1), lambda i: (0, 0)),           # project bias (column)
        ],
        out_specs=pl.BlockSpec((N, Cout, HW), lambda i: (0, 0, 0)),
        scratch_shapes=[pltpu.VMEM((Cexp, bufw), jnp.float32)],  # flat 1-D halo buffer
        compiler_params=pltpu.CompilerParams(
            dimension_semantics=("arbitrary",),
        ),
    )(x_chw, w_exp_t, b_exp_c, w_dw_cm, b_dw_c,
      w_se1, b_se1_r, w_se2_ct, b_se2_c, w_proj_t, b_proj_c)

    return out.reshape(N, Cout, H, W)                            # already NCHW


# --------------------------------------------------------------------------
# Pure-JAX reference (same math, no Pallas) for a sanity check
# --------------------------------------------------------------------------
def mixblock_reference(x_nchw, p):
    N, Cin, H, W = x_nchw.shape
    x = jnp.transpose(x_nchw, (0, 2, 3, 1)).astype(jnp.float32)
    y = jnp.einsum("nhwc,cd->nhwd", x, p["w_exp"]) * p["s_exp"] + p["b_exp"]
    y = _swish(y)
    K = int(p["k_max"])
    pad = K // 2
    yp = jnp.pad(y, ((0, 0), (pad, pad), (pad, pad), (0, 0)))
    acc = jnp.zeros_like(y)
    for kh in range(K):
        for kw in range(K):
            acc = acc + yp[:, kh:kh + H, kw:kw + W, :] * p["w_dw"][kh, kw, :]
    y = _swish(acc * p["s_dw"] + p["b_dw"])
    m = jnp.mean(y, axis=(1, 2))
    s = _swish(m @ p["w_se1"] + p["b_se1"])
    gate = jax.nn.sigmoid(s @ p["w_se2"] + p["b_se2"])
    y = y * gate[:, None, None, :]
    out = jnp.einsum("nhwc,cd->nhwd", y, p["w_proj"]) * p["s_proj"] + p["b_proj"]
    out = out + x
    return jnp.transpose(out, (0, 3, 1, 2))


if __name__ == "__main__":
    key = jax.random.PRNGKey(0)
    k_x, k_p = jax.random.split(key)

    # Module config: dw_ksize=[3,5], expand_ksize=1, project_ksize=1,
    # in=out=16, expand_ratio=2, strides=(1,1), se_ratio=0.25, swish=True -> id_skip active.
    in_ch = out_ch = 16
    expand_ratio = 2
    dw_ksizes = (3, 5)
    se_ratio = 0.25

    N, H, W = 2, 16, 16
    x = jax.random.normal(k_x, (N, in_ch, H, W), jnp.float32)     # NCHW like PyTorch

    params = make_mixblock_params(
        k_p, in_ch=in_ch, out_ch=out_ch, expand_ratio=expand_ratio,
        dw_ksizes=dw_ksizes, se_ratio=se_ratio,
    )

    out = jax.block_until_ready(mixblock_forward(x, params))
    ref = mixblock_reference(x, params)

    assert out.shape == (N, out_ch, H, W)
    assert bool(jnp.all(jnp.isfinite(out)))
    assert bool(jnp.allclose(out, ref, atol=1e-4, rtol=1e-4))

    print("KERNEL_OK")
</pallas_src>

<mosaic_0001>
module attributes {stable_mosaic.version = 11 : i64} {
  func.func @_mixblock_kernel(%arg0: i32, %arg1: memref<2x16x256xf32, #tpu.memory_space<vmem>>, %arg2: memref<32x16xf32, #tpu.memory_space<vmem>>, %arg3: memref<32x1xf32, #tpu.memory_space<vmem>>, %arg4: memref<32x25xf32, #tpu.memory_space<vmem>>, %arg5: memref<32x1xf32, #tpu.memory_space<vmem>>, %arg6: memref<32x8xf32, #tpu.memory_space<vmem>>, %arg7: memref<1x8xf32, #tpu.memory_space<vmem>>, %arg8: memref<32x8xf32, #tpu.memory_space<vmem>>, %arg9: memref<32x1xf32, #tpu.memory_space<vmem>>, %arg10: memref<16x32xf32, #tpu.memory_space<vmem>>, %arg11: memref<16x1xf32, #tpu.memory_space<vmem>>, %arg12: memref<2x16x256xf32, #tpu.memory_space<vmem>>, %arg13: memref<32x512xf32, #tpu.memory_space<vmem>>) attributes {dimension_semantics = [#tpu.dimension_semantics<arbitrary>], iteration_bounds = array<i64: 1>, scalar_prefetch = 0 : i64, scratch_operands = 1 : i64, tpu.core_type = #tpu.core_type<tc>, window_params = [{pipeline_mode = #tpu.pipeline_mode<synchronous>, transform_indices = @transform_0, window_bounds = array<i64: 2, 16, 256>}, {pipeline_mode = #tpu.pipeline_mode<synchronous>, transform_indices = @transform_1, window_bounds = array<i64: 32, 16>}, {pipeline_mode = #tpu.pipeline_mode<synchronous>, transform_indices = @transform_2, window_bounds = array<i64: 32, 1>}, {pipeline_mode = #tpu.pipeline_mode<synchronous>, transform_indices = @transform_3, window_bounds = array<i64: 32, 25>}, {pipeline_mode = #tpu.pipeline_mode<synchronous>, transform_indices = @transform_4, window_bounds = array<i64: 32, 1>}, {pipeline_mode = #tpu.pipeline_mode<synchronous>, transform_indices = @transform_5, window_bounds = array<i64: 32, 8>}, {pipeline_mode = #tpu.pipeline_mode<synchronous>, transform_indices = @transform_6, window_bounds = array<i64: 1, 8>}, {pipeline_mode = #tpu.pipeline_mode<synchronous>, transform_indices = @transform_7, window_bounds = array<i64: 32, 8>}, {pipeline_mode = #tpu.pipeline_mode<synchronous>, transform_indices = @transform_8, window_bounds = array<i64: 32, 1>}, {pipeline_mode = #tpu.pipeline_mode<synchronous>, transform_indices = @transform_9, window_bounds = array<i64: 16, 32>}, {pipeline_mode = #tpu.pipeline_mode<synchronous>, transform_indices = @transform_10, window_bounds = array<i64: 16, 1>}, {pipeline_mode = #tpu.pipeline_mode<synchronous>, transform_indices = @transform_11, window_bounds = array<i64: 2, 16, 256>}]} {
    %cst = arith.constant 0.000000e+00 : f32
    %0 = vector.broadcast %cst : f32 to vector<32x128xf32>
    %c0 = arith.constant 0 : index
    %c0_0 = arith.constant 0 : index
    %1 = vector.load %arg13[%c0, %c0_0] : memref<32x512xf32, #tpu.memory_space<vmem>>, vector<32x128xf32>
    tpu.vector_store %arg13[%c0, %c0_0], %0 {strides = array<i32>} : memref<32x512xf32, #tpu.memory_space<vmem>>, vector<32x128xf32>,
    %cst_1 = arith.constant 0.000000e+00 : f32
    %2 = vector.broadcast %cst_1 : f32 to vector<32x128xf32>
    %c0_2 = arith.constant 0 : index
    %c384 = arith.constant 384 : index
    %3 = vector.load %arg13[%c0_2, %c384] : memref<32x512xf32, #tpu.memory_space<vmem>>, vector<32x128xf32>
    tpu.vector_store %arg13[%c0_2, %c384], %2 {strides = array<i32>} : memref<32x512xf32, #tpu.memory_space<vmem>>, vector<32x128xf32>,
    %c0_3 = arith.constant 0 : index
    %c0_4 = arith.constant 0 : index
    %4 = vector.load %arg2[%c0_3, %c0_4] : memref<32x16xf32, #tpu.memory_space<vmem>>, vector<32x16xf32>
    %c0_5 = arith.constant 0 : index
    %c0_6 = arith.constant 0 : index
    %5 = vector.load %arg3[%c0_5, %c0_6] : memref<32x1xf32, #tpu.memory_space<vmem>>, vector<32x1xf32>
    %c0_7 = arith.constant 0 : index
    %c0_8 = arith.constant 0 : index
    %6 = vector.load %arg4[%c0_7, %c0_8] : memref<32x25xf32, #tpu.memory_space<vmem>>, vector<32x25xf32>
    %c0_9 = arith.constant 0 : index
    %c0_10 = arith.constant 0 : index
    %7 = vector.load %arg5[%c0_9, %c0_10] : memref<32x1xf32, #tpu.memory_space<vmem>>, vector<32x1xf32>
    %c0_11 = arith.constant 0 : index
    %c0_12 = arith.constant 0 : index
    %8 = vector.load %arg6[%c0_11, %c0_12] : memref<32x8xf32, #tpu.memory_space<vmem>>, vector<32x8xf32>
    %c0_13 = arith.constant 0 : index
    %c0_14 = arith.constant 0 : index
    %9 = vector.load %arg7[%c0_13, %c0_14] : memref<1x8xf32, #tpu.memory_space<vmem>>, vector<1x8xf32>
    %c0_15 = arith.constant 0 : index
    %c0_16 = arith.constant 0 : index
    %10 = vector.load %arg8[%c0_15, %c0_16] : memref<32x8xf32, #tpu.memory_space<vmem>>, vector<32x8xf32>
    %c0_17 = arith.constant 0 : index
    %c0_18 = arith.constant 0 : index
    %11 = vector.load %arg9[%c0_17, %c0_18] : memref<32x1xf32, #tpu.memory_space<vmem>>, vector<32x1xf32>
    %c0_19 = arith.constant 0 : index
    %c0_20 = arith.constant 0 : index
    %12 = vector.load %arg10[%c0_19, %c0_20] : memref<16x32xf32, #tpu.memory_space<vmem>>, vector<16x32xf32>
    %c0_21 = arith.constant 0 : index
    %c0_22 = arith.constant 0 : index
    %13 = vector.load %arg11[%c0_21, %c0_22] : memref<16x1xf32, #tpu.memory_space<vmem>>, vector<16x1xf32>
    %14 = tpu.iota {dimensions = array<i32: 1>} : vector<1x256xi32>
    %c15_i32 = arith.constant 15 : i32
    %15 = vector.broadcast %c15_i32 : i32 to vector<1x256xi32>
    %16 = arith.andi %14, %15 : vector<1x256xi32>
    %c-2_i32 = arith.constant -2 : i32
    %17 = vector.broadcast %c-2_i32 : i32 to vector<1x256xi32>
    %18 = arith.addi %16, %17 : vector<1x256xi32>
    %c0_i32 = arith.constant 0 : i32
    %19 = vector.broadcast %c0_i32 : i32 to vector<1x256xi32>
    %20 = arith.cmpi sge, %18, %19 : vector<1x256xi32>
    %c-2_i32_23 = arith.constant -2 : i32
    %21 = vector.broadcast %c-2_i32_23 : i32 to vector<1x256xi32>
    %22 = arith.addi %16, %21 : vector<1x256xi32>
    %c16_i32 = arith.constant 16 : i32
    %23 = vector.broadcast %c16_i32 : i32 to vector<1x256xi32>
    %24 = arith.cmpi slt, %22, %23 : vector<1x256xi32>
    %25 = arith.andi %20, %24 : vector<1x256xi1>
    %c-1_i32 = arith.constant -1 : i32
    %26 = vector.broadcast %c-1_i32 : i32 to vector<1x256xi32>
    %27 = arith.addi %16, %26 : vector<1x256xi32>
    %c0_i32_24 = arith.constant 0 : i32
    %28 = vector.broadcast %c0_i32_24 : i32 to vector<1x256xi32>
    %29 = arith.cmpi sge, %27, %28 : vector<1x256xi32>
    %c-1_i32_25 = arith.constant -1 : i32
    %30 = vector.broadcast %c-1_i32_25 : i32 to vector<1x256xi32>
    %31 = arith.addi %16, %30 : vector<1x256xi32>
    %c16_i32_26 = arith.constant 16 : i32
    %32 = vector.broadcast %c16_i32_26 : i32 to vector<1x256xi32>
    %33 = arith.cmpi slt, %31, %32 : vector<1x256xi32>
    %34 = arith.andi %29, %33 : vector<1x256xi1>
    %c0_i32_27 = arith.constant 0 : i32
    %35 = vector.broadcast %c0_i32_27 : i32 to vector<1x256xi32>
    %36 = arith.addi %16, %35 : vector<1x256xi32>
    %c0_i32_28 = arith.constant 0 : i32
    %37 = vector.broadcast %c0_i32_28 : i32 to vector<1x256xi32>
    %38 = arith.cmpi sge, %36, %37 : vector<1x256xi32>
    %c0_i32_29 = arith.constant 0 : i32
    %39 = vector.broadcast %c0_i32_29 : i32 to vector<1x256xi32>
    %40 = arith.addi %16, %39 : vector<1x256xi32>
    %c16_i32_30 = arith.constant 16 : i32
    %41 = vector.broadcast %c16_i32_30 : i32 to vector<1x256xi32>
    %42 = arith.cmpi slt, %40, %41 : vector<1x256xi32>
    %43 = arith.andi %38, %42 : vector<1x256xi1>
    %c1_i32 = arith.constant 1 : i32
    %44 = vector.broadcast %c1_i32 : i32 to vector<1x256xi32>
    %45 = arith.addi %16, %44 : vector<1x256xi32>
    %c0_i32_31 = arith.constant 0 : i32
    %46 = vector.broadcast %c0_i32_31 : i32 to vector<1x256xi32>
    %47 = arith.cmpi sge, %45, %46 : vector<1x256xi32>
    %c1_i32_32 = arith.constant 1 : i32
    %48 = vector.broadcast %c1_i32_32 : i32 to vector<1x256xi32>
    %49 = arith.addi %16, %48 : vector<1x256xi32>
    %c16_i32_33 = arith.constant 16 : i32
    %50 = vector.broadcast %c16_i32_33 : i32 to vector<1x256xi32>
    %51 = arith.cmpi slt, %49, %50 : vector<1x256xi32>
    %52 = arith.andi %47, %51 : vector<1x256xi1>
    %c2_i32 = arith.constant 2 : i32
    %53 = vector.broadcast %c2_i32 : i32 to vector<1x256xi32>
    %54 = arith.addi %16, %53 : vector<1x256xi32>
    %c0_i32_34 = arith.constant 0 : i32
    %55 = vector.broadcast %c0_i32_34 : i32 to vector<1x256xi32>
    %56 = arith.cmpi sge, %54, %55 : vector<1x256xi32>
    %c2_i32_35 = arith.constant 2 : i32
    %57 = vector.broadcast %c2_i32_35 : i32 to vector<1x256xi32>
    %58 = arith.addi %16, %57 : vector<1x256xi32>
    %c16_i32_36 = arith.constant 16 : i32
    %59 = vector.broadcast %c16_i32_36 : i32 to vector<1x256xi32>
    %60 = arith.cmpi slt, %58, %59 : vector<1x256xi32>
    %61 = arith.andi %56, %60 : vector<1x256xi1>
    %c0_37 = arith.constant 0 : index
    %c0_38 = arith.constant 0 : index
    %c0_39 = arith.constant 0 : index
    %62 = vector.load %arg1[%c0_37, %c0_38, %c0_39] : memref<2x16x256xf32, #tpu.memory_space<vmem>>, vector<1x16x256xf32>
    %63 = vector.shape_cast %62 : vector<1x16x256xf32> to vector<16x256xf32>
    %cst_40 = arith.constant dense<0.000000e+00> : vector<32x256xf32>
    %64 = tpu.matmul %4, %63, %cst_40 {dimension_numbers = #tpu.dot_dimension_numbers<[1], [0], [0], [1], [0, 0, 1, 1], [], []>} : vector<32x16xf32>, vector<16x256xf32>, vector<32x256xf32> -> vector<32x256xf32>
    %65 = vector.broadcast %5 : vector<32x1xf32> to vector<32x256xf32>
    %66 = arith.addf %64, %65 : vector<32x256xf32>
    %67 = arith.negf %66 : vector<32x256xf32>
    %68 = math.exp %67 : vector<32x256xf32>
    %cst_41 = arith.constant 1.000000e+00 : f32
    %69 = vector.broadcast %cst_41 : f32 to vector<32x256xf32>
    %70 = arith.addf %69, %68 : vector<32x256xf32>
    %71 = arith.divf %69, %70 : vector<32x256xf32>
    %72 = arith.mulf %66, %71 : vector<32x256xf32>
    %c0_42 = arith.constant 0 : index
    %c128 = arith.constant 128 : index
    %73 = vector.load %arg13[%c0_42, %c128] : memref<32x512xf32, #tpu.memory_space<vmem>>, vector<32x256xf32>
    tpu.vector_store %arg13[%c0_42, %c128], %72 {strides = array<i32>} : memref<32x512xf32, #tpu.memory_space<vmem>>, vector<32x256xf32>,
    %cst_43 = arith.constant 0.000000e+00 : f32
    %74 = vector.broadcast %cst_43 : f32 to vector<32x256xf32>
    %c0_44 = arith.constant 0 : index
    %c94 = arith.constant 94 : index
    %75 = vector.load %arg13[%c0_44, %c94] : memref<32x512xf32, #tpu.memory_space<vmem>>, vector<32x256xf32>
    %76 = vector.extract_strided_slice %6 {offsets = [0, 0], sizes = [32, 1], strides = [1, 1]} : vector<32x25xf32> to vector<32x1xf32>
    %cst_45 = arith.constant 0.000000e+00 : f32
    %77 = vector.shape_cast %25 : vector<1x256xi1> to vector<1x256xi1>
    %78 = vector.broadcast %77 : vector<1x256xi1> to vector<32x256xi1>
    %79 = vector.broadcast %cst_45 : f32 to vector<32x256xf32>
    %80 = arith.select %78, %75, %79 : vector<32x256xi1>, vector<32x256xf32>
    %81 = vector.broadcast %76 : vector<32x1xf32> to vector<32x256xf32>
    %82 = arith.mulf %80, %81 : vector<32x256xf32>
    %83 = arith.addf %74, %82 : vector<32x256xf32>
    %c0_46 = arith.constant 0 : index
    %c95 = arith.constant 95 : index
    %84 = vector.load %arg13[%c0_46, %c95] : memref<32x512xf32, #tpu.memory_space<vmem>>, vector<32x256xf32>
    %85 = vector.extract_strided_slice %6 {offsets = [0, 1], sizes = [32, 1], strides = [1, 1]} : vector<32x25xf32> to vector<32x1xf32>
    %cst_47 = arith.constant 0.000000e+00 : f32
    %86 = vector.shape_cast %34 : vector<1x256xi1> to vector<1x256xi1>
    %87 = vector.broadcast %86 : vector<1x256xi1> to vector<32x256xi1>
    %88 = vector.broadcast %cst_47 : f32 to vector<32x256xf32>
    %89 = arith.select %87, %84, %88 : vector<32x256xi1>, vector<32x256xf32>
    %90 = vector.broadcast %85 : vector<32x1xf32> to vector<32x256xf32>
    %91 = arith.mulf %89, %90 : vector<32x256xf32>
    %92 = arith.addf %83, %91 : vector<32x256xf32>
    %c0_48 = arith.constant 0 : index
    %c96 = arith.constant 96 : index
    %93 = vector.load %arg13[%c0_48, %c96] : memref<32x512xf32, #tpu.memory_space<vmem>>, vector<32x256xf32>
    %94 = vector.extract_strided_slice %6 {offsets = [0, 2], sizes = [32, 1], strides = [1, 1]} : vector<32x25xf32> to vector<32x1xf32>
    %cst_49 = arith.constant 0.000000e+00 : f32
    %95 = vector.shape_cast %43 : vector<1x256xi1> to vector<1x256xi1>
    %96 = vector.broadcast %95 : vector<1x256xi1> to vector<32x256xi1>
    %97 = vector.broadcast %cst_49 : f32 to vector<32x256xf32>
    %98 = arith.select %96, %93, %97 : vector<32x256xi1>, vector<32x256xf32>
    %99 = vector.broadcast %94 : vector<32x1xf32> to vector<32x256xf32>
    %100 = arith.mulf %98, %99 : vector<32x256xf32>
    %101 = arith.addf %92, %100 : vector<32x256xf32>
    %c0_50 = arith.constant 0 : index
    %c97 = arith.constant 97 : index
    %102 = vector.load %arg13[%c0_50, %c97] : memref<32x512xf32, #tpu.memory_space<vmem>>, vector<32x256xf32>
    %103 = vector.extract_strided_slice %6 {offsets = [0, 3], sizes = [32, 1], strides = [1, 1]} : vector<32x25xf32> to vector<32x1xf32>
    %cst_51 = arith.constant 0.000000e+00 : f32
    %104 = vector.shape_cast %52 : vector<1x256xi1> to vector<1x256xi1>
    %105 = vector.broadcast %104 : vector<1x256xi1> to vector<32x256xi1>
    %106 = vector.broadcast %cst_51 : f32 to vector<32x256xf32>
    %107 = arith.select %105, %102, %106 : vector<32x256xi1>, vector<32x256xf32>
    %108 = vector.broadcast %103 : vector<32x1xf32> to vector<32x256xf32>
    %109 = arith.mulf %107, %108 : vector<32x256xf32>
    %110 = arith.addf %101, %109 : vector<32x256xf32>
    %c0_52 = arith.constant 0 : index
    %c98 = arith.constant 98 : index
    %111 = vector.load %arg13[%c0_52, %c98] : memref<32x512xf32, #tpu.memory_space<vmem>>, vector<32x256xf32>
    %112 = vector.extract_strided_slice %6 {offsets = [0, 4], sizes = [32, 1], strides = [1, 1]} : vector<32x25xf32> to vector<32x1xf32>
    %cst_53 = arith.constant 0.000000e+00 : f32
    %113 = vector.shape_cast %61 : vector<1x256xi1> to vector<1x256xi1>
    %114 = vector.broadcast %113 : vector<1x256xi1> to vector<32x256xi1>
    %115 = vector.broadcast %cst_53 : f32 to vector<32x256xf32>
    %116 = arith.select %114, %111, %115 : vector<32x256xi1>, vector<32x256xf32>
    %117 = vector.broadcast %112 : vector<32x1xf32> to vector<32x256xf32>
    %118 = arith.mulf %116, %117 : vector<32x256xf32>
    %119 = arith.addf %110, %118 : vector<32x256xf32>
    %c0_54 = arith.constant 0 : index
    %c110 = arith.constant 110 : index
    %120 = vector.load %arg13[%c0_54, %c110] : memref<32x512xf32, #tpu.memory_space<vmem>>, vector<32x256xf32>
    %121 = vector.extract_strided_slice %6 {offsets = [0, 5], sizes = [32, 1], strides = [1, 1]} : vector<32x25xf32> to vector<32x1xf32>
    %cst_55 = arith.constant 0.000000e+00 : f32
    %122 = vector.shape_cast %25 : vector<1x256xi1> to vector<1x256xi1>
    %123 = vector.broadcast %122 : vector<1x256xi1> to vector<32x256xi1>
    %124 = vector.broadcast %cst_55 : f32 to vector<32x256xf32>
    %125 = arith.select %123, %120, %124 : vector<32x256xi1>, vector<32x256xf32>
    %126 = vector.broadcast %121 : vector<32x1xf32> to vector<32x256xf32>
    %127 = arith.mulf %125, %126 : vector<32x256xf32>
    %128 = arith.addf %119, %127 : vector<32x256xf32>
    %c0_56 = arith.constant 0 : index
    %c111 = arith.constant 111 : index
    %129 = vector.load %arg13[%c0_56, %c111] : memref<32x512xf32, #tpu.memory_space<vmem>>, vector<32x256xf32>
    %130 = vector.extract_strided_slice %6 {offsets = [0, 6], sizes = [32, 1], strides = [1, 1]} : vector<32x25xf32> to vector<32x1xf32>
    %cst_57 = arith.constant 0.000000e+00 : f32
    %131 = vector.shape_cast %34 : vector<1x256xi1> to vector<1x256xi1>
    %132 = vector.broadcast %131 : vector<1x256xi1> to vector<32x256xi1>
    %133 = vector.broadcast %cst_57 : f32 to vector<32x256xf32>
    %134 = arith.select %132, %129, %133 : vector<32x256xi1>, vector<32x256xf32>
    %135 = vector.broadcast %130 : vector<32x1xf32> to vector<32x256xf32>
    %136 = arith.mulf %134, %135 : vector<32x256xf32>
    %137 = arith.addf %128, %136 : vector<32x256xf32>
    %c0_58 = arith.constant 0 : index
    %c112 = arith.constant 112 : index
    %138 = vector.load %arg13[%c0_58, %c112] : memref<32x512xf32, #tpu.memory_space<vmem>>, vector<32x256xf32>
    %139 = vector.extract_strided_slice %6 {offsets = [0, 7], sizes = [32, 1], strides = [1, 1]} : vector<32x25xf32> to vector<32x1xf32>
    %cst_59 = arith.constant 0.000000e+00 : f32
    %140 = vector.shape_cast %43 : vector<1x256xi1> to vector<1x256xi1>
    %141 = vector.broadcast %140 : vector<1x256xi1> to vector<32x256xi1>
    %142 = vector.broadcast %cst_59 : f32 to vector<32x256xf32>
    %143 = arith.select %141, %138, %142 : vector<32x256xi1>, vector<32x256xf32>
    %144 = vector.broadcast %139 : vector<32x1xf32> to vector<32x256xf32>
    %145 = arith.mulf %143, %144 : vector<32x256xf32>
    %146 = arith.addf %137, %145 : vector<32x256xf32>
    %c0_60 = arith.constant 0 : index
    %c113 = arith.constant 113 : index
    %147 = vector.load %arg13[%c0_60, %c113] : memref<32x512xf32, #tpu.memory_space<vmem>>, vector<32x256xf32>
    %148 = vector.extract_strided_slice %6 {offsets = [0, 8], sizes = [32, 1], strides = [1, 1]} : vector<32x25xf32> to vector<32x1xf32>
    %cst_61 = arith.constant 0.000000e+00 : f32
    %149 = vector.shape_cast %52 : vector<1x256xi1> to vector<1x256xi1>
    %150 = vector.broadcast %149 : vector<1x256xi1> to vector<32x256xi1>
    %151 = vector.broadcast %cst_61 : f32 to vector<32x256xf32>
    %152 = arith.select %150, %147, %151 : vector<32x256xi1>, vector<32x256xf32>
    %153 = vector.broadcast %148 : vector<32x1xf32> to vector<32x256xf32>
    %154 = arith.mulf %152, %153 : vector<32x256xf32>
    %155 = arith.addf %146, %154 : vector<32x256xf32>
    %c0_62 = arith.constant 0 : index
    %c114 = arith.constant 114 : index
    %156 = vector.load %arg13[%c0_62, %c114] : memref<32x512xf32, #tpu.memory_space<vmem>>, vector<32x256xf32>
    %157 = vector.extract_strided_slice %6 {offsets = [0, 9], sizes = [32, 1], strides = [1, 1]} : vector<32x25xf32> to vector<32x1xf32>
    %cst_63 = arith.constant 0.000000e+00 : f32
    %158 = vector.shape_cast %61 : vector<1x256xi1> to vector<1x256xi1>
    %159 = vector.broadcast %158 : vector<1x256xi1> to vector<32x256xi1>
    %160 = vector.broadcast %cst_63 : f32 to vector<32x256xf32>
    %161 = arith.select %159, %156, %160 : vector<32x256xi1>, vector<32x256xf32>
    %162 = vector.broadcast %157 : vector<32x1xf32> to vector<32x256xf32>
    %163 = arith.mulf %161, %162 : vector<32x256xf32>
    %164 = arith.addf %155, %163 : vector<32x256xf32>
    %c0_64 = arith.constant 0 : index
    %c126 = arith.constant 126 : index
    %165 = vector.load %arg13[%c0_64, %c126] : memref<32x512xf32, #tpu.memory_space<vmem>>, vector<32x256xf32>
    %166 = vector.extract_strided_slice %6 {offsets = [0, 10], sizes = [32, 1], strides = [1, 1]} : vector<32x25xf32> to vector<32x1xf32>
    %cst_65 = arith.constant 0.000000e+00 : f32
    %167 = vector.shape_cast %25 : vector<1x256xi1> to vector<1x256xi1>
    %168 = vector.broadcast %167 : vector<1x256xi1> to vector<32x256xi1>
    %169 = vector.broadcast %cst_65 : f32 to vector<32x256xf32>
    %170 = arith.select %168, %165, %169 : vector<32x256xi1>, vector<32x256xf32>
    %171 = vector.broadcast %166 : vector<32x1xf32> to vector<32x256xf32>
    %172 = arith.mulf %170, %171 : vector<32x256xf32>
    %173 = arith.addf %164, %172 : vector<32x256xf32>
    %c0_66 = arith.constant 0 : index
    %c127 = arith.constant 127 : index
    %174 = vector.load %arg13[%c0_66, %c127] : memref<32x512xf32, #tpu.memory_space<vmem>>, vector<32x256xf32>
    %175 = vector.extract_strided_slice %6 {offsets = [0, 11], sizes = [32, 1], strides = [1, 1]} : vector<32x25xf32> to vector<32x1xf32>
    %cst_67 = arith.constant 0.000000e+00 : f32
    %176 = vector.shape_cast %34 : vector<1x256xi1> to vector<1x256xi1>
    %177 = vector.broadcast %176 : vector<1x256xi1> to vector<32x256xi1>
    %178 = vector.broadcast %cst_67 : f32 to vector<32x256xf32>
    %179 = arith.select %177, %174, %178 : vector<32x256xi1>, vector<32x256xf32>
    %180 = vector.broadcast %175 : vector<32x1xf32> to vector<32x256xf32>
    %181 = arith.mulf %179, %180 : vector<32x256xf32>
    %182 = arith.addf %173, %181 : vector<32x256xf32>
    %c0_68 = arith.constant 0 : index
    %c128_69 = arith.constant 128 : index
    %183 = vector.load %arg13[%c0_68, %c128_69] : memref<32x512xf32, #tpu.memory_space<vmem>>, vector<32x256xf32>
    %184 = vector.extract_strided_slice %6 {offsets = [0, 12], sizes = [32, 1], strides = [1, 1]} : vector<32x25xf32> to vector<32x1xf32>
    %cst_70 = arith.constant 0.000000e+00 : f32
    %185 = vector.shape_cast %43 : vector<1x256xi1> to vector<1x256xi1>
    %186 = vector.broadcast %185 : vector<1x256xi1> to vector<32x256xi1>
    %187 = vector.broadcast %cst_70 : f32 to vector<32x256xf32>
    %188 = arith.select %186, %183, %187 : vector<32x256xi1>, vector<32x256xf32>
    %189 = vector.broadcast %184 : vector<32x1xf32> to vector<32x256xf32>
    %190 = arith.mulf %188, %189 : vector<32x256xf32>
    %191 = arith.addf %182, %190 : vector<32x256xf32>
    %c0_71 = arith.constant 0 : index
    %c129 = arith.constant 129 : index
    %192 = vector.load %arg13[%c0_71, %c129] : memref<32x512xf32, #tpu.memory_space<vmem>>, vector<32x256xf32>
    %193 = vector.extract_strided_slice %6 {offsets = [0, 13], sizes = [32, 1], strides = [1, 1]} : vector<32x25xf32> to vector<32x1xf32>
    %cst_72 = arith.constant 0.000000e+00 : f32
    %194 = vector.shape_cast %52 : vector<1x256xi1> to vector<1x256xi1>
    %195 = vector.broadcast %194 : vector<1x256xi1> to vector<32x256xi1>
    %196 = vector.broadcast %cst_72 : f32 to vector<32x256xf32>
    %197 = arith.select %195, %192, %196 : vector<32x256xi1>, vector<32x256xf32>
    %198 = vector.broadcast %193 : vector<32x1xf32> to vector<32x256xf32>
    %199 = arith.mulf %197, %198 : vector<32x256xf32>
    %200 = arith.addf %191, %199 : vector<32x256xf32>
    %c0_73 = arith.constant 0 : index
    %c130 = arith.constant 130 : index
    %201 = vector.load %arg13[%c0_73, %c130] : memref<32x512xf32, #tpu.memory_space<vmem>>, vector<32x256xf32>
    %202 = vector.extract_strided_slice %6 {offsets = [0, 14], sizes = [32, 1], strides = [1, 1]} : vector<32x25xf32> to vector<32x1xf32>
    %cst_74 = arith.constant 0.000000e+00 : f32
    %203 = vector.shape_cast %61 : vector<1x256xi1> to vector<1x256xi1>
    %204 = vector.broadcast %203 : vector<1x256xi1> to vector<32x256xi1>
    %205 = vector.broadcast %cst_74 : f32 to vector<32x256xf32>
    %206 = arith.select %204, %201, %205 : vector<32x256xi1>, vector<32x256xf32>
    %207 = vector.broadcast %202 : vector<32x1xf32> to vector<32x256xf32>
    %208 = arith.mulf %206, %207 : vector<32x256xf32>
    %209 = arith.addf %200, %208 : vector<32x256xf32>
    %c0_75 = arith.constant 0 : index
    %c142 = arith.constant 142 : index
    %210 = vector.load %arg13[%c0_75, %c142] : memref<32x512xf32, #tpu.memory_space<vmem>>, vector<32x256xf32>
    %211 = vector.extract_strided_slice %6 {offsets = [0, 15], sizes = [32, 1], strides = [1, 1]} : vector<32x25xf32> to vector<32x1xf32>
    %cst_76 = arith.constant 0.000000e+00 : f32
    %212 = vector.shape_cast %25 : vector<1x256xi1> to vector<1x256xi1>
    %213 = vector.broadcast %212 : vector<1x256xi1> to vector<32x256xi1>
    %214 = vector.broadcast %cst_76 : f32 to vector<32x256xf32>
    %215 = arith.select %213, %210, %214 : vector<32x256xi1>, vector<32x256xf32>
    %216 = vector.broadcast %211 : vector<32x1xf32> to vector<32x256xf32>
    %217 = arith.mulf %215, %216 : vector<32x256xf32>
    %218 = arith.addf %209, %217 : vector<32x256xf32>
    %c0_77 = arith.constant 0 : index
    %c143 = arith.constant 143 : index
    %219 = vector.load %arg13[%c0_77, %c143] : memref<32x512xf32, #tpu.memory_space<vmem>>, vector<32x256xf32>
    %220 = vector.extract_strided_slice %6 {offsets = [0, 16], sizes = [32, 1], strides = [1, 1]} : vector<32x25xf32> to vector<32x1xf32>
    %cst_78 = arith.constant 0.000000e+00 : f32
    %221 = vector.shape_cast %34 : vector<1x256xi1> to vector<1x256xi1>
    %222 = vector.broadcast %221 : vector<1x256xi1> to vector<32x256xi1>
    %223 = vector.broadcast %cst_78 : f32 to vector<32x256xf32>
    %224 = arith.select %222, %219, %223 : vector<32x256xi1>, vector<32x256xf32>
    %225 = vector.broadcast %220 : vector<32x1xf32> to vector<32x256xf32>
    %226 = arith.mulf %224, %225 : vector<32x256xf32>
    %227 = arith.addf %218, %226 : vector<32x256xf32>
    %c0_79 = arith.constant 0 : index
    %c144 = arith.constant 144 : index
    %228 = vector.load %arg13[%c0_79, %c144] : memref<32x512xf32, #tpu.memory_space<vmem>>, vector<32x256xf32>
    %229 = vector.extract_strided_slice %6 {offsets = [0, 17], sizes = [32, 1], strides = [1, 1]} : vector<32x25xf32> to vector<32x1xf32>
    %cst_80 = arith.constant 0.000000e+00 : f32
    %230 = vector.shape_cast %43 : vector<1x256xi1> to vector<1x256xi1>
    %231 = vector.broadcast %230 : vector<1x256xi1> to vector<32x256xi1>
    %232 = vector.broadcast %cst_80 : f32 to vector<32x256xf32>
    %233 = arith.select %231, %228, %232 : vector<32x256xi1>, vector<32x256xf32>
    %234 = vector.broadcast %229 : vector<32x1xf32> to vector<32x256xf32>
    %235 = arith.mulf %233, %234 : vector<32x256xf32>
    %236 = arith.addf %227, %235 : vector<32x256xf32>
    %c0_81 = arith.constant 0 : index
    %c145 = arith.constant 145 : index
    %237 = vector.load %arg13[%c0_81, %c145] : memref<32x512xf32, #tpu.memory_space<vmem>>, vector<32x256xf32>
    %238 = vector.extract_strided_slice %6 {offsets = [0, 18], sizes = [32, 1], strides = [1, 1]} : vector<32x25xf32> to vector<32x1xf32>
    %cst_82 = arith.constant 0.000000e+00 : f32
    %239 = vector.shape_cast %52 : vector<1x256xi1> to vector<1x256xi1>
    %240 = vector.broadcast %239 : vector<1x256xi1> to vector<32x256xi1>
    %241 = vector.broadcast %cst_82 : f32 to vector<32x256xf32>
    %242 = arith.select %240, %237, %241 : vector<32x256xi1>, vector<32x256xf32>
    %243 = vector.broadcast %238 : vector<32x1xf32> to vector<32x256xf32>
    %244 = arith.mulf %242, %243 : vector<32x256xf32>
    %245 = arith.addf %236, %244 : vector<32x256xf32>
    %c0_83 = arith.constant 0 : index
    %c146 = arith.constant 146 : index
    %246 = vector.load %arg13[%c0_83, %c146] : memref<32x512xf32, #tpu.memory_space<vmem>>, vector<32x256xf32>
    %247 = vector.extract_strided_slice %6 {offsets = [0, 19], sizes = [32, 1], strides = [1, 1]} : vector<32x25xf32> to vector<32x1xf32>
    %cst_84 = arith.constant 0.000000e+00 : f32
    %248 = vector.shape_cast %61 : vector<1x256xi1> to vector<1x256xi1>
    %249 = vector.broadcast %248 : vector<1x256xi1> to vector<32x256xi1>
    %250 = vector.broadcast %cst_84 : f32 to vector<32x256xf32>
    %251 = arith.select %249, %246, %250 : vector<32x256xi1>, vector<32x256xf32>
    %252 = vector.broadcast %247 : vector<32x1xf32> to vector<32x256xf32>
    %253 = arith.mulf %251, %252 : vector<32x256xf32>
    %254 = arith.addf %245, %253 : vector<32x256xf32>
    %c0_85 = arith.constant 0 : index
    %c158 = arith.constant 158 : index
    %255 = vector.load %arg13[%c0_85, %c158] : memref<32x512xf32, #tpu.memory_space<vmem>>, vector<32x256xf32>
    %256 = vector.extract_strided_slice %6 {offsets = [0, 20], sizes = [32, 1], strides = [1, 1]} : vector<32x25xf32> to vector<32x1xf32>
    %cst_86 = arith.constant 0.000000e+00 : f32
    %257 = vector.shape_cast %25 : vector<1x256xi1> to vector<1x256xi1>
    %258 = vector.broadcast %257 : vector<1x256xi1> to vector<32x256xi1>
    %259 = vector.broadcast %cst_86 : f32 to vector<32x256xf32>
    %260 = arith.select %258, %255, %259 : vector<32x256xi1>, vector<32x256xf32>
    %261 = vector.broadcast %256 : vector<32x1xf32> to vector<32x256xf32>
    %262 = arith.mulf %260, %261 : vector<32x256xf32>
    %263 = arith.addf %254, %262 : vector<32x256xf32>
    %c0_87 = arith.constant 0 : index
    %c159 = arith.constant 159 : index
    %264 = vector.load %arg13[%c0_87, %c159] : memref<32x512xf32, #tpu.memory_space<vmem>>, vector<32x256xf32>
    %265 = vector.extract_strided_slice %6 {offsets = [0, 21], sizes = [32, 1], strides = [1, 1]} : vector<32x25xf32> to vector<32x1xf32>
    %cst_88 = arith.constant 0.000000e+00 : f32
    %266 = vector.shape_cast %34 : vector<1x256xi1> to vector<1x256xi1>
    %267 = vector.broadcast %266 : vector<1x256xi1> to vector<32x256xi1>
    %268 = vector.broadcast %cst_88 : f32 to vector<32x256xf32>
    %269 = arith.select %267, %264, %268 : vector<32x256xi1>, vector<32x256xf32>
    %270 = vector.broadcast %265 : vector<32x1xf32> to vector<32x256xf32>
    %271 = arith.mulf %269, %270 : vector<32x256xf32>
    %272 = arith.addf %263, %271 : vector<32x256xf32>
    %c0_89 = arith.constant 0 : index
    %c160 = arith.constant 160 : index
    %273 = vector.load %arg13[%c0_89, %c160] : memref<32x512xf32, #tpu.memory_space<vmem>>, vector<32x256xf32>
    %274 = vector.extract_strided_slice %6 {offsets = [0, 22], sizes = [32, 1], strides = [1, 1]} : vector<32x25xf32> to vector<32x1xf32>
    %cst_90 = arith.constant 0.000000e+00 : f32
    %275 = vector.shape_cast %43 : vector<1x256xi1> to vector<1x256xi1>
    %276 = vector.broadcast %275 : vector<1x256xi1> to vector<32x256xi1>
    %277 = vector.broadcast %cst_90 : f32 to vector<32x256xf32>
    %278 = arith.select %276, %273, %277 : vector<32x256xi1>, vector<32x256xf32>
    %279 = vector.broadcast %274 : vector<32x1xf32> to vector<32x256xf32>
    %280 = arith.mulf %278, %279 : vector<32x256xf32>
    %281 = arith.addf %272, %280 : vector<32x256xf32>
    %c0_91 = arith.constant 0 : index
    %c161 = arith.constant 161 : index
    %282 = vector.load %arg13[%c0_91, %c161] : memref<32x512xf32, #tpu.memory_space<vmem>>, vector<32x256xf32>
    %283 = vector.extract_strided_slice %6 {offsets = [0, 23], sizes = [32, 1], strides = [1, 1]} : vector<32x25xf32> to vector<32x1xf32>
    %cst_92 = arith.constant 0.000000e+00 : f32
    %284 = vector.shape_cast %52 : vector<1x256xi1> to vector<1x256xi1>
    %285 = vector.broadcast %284 : vector<1x256xi1> to vector<32x256xi1>
    %286 = vector.broadcast %cst_92 : f32 to vector<32x256xf32>
    %287 = arith.select %285, %282, %286 : vector<32x256xi1>, vector<32x256xf32>
    %288 = vector.broadcast %283 : vector<32x1xf32> to vector<32x256xf32>
    %289 = arith.mulf %287, %288 : vector<32x256xf32>
    %290 = arith.addf %281, %289 : vector<32x256xf32>
    %c0_93 = arith.constant 0 : index
    %c162 = arith.constant 162 : index
    %291 = vector.load %arg13[%c0_93, %c162] : memref<32x512xf32, #tpu.memory_space<vmem>>, vector<32x256xf32>
    %292 = vector.extract_strided_slice %6 {offsets = [0, 24], sizes = [32, 1], strides = [1, 1]} : vector<32x25xf32> to vector<32x1xf32>
    %cst_94 = arith.constant 0.000000e+00 : f32
    %293 = vector.shape_cast %61 : vector<1x256xi1> to vector<1x256xi1>
    %294 = vector.broadcast %293 : vector<1x256xi1> to vector<32x256xi1>
    %295 = vector.broadcast %cst_94 : f32 to vector<32x256xf32>
    %296 = arith.select %294, %291, %295 : vector<32x256xi1>, vector<32x256xf32>
    %297 = vector.broadcast %292 : vector<32x1xf32> to vector<32x256xf32>
    %298 = arith.mulf %296, %297 : vector<32x256xf32>
    %299 = arith.addf %290, %298 : vector<32x256xf32>
    %300 = vector.broadcast %7 : vector<32x1xf32> to vector<32x256xf32>
    %301 = arith.addf %299, %300 : vector<32x256xf32>
    %302 = arith.negf %301 : vector<32x256xf32>
    %303 = math.exp %302 : vector<32x256xf32>
    %cst_95 = arith.constant 1.000000e+00 : f32
    %304 = vector.broadcast %cst_95 : f32 to vector<32x256xf32>
    %305 = arith.addf %304, %303 : vector<32x256xf32>
    %306 = arith.divf %304, %305 : vector<32x256xf32>
    %307 = arith.mulf %301, %306 : vector<32x256xf32>
    %cst_96 = arith.constant dense<0.000000e+00> : vector<32xf32>
    %308 = vector.multi_reduction <add>, %307, %cst_96 [1] : vector<32x256xf32> to vector<32xf32>
    %309 = vector.shape_cast %308 : vector<32xf32> to vector<32x1xf32>
    %cst_97 = arith.constant 3.906250e-03 : f32
    %310 = vector.broadcast %cst_97 : f32 to vector<32x1xf32>
    %311 = arith.mulf %309, %310 : vector<32x1xf32>
    %312 = vector.broadcast %311 : vector<32x1xf32> to vector<32x8xf32>
    %313 = arith.mulf %8, %312 : vector<32x8xf32>
    %cst_98 = arith.constant dense<0.000000e+00> : vector<8xf32>
    %314 = vector.multi_reduction <add>, %313, %cst_98 [0] : vector<32x8xf32> to vector<8xf32>
    %315 = vector.shape_cast %314 : vector<8xf32> to vector<1x8xf32>
    %316 = arith.addf %315, %9 : vector<1x8xf32>
    %317 = arith.negf %316 : vector<1x8xf32>
    %318 = math.exp %317 : vector<1x8xf32>
    %cst_99 = arith.constant 1.000000e+00 : f32
    %319 = vector.broadcast %cst_99 : f32 to vector<1x8xf32>
    %320 = arith.addf %319, %318 : vector<1x8xf32>
    %321 = arith.divf %319, %320 : vector<1x8xf32>
    %322 = arith.mulf %316, %321 : vector<1x8xf32>
    %323 = vector.broadcast %322 : vector<1x8xf32> to vector<32x8xf32>
    %324 = arith.mulf %10, %323 : vector<32x8xf32>
    %cst_100 = arith.constant dense<0.000000e+00> : vector<32xf32>
    %325 = vector.multi_reduction <add>, %324, %cst_100 [1] : vector<32x8xf32> to vector<32xf32>
    %326 = vector.shape_cast %325 : vector<32xf32> to vector<32x1xf32>
    %327 = arith.addf %326, %11 : vector<32x1xf32>
    %328 = arith.negf %327 : vector<32x1xf32>
    %329 = math.exp %328 : vector<32x1xf32>
    %cst_101 = arith.constant 1.000000e+00 : f32
    %330 = vector.broadcast %cst_101 : f32 to vector<32x1xf32>
    %331 = arith.addf %330, %329 : vector<32x1xf32>
    %332 = arith.divf %330, %331 : vector<32x1xf32>
    %333 = vector.broadcast %332 : vector<32x1xf32> to vector<32x256xf32>
    %334 = arith.mulf %307, %333 : vector<32x256xf32>
    %cst_102 = arith.constant dense<0.000000e+00> : vector<16x256xf32>
    %335 = tpu.matmul %12, %334, %cst_102 {dimension_numbers = #tpu.dot_dimension_numbers<[1], [0], [0], [1], [0, 0, 1, 1], [], []>} : vector<16x32xf32>, vector<32x256xf32>, vector<16x256xf32> -> vector<16x256xf32>
    %336 = vector.broadcast %13 : vector<16x1xf32> to vector<16x256xf32>
    %337 = arith.addf %335, %336 : vector<16x256xf32>
    %338 = arith.addf %337, %63 : vector<16x256xf32>
    %c0_103 = arith.constant 0 : index
    %c0_104 = arith.constant 0 : index
    %c0_105 = arith.constant 0 : index
    %339 = vector.load %arg12[%c0_103, %c0_104, %c0_105] : memref<2x16x256xf32, #tpu.memory_space<vmem>>, vector<1x16x256xf32>
    %340 = vector.shape_cast %339 : vector<1x16x256xf32> to vector<16x256xf32>
    %341 = vector.shape_cast %338 : vector<16x256xf32> to vector<1x16x256xf32>
    tpu.vector_store %arg12[%c0_103, %c0_104, %c0_105], %341 {strides = array<i32>} : memref<2x16x256xf32, #tpu.memory_space<vmem>>, vector<1x16x256xf32>,
    %c1 = arith.constant 1 : index
    %c0_106 = arith.constant 0 : index
    %c0_107 = arith.constant 0 : index
    %342 = vector.load %arg1[%c1, %c0_106, %c0_107] : memref<2x16x256xf32, #tpu.memory_space<vmem>>, vector<1x16x256xf32>
    %343 = vector.shape_cast %342 : vector<1x16x256xf32> to vector<16x256xf32>
    %cst_108 = arith.constant dense<0.000000e+00> : vector<32x256xf32>
    %344 = tpu.matmul %4, %343, %cst_108 {dimension_numbers = #tpu.dot_dimension_numbers<[1], [0], [0], [1], [0, 0, 1, 1], [], []>} : vector<32x16xf32>, vector<16x256xf32>, vector<32x256xf32> -> vector<32x256xf32>
    %345 = vector.broadcast %5 : vector<32x1xf32> to vector<32x256xf32>
    %346 = arith.addf %344, %345 : vector<32x256xf32>
    %347 = arith.negf %346 : vector<32x256xf32>
    %348 = math.exp %347 : vector<32x256xf32>
    %cst_109 = arith.constant 1.000000e+00 : f32
    %349 = vector.broadcast %cst_109 : f32 to vector<32x256xf32>
    %350 = arith.addf %349, %348 : vector<32x256xf32>
    %351 = arith.divf %349, %350 : vector<32x256xf32>
    %352 = arith.mulf %346, %351 : vector<32x256xf32>
    %c0_110 = arith.constant 0 : index
    %c128_111 = arith.constant 128 : index
    %353 = vector.load %arg13[%c0_110, %c128_111] : memref<32x512xf32, #tpu.memory_space<vmem>>, vector<32x256xf32>
    tpu.vector_store %arg13[%c0_110, %c128_111], %352 {strides = array<i32>} : memref<32x512xf32, #tpu.memory_space<vmem>>, vector<32x256xf32>,
    %cst_112 = arith.constant 0.000000e+00 : f32
    %354 = vector.broadcast %cst_112 : f32 to vector<32x256xf32>
    %c0_113 = arith.constant 0 : index
    %c94_114 = arith.constant 94 : index
    %355 = vector.load %arg13[%c0_113, %c94_114] : memref<32x512xf32, #tpu.memory_space<vmem>>, vector<32x256xf32>
    %356 = vector.extract_strided_slice %6 {offsets = [0, 0], sizes = [32, 1], strides = [1, 1]} : vector<32x25xf32> to vector<32x1xf32>
    %cst_115 = arith.constant 0.000000e+00 : f32
    %357 = vector.shape_cast %25 : vector<1x256xi1> to vector<1x256xi1>
    %358 = vector.broadcast %357 : vector<1x256xi1> to vector<32x256xi1>
    %359 = vector.broadcast %cst_115 : f32 to vector<32x256xf32>
    %360 = arith.select %358, %355, %359 : vector<32x256xi1>, vector<32x256xf32>
    %361 = vector.broadcast %356 : vector<32x1xf32> to vector<32x256xf32>
    %362 = arith.mulf %360, %361 : vector<32x256xf32>
    %363 = arith.addf %354, %362 : vector<32x256xf32>
    %c0_116 = arith.constant 0 : index
    %c95_117 = arith.constant 95 : index
    %364 = vector.load %arg13[%c0_116, %c95_117] : memref<32x512xf32, #tpu.memory_space<vmem>>, vector<32x256xf32>
    %365 = vector.extract_strided_slice %6 {offsets = [0, 1], sizes = [32, 1], strides = [1, 1]} : vector<32x25xf32> to vector<32x1xf32>
    %cst_118 = arith.constant 0.000000e+00 : f32
    %366 = vector.shape_cast %34 : vector<1x256xi1> to vector<1x256xi1>
    %367 = vector.broadcast %366 : vector<1x256xi1> to vector<32x256xi1>
    %368 = vector.broadcast %cst_118 : f32 to vector<32x256xf32>
    %369 = arith.select %367, %364, %368 : vector<32x256xi1>, vector<32x256xf32>
    %370 = vector.broadcast %365 : vector<32x1xf32> to vector<32x256xf32>
    %371 = arith.mulf %369, %370 : vector<32x256xf32>
    %372 = arith.addf %363, %371 : vector<32x256xf32>
    %c0_119 = arith.constant 0 : index
    %c96_120 = arith.constant 96 : index
    %373 = vector.load %arg13[%c0_119, %c96_120] : memref<32x512xf32, #tpu.memory_space<vmem>>, vector<32x256xf32>
    %374 = vector.extract_strided_slice %6 {offsets = [0, 2], sizes = [32, 1], strides = [1, 1]} : vector<32x25xf32> to vector<32x1xf32>
    %cst_121 = arith.constant 0.000000e+00 : f32
    %375 = vector.shape_cast %43 : vector<1x256xi1> to vector<1x256xi1>
    %376 = vector.broadcast %375 : vector<1x256xi1> to vector<32x256xi1>
    %377 = vector.broadcast %cst_121 : f32 to vector<32x256xf32>
    %378 = arith.select %376, %373, %377 : vector<32x256xi1>, vector<32x256xf32>
    %379 = vector.broadcast %374 : vector<32x1xf32> to vector<32x256xf32>
    %380 = arith.mulf %378, %379 : vector<32x256xf32>
    %381 = arith.addf %372, %380 : vector<32x256xf32>
    %c0_122 = arith.constant 0 : index
    %c97_123 = arith.constant 97 : index
    %382 = vector.load %arg13[%c0_122, %c97_123] : memref<32x512xf32, #tpu.memory_space<vmem>>, vector<32x256xf32>
    %383 = vector.extract_strided_slice %6 {offsets = [0, 3], sizes = [32, 1], strides = [1, 1]} : vector<32x25xf32> to vector<32x1xf32>
    %cst_124 = arith.constant 0.000000e+00 : f32
    %384 = vector.shape_cast %52 : vector<1x256xi1> to vector<1x256xi1>
    %385 = vector.broadcast %384 : vector<1x256xi1> to vector<32x256xi1>
    %386 = vector.broadcast %cst_124 : f32 to vector<32x256xf32>
    %387 = arith.select %385, %382, %386 : vector<32x256xi1>, vector<32x256xf32>
    %388 = vector.broadcast %383 : vector<32x1xf32> to vector<32x256xf32>
    %389 = arith.mulf %387, %388 : vector<32x256xf32>
    %390 = arith.addf %381, %389 : vector<32x256xf32>
    %c0_125 = arith.constant 0 : index
    %c98_126 = arith.constant 98 : index
    %391 = vector.load %arg13[%c0_125, %c98_126] : memref<32x512xf32, #tpu.memory_space<vmem>>, vector<32x256xf32>
    %392 = vector.extract_strided_slice %6 {offsets = [0, 4], sizes = [32, 1], strides = [1, 1]} : vector<32x25xf32> to vector<32x1xf32>
    %cst_127 = arith.constant 0.000000e+00 : f32
    %393 = vector.shape_cast %61 : vector<1x256xi1> to vector<1x256xi1>
    %394 = vector.broadcast %393 : vector<1x256xi1> to vector<32x256xi1>
    %395 = vector.broadcast %cst_127 : f32 to vector<32x256xf32>
    %396 = arith.select %394, %391, %395 : vector<32x256xi1>, vector<32x256xf32>
    %397 = vector.broadcast %392 : vector<32x1xf32> to vector<32x256xf32>
    %398 = arith.mulf %396, %397 : vector<32x256xf32>
    %399 = arith.addf %390, %398 : vector<32x256xf32>
    %c0_128 = arith.constant 0 : index
    %c110_129 = arith.constant 110 : index
    %400 = vector.load %arg13[%c0_128, %c110_129] : memref<32x512xf32, #tpu.memory_space<vmem>>, vector<32x256xf32>
    %401 = vector.extract_strided_slice %6 {offsets = [0, 5], sizes = [32, 1], strides = [1, 1]} : vector<32x25xf32> to vector<32x1xf32>
    %cst_130 = arith.constant 0.000000e+00 : f32
    %402 = vector.shape_cast %25 : vector<1x256xi1> to vector<1x256xi1>
    %403 = vector.broadcast %402 : vector<1x256xi1> to vector<32x256xi1>
    %404 = vector.broadcast %cst_130 : f32 to vector<32x256xf32>
    %405 = arith.select %403, %400, %404 : vector<32x256xi1>, vector<32x256xf32>
    %406 = vector.broadcast %401 : vector<32x1xf32> to vector<32x256xf32>
    %407 = arith.mulf %405, %406 : vector<32x256xf32>
    %408 = arith.addf %399, %407 : vector<32x256xf32>
    %c0_131 = arith.constant 0 : index
    %c111_132 = arith.constant 111 : index
    %409 = vector.load %arg13[%c0_131, %c111_132] : memref<32x512xf32, #tpu.memory_space<vmem>>, vector<32x256xf32>
    %410 = vector.extract_strided_slice %6 {offsets = [0, 6], sizes = [32, 1], strides = [1, 1]} : vector<32x25xf32> to vector<32x1xf32>
    %cst_133 = arith.constant 0.000000e+00 : f32
    %411 = vector.shape_cast %34 : vector<1x256xi1> to vector<1x256xi1>
    %412 = vector.broadcast %411 : vector<1x256xi1> to vector<32x256xi1>
    %413 = vector.broadcast %cst_133 : f32 to vector<32x256xf32>
    %414 = arith.select %412, %409, %413 : vector<32x256xi1>, vector<32x256xf32>
    %415 = vector.broadcast %410 : vector<32x1xf32> to vector<32x256xf32>
    %416 = arith.mulf %414, %415 : vector<32x256xf32>
    %417 = arith.addf %408, %416 : vector<32x256xf32>
    %c0_134 = arith.constant 0 : index
    %c112_135 = arith.constant 112 : index
    %418 = vector.load %arg13[%c0_134, %c112_135] : memref<32x512xf32, #tpu.memory_space<vmem>>, vector<32x256xf32>
    %419 = vector.extract_strided_slice %6 {offsets = [0, 7], sizes = [32, 1], strides = [1, 1]} : vector<32x25xf32> to vector<32x1xf32>
    %cst_136 = arith.constant 0.000000e+00 : f32
    %420 = vector.shape_cast %43 : vector<1x256xi1> to vector<1x256xi1>
    %421 = vector.broadcast %420 : vector<1x256xi1> to vector<32x256xi1>
    %422 = vector.broadcast %cst_136 : f32 to vector<32x256xf32>
    %423 = arith.select %421, %418, %422 : vector<32x256xi1>, vector<32x256xf32>
    %424 = vector.broadcast %419 : vector<32x1xf32> to vector<32x256xf32>
    %425 = arith.mulf %423, %424 : vector<32x256xf32>
    %426 = arith.addf %417, %425 : vector<32x256xf32>
    %c0_137 = arith.constant 0 : index
    %c113_138 = arith.constant 113 : index
    %427 = vector.load %arg13[%c0_137, %c113_138] : memref<32x512xf32, #tpu.memory_space<vmem>>, vector<32x256xf32>
    %428 = vector.extract_strided_slice %6 {offsets = [0, 8], sizes = [32, 1], strides = [1, 1]} : vector<32x25xf32> to vector<32x1xf32>
    %cst_139 = arith.constant 0.000000e+00 : f32
    %429 = vector.shape_cast %52 : vector<1x256xi1> to vector<1x256xi1>
    %430 = vector.broadcast %429 : vector<1x256xi1> to vector<32x256xi1>
    %431 = vector.broadcast %cst_139 : f32 to vector<32x256xf32>
    %432 = arith.select %430, %427, %431 : vector<32x256xi1>, vector<32x256xf32>
    %433 = vector.broadcast %428 : vector<32x1xf32> to vector<32x256xf32>
    %434 = arith.mulf %432, %433 : vector<32x256xf32>
    %435 = arith.addf %426, %434 : vector<32x256xf32>
    %c0_140 = arith.constant 0 : index
    %c114_141 = arith.constant 114 : index
    %436 = vector.load %arg13[%c0_140, %c114_141] : memref<32x512xf32, #tpu.memory_space<vmem>>, vector<32x256xf32>
    %437 = vector.extract_strided_slice %6 {offsets = [0, 9], sizes = [32, 1], strides = [1, 1]} : vector<32x25xf32> to vector<32x1xf32>
    %cst_142 = arith.constant 0.000000e+00 : f32
    %438 = vector.shape_cast %61 : vector<1x256xi1> to vector<1x256xi1>
    %439 = vector.broadcast %438 : vector<1x256xi1> to vector<32x256xi1>
    %440 = vector.broadcast %cst_142 : f32 to vector<32x256xf32>
    %441 = arith.select %439, %436, %440 : vector<32x256xi1>, vector<32x256xf32>
    %442 = vector.broadcast %437 : vector<32x1xf32> to vector<32x256xf32>
    %443 = arith.mulf %441, %442 : vector<32x256xf32>
    %444 = arith.addf %435, %443 : vector<32x256xf32>
    %c0_143 = arith.constant 0 : index
    %c126_144 = arith.constant 126 : index
    %445 = vector.load %arg13[%c0_143, %c126_144] : memref<32x512xf32, #tpu.memory_space<vmem>>, vector<32x256xf32>
    %446 = vector.extract_strided_slice %6 {offsets = [0, 10], sizes = [32, 1], strides = [1, 1]} : vector<32x25xf32> to vector<32x1xf32>
    %cst_145 = arith.constant 0.000000e+00 : f32
    %447 = vector.shape_cast %25 : vector<1x256xi1> to vector<1x256xi1>
    %448 = vector.broadcast %447 : vector<1x256xi1> to vector<32x256xi1>
    %449 = vector.broadcast %cst_145 : f32 to vector<32x256xf32>
    %450 = arith.select %448, %445, %449 : vector<32x256xi1>, vector<32x256xf32>
    %451 = vector.broadcast %446 : vector<32x1xf32> to vector<32x256xf32>
    %452 = arith.mulf %450, %451 : vector<32x256xf32>
    %453 = arith.addf %444, %452 : vector<32x256xf32>
    %c0_146 = arith.constant 0 : index
    %c127_147 = arith.constant 127 : index
    %454 = vector.load %arg13[%c0_146, %c127_147] : memref<32x512xf32, #tpu.memory_space<vmem>>, vector<32x256xf32>
    %455 = vector.extract_strided_slice %6 {offsets = [0, 11], sizes = [32, 1], strides = [1, 1]} : vector<32x25xf32> to vector<32x1xf32>
    %cst_148 = arith.constant 0.000000e+00 : f32
    %456 = vector.shape_cast %34 : vector<1x256xi1> to vector<1x256xi1>
    %457 = vector.broadcast %456 : vector<1x256xi1> to vector<32x256xi1>
    %458 = vector.broadcast %cst_148 : f32 to vector<32x256xf32>
    %459 = arith.select %457, %454, %458 : vector<32x256xi1>, vector<32x256xf32>
    %460 = vector.broadcast %455 : vector<32x1xf32> to vector<32x256xf32>
    %461 = arith.mulf %459, %460 : vector<32x256xf32>
    %462 = arith.addf %453, %461 : vector<32x256xf32>
    %c0_149 = arith.constant 0 : index
    %c128_150 = arith.constant 128 : index
    %463 = vector.load %arg13[%c0_149, %c128_150] : memref<32x512xf32, #tpu.memory_space<vmem>>, vector<32x256xf32>
    %464 = vector.extract_strided_slice %6 {offsets = [0, 12], sizes = [32, 1], strides = [1, 1]} : vector<32x25xf32> to vector<32x1xf32>
    %cst_151 = arith.constant 0.000000e+00 : f32
    %465 = vector.shape_cast %43 : vector<1x256xi1> to vector<1x256xi1>
    %466 = vector.broadcast %465 : vector<1x256xi1> to vector<32x256xi1>
    %467 = vector.broadcast %cst_151 : f32 to vector<32x256xf32>
    %468 = arith.select %466, %463, %467 : vector<32x256xi1>, vector<32x256xf32>
    %469 = vector.broadcast %464 : vector<32x1xf32> to vector<32x256xf32>
    %470 = arith.mulf %468, %469 : vector<32x256xf32>
    %471 = arith.addf %462, %470 : vector<32x256xf32>
    %c0_152 = arith.constant 0 : index
    %c129_153 = arith.constant 129 : index
    %472 = vector.load %arg13[%c0_152, %c129_153] : memref<32x512xf32, #tpu.memory_space<vmem>>, vector<32x256xf32>
    %473 = vector.extract_strided_slice %6 {offsets = [0, 13], sizes = [32, 1], strides = [1, 1]} : vector<32x25xf32> to vector<32x1xf32>
    %cst_154 = arith.constant 0.000000e+00 : f32
    %474 = vector.shape_cast %52 : vector<1x256xi1> to vector<1x256xi1>
    %475 = vector.broadcast %474 : vector<1x256xi1> to vector<32x256xi1>
    %476 = vector.broadcast %cst_154 : f32 to vector<32x256xf32>
    %477 = arith.select %475, %472, %476 : vector<32x256xi1>, vector<32x256xf32>
    %478 = vector.broadcast %473 : vector<32x1xf32> to vector<32x256xf32>
    %479 = arith.mulf %477, %478 : vector<32x256xf32>
    %480 = arith.addf %471, %479 : vector<32x256xf32>
    %c0_155 = arith.constant 0 : index
    %c130_156 = arith.constant 130 : index
    %481 = vector.load %arg13[%c0_155, %c130_156] : memref<32x512xf32, #tpu.memory_space<vmem>>, vector<32x256xf32>
    %482 = vector.extract_strided_slice %6 {offsets = [0, 14], sizes = [32, 1], strides = [1, 1]} : vector<32x25xf32> to vector<32x1xf32>
    %cst_157 = arith.constant 0.000000e+00 : f32
    %483 = vector.shape_cast %61 : vector<1x256xi1> to vector<1x256xi1>
    %484 = vector.broadcast %483 : vector<1x256xi1> to vector<32x256xi1>
    %485 = vector.broadcast %cst_157 : f32 to vector<32x256xf32>
    %486 = arith.select %484, %481, %485 : vector<32x256xi1>, vector<32x256xf32>
    %487 = vector.broadcast %482 : vector<32x1xf32> to vector<32x256xf32>
    %488 = arith.mulf %486, %487 : vector<32x256xf32>
    %489 = arith.addf %480, %488 : vector<32x256xf32>
    %c0_158 = arith.constant 0 : index
    %c142_159 = arith.constant 142 : index
    %490 = vector.load %arg13[%c0_158, %c142_159] : memref<32x512xf32, #tpu.memory_space<vmem>>, vector<32x256xf32>
    %491 = vector.extract_strided_slice %6 {offsets = [0, 15], sizes = [32, 1], strides = [1, 1]} : vector<32x25xf32> to vector<32x1xf32>
    %cst_160 = arith.constant 0.000000e+00 : f32
    %492 = vector.shape_cast %25 : vector<1x256xi1> to vector<1x256xi1>
    %493 = vector.broadcast %492 : vector<1x256xi1> to vector<32x256xi1>
    %494 = vector.broadcast %cst_160 : f32 to vector<32x256xf32>
    %495 = arith.select %493, %490, %494 : vector<32x256xi1>, vector<32x256xf32>
    %496 = vector.broadcast %491 : vector<32x1xf32> to vector<32x256xf32>
    %497 = arith.mulf %495, %496 : vector<32x256xf32>
    %498 = arith.addf %489, %497 : vector<32x256xf32>
    %c0_161 = arith.constant 0 : index
    %c143_162 = arith.constant 143 : index
    %499 = vector.load %arg13[%c0_161, %c143_162] : memref<32x512xf32, #tpu.memory_space<vmem>>, vector<32x256xf32>
    %500 = vector.extract_strided_slice %6 {offsets = [0, 16], sizes = [32, 1], strides = [1, 1]} : vector<32x25xf32> to vector<32x1xf32>
    %cst_163 = arith.constant 0.000000e+00 : f32
    %501 = vector.shape_cast %34 : vector<1x256xi1> to vector<1x256xi1>
    %502 = vector.broadcast %501 : vector<1x256xi1> to vector<32x256xi1>
    %503 = vector.broadcast %cst_163 : f32 to vector<32x256xf32>
    %504 = arith.select %502, %499, %503 : vector<32x256xi1>, vector<32x256xf32>
    %505 = vector.broadcast %500 : vector<32x1xf32> to vector<32x256xf32>
    %506 = arith.mulf %504, %505 : vector<32x256xf32>
    %507 = arith.addf %498, %506 : vector<32x256xf32>
    %c0_164 = arith.constant 0 : index
    %c144_165 = arith.constant 144 : index
    %508 = vector.load %arg13[%c0_164, %c144_165] : memref<32x512xf32, #tpu.memory_space<vmem>>, vector<32x256xf32>
    %509 = vector.extract_strided_slice %6 {offsets = [0, 17], sizes = [32, 1], strides = [1, 1]} : vector<32x25xf32> to vector<32x1xf32>
    %cst_166 = arith.constant 0.000000e+00 : f32
    %510 = vector.shape_cast %43 : vector<1x256xi1> to vector<1x256xi1>
    %511 = vector.broadcast %510 : vector<1x256xi1> to vector<32x256xi1>
    %512 = vector.broadcast %cst_166 : f32 to vector<32x256xf32>
    %513 = arith.select %511, %508, %512 : vector<32x256xi1>, vector<32x256xf32>
    %514 = vector.broadcast %509 : vector<32x1xf32> to vector<32x256xf32>
    %515 = arith.mulf %513, %514 : vector<32x256xf32>
    %516 = arith.addf %507, %515 : vector<32x256xf32>
    %c0_167 = arith.constant 0 : index
    %c145_168 = arith.constant 145 : index
    %517 = vector.load %arg13[%c0_167, %c145_168] : memref<32x512xf32, #tpu.memory_space<vmem>>, vector<32x256xf32>
    %518 = vector.extract_strided_slice %6 {offsets = [0, 18], sizes = [32, 1], strides = [1, 1]} : vector<32x25xf32> to vector<32x1xf32>
    %cst_169 = arith.constant 0.000000e+00 : f32
    %519 = vector.shape_cast %52 : vector<1x256xi1> to vector<1x256xi1>
    %520 = vector.broadcast %519 : vector<1x256xi1> to vector<32x256xi1>
    %521 = vector.broadcast %cst_169 : f32 to vector<32x256xf32>
    %522 = arith.select %520, %517, %521 : vector<32x256xi1>, vector<32x256xf32>
    %523 = vector.broadcast %518 : vector<32x1xf32> to vector<32x256xf32>
    %524 = arith.mulf %522, %523 : vector<32x256xf32>
    %525 = arith.addf %516, %524 : vector<32x256xf32>
    %c0_170 = arith.constant 0 : index
    %c146_171 = arith.constant 146 : index
    %526 = vector.load %arg13[%c0_170, %c146_171] : memref<32x512xf32, #tpu.memory_space<vmem>>, vector<32x256xf32>
    %527 = vector.extract_strided_slice %6 {offsets = [0, 19], sizes = [32, 1], strides = [1, 1]} : vector<32x25xf32> to vector<32x1xf32>
    %cst_172 = arith.constant 0.000000e+00 : f32
    %528 = vector.shape_cast %61 : vector<1x256xi1> to vector<1x256xi1>
    %529 = vector.broadcast %528 : vector<1x256xi1> to vector<32x256xi1>
    %530 = vector.broadcast %cst_172 : f32 to vector<32x256xf32>
    %531 = arith.select %529, %526, %530 : vector<32x256xi1>, vector<32x256xf32>
    %532 = vector.broadcast %527 : vector<32x1xf32> to vector<32x256xf32>
    %533 = arith.mulf %531, %532 : vector<32x256xf32>
    %534 = arith.addf %525, %533 : vector<32x256xf32>
    %c0_173 = arith.constant 0 : index
    %c158_174 = arith.constant 158 : index
    %535 = vector.load %arg13[%c0_173, %c158_174] : memref<32x512xf32, #tpu.memory_space<vmem>>, vector<32x256xf32>
    %536 = vector.extract_strided_slice %6 {offsets = [0, 20], sizes = [32, 1], strides = [1, 1]} : vector<32x25xf32> to vector<32x1xf32>
    %cst_175 = arith.constant 0.000000e+00 : f32
    %537 = vector.shape_cast %25 : vector<1x256xi1> to vector<1x256xi1>
    %538 = vector.broadcast %537 : vector<1x256xi1> to vector<32x256xi1>
    %539 = vector.broadcast %cst_175 : f32 to vector<32x256xf32>
    %540 = arith.select %538, %535, %539 : vector<32x256xi1>, vector<32x256xf32>
    %541 = vector.broadcast %536 : vector<32x1xf32> to vector<32x256xf32>
    %542 = arith.mulf %540, %541 : vector<32x256xf32>
    %543 = arith.addf %534, %542 : vector<32x256xf32>
    %c0_176 = arith.constant 0 : index
    %c159_177 = arith.constant 159 : index
    %544 = vector.load %arg13[%c0_176, %c159_177] : memref<32x512xf32, #tpu.memory_space<vmem>>, vector<32x256xf32>
    %545 = vector.extract_strided_slice %6 {offsets = [0, 21], sizes = [32, 1], strides = [1, 1]} : vector<32x25xf32> to vector<32x1xf32>
    %cst_178 = arith.constant 0.000000e+00 : f32
    %546 = vector.shape_cast %34 : vector<1x256xi1> to vector<1x256xi1>
    %547 = vector.broadcast %546 : vector<1x256xi1> to vector<32x256xi1>
    %548 = vector.broadcast %cst_178 : f32 to vector<32x256xf32>
    %549 = arith.select %547, %544, %548 : vector<32x256xi1>, vector<32x256xf32>
    %550 = vector.broadcast %545 : vector<32x1xf32> to vector<32x256xf32>
    %551 = arith.mulf %549, %550 : vector<32x256xf32>
    %552 = arith.addf %543, %551 : vector<32x256xf32>
    %c0_179 = arith.constant 0 : index
    %c160_180 = arith.constant 160 : index
    %553 = vector.load %arg13[%c0_179, %c160_180] : memref<32x512xf32, #tpu.memory_space<vmem>>, vector<32x256xf32>
    %554 = vector.extract_strided_slice %6 {offsets = [0, 22], sizes = [32, 1], strides = [1, 1]} : vector<32x25xf32> to vector<32x1xf32>
    %cst_181 = arith.constant 0.000000e+00 : f32
    %555 = vector.shape_cast %43 : vector<1x256xi1> to vector<1x256xi1>
    %556 = vector.broadcast %555 : vector<1x256xi1> to vector<32x256xi1>
    %557 = vector.broadcast %cst_181 : f32 to vector<32x256xf32>
    %558 = arith.select %556, %553, %557 : vector<32x256xi1>, vector<32x256xf32>
    %559 = vector.broadcast %554 : vector<32x1xf32> to vector<32x256xf32>
    %560 = arith.mulf %558, %559 : vector<32x256xf32>
    %561 = arith.addf %552, %560 : vector<32x256xf32>
    %c0_182 = arith.constant 0 : index
    %c161_183 = arith.constant 161 : index
    %562 = vector.load %arg13[%c0_182, %c161_183] : memref<32x512xf32, #tpu.memory_space<vmem>>, vector<32x256xf32>
    %563 = vector.extract_strided_slice %6 {offsets = [0, 23], sizes = [32, 1], strides = [1, 1]} : vector<32x25xf32> to vector<32x1xf32>
    %cst_184 = arith.constant 0.000000e+00 : f32
    %564 = vector.shape_cast %52 : vector<1x256xi1> to vector<1x256xi1>
    %565 = vector.broadcast %564 : vector<1x256xi1> to vector<32x256xi1>
    %566 = vector.broadcast %cst_184 : f32 to vector<32x256xf32>
    %567 = arith.select %565, %562, %566 : vector<32x256xi1>, vector<32x256xf32>
    %568 = vector.broadcast %563 : vector<32x1xf32> to vector<32x256xf32>
    %569 = arith.mulf %567, %568 : vector<32x256xf32>
    %570 = arith.addf %561, %569 : vector<32x256xf32>
    %c0_185 = arith.constant 0 : index
    %c162_186 = arith.constant 162 : index
    %571 = vector.load %arg13[%c0_185, %c162_186] : memref<32x512xf32, #tpu.memory_space<vmem>>, vector<32x256xf32>
    %572 = vector.extract_strided_slice %6 {offsets = [0, 24], sizes = [32, 1], strides = [1, 1]} : vector<32x25xf32> to vector<32x1xf32>
    %cst_187 = arith.constant 0.000000e+00 : f32
    %573 = vector.shape_cast %61 : vector<1x256xi1> to vector<1x256xi1>
    %574 = vector.broadcast %573 : vector<1x256xi1> to vector<32x256xi1>
    %575 = vector.broadcast %cst_187 : f32 to vector<32x256xf32>
    %576 = arith.select %574, %571, %575 : vector<32x256xi1>, vector<32x256xf32>
    %577 = vector.broadcast %572 : vector<32x1xf32> to vector<32x256xf32>
    %578 = arith.mulf %576, %577 : vector<32x256xf32>
    %579 = arith.addf %570, %578 : vector<32x256xf32>
    %580 = vector.broadcast %7 : vector<32x1xf32> to vector<32x256xf32>
    %581 = arith.addf %579, %580 : vector<32x256xf32>
    %582 = arith.negf %581 : vector<32x256xf32>
    %583 = math.exp %582 : vector<32x256xf32>
    %cst_188 = arith.constant 1.000000e+00 : f32
    %584 = vector.broadcast %cst_188 : f32 to vector<32x256xf32>
    %585 = arith.addf %584, %583 : vector<32x256xf32>
    %586 = arith.divf %584, %585 : vector<32x256xf32>
    %587 = arith.mulf %581, %586 : vector<32x256xf32>
    %cst_189 = arith.constant dense<0.000000e+00> : vector<32xf32>
    %588 = vector.multi_reduction <add>, %587, %cst_189 [1] : vector<32x256xf32> to vector<32xf32>
    %589 = vector.shape_cast %588 : vector<32xf32> to vector<32x1xf32>
    %cst_190 = arith.constant 3.906250e-03 : f32
    %590 = vector.broadcast %cst_190 : f32 to vector<32x1xf32>
    %591 = arith.mulf %589, %590 : vector<32x1xf32>
    %592 = vector.broadcast %591 : vector<32x1xf32> to vector<32x8xf32>
    %593 = arith.mulf %8, %592 : vector<32x8xf32>
    %cst_191 = arith.constant dense<0.000000e+00> : vector<8xf32>
    %594 = vector.multi_reduction <add>, %593, %cst_191 [0] : vector<32x8xf32> to vector<8xf32>
    %595 = vector.shape_cast %594 : vector<8xf32> to vector<1x8xf32>
    %596 = arith.addf %595, %9 : vector<1x8xf32>
    %597 = arith.negf %596 : vector<1x8xf32>
    %598 = math.exp %597 : vector<1x8xf32>
    %cst_192 = arith.constant 1.000000e+00 : f32
    %599 = vector.broadcast %cst_192 : f32 to vector<1x8xf32>
    %600 = arith.addf %599, %598 : vector<1x8xf32>
    %601 = arith.divf %599, %600 : vector<1x8xf32>
    %602 = arith.mulf %596, %601 : vector<1x8xf32>
    %603 = vector.broadcast %602 : vector<1x8xf32> to vector<32x8xf32>
    %604 = arith.mulf %10, %603 : vector<32x8xf32>
    %cst_193 = arith.constant dense<0.000000e+00> : vector<32xf32>
    %605 = vector.multi_reduction <add>, %604, %cst_193 [1] : vector<32x8xf32> to vector<32xf32>
    %606 = vector.shape_cast %605 : vector<32xf32> to vector<32x1xf32>
    %607 = arith.addf %606, %11 : vector<32x1xf32>
    %608 = arith.negf %607 : vector<32x1xf32>
    %609 = math.exp %608 : vector<32x1xf32>
    %cst_194 = arith.constant 1.000000e+00 : f32
    %610 = vector.broadcast %cst_194 : f32 to vector<32x1xf32>
    %611 = arith.addf %610, %609 : vector<32x1xf32>
    %612 = arith.divf %610, %611 : vector<32x1xf32>
    %613 = vector.broadcast %612 : vector<32x1xf32> to vector<32x256xf32>
    %614 = arith.mulf %587, %613 : vector<32x256xf32>
    %cst_195 = arith.constant dense<0.000000e+00> : vector<16x256xf32>
    %615 = tpu.matmul %12, %614, %cst_195 {dimension_numbers = #tpu.dot_dimension_numbers<[1], [0], [0], [1], [0, 0, 1, 1], [], []>} : vector<16x32xf32>, vector<32x256xf32>, vector<16x256xf32> -> vector<16x256xf32>
    %616 = vector.broadcast %13 : vector<16x1xf32> to vector<16x256xf32>
    %617 = arith.addf %615, %616 : vector<16x256xf32>
    %618 = arith.addf %617, %343 : vector<16x256xf32>
    %c1_196 = arith.constant 1 : index
    %c0_197 = arith.constant 0 : index
    %c0_198 = arith.constant 0 : index
    %619 = vector.load %arg12[%c1_196, %c0_197, %c0_198] : memref<2x16x256xf32, #tpu.memory_space<vmem>>, vector<1x16x256xf32>
    %620 = vector.shape_cast %619 : vector<1x16x256xf32> to vector<16x256xf32>
    %621 = vector.shape_cast %618 : vector<16x256xf32> to vector<1x16x256xf32>
    tpu.vector_store %arg12[%c1_196, %c0_197, %c0_198], %621 {strides = array<i32>} : memref<2x16x256xf32, #tpu.memory_space<vmem>>, vector<1x16x256xf32>,
    return
  }
  func.func @transform_0(%arg0: i32) -> (i32, i32, i32) {
    %c0_i32 = arith.constant 0 : i32
    %c0_i32_0 = arith.constant 0 : i32
    %c0_i32_1 = arith.constant 0 : i32
    %c0_i32_2 = arith.constant 0 : i32
    return %c0_i32, %c0_i32_0, %c0_i32_1 : i32, i32, i32
  }
  func.func @transform_1(%arg0: i32) -> (i32, i32) {
    %c0_i32 = arith.constant 0 : i32
    %c0_i32_0 = arith.constant 0 : i32
    %c0_i32_1 = arith.constant 0 : i32
    return %c0_i32, %c0_i32_0 : i32, i32
  }
  func.func @transform_2(%arg0: i32) -> (i32, i32) {
    %c0_i32 = arith.constant 0 : i32
    %c0_i32_0 = arith.constant 0 : i32
    %c0_i32_1 = arith.constant 0 : i32
    return %c0_i32, %c0_i32_0 : i32, i32
  }
  func.func @transform_3(%arg0: i32) -> (i32, i32) {
    %c0_i32 = arith.constant 0 : i32
    %c0_i32_0 = arith.constant 0 : i32
    %c0_i32_1 = arith.constant 0 : i32
    return %c0_i32, %c0_i32_0 : i32, i32
  }
  func.func @transform_4(%arg0: i32) -> (i32, i32) {
    %c0_i32 = arith.constant 0 : i32
    %c0_i32_0 = arith.constant 0 : i32
    %c0_i32_1 = arith.constant 0 : i32
    return %c0_i32, %c0_i32_0 : i32, i32
  }
  func.func @transform_5(%arg0: i32) -> (i32, i32) {
    %c0_i32 = arith.constant 0 : i32
    %c0_i32_0 = arith.constant 0 : i32
    %c0_i32_1 = arith.constant 0 : i32
    return %c0_i32, %c0_i32_0 : i32, i32
  }
  func.func @transform_6(%arg0: i32) -> (i32, i32) {
    %c0_i32 = arith.constant 0 : i32
    %c0_i32_0 = arith.constant 0 : i32
    %c0_i32_1 = arith.constant 0 : i32
    return %c0_i32, %c0_i32_0 : i32, i32
  }
  func.func @transform_7(%arg0: i32) -> (i32, i32) {
    %c0_i32 = arith.constant 0 : i32
    %c0_i32_0 = arith.constant 0 : i32
    %c0_i32_1 = arith.constant 0 : i32
    return %c0_i32, %c0_i32_0 : i32, i32
  }
  func.func @transform_8(%arg0: i32) -> (i32, i32) {
    %c0_i32 = arith.constant 0 : i32
    %c0_i32_0 = arith.constant 0 : i32
    %c0_i32_1 = arith.constant 0 : i32
    return %c0_i32, %c0_i32_0 : i32, i32
  }
  func.func @transform_9(%arg0: i32) -> (i32, i32) {
    %c0_i32 = arith.constant 0 : i32
    %c0_i32_0 = arith.constant 0 : i32
    %c0_i32_1 = arith.constant 0 : i32
    return %c0_i32, %c0_i32_0 : i32, i32
  }
  func.func @transform_10(%arg0: i32) -> (i32, i32) {
    %c0_i32 = arith.constant 0 : i32
    %c0_i32_0 = arith.constant 0 : i32
    %c0_i32_1 = arith.constant 0 : i32
    return %c0_i32, %c0_i32_0 : i32, i32
  }
  func.func @transform_11(%arg0: i32) -> (i32, i32, i32) {
    %c0_i32 = arith.constant 0 : i32
    %c0_i32_0 = arith.constant 0 : i32
    %c0_i32_1 = arith.constant 0 : i32
    %c0_i32_2 = arith.constant 0 : i32
    return %c0_i32, %c0_i32_0, %c0_i32_1 : i32, i32, i32
  }
}

</mosaic_0001>

<bundles_post_ra>
// kernel: tpu_custom_call.1
= control target key start
LH: loop header
LB: loop body
LE: loop exit
PB: predicated region body
PF: predicated region fallthrough
CT: control target
= control target key end

     0   :  { %v11159_v5 = vmov 0.0   ;;  %v11157_v6 = vmov 0   ;;  %vm147_vm0 = vcmask 130048   ;;  %s11145_s0 = inlined_call_operand.vmem [shape: f32[2,16,256], index: 0, kind: input, shape index: {}]   ;;  %s11146_s1 = inlined_call_operand.vmem [shape: f32[32,16], index: 1, kind: input, shape index: {}]   ;;  %s11147_s2 = inlined_call_operand.vmem [shape: f32[32,1], index: 2, kind: input, shape index: {}]   ;;  %s11148_s3 = inlined_call_operand.vmem [shape: f32[32,25], index: 3, kind: input, shape index: {}]   ;;  %s11149_s4 = inlined_call_operand.vmem [shape: f32[32,1], index: 4, kind: input, shape index: {}]   ;;  %s11150_s5 = inlined_call_operand.vmem [shape: f32[32,8], index: 5, kind: input, shape index: {}]   ;;  %s11151_s6 = inlined_call_operand.vmem [shape: f32[1,8], index: 6, kind: input, shape index: {}]   ;;  %s11152_s7 = inlined_call_operand.vmem [shape: f32[32,8], index: 7, kind: input, shape index: {}]   ;;  %s11153_s8 = inlined_call_operand.vmem [shape: f32[32,1], index: 8, kind: input, shape index: {}]   ;;  %s11154_s9 = inlined_call_operand.vmem [shape: f32[16,32], index: 9, kind: input, shape index: {}]   ;;  %s11155_s10 = inlined_call_operand.vmem [shape: f32[16,1], index: 10, kind: input, shape index: {}]   ;;  %s11156_s11 = inlined_call_operand.hbm [shape: f32[2,16,256], index: 11, kind: output, shape index: {}]  }
   0x1   :  { %v124_v0 = vld [vmem:[%s11145_s0 + $0x8] sm:$0xff]  ;;  %v126_v1 = vld [vmem:[%s11145_s0 + $0x18] sm:$0xff]  ;;  %v123_v2 = vld [vmem:[%s11145_s0] sm:$0xff]  ;;  %224 = vmatprep.mubr.f32.mxu0 %v11159_v5  ;;  %4854 = vset.pattern.permute.xlu0 %v11157_v6 }
   0x2   :  { %v4778_v3 = vpack.c.bf16 %v126_v1, %v124_v0  ;;  %v125_v4 = vld [vmem:[%s11145_s0 + $0x10] sm:$0xff]  ;;  %v51_v8 = vld [vmem:[%s11147_s2] sm:$0xff]  ;;  %4855 = vset.pattern.permute.xlu1 %v11157_v6  ;;  %2650 = vmatprep.mubr.f32.mxu1 %v11159_v5  ;;  %v52_v11 = vld [vmem:[%s11147_s2 + $0x8] sm:$0xff] }
   0x3   :  { %v4780_v7 = vpack.c.bf16 %v125_v4, %v123_v2  ;;  %129 = vperm.xlu0 %4854, %v51_v8   ;;  %v53_v9 = vld [vmem:[%s11147_s2 + $0x10] sm:$0xff]  ;;  %v47_v10 = vld [vmem:[%s11146_s1] sm:$0xff]  ;;  %v54_v12 = vld [vmem:[%s11147_s2 + $0x18] sm:$0xff] }
   0x4   :  { %4779 = vmatprep.subr.bf16.mxu0 %v4778_v3  ;;  %139 = vperm.xlu1 %4855, %v53_v9  }
   0x5   :  { %4781 = vmatpush1.bf16.msra.mxu0 %v4780_v7 }
   0x6   :  { %16 = vsyncpa [#allocation4], 0  ;;  %v48_v13 = vld [vmem:[%s11146_s1 + $0x8] sm:$0xff]  ;;  %s5607_s18 = smov 34   ;;  %v49_v14 = vld [vmem:[%s11146_s1 + $0x10] sm:$0xff]  ;;  %v5608_v16 = vmov 1  }
   0x7   :  { %134 = vperm.xlu0 %4854, %v52_v11   ;;  %v5765_v15 = vld [vmem:[%s11148_s3 + $0x8] sm:$0xff]  ;;  %s5609_s22 = smov 33   ;;  %v50_v17 = vld [vmem:[%s11146_s1 + $0x18] sm:$0xff]  ;;  %v5783_v19 = vld [vmem:[%s11148_s3] sm:$0xff]  ;;  %s5610_s29 = smov 32   ;;  %v5611_v20 = vmov 2  }
   0x8   :  { %4720 = vmatmul.mubr.msk.f32.vlgmr.msra.gmra.mrb[0].mxu0 %vm147_vm0, %v47_v10  ;;  %144 = vperm.xlu1 %4855, %v54_v12   ;;  %v5778_v18 = vld [vmem:[%s11148_s3 + $0x18] sm:$0xff]  ;;  %v5798_v21 = vld [vmem:[%s11148_s3 + $0x10] sm:$0xff]  ;;  %s5612_s13 = smov 31   ;;  %v5613_v22 = vmov 3   ;;  %s5614_s14 = smov 30   ;;  %v5615_v23 = vmov 4  }
   0x9   :  { %230 = vmatprep.mubr.f32.mxu0 %v11159_v5  ;;  %s5616_s15 = smov 18   ;;  %v5617_v24 = vmov 5   ;;  %s5618_s16 = smov 17   ;;  %v5619_v25 = vmov 6   ;;  %v5621_v26 = vmov 7   ;;  %v11163_v27 = vmov 8  }
   0xa   :  { %s5620_s17 = smov 16   ;;  %s5623_s2 = smov 15   ;;  %v11161_v7 = vmov 9   ;;  %vm11502_vm1 = vcmask 269312   ;;  %vm539_vm2 = vcmask 261120   ;;  %vm11492_vm3 = vcmask 277504  }
   0xb   :  { %4857 = vrot.lane.b32.xlu0 %v11159_v5, %s5607_s18  ;;  %s5627_s19 = smov 14   ;;  %s5628_s20 = smov 2   ;;  %vm11411_vm7 = vcmask 244736   ;;  %vm11415_vm8 = vcmask 138240   ;;  %vm11420_vm10 = vcmask 252928   ;;  %vm11364_vm11 = vcmask 121856  }
   0xc   :  { %4721 = vmatmul.mubr.msk.f32.gmra.mrb[2].mxu0 %vm147_vm0, %v48_v13  ;;  %4862 = vrot.lane.b32.xlu1 %v11159_v5, %s5607_s18  ;;  %s5631_s21 = smov 1   ;;  %s5634_s23 = smov 127   ;;  %vm11381_vm12 = vcmask 146432  }
   0xd   :  { %236 = vmatprep.mubr.f32.mxu0 %v11159_v5  ;;  %4876 = vset.pattern.permute.xlu0 %v5608_v16  ;;  %s11308_s24 = smov 126   ;;  %s11301_s25 = smov 114  }
   0xe   :  { %s11290_s26 = smov 113   ;;  %s11306_s30 = smov 112  }
   0xf   :  { %4867 = vrot.lane.b32.xlu0 %v11159_v5, %s5609_s22  ;;  %s5643_s12 = smov 111   ;;  %s11519_s27 = smov 98  }
  0x10   :  { %4722 = vmatmul.mubr.msk.f32.gmra.mrb[4].mxu0 %vm147_vm0, %v49_v14  ;;  %397 = vperm.xlu1 %4855, %v5765_v15   ;;  %s11399_s28 = smov 97  }
  0x11   :  { %242 = vmatprep.mubr.f32.mxu0 %v11159_v5 }
  0x13   :  { %480 = vperm.xlu0 %4876, %v5783_v19  }
  0x14   :  { %4723 = vmatmul.mubr.msk.f32.gmra.mrb[6].mxu0 %vm147_vm0, %v50_v17  ;;  %407 = vperm.xlu1 %4855, %v5778_v18  }
  0x15   :  { %4682 = vmatprep.mubr.f32.mxu0 %v11159_v5 }
  0x17   :  { %492 = vperm.xlu0 %4876, %v5778_v18  }
  0x18   :  { %4872 = vrot.lane.b32.xlu1 %v11159_v5, %s5609_s22 }
  0x19   :  { %4877 = vset.pattern.permute.xlu1 %v5608_v16 }
  0x1b   :  { %4884 = vrot.lane.b32.xlu0 %v11159_v5, %s5610_s29 }
  0x1c   :  { %484 = vperm.xlu1 %4877, %v5765_v15   ;;  %4889 = vset.pattern.permute.xlu0 %v5611_v20 }
  0x1f   :  { %569 = vperm.xlu0 %4889, %v5765_v15  }
  0x20   :  { %488 = vperm.xlu1 %4877, %v5798_v21  }
  0x23   :  { %4891 = vrot.lane.b32.xlu0 %v11159_v5, %s5612_s13 }
  0x24   :  { %4879 = vrot.lane.b32.xlu1 %v11159_v5, %s5610_s29  ;;  %4900 = vset.pattern.permute.xlu0 %v5613_v22 }
  0x25   :  { %4888 = vset.pattern.permute.xlu1 %v5611_v20 }
  0x27   :  { %650 = vperm.xlu0 %4900, %v5783_v19  }
  0x28   :  { %565 = vperm.xlu1 %4888, %v5783_v19  }
  0x2b   :  { %662 = vperm.xlu0 %4900, %v5778_v18  }
  0x2c   :  { %573 = vperm.xlu1 %4888, %v5798_v21  }
  0x2f   :  { %4908 = vrot.lane.b32.xlu0 %v11159_v5, %s5614_s14 }
  0x30   :  { %577 = vperm.xlu1 %4888, %v5778_v18   ;;  %4913 = vset.pattern.permute.xlu0 %v5615_v23 }
  0x33   :  { %739 = vperm.xlu0 %4913, %v5765_v15  }
  0x34   :  { %4896 = vrot.lane.b32.xlu1 %v11159_v5, %s5612_s13 }
  0x35   :  { %4901 = vset.pattern.permute.xlu1 %v5613_v22 }
  0x37   :  { %4915 = vrot.lane.b32.xlu0 %v11159_v5, %s5616_s15 }
  0x38   :  { %654 = vperm.xlu1 %4901, %v5765_v15   ;;  %4924 = vset.pattern.permute.xlu0 %v5617_v24 }
  0x3b   :  { %816 = vperm.xlu0 %4924, %v5783_v19  }
  0x3c   :  { %658 = vperm.xlu1 %4901, %v5798_v21  }
  0x3f   :  { %828 = vperm.xlu0 %4924, %v5778_v18  }
  0x40   :  { %4903 = vrot.lane.b32.xlu1 %v11159_v5, %s5614_s14 }
  0x41   :  { %4912 = vset.pattern.permute.xlu1 %v5615_v23 }
  0x43   :  { %4932 = vrot.lane.b32.xlu0 %v11159_v5, %s5618_s16 }
  0x44   :  { %735 = vperm.xlu1 %4912, %v5783_v19   ;;  %4937 = vset.pattern.permute.xlu0 %v5619_v25 }
  0x47   :  { %901 = vperm.xlu0 %4937, %v5765_v15  }
  0x48   :  { %743 = vperm.xlu1 %4912, %v5798_v21  }
  0x4b   :  { %4939 = vrot.lane.b32.xlu0 %v11159_v5, %s5620_s17 }
  0x4c   :  { %747 = vperm.xlu1 %4912, %v5778_v18   ;;  %4948 = vset.pattern.permute.xlu0 %v5621_v26 }
  0x4f   :  { %977 = vperm.xlu0 %4948, %v5783_v19  }
  0x50   :  { %4920 = vrot.lane.b32.xlu1 %v11159_v5, %s5616_s15 }
  0x51   :  { %4925 = vset.pattern.permute.xlu1 %v5617_v24 }
  0x53   :  { %989 = vperm.xlu0 %4948, %v5778_v18  }
  0x54   :  { %820 = vperm.xlu1 %4925, %v5765_v15  }
  0x57   :  { %4961 = vset.pattern.permute.xlu0 %v11163_v27 }
  0x58   :  { %824 = vperm.xlu1 %4925, %v5798_v21   ;;  %4956 = vrot.lane.b32.xlu0 %v11159_v5, %s5623_s2 }
  0x5c   :  { %4927 = vrot.lane.b32.xlu1 %v11159_v5, %s5618_s16  ;;  %1062 = vperm.xlu0 %4961, %v5765_v15  }
  0x5d   :  { %4936 = vset.pattern.permute.xlu1 %v5619_v25 }
  0x60   :  { %897 = vperm.xlu1 %4936, %v5783_v19   ;;  %4963 = vset.pattern.permute.xlu0 %v11161_v7 }
  0x64   :  { %905 = vperm.xlu1 %4936, %v5798_v21  }
  0x68   :  { %909 = vperm.xlu1 %4936, %v5778_v18  }
  0x6c   :  { %4944 = vrot.lane.b32.xlu1 %v11159_v5, %s5620_s17 }
  0x6d   :  { %4949 = vset.pattern.permute.xlu1 %v5621_v26 }
  0x70   :  { %981 = vperm.xlu1 %4949, %v5765_v15  }
  0x74   :  { %985 = vperm.xlu1 %4949, %v5798_v21  }
  0x78   :  { %4951 = vrot.lane.b32.xlu1 %v11159_v5, %s5623_s2 }
  0x79   :  { %4960 = vset.pattern.permute.xlu1 %v11163_v27 }
  0x7c   :  { %1058 = vperm.xlu1 %4960, %v5783_v19  }
  0x80   :  { %1066 = vperm.xlu1 %4960, %v5798_v21  }
  0x82   :  { %v5872_v36 = vpop.permute.xlu0 %129 }
  0x83   :  { %v5856_v28 = vpop.permute.xlu1 %139  ;;  %11688 = vst [vmem:[#allocation12_spill] sm:$0xff] %v5872_v36 }
  0x84   :  { %11682 = vst [vmem:[#allocation6_spill] sm:$0xff] %v5856_v28  ;;  %4962 = vset.pattern.permute.xlu1 %v11161_v7 }
  0x86   :  { %v5890_v53 = vpop.permute.xlu0 %134 }
  0x87   :  { %v5858_v29 = vpop.permute.xlu1 %144  ;;  %11691 = vst [vmem:[#allocation15_spill] sm:$0xff] %v5890_v53 }
  0x88   :  { %11683 = vst [vmem:[#allocation7_spill] sm:$0xff] %v5858_v29 }
  0x8a   :  { %v5894_v56 = vpop.permute.xlu0 %4857 }
  0x8b   :  { %v5860_v30 = vpop.permute.xlu1 %4862 }
  0x8e   :  { %v5898_v59 = vpop.permute.xlu0 %4867 }
  0x8f   :  { %v5862_v31 = vpop.permute.xlu1 %397 }
  0x90   :  { %11684 = vst [vmem:[#allocation8_spill] sm:$0xff] %v5862_v31 }
  0x92   :  { %v5909_v2 = vpop.permute.xlu0 %480 }
  0x93   :  { %v5864_v32 = vpop.permute.xlu1 %407  ;;  %11694 = vst [vmem:[#allocation18_spill] sm:$0xff] %v5909_v2 }
  0x94   :  { %11685 = vst [vmem:[#allocation9_spill] sm:$0xff] %v5864_v32 }
  0x96   :  { %v5917_v4 = vpop.permute.xlu0 %492 }
  0x97   :  { %v5866_v33 = vpop.permute.xlu1 %4872  ;;  %11696 = vst [vmem:[#allocation20_spill] sm:$0xff] %v5917_v4 }
  0x9a   :  { %v5932_v11 = vpop.permute.xlu0 %4884 }
  0x9b   :  { %v5868_v34 = vpop.permute.xlu1 %484  ;;  %11697 = vst [vmem:[#allocation21_spill] sm:$0xff] %v5932_v11 }
  0x9c   :  { %11686 = vst [vmem:[#allocation10_spill] sm:$0xff] %v5868_v34 }
  0x9e   :  { %v5942_v20 = vpop.permute.xlu0 %569 }
  0x9f   :  { %v5870_v35 = vpop.permute.xlu1 %488  ;;  %11700 = vst [vmem:[#allocation24_spill] sm:$0xff] %v5942_v20 }
  0xa0   :  { %11687 = vst [vmem:[#allocation11_spill] sm:$0xff] %v5870_v35 }
  0xa2   :  { %v5954_v23 = vpop.permute.xlu0 %4891 }
  0xa3   :  { %v5875_v40 = vpop.permute.xlu1 %4879 }
  0xa6   :  { %v5962_v26 = vpop.permute.xlu0 %650 }
  0xa7   :  { %v5878_v45 = vpop.permute.xlu1 %565  ;;  %11703 = vst [vmem:[#allocation27_spill] sm:$0xff] %v5962_v26 }
  0xa8   :  { %11689 = vst [vmem:[#allocation13_spill] sm:$0xff] %v5878_v45 }
  0xab   :  { %v5888_v51 = vpop.permute.xlu1 %573 }
  0xac   :  { %11690 = vst [vmem:[#allocation14_spill] sm:$0xff] %v5888_v51 }
  0xaf   :  { %v5892_v55 = vpop.permute.xlu1 %577 }
  0xb0   :  { %11692 = vst [vmem:[#allocation16_spill] sm:$0xff] %v5892_v55  ;;  %v5625_v55 = vmov 10  }
  0xb3   :  { %v5896_v58 = vpop.permute.xlu1 %4896 }
  0xb7   :  { %v5907_v1 = vpop.permute.xlu1 %654 }
  0xb8   :  { %11693 = vst [vmem:[#allocation17_spill] sm:$0xff] %v5907_v1 }
  0xbb   :  { %v5915_v3 = vpop.permute.xlu1 %658 }
  0xbc   :  { %11695 = vst [vmem:[#allocation19_spill] sm:$0xff] %v5915_v3 }
  0xbf   :  { %v5930_v10 = vpop.permute.xlu1 %4903 }
  0xc3   :  { %v5940_v17 = vpop.permute.xlu1 %735 }
  0xc4   :  { %11699 = vst [vmem:[#allocation23_spill] sm:$0xff] %v5940_v17 }
  0xc7   :  { %v5952_v22 = vpop.permute.xlu1 %743 }
  0xc8   :  { %11701 = vst [vmem:[#allocation25_spill] sm:$0xff] %v5952_v22 }
  0xcb   :  { %v5960_v25 = vpop.permute.xlu1 %747 }
  0xcc   :  { %11702 = vst [vmem:[#allocation26_spill] sm:$0xff] %v5960_v25 }
  0xdb   :  { %v226_v37 = vpop.f32.mrb[0].mxu0 }
  0xdc   :  { %v227_v38 = vadd.f32 %v226_v37, %v5872_v36  ;;  %v228_v39 = vpop.f32.mrb[1].mxu0 }
  0xdd   :  { %v229_v44 = vadd.f32 %v228_v39, %v5872_v36 }
  0xde   :  { %v4724_v41 = vmul.f32 -1.442695, %v227_v38 }
  0xdf   :  { %v232_v42 = vpop.f32.mrb[2].mxu0  ;;  %v4725_v48 = vmul.f32 -1.442695, %v229_v44 }
  0xe0   :  { %5382 = vpow2.f32 %v4724_v41  ;;  %v234_v43 = vpop.f32.mrb[3].mxu0  ;;  %v233_v60 = vadd.f32 %v232_v42, %v5890_v53 }
  0xe1   :  { %5384 = vpow2.f32 %v4725_v48  ;;  %v235_v9 = vadd.f32 %v234_v43, %v5890_v53  ;;  %v5976_v43 = vpop.permute.xlu1 %4920 }
  0xe2   :  { %v4726_v0 = vmul.f32 -1.442695, %v233_v60  ;;  %11705 = vst [vmem:[#allocation29_spill] sm:$0xff] %v5976_v43  ;;  %v11941_v43 = vunpack.i.h.bf16 %v5954_v23 }
  0xe3   :  { %v5880_v46 = vpop.f32.mrb[4].mxu0  ;;  %v4727_v14 = vmul.f32 -1.442695, %v235_v9 }
  0xe4   :  { %v5882_v47 = vpop.f32.mrb[5].mxu0 }
  0xe7   :  { %v5884_v49 = vpop.f32.mrb[6].mxu0 }
  0xe8   :  { %v5886_v50 = vpop.f32.mrb[7].mxu0 }
  0xea   :  { %v5383_v52 = vpop.eup %5382 }
  0xeb   :  { %v273_v54 = vadd.f32 1.0, %v5383_v52  ;;  %v5385_v57 = vpop.eup %5384  ;;  %v241_v52 = vadd.f32 %v5882_v47, %v5856_v28 }
  0xec   :  { %v274_v62 = vadd.f32 1.0, %v5385_v57 }
  0xed   :  { %5386 = vrcp.f32 %v273_v54  ;;  %v4729_v57 = vmul.f32 -1.442695, %v241_v52 }
  0xee   :  { %5388 = vrcp.f32 %v274_v62 }
  0xef   :  { %5390 = vpow2.f32 %v4726_v0 }
  0xf0   :  { %5392 = vpow2.f32 %v4727_v14 }
  0xf7   :  { %v5387_v61 = vpop.eup %5386 }
  0xf8   :  { %v5901_v63 = vmul.f32 %v5387_v61, %v227_v38  ;;  %v5389_v8 = vpop.eup %5388  ;;  %v239_v38 = vadd.f32 %v5880_v46, %v5856_v28  ;;  %v5984_v46 = vpop.permute.xlu1 %820 }
  0xf9   :  { %v5391_v12 = vpop.eup %5390  ;;  %v5934_v13 = vmul.f32 %v5389_v8, %v229_v44  ;;  %v5978_v44 = vpop.permute.xlu0 %662  ;;  %11707 = vst [vmem:[#allocation31_spill] sm:$0xff] %v5984_v46 }
  0xfa   :  { %517 = vrot.lane.b32.xlu0 %v5901_v63, %s5610_s29  ;;  %343 = vrot.lane.b32.xlu1 %v5901_v63, %s5607_s18  ;;  %v275_v16 = vadd.f32 1.0, %v5391_v12  ;;  %v5393_v24 = vpop.eup %5392  ;;  %v4728_v42 = vmul.f32 -1.442695, %v239_v38  ;;  %11706 = vst [vmem:[#allocation30_spill] sm:$0xff] %v5978_v44 }
  0xfb   :  { %11698 = vst [vmem:[#allocation22_spill] sm:$0xff] %v5934_v13  ;;  %v276_v39 = vadd.f32 1.0, %v5393_v24  ;;  %v245_v24 = vadd.f32 %v5884_v49, %v5858_v29 }
  0xfc   :  { %5394 = vrcp.f32 %v275_v16 }
  0xfd   :  { %5396 = vrcp.f32 %v276_v39  ;;  %v5986_v48 = vpop.permute.xlu0 %4908 }
  0xfe   :  { %687 = vrot.lane.b32.xlu0 %v5901_v63, %s5614_s14  ;;  %432 = vrot.lane.b32.xlu1 %v5901_v63, %s5609_s22  ;;  %5398 = vpow2.f32 %v4728_v42  ;;  %11708 = vst [vmem:[#allocation32_spill] sm:$0xff] %v5986_v48  ;;  %v11943_v48 = vunpack.i.h.bf16 %v5875_v40 }
  0xff   :  { %5400 = vpow2.f32 %v4729_v57  ;;  %v4730_v57 = vmul.f32 -1.442695, %v245_v24 }
 0x101   :  { %v6000_v61 = vpop.permute.xlu0 %739 }
 0x102   :  { %849 = vrot.lane.b32.xlu0 %v5901_v63, %s5618_s16  ;;  %602 = vrot.lane.b32.xlu1 %v5901_v63, %s5612_s13  ;;  %11710 = vst [vmem:[#allocation34_spill] sm:$0xff] %v6000_v61 }
 0x105   :  { %v6010_v12 = vpop.permute.xlu0 %4915 }
 0x106   :  { %1010 = vrot.lane.b32.xlu0 %v5901_v63, %s5623_s2  ;;  %768 = vrot.lane.b32.xlu1 %v5901_v63, %s5616_s15  ;;  %v5395_v37 = vpop.eup %5394 }
 0x107   :  { %v5970_v41 = vmul.f32 %v5395_v37, %v233_v60  ;;  %v5397_v54 = vpop.eup %5396  ;;  %v5998_v60 = vpop.permute.xlu1 %824 }
 0x108   :  { %11709 = vst [vmem:[#allocation33_spill] sm:$0xff] %v5998_v60  ;;  %v5399_v62 = vpop.eup %5398  ;;  %v6002_v47 = vmul.f32 %v5397_v54, %v235_v9 }
 0x109   :  { %11704 = vst [vmem:[#allocation28_spill] sm:$0xff] %v5970_v41  ;;  %v277_v0 = vadd.f32 1.0, %v5399_v62  ;;  %v6022_v14 = vpop.permute.xlu0 %816  ;;  %v5401_v16 = vpop.eup %5400 }
 0x10a   :  { %345 = vrot.lane.b32.xlu0 %v5934_v13, %s5607_s18  ;;  %930 = vrot.lane.b32.xlu1 %v5901_v63, %s5620_s17  ;;  %11712 = vst [vmem:[#allocation36_spill] sm:$0xff] %v6022_v14  ;;  %v278_v37 = vadd.f32 1.0, %v5401_v16  ;;  %v247_v16 = vadd.f32 %v5886_v50, %v5858_v29 }
 0x10b   :  { %v6008_v8 = vpop.permute.xlu1 %4927  ;;  %5402 = vrcp.f32 %v277_v0 }
 0x10c   :  { %5404 = vrcp.f32 %v278_v37 }
 0x10d   :  { %v6032_v42 = vpop.permute.xlu0 %828  ;;  %5406 = vpow2.f32 %v4730_v57  ;;  %v4731_v57 = vmul.f32 -1.442695, %v247_v16 }
 0x10e   :  { %434 = vrot.lane.b32.xlu0 %v5934_v13, %s5609_s22  ;;  %519 = vrot.lane.b32.xlu1 %v5934_v13, %s5610_s29  ;;  %11714 = vst [vmem:[#allocation38_spill] sm:$0xff] %v6032_v42 }
 0x10f   :  { %v6020_v9 = vpop.permute.xlu1 %897  ;;  %5408 = vpow2.f32 %v4731_v57 }
 0x110   :  { %11711 = vst [vmem:[#allocation35_spill] sm:$0xff] %v6020_v9 }
 0x111   :  { %v6046_v0 = vpop.permute.xlu0 %4932 }
 0x112   :  { %604 = vrot.lane.b32.xlu0 %v5934_v13, %s5612_s13  ;;  %689 = vrot.lane.b32.xlu1 %v5934_v13, %s5614_s14  ;;  %11717 = vst [vmem:[#allocation41_spill] sm:$0xff] %v6046_v0 }
 0x113   :  { %v6030_v39 = vpop.permute.xlu1 %905 }
 0x114   :  { %11713 = vst [vmem:[#allocation37_spill] sm:$0xff] %v6030_v39 }
 0x115   :  { %v5403_v54 = vpop.eup %5402  ;;  %v6056_v37 = vpop.permute.xlu0 %901 }
 0x116   :  { %770 = vrot.lane.b32.xlu0 %v5934_v13, %s5616_s15  ;;  %851 = vrot.lane.b32.xlu1 %v5934_v13, %s5618_s16  ;;  %v6038_v49 = vmul.f32 %v5403_v54, %v239_v38  ;;  %11719 = vst [vmem:[#allocation43_spill] sm:$0xff] %v6056_v37  ;;  %v5405_v54 = vpop.eup %5404 }
 0x117   :  { %v6044_v62 = vpop.permute.xlu1 %909  ;;  %v5407_v6 = vpop.eup %5406  ;;  %v6062_v50 = vmul.f32 %v5405_v54, %v241_v52 }
 0x118   :  { %11715 = vst [vmem:[#allocation39_spill] sm:$0xff] %v6038_v49  ;;  %11716 = vst [vmem:[#allocation40_spill] sm:$0xff] %v6044_v62  ;;  %v279_v27 = vadd.f32 1.0, %v5407_v6 }
 0x119   :  { %11720 = vst [vmem:[#allocation44_spill] sm:$0xff] %v6062_v50  ;;  %v6070_v7 = vpop.permute.xlu0 %4939  ;;  %v5409_v57 = vpop.eup %5408 }
 0x11a   :  { %932 = vrot.lane.b32.xlu0 %v5934_v13, %s5620_s17  ;;  %1012 = vrot.lane.b32.xlu1 %v5934_v13, %s5623_s2  ;;  %5410 = vrcp.f32 %v279_v27  ;;  %v280_v29 = vadd.f32 1.0, %v5409_v57 }
 0x11b   :  { %v6054_v38 = vpop.permute.xlu1 %4944 }
 0x11c   :  { %11718 = vst [vmem:[#allocation42_spill] sm:$0xff] %v6054_v38  ;;  %5412 = vrcp.f32 %v280_v29 }
 0x11d   :  { %v6078_v54 = vpop.permute.xlu0 %977 }
 0x11e   :  { %523 = vrot.lane.b32.xlu0 %v5970_v41, %s5610_s29  ;;  %349 = vrot.lane.b32.xlu1 %v5970_v41, %s5607_s18  ;;  %11723 = vst [vmem:[#allocation47_spill] sm:$0xff] %v6078_v54 }
 0x11f   :  { %v6068_v5 = vpop.permute.xlu1 %981 }
 0x120   :  { %11721 = vst [vmem:[#allocation45_spill] sm:$0xff] %v6068_v5  ;;  %v11739_v5 = vmov 9  }
 0x121   :  { %v6090_v27 = vpop.permute.xlu0 %989 }
 0x122   :  { %693 = vrot.lane.b32.xlu0 %v5970_v41, %s5614_s14  ;;  %438 = vrot.lane.b32.xlu1 %v5970_v41, %s5609_s22  ;;  %11724 = vst [vmem:[#allocation48_spill] sm:$0xff] %v6090_v27 }
 0x123   :  { %v6076_v52 = vpop.permute.xlu1 %985 }
 0x124   :  { %11722 = vst [vmem:[#allocation46_spill] sm:$0xff] %v6076_v52  ;;  %v5411_v28 = vpop.eup %5410 }
 0x125   :  { %v6096_v53 = vmul.f32 %v5411_v28, %v245_v24  ;;  %v6100_v62 = vpop.permute.xlu0 %4956 }
 0x126   :  { %855 = vrot.lane.b32.xlu0 %v5970_v41, %s5618_s16  ;;  %608 = vrot.lane.b32.xlu1 %v5970_v41, %s5612_s13  ;;  %11726 = vst [vmem:[#allocation50_spill] sm:$0xff] %v6100_v62  ;;  %v5413_v29 = vpop.eup %5412 }
 0x127   :  { %v6088_v6 = vpop.permute.xlu1 %4951  ;;  %v6118_v24 = vmul.f32 %v5413_v29, %v247_v16 }
 0x129   :  { %v6112_v28 = vpop.permute.xlu0 %1062  ;;  %11729 = vst [vmem:[#allocation53_spill] sm:$0xff] %v6118_v24 }
 0x12a   :  { %1016 = vrot.lane.b32.xlu0 %v5970_v41, %s5623_s2  ;;  %774 = vrot.lane.b32.xlu1 %v5970_v41, %s5616_s15  ;;  %11728 = vst [vmem:[#allocation52_spill] sm:$0xff] %v6112_v28  ;;  %v11736_v28 = vmov 8  }
 0x12b   :  { %v6098_v36 = vpop.permute.xlu1 %1058 }
 0x12c   :  { %11725 = vst [vmem:[#allocation49_spill] sm:$0xff] %v6098_v36 }
 0x12e   :  { %351 = vrot.lane.b32.xlu0 %v6002_v47, %s5607_s18  ;;  %936 = vrot.lane.b32.xlu1 %v5970_v41, %s5620_s17 }
 0x12f   :  { %v6110_v57 = vpop.permute.xlu1 %1066 }
 0x130   :  { %11727 = vst [vmem:[#allocation51_spill] sm:$0xff] %v6110_v57 }
 0x132   :  { %440 = vrot.lane.b32.xlu0 %v6002_v47, %s5609_s22  ;;  %525 = vrot.lane.b32.xlu1 %v6002_v47, %s5610_s29 }
 0x136   :  { %610 = vrot.lane.b32.xlu0 %v6002_v47, %s5612_s13  ;;  %695 = vrot.lane.b32.xlu1 %v6002_v47, %s5614_s14 }
 0x13a   :  { %776 = vrot.lane.b32.xlu0 %v6002_v47, %s5616_s15  ;;  %857 = vrot.lane.b32.xlu1 %v6002_v47, %s5618_s16 }
 0x13e   :  { %938 = vrot.lane.b32.xlu0 %v6002_v47, %s5620_s17  ;;  %1018 = vrot.lane.b32.xlu1 %v6002_v47, %s5623_s2 }
 0x142   :  { %355 = vrot.lane.b32.xlu0 %v6038_v49, %s5607_s18  ;;  %529 = vrot.lane.b32.xlu1 %v6038_v49, %s5610_s29 }
 0x146   :  { %444 = vrot.lane.b32.xlu0 %v6038_v49, %s5609_s22  ;;  %699 = vrot.lane.b32.xlu1 %v6038_v49, %s5614_s14 }
 0x14a   :  { %614 = vrot.lane.b32.xlu0 %v6038_v49, %s5612_s13  ;;  %861 = vrot.lane.b32.xlu1 %v6038_v49, %s5618_s16 }
 0x14e   :  { %780 = vrot.lane.b32.xlu0 %v6038_v49, %s5616_s15  ;;  %357 = vrot.lane.b32.xlu1 %v6062_v50, %s5607_s18 }
 0x152   :  { %942 = vrot.lane.b32.xlu0 %v6038_v49, %s5620_s17  ;;  %446 = vrot.lane.b32.xlu1 %v6062_v50, %s5609_s22 }
 0x156   :  { %531 = vrot.lane.b32.xlu0 %v6062_v50, %s5610_s29  ;;  %616 = vrot.lane.b32.xlu1 %v6062_v50, %s5612_s13 }
 0x15a   :  { %701 = vrot.lane.b32.xlu0 %v6062_v50, %s5614_s14  ;;  %782 = vrot.lane.b32.xlu1 %v6062_v50, %s5616_s15 }
 0x15e   :  { %863 = vrot.lane.b32.xlu0 %v6062_v50, %s5618_s16  ;;  %944 = vrot.lane.b32.xlu1 %v6062_v50, %s5620_s17 }
 0x162   :  { %361 = vrot.lane.b32.xlu0 %v6096_v53, %s5607_s18  ;;  %535 = vrot.lane.b32.xlu1 %v6096_v53, %s5610_s29 }
 0x166   :  { %450 = vrot.lane.b32.xlu0 %v6096_v53, %s5609_s22  ;;  %705 = vrot.lane.b32.xlu1 %v6096_v53, %s5614_s14 }
 0x16a   :  { %620 = vrot.lane.b32.xlu0 %v6096_v53, %s5612_s13  ;;  %867 = vrot.lane.b32.xlu1 %v6096_v53, %s5618_s16 }
 0x16c   :  { %v6120_v27 = vpop.permute.xlu0 %517  ;;  %v6122_v52 = vpop.permute.xlu1 %343 }
 0x16e   :  { %786 = vrot.lane.b32.xlu0 %v6096_v53, %s5616_s15  ;;  %363 = vrot.lane.b32.xlu1 %v6118_v24, %s5607_s18 }
 0x170   :  { %v6128_v57 = vpop.permute.xlu0 %687  ;;  %v6130_v60 = vpop.permute.xlu1 %432 }
 0x172   :  { %948 = vrot.lane.b32.xlu0 %v6096_v53, %s5620_s17  ;;  %452 = vrot.lane.b32.xlu1 %v6118_v24, %s5609_s22 }
 0x174   :  { %v6136_v16 = vpop.permute.xlu0 %849  ;;  %v6138_v29 = vpop.permute.xlu1 %602 }
 0x176   :  { %537 = vrot.lane.b32.xlu0 %v6118_v24, %s5610_s29  ;;  %622 = vrot.lane.b32.xlu1 %v6118_v24, %s5612_s13 }
 0x178   :  { %v6144_v39 = vpop.permute.xlu0 %1010  ;;  %v6146_v3 = vpop.permute.xlu1 %768 }
 0x17a   :  { %707 = vrot.lane.b32.xlu0 %v6118_v24, %s5614_s14  ;;  %788 = vrot.lane.b32.xlu1 %v6118_v24, %s5616_s15 }
 0x17c   :  { %v6152_v42 = vpop.permute.xlu0 %345  ;;  %v6154_v25 = vpop.permute.xlu1 %930 }
 0x17d   :  { %11730 = vst [vmem:[#allocation54_spill] sm:$0xff] %v6152_v42  ;;  %11731 = vst [vmem:[#allocation55_spill] sm:$0xff] %v6154_v25 }
 0x17e   :  { %869 = vrot.lane.b32.xlu0 %v6118_v24, %s5618_s16  ;;  %950 = vrot.lane.b32.xlu1 %v6118_v24, %s5620_s17 }
 0x180   :  { %v6160_v22 = vpop.permute.xlu0 %434  ;;  %v6162_v35 = vpop.permute.xlu1 %519 }
 0x181   :  { %11732 = vst [vmem:[#allocation56_spill] sm:$0xff] %v6160_v22  ;;  %11733 = vst [vmem:[#allocation57_spill] sm:$0xff] %v6162_v35 }
 0x182   :  { %1143 = vperm.xlu0 %4963, %v5765_v15   ;;  %1139 = vperm.xlu1 %4962, %v5783_v19  }
 0x184   :  { %v6166_v51 = vpop.permute.xlu0 %604  ;;  %v6168_v44 = vpop.permute.xlu1 %689 }
 0x185   :  { %11734 = vst [vmem:[#allocation58_spill] sm:$0xff] %v6166_v51  ;;  %11735 = vst [vmem:[#allocation59_spill] sm:$0xff] %v6168_v44  ;;  %v5626_v44 = vmov 11  }
 0x186   :  { %4966 = vset.pattern.permute.xlu0 %v5625_v55  ;;  %4964 = vset.pattern.permute.xlu1 %v11736_v28 }
 0x187   :  { %1220 = vperm.xlu0 %4966, %v5783_v19   ;;  %1070 = vperm.xlu1 %4964, %v5778_v18  }
 0x188   :  { %v6173_v32 = vpop.permute.xlu0 %770  ;;  %v6175_v4 = vpop.permute.xlu1 %851 }
 0x189   :  { %11737 = vst [vmem:[#allocation60_spill] sm:$0xff] %v6173_v32  ;;  %11738 = vst [vmem:[#allocation61_spill] sm:$0xff] %v6175_v4  ;;  %v11742_v4 = vmov 0.0  }
 0x18b   :  { %1228 = vperm.xlu0 %4966, %v5798_v21   ;;  %4965 = vset.pattern.permute.xlu1 %v11739_v5 }
 0x18c   :  { %v6179_v37 = vpop.permute.xlu0 %932  ;;  %1147 = vperm.xlu1 %4965, %v5798_v21   ;;  %v6182_v54 = vpop.permute.xlu1 %1012 }
 0x18d   :  { %11740 = vst [vmem:[#allocation62_spill] sm:$0xff] %v6179_v37  ;;  %11741 = vst [vmem:[#allocation63_spill] sm:$0xff] %v6182_v54 }
 0x18f   :  { %4970 = vset.pattern.permute.xlu0 %v5626_v44 }
 0x190   :  { %1305 = vperm.xlu0 %4970, %v5765_v15   ;;  %v6185_v28 = vpop.permute.xlu0 %523  ;;  %4967 = vset.pattern.permute.xlu1 %v5625_v55  ;;  %v6187_v32 = vpop.permute.xlu1 %349 }
 0x191   :  { %1224 = vperm.xlu1 %4967, %v5765_v15  }
 0x194   :  { %4972 = vrot.lane.b32.xlu0 %v11742_v4, %s5627_s19  ;;  %v6192_v37 = vpop.permute.xlu0 %693  ;;  %v6194_v46 = vpop.permute.xlu1 %438 }
 0x195   :  { %4968 = vset.pattern.permute.xlu1 %v11739_v5 }
 0x196   :  { %1151 = vperm.xlu1 %4968, %v5778_v18  }
 0x198   :  { %1093 = vrot.lane.b32.xlu0 %v5934_v13, %s5627_s19  ;;  %v6200_v54 = vpop.permute.xlu0 %855  ;;  %v6202_v51 = vpop.permute.xlu1 %608 }
 0x199   :  { %11743 = vst [vmem:[#allocation64_spill] sm:$0xff] %v6200_v54 }
 0x19a   :  { %4969 = vset.pattern.permute.xlu1 %v5626_v44 }
 0x19b   :  { %1301 = vperm.xlu1 %4969, %v5783_v19  }
 0x19c   :  { %1099 = vrot.lane.b32.xlu0 %v6002_v47, %s5627_s19  ;;  %v6207_v61 = vpop.permute.xlu0 %1016  ;;  %v6209_v35 = vpop.permute.xlu1 %774 }
 0x19d   :  { %11744 = vst [vmem:[#allocation65_spill] sm:$0xff] %v6207_v61 }
 0x19f   :  { %1022 = vrot.lane.b32.xlu1 %v6038_v49, %s5623_s2 }
 0x1a0   :  { %1309 = vperm.xlu0 %4970, %v5798_v21   ;;  %v6214_v5 = vpop.permute.xlu0 %351  ;;  %v6216_v54 = vpop.permute.xlu1 %936  ;;  %4976 = vset.pattern.permute.xlu1 %v5625_v55 }
 0x1a1   :  { %11745 = vst [vmem:[#allocation66_spill] sm:$0xff] %v6216_v54 }
 0x1a3   :  { %1024 = vrot.lane.b32.xlu1 %v6062_v50, %s5623_s2 }
 0x1a4   :  { %4979 = vrot.lane.b32.xlu0 %v11742_v4, %s5627_s19  ;;  %v6222_v44 = vpop.permute.xlu0 %440  ;;  %v6224_v61 = vpop.permute.xlu1 %525 }
 0x1a7   :  { %1091 = vrot.lane.b32.xlu1 %v5901_v63, %s5627_s19 }
 0x1a8   :  { %1105 = vrot.lane.b32.xlu0 %v6062_v50, %s5627_s19  ;;  %v6230_v22 = vpop.permute.xlu0 %610  ;;  %v6232_v54 = vpop.permute.xlu1 %695 }
 0x1a9   :  { %11746 = vst [vmem:[#allocation67_spill] sm:$0xff] %v6232_v54  ;;  %v5629_v54 = vmov 12  }
 0x1ab   :  { %1097 = vrot.lane.b32.xlu1 %v5970_v41, %s5627_s19 }
 0x1ac   :  { %1172 = vrot.lane.b32.xlu0 %v5901_v63, %s5628_s20  ;;  %v6238_v55 = vpop.permute.xlu0 %776  ;;  %v6240_v25 = vpop.permute.xlu1 %857 }
 0x1ad   :  { %11747 = vst [vmem:[#allocation68_spill] sm:$0xff] %v6238_v55  ;;  %11748 = vst [vmem:[#allocation69_spill] sm:$0xff] %v6240_v25  ;;  %v11202_v25 = vmov 13  }
 0x1af   :  { %1232 = vperm.xlu1 %4976, %v5778_v18  }
 0x1b0   :  { %1178 = vrot.lane.b32.xlu0 %v5970_v41, %s5628_s20  ;;  %v6245_v42 = vpop.permute.xlu0 %938  ;;  %v6247_v14 = vpop.permute.xlu1 %1018 }
 0x1b1   :  { %11749 = vst [vmem:[#allocation70_spill] sm:$0xff] %v6245_v42  ;;  %11750 = vst [vmem:[#allocation71_spill] sm:$0xff] %v6247_v14 }
 0x1b3   :  { %4977 = vset.pattern.permute.xlu1 %v5629_v54 }
 0x1b4   :  { %1313 = vperm.xlu0 %4970, %v5778_v18   ;;  %v6250_v36 = vpop.permute.xlu0 %355  ;;  %1341 = vperm.xlu1 %4977, %v5783_v19   ;;  %v6253_v55 = vpop.permute.xlu1 %529 }
 0x1b5   :  { %11751 = vst [vmem:[#allocation72_spill] sm:$0xff] %v6250_v36  ;;  %11752 = vst [vmem:[#allocation73_spill] sm:$0xff] %v6253_v55 }
 0x1b8   :  { %4989 = vset.pattern.permute.xlu0 %v11202_v25  ;;  %v6256_v26 = vpop.permute.xlu0 %444  ;;  %1028 = vrot.lane.b32.xlu1 %v6096_v53, %s5623_s2  ;;  %v6260_v42 = vpop.permute.xlu1 %699 }
 0x1b9   :  { %11753 = vst [vmem:[#allocation74_spill] sm:$0xff] %v6256_v26  ;;  %11754 = vst [vmem:[#allocation75_spill] sm:$0xff] %v6260_v42  ;;  %1450 = vperm.xlu0 %4989, %v5765_v15  }
 0x1bc   :  { %v6263_v14 = vpop.permute.xlu0 %614  ;;  %1030 = vrot.lane.b32.xlu1 %v6118_v24, %s5623_s2  ;;  %v6267_v36 = vpop.permute.xlu1 %861 }
 0x1bd   :  { %11755 = vst [vmem:[#allocation76_spill] sm:$0xff] %v6263_v14  ;;  %11756 = vst [vmem:[#allocation77_spill] sm:$0xff] %v6267_v36  ;;  %4990 = vset.pattern.permute.xlu0 %v5629_v54  ;;  %v11768_v36 = vmov 13  }
 0x1be   :  { %1345 = vperm.xlu0 %4990, %v5765_v15  }
 0x1c0   :  { %v6270_v25 = vpop.permute.xlu0 %780  ;;  %1103 = vrot.lane.b32.xlu1 %v6038_v49, %s5627_s19  ;;  %v6274_v55 = vpop.permute.xlu1 %357 }
 0x1c1   :  { %11757 = vst [vmem:[#allocation78_spill] sm:$0xff] %v6270_v25  ;;  %11758 = vst [vmem:[#allocation79_spill] sm:$0xff] %v6274_v55 }
 0x1c2   :  { %4992 = vrot.lane.b32.xlu0 %v11742_v4, %s5628_s20 }
 0x1c4   :  { %v6278_v42 = vpop.permute.xlu0 %942  ;;  %4984 = vrot.lane.b32.xlu1 %v11742_v4, %s5628_s20  ;;  %v6282_v14 = vpop.permute.xlu1 %446 }
 0x1c5   :  { %11759 = vst [vmem:[#allocation80_spill] sm:$0xff] %v6278_v42  ;;  %11760 = vst [vmem:[#allocation81_spill] sm:$0xff] %v6282_v14 }
 0x1c6   :  { %1186 = vrot.lane.b32.xlu0 %v6062_v50, %s5628_s20 }
 0x1c8   :  { %v6286_v54 = vpop.permute.xlu0 %531  ;;  %1174 = vrot.lane.b32.xlu1 %v5934_v13, %s5628_s20  ;;  %v6290_v25 = vpop.permute.xlu1 %616 }
 0x1c9   :  { %11761 = vst [vmem:[#allocation82_spill] sm:$0xff] %v6286_v54  ;;  %11762 = vst [vmem:[#allocation83_spill] sm:$0xff] %v6290_v25 }
 0x1ca   :  { %1253 = vrot.lane.b32.xlu0 %v5901_v63, %s5631_s21 }
 0x1cc   :  { %v6294_v42 = vpop.permute.xlu0 %701  ;;  %1180 = vrot.lane.b32.xlu1 %v6002_v47, %s5628_s20  ;;  %v6298_v14 = vpop.permute.xlu1 %782 }
 0x1cd   :  { %11763 = vst [vmem:[#allocation84_spill] sm:$0xff] %v6294_v42  ;;  %11764 = vst [vmem:[#allocation85_spill] sm:$0xff] %v6298_v14  ;;  %v5632_v14 = vmov 14  }
 0x1ce   :  { %1259 = vrot.lane.b32.xlu0 %v5970_v41, %s5631_s21 }
 0x1d0   :  { %v6302_v54 = vpop.permute.xlu0 %863  ;;  %1349 = vperm.xlu1 %4977, %v5798_v21   ;;  %v6305_v55 = vpop.permute.xlu1 %944 }
 0x1d1   :  { %11765 = vst [vmem:[#allocation86_spill] sm:$0xff] %v6302_v54  ;;  %11766 = vst [vmem:[#allocation87_spill] sm:$0xff] %v6305_v55 }
 0x1d2   :  { %1353 = vperm.xlu0 %4990, %v5778_v18  }
 0x1d4   :  { %v6308_v25 = vpop.permute.xlu0 %361  ;;  %4988 = vset.pattern.permute.xlu1 %v11768_v36  ;;  %v6311_v42 = vpop.permute.xlu1 %535 }
 0x1d5   :  { %11767 = vst [vmem:[#allocation88_spill] sm:$0xff] %v6308_v25  ;;  %11769 = vst [vmem:[#allocation89_spill] sm:$0xff] %v6311_v42  ;;  %1446 = vperm.xlu1 %4988, %v5783_v19  }
 0x1d6   :  { %5002 = vset.pattern.permute.xlu0 %v5632_v14 }
 0x1d7   :  { %1531 = vperm.xlu0 %5002, %v5765_v15  }
 0x1d8   :  { %v6315_v26 = vpop.permute.xlu0 %450  ;;  %v6317_v54 = vpop.permute.xlu1 %705 }
 0x1d9   :  { %11770 = vst [vmem:[#allocation90_spill] sm:$0xff] %v6315_v26  ;;  %11771 = vst [vmem:[#allocation91_spill] sm:$0xff] %v6317_v54  ;;  %1109 = vrot.lane.b32.xlu1 %v6096_v53, %s5627_s19  ;;  %v5633_v26 = vmov 15  }
 0x1db   :  { %5004 = vrot.lane.b32.xlu0 %v11742_v4, %s5631_s21 }
 0x1dc   :  { %v6325_v55 = vpop.permute.xlu0 %620  ;;  %v6327_v42 = vpop.permute.xlu1 %867 }
 0x1dd   :  { %1111 = vrot.lane.b32.xlu1 %v6118_v24, %s5627_s19  ;;  %11772 = vst [vmem:[#allocation92_spill] sm:$0xff] %v6325_v55  ;;  %11773 = vst [vmem:[#allocation93_spill] sm:$0xff] %v6327_v42 }
 0x1df   :  { %1267 = vrot.lane.b32.xlu0 %v6062_v50, %s5631_s21 }
 0x1e0   :  { %v6334_v54 = vpop.permute.xlu0 %786  ;;  %v6336_v25 = vpop.permute.xlu1 %363 }
 0x1e1   :  { %1184 = vrot.lane.b32.xlu1 %v6038_v49, %s5628_s20  ;;  %11774 = vst [vmem:[#allocation94_spill] sm:$0xff] %v6334_v54  ;;  %11775 = vst [vmem:[#allocation95_spill] sm:$0xff] %v6336_v25 }
 0x1e3   :  { %1535 = vperm.xlu0 %5002, %v5798_v21  }
 0x1e4   :  { %v6343_v42 = vpop.permute.xlu0 %948  ;;  %v6345_v55 = vpop.permute.xlu1 %452 }
 0x1e5   :  { %4997 = vrot.lane.b32.xlu1 %v11742_v4, %s5631_s21  ;;  %11776 = vst [vmem:[#allocation96_spill] sm:$0xff] %v6343_v42  ;;  %11777 = vst [vmem:[#allocation97_spill] sm:$0xff] %v6345_v55 }
 0x1e7   :  { %5010 = vset.pattern.permute.xlu0 %v5633_v26 }
 0x1e8   :  { %1612 = vperm.xlu0 %5010, %v5765_v15   ;;  %v6353_v54 = vpop.permute.xlu0 %537  ;;  %v6355_v25 = vpop.permute.xlu1 %622 }
 0x1e9   :  { %1255 = vrot.lane.b32.xlu1 %v5934_v13, %s5631_s21  ;;  %11778 = vst [vmem:[#allocation98_spill] sm:$0xff] %v6353_v54  ;;  %11779 = vst [vmem:[#allocation99_spill] sm:$0xff] %v6355_v25 }
 0x1ec   :  { %1396 = vrot.lane.b32.xlu0 %v5901_v63, %s5634_s23  ;;  %v6361_v42 = vpop.permute.xlu0 %707  ;;  %v6363_v55 = vpop.permute.xlu1 %788 }
 0x1ed   :  { %1261 = vrot.lane.b32.xlu1 %v6002_v47, %s5631_s21  ;;  %11780 = vst [vmem:[#allocation100_spill] sm:$0xff] %v6361_v42  ;;  %11781 = vst [vmem:[#allocation101_spill] sm:$0xff] %v6363_v55 }
 0x1f0   :  { %5012 = vrot.lane.b32.xlu0 %v11742_v4, %s5634_s23  ;;  %v6371_v25 = vpop.permute.xlu0 %869  ;;  %v6373_v54 = vpop.permute.xlu1 %950 }
 0x1f1   :  { %1454 = vperm.xlu1 %4988, %v5798_v21   ;;  %11782 = vst [vmem:[#allocation102_spill] sm:$0xff] %v6371_v25  ;;  %11783 = vst [vmem:[#allocation103_spill] sm:$0xff] %v6373_v54 }
 0x1f4   :  { %1404 = vrot.lane.b32.xlu0 %v6002_v47, %s5634_s23 }
 0x1f5   :  { %5001 = vset.pattern.permute.xlu1 %v5632_v14 }
 0x1f6   :  { %1527 = vperm.xlu1 %5001, %v5783_v19  }
 0x1f8   :  { %1616 = vperm.xlu0 %5010, %v5798_v21  }
 0x1fa   :  { %1190 = vrot.lane.b32.xlu1 %v6096_v53, %s5628_s20 }
 0x1fb   :  { %5008 = vset.pattern.permute.xlu1 %v11768_v36 }
 0x1fc   :  { %5019 = vrot.lane.b32.xlu0 %v11742_v4, %s5634_s23 }
 0x1fe   :  { %1192 = vrot.lane.b32.xlu1 %v6118_v24, %s5628_s20 }
 0x200   :  { %1479 = vrot.lane.b32.xlu0 %v5934_v13, %s11308_s24 }
 0x201   :  { %v6379_v55 = vpop.permute.xlu1 %1139  ;;  %v6381_v42 = vpop.permute.xlu0 %1143 }
 0x202   :  { %11784 = vst [vmem:[#allocation104_spill] sm:$0xff] %v6379_v55  ;;  %11785 = vst [vmem:[#allocation105_spill] sm:$0xff] %v6381_v42  ;;  %1265 = vrot.lane.b32.xlu1 %v6038_v49, %s5631_s21  ;;  %v5636_v42 = vmov 16  }
 0x204   :  { %1483 = vrot.lane.b32.xlu0 %v5970_v41, %s11308_s24 }
 0x206   :  { %1458 = vperm.xlu1 %5008, %v5778_v18   ;;  %v6388_v36 = vpop.permute.xlu1 %1070  ;;  %v6390_v54 = vpop.permute.xlu0 %1220 }
 0x207   :  { %11786 = vst [vmem:[#allocation106_spill] sm:$0xff] %v6388_v36  ;;  %11787 = vst [vmem:[#allocation107_spill] sm:$0xff] %v6390_v54 }
 0x208   :  { %1620 = vperm.xlu0 %5010, %v5778_v18  }
 0x20a   :  { %5009 = vset.pattern.permute.xlu1 %v5633_v26  ;;  %v6393_v25 = vpop.permute.xlu0 %1228 }
 0x20b   :  { %11788 = vst [vmem:[#allocation108_spill] sm:$0xff] %v6393_v25  ;;  %1608 = vperm.xlu1 %5009, %v5783_v19   ;;  %v6396_v55 = vpop.permute.xlu1 %1147 }
 0x20c   :  { %11789 = vst [vmem:[#allocation109_spill] sm:$0xff] %v6396_v55  ;;  %5028 = vset.pattern.permute.xlu0 %v5636_v42 }
 0x20d   :  { %1693 = vperm.xlu0 %5028, %v5765_v15  }
 0x20f   :  { %v6399_v9 = vpop.permute.xlu0 %1305  ;;  %1271 = vrot.lane.b32.xlu1 %v6096_v53, %s5631_s21 }
 0x210   :  { %11790 = vst [vmem:[#allocation110_spill] sm:$0xff] %v6399_v9  ;;  %v6403_v36 = vpop.permute.xlu1 %1224  ;;  %5016 = vset.pattern.permute.xlu1 %v5632_v14 }
 0x211   :  { %11791 = vst [vmem:[#allocation111_spill] sm:$0xff] %v6403_v36  ;;  %1489 = vrot.lane.b32.xlu0 %v6038_v49, %s11308_s24 }
 0x213   :  { %v6407_v26 = vpop.permute.xlu0 %4972  ;;  %1273 = vrot.lane.b32.xlu1 %v6118_v24, %s5631_s21 }
 0x214   :  { %11792 = vst [vmem:[#allocation112_spill] sm:$0xff] %v6407_v26 }
 0x215   :  { %5031 = vrot.lane.b32.xlu0 %v11742_v4, %s11308_s24  ;;  %v6413_v25 = vpop.permute.xlu1 %1151 }
 0x216   :  { %11793 = vst [vmem:[#allocation113_spill] sm:$0xff] %v6413_v25 }
 0x217   :  { %v6415_v9 = vpop.permute.xlu0 %1093  ;;  %1398 = vrot.lane.b32.xlu1 %v5934_v13, %s5634_s23 }
 0x218   :  { %11794 = vst [vmem:[#allocation114_spill] sm:$0xff] %v6415_v9 }
 0x219   :  { %1560 = vrot.lane.b32.xlu0 %v5934_v13, %s11301_s25 }
 0x21a   :  { %v6421_v14 = vpop.permute.xlu1 %1301 }
 0x21b   :  { %11795 = vst [vmem:[#allocation115_spill] sm:$0xff] %v6421_v14  ;;  %v6423_v54 = vpop.permute.xlu0 %1099  ;;  %1402 = vrot.lane.b32.xlu1 %v5970_v41, %s5634_s23  ;;  %v5638_v14 = vmov 17  }
 0x21c   :  { %11796 = vst [vmem:[#allocation116_spill] sm:$0xff] %v6423_v54 }
 0x21d   :  { %1564 = vrot.lane.b32.xlu0 %v5970_v41, %s11301_s25 }
 0x21e   :  { %v6429_v25 = vpop.permute.xlu1 %1022 }
 0x21f   :  { %11797 = vst [vmem:[#allocation117_spill] sm:$0xff] %v6429_v25  ;;  %v6431_v55 = vpop.permute.xlu0 %1309  ;;  %1539 = vperm.xlu1 %5016, %v5778_v18  }
 0x220   :  { %11798 = vst [vmem:[#allocation118_spill] sm:$0xff] %v6431_v55 }
 0x221   :  { %1701 = vperm.xlu0 %5028, %v5778_v18  }
 0x222   :  { %v6435_v36 = vpop.permute.xlu1 %1024 }
 0x223   :  { %11799 = vst [vmem:[#allocation119_spill] sm:$0xff] %v6435_v36  ;;  %v6437_v9 = vpop.permute.xlu0 %4979  ;;  %5017 = vset.pattern.permute.xlu1 %v5636_v42 }
 0x224   :  { %11800 = vst [vmem:[#allocation120_spill] sm:$0xff] %v6437_v9  ;;  %1689 = vperm.xlu1 %5017, %v5783_v19   ;;  %v5640_v9 = vmov 18  }
 0x225   :  { %5040 = vset.pattern.permute.xlu0 %v5638_v14 }
 0x226   :  { %1774 = vperm.xlu0 %5040, %v5765_v15   ;;  %v6441_v54 = vpop.permute.xlu1 %1091 }
 0x227   :  { %11801 = vst [vmem:[#allocation121_spill] sm:$0xff] %v6441_v54  ;;  %v6443_v25 = vpop.permute.xlu0 %1105 }
 0x228   :  { %11802 = vst [vmem:[#allocation122_spill] sm:$0xff] %v6443_v25  ;;  %1408 = vrot.lane.b32.xlu1 %v6038_v49, %s5634_s23 }
 0x22a   :  { %1570 = vrot.lane.b32.xlu0 %v6038_v49, %s11301_s25  ;;  %v6449_v18 = vpop.permute.xlu1 %1097 }
 0x22b   :  { %11803 = vst [vmem:[#allocation123_spill] sm:$0xff] %v6449_v18  ;;  %v6451_v55 = vpop.permute.xlu0 %1172 }
 0x22c   :  { %11804 = vst [vmem:[#allocation124_spill] sm:$0xff] %v6451_v55  ;;  %1410 = vrot.lane.b32.xlu1 %v6062_v50, %s5634_s23 }
 0x22e   :  { %5043 = vrot.lane.b32.xlu0 %v11742_v4, %s11301_s25  ;;  %v6457_v15 = vpop.permute.xlu1 %1232 }
 0x22f   :  { %11805 = vst [vmem:[#allocation125_spill] sm:$0xff] %v6457_v15  ;;  %v6459_v19 = vpop.permute.xlu0 %1178 }
 0x230   :  { %11806 = vst [vmem:[#allocation126_spill] sm:$0xff] %v6459_v19  ;;  %1477 = vrot.lane.b32.xlu1 %v5901_v63, %s11308_s24  ;;  %v6482_v19 = vld [vmem:[%s11148_s3 + $0x18] sm:$0xff] }
 0x231   :  { %11811 = vst [vmem:[#allocation131_spill] sm:$0xff] %v6482_v19 }
 0x232   :  { %1641 = vrot.lane.b32.xlu0 %v5934_v13, %s11290_s26 }
 0x233   :  { %v6465_v42 = vpop.permute.xlu1 %1341  ;;  %v6467_v55 = vpop.permute.xlu0 %1313 }
 0x234   :  { %11807 = vst [vmem:[#allocation127_spill] sm:$0xff] %v6465_v42  ;;  %11808 = vst [vmem:[#allocation128_spill] sm:$0xff] %v6467_v55  ;;  %5024 = vrot.lane.b32.xlu1 %v11742_v4, %s11308_s24 }
 0x236   :  { %1645 = vrot.lane.b32.xlu0 %v5970_v41, %s11290_s26 }
 0x237   :  { %v6473_v15 = vpop.permute.xlu1 %1028 }
 0x238   :  { %11809 = vst [vmem:[#allocation129_spill] sm:$0xff] %v6473_v15  ;;  %1485 = vrot.lane.b32.xlu1 %v6002_v47, %s11308_s24  ;;  %v6477_v25 = vpop.permute.xlu0 %1450  ;;  %v6493_v15 = vld [vmem:[%s11148_s3 + $0x8] sm:$0xff] }
 0x239   :  { %11810 = vst [vmem:[#allocation130_spill] sm:$0xff] %v6477_v25 }
 0x23a   :  { %1782 = vperm.xlu0 %5040, %v6482_v19  }
 0x23b   :  { %v6485_v55 = vpop.permute.xlu1 %1030 }
 0x23c   :  { %11812 = vst [vmem:[#allocation132_spill] sm:$0xff] %v6485_v55  ;;  %1697 = vperm.xlu1 %5017, %v5798_v21   ;;  %v6503_v21 = vld [vmem:[%s11148_s3] sm:$0xff] }
 0x23d   :  { %v6488_v42 = vpop.permute.xlu0 %1345 }
 0x23e   :  { %11813 = vst [vmem:[#allocation133_spill] sm:$0xff] %v6488_v42  ;;  %5052 = vset.pattern.permute.xlu0 %v5640_v9 }
 0x23f   :  { %1855 = vperm.xlu0 %5052, %v6493_v15   ;;  %v6496_v25 = vpop.permute.xlu1 %1103 }
 0x240   :  { %11814 = vst [vmem:[#allocation134_spill] sm:$0xff] %v6496_v25  ;;  %5029 = vset.pattern.permute.xlu1 %v5638_v14 }
 0x241   :  { %v6498_v54 = vpop.permute.xlu0 %4992  ;;  %1770 = vperm.xlu1 %5029, %v6503_v21  }
 0x242   :  { %11815 = vst [vmem:[#allocation135_spill] sm:$0xff] %v6498_v54 }
 0x243   :  { %1651 = vrot.lane.b32.xlu0 %v6038_v49, %s11290_s26  ;;  %v6508_v42 = vpop.permute.xlu1 %4984 }
 0x244   :  { %11816 = vst [vmem:[#allocation136_spill] sm:$0xff] %v6508_v42 }
 0x245   :  { %v6510_v55 = vpop.permute.xlu0 %1186  ;;  %1414 = vrot.lane.b32.xlu1 %v6096_v53, %s5634_s23 }
 0x246   :  { %11817 = vst [vmem:[#allocation137_spill] sm:$0xff] %v6510_v55 }
 0x247   :  { %5055 = vrot.lane.b32.xlu0 %v11742_v4, %s11290_s26  ;;  %v6516_v14 = vpop.permute.xlu1 %1174 }
 0x248   :  { %11818 = vst [vmem:[#allocation138_spill] sm:$0xff] %v6516_v14 }
 0x249   :  { %v6518_v54 = vpop.permute.xlu0 %1253  ;;  %1416 = vrot.lane.b32.xlu1 %v6118_v24, %s5634_s23 }
 0x24a   :  { %11819 = vst [vmem:[#allocation139_spill] sm:$0xff] %v6518_v54 }
 0x24b   :  { %1722 = vrot.lane.b32.xlu0 %v5934_v13, %s11306_s30  ;;  %v6524_v25 = vpop.permute.xlu1 %1180 }
 0x24c   :  { %11820 = vst [vmem:[#allocation140_spill] sm:$0xff] %v6524_v25  ;;  %v5642_v25 = vmov 19  }
 0x24d   :  { %v6526_v55 = vpop.permute.xlu0 %1259  ;;  %1491 = vrot.lane.b32.xlu1 %v6062_v50, %s11308_s24 }
 0x24e   :  { %11821 = vst [vmem:[#allocation141_spill] sm:$0xff] %v6526_v55 }
 0x24f   :  { %1726 = vrot.lane.b32.xlu0 %v5970_v41, %s11306_s30  ;;  %v6532_v14 = vpop.permute.xlu1 %1349 }
 0x250   :  { %11822 = vst [vmem:[#allocation142_spill] sm:$0xff] %v6532_v14 }
 0x251   :  { %v6534_v54 = vpop.permute.xlu0 %1353  ;;  %1558 = vrot.lane.b32.xlu1 %v5901_v63, %s11301_s25 }
 0x252   :  { %11823 = vst [vmem:[#allocation143_spill] sm:$0xff] %v6534_v54 }
 0x253   :  { %1863 = vperm.xlu0 %5052, %v6482_v19  }
 0x254   :  { %v6539_v42 = vpop.permute.xlu1 %1446 }
 0x255   :  { %11824 = vst [vmem:[#allocation144_spill] sm:$0xff] %v6539_v42  ;;  %5036 = vrot.lane.b32.xlu1 %v11742_v4, %s11301_s25 }
 0x256   :  { %v6543_v55 = vpop.permute.xlu0 %1531 }
 0x257   :  { %11825 = vst [vmem:[#allocation145_spill] sm:$0xff] %v6543_v55  ;;  %5064 = vset.pattern.permute.xlu0 %v5642_v25  ;;  %v6559_v55 = vld [vmem:[%s11148_s3 + $0x10] sm:$0xff]  ;;  %s11521_s3 = smov 110  }
 0x258   :  { %1936 = vperm.xlu0 %5064, %v6493_v15   ;;  %v6546_v36 = vpop.permute.xlu1 %1109 }
 0x259   :  { %11826 = vst [vmem:[#allocation146_spill] sm:$0xff] %v6546_v36  ;;  %1566 = vrot.lane.b32.xlu1 %v6002_v47, %s11301_s25 }
 0x25a   :  { %v6550_v54 = vpop.permute.xlu0 %5004 }
 0x25b   :  { %11827 = vst [vmem:[#allocation147_spill] sm:$0xff] %v6550_v54 }
 0x25c   :  { %1801 = vrot.lane.b32.xlu0 %v5901_v63, %s5643_s12  ;;  %v6554_v42 = vpop.permute.xlu1 %1111 }
 0x25d   :  { %11828 = vst [vmem:[#allocation148_spill] sm:$0xff] %v6554_v42  ;;  %1778 = vperm.xlu1 %5029, %v6559_v55  }
 0x25e   :  { %v6562_v14 = vpop.permute.xlu0 %1267 }
 0x25f   :  { %11829 = vst [vmem:[#allocation149_spill] sm:$0xff] %v6562_v14 }
 0x260   :  { %5067 = vrot.lane.b32.xlu0 %v11742_v4, %s5643_s12  ;;  %v6566_v36 = vpop.permute.xlu1 %1184 }
 0x261   :  { %11830 = vst [vmem:[#allocation150_spill] sm:$0xff] %v6566_v36  ;;  %5041 = vset.pattern.permute.xlu1 %v5640_v9 }
 0x262   :  { %1851 = vperm.xlu1 %5041, %v6503_v21   ;;  %v6569_v54 = vpop.permute.xlu0 %1535 }
 0x263   :  { %11831 = vst [vmem:[#allocation151_spill] sm:$0xff] %v6569_v54 }
 0x264   :  { %1809 = vrot.lane.b32.xlu0 %v6002_v47, %s5643_s12  ;;  %v6573_v42 = vpop.permute.xlu1 %4997 }
 0x265   :  { %11832 = vst [vmem:[#allocation152_spill] sm:$0xff] %v6573_v42 }
 0x266   :  { %1495 = vrot.lane.b32.xlu1 %v6096_v53, %s11308_s24 }
 0x267   :  { %v6577_v18 = vpop.permute.xlu0 %1612 }
 0x268   :  { %11833 = vst [vmem:[#allocation153_spill] sm:$0xff] %v6577_v18  ;;  %1734 = vrot.lane.b32.xlu0 %v6062_v50, %s11306_s30  ;;  %v6581_v14 = vpop.permute.xlu1 %1255  ;;  %v5644_v18 = vmov 20  }
 0x269   :  { %11834 = vst [vmem:[#allocation154_spill] sm:$0xff] %v6581_v14 }
 0x26a   :  { %1497 = vrot.lane.b32.xlu1 %v6118_v24, %s11308_s24  ;;  %s11513_s24 = smov 94  }
 0x26b   :  { %v6585_v9 = vpop.permute.xlu0 %1396 }
 0x26c   :  { %11835 = vst [vmem:[#allocation155_spill] sm:$0xff] %v6585_v9  ;;  %1944 = vperm.xlu0 %5064, %v6482_v19   ;;  %v6588_v54 = vpop.permute.xlu1 %1261 }
 0x26d   :  { %11836 = vst [vmem:[#allocation156_spill] sm:$0xff] %v6588_v54 }
 0x26e   :  { %1572 = vrot.lane.b32.xlu1 %v6062_v50, %s11301_s25 }
 0x26f   :  { %v6592_v36 = vpop.permute.xlu0 %5012 }
 0x270   :  { %11837 = vst [vmem:[#allocation157_spill] sm:$0xff] %v6592_v36  ;;  %5076 = vset.pattern.permute.xlu0 %v5644_v18  ;;  %v6594_v42 = vpop.permute.xlu1 %1454 }
 0x271   :  { %11838 = vst [vmem:[#allocation158_spill] sm:$0xff] %v6594_v42  ;;  %2017 = vperm.xlu0 %5076, %v6493_v15  }
 0x272   :  { %1639 = vrot.lane.b32.xlu1 %v5901_v63, %s11290_s26 }
 0x273   :  { %v6599_v14 = vpop.permute.xlu0 %1404 }
 0x274   :  { %11839 = vst [vmem:[#allocation159_spill] sm:$0xff] %v6599_v14 }
 0x275   :  { %5079 = vrot.lane.b32.xlu0 %v11742_v4, %s5643_s12  ;;  %v6603_v9 = vpop.permute.xlu1 %1527 }
 0x276   :  { %11840 = vst [vmem:[#allocation160_spill] sm:$0xff] %v6603_v9  ;;  %5048 = vrot.lane.b32.xlu1 %v11742_v4, %s11290_s26 }
 0x277   :  { %v6607_v36 = vpop.permute.xlu0 %1616 }
 0x278   :  { %11841 = vst [vmem:[#allocation161_spill] sm:$0xff] %v6607_v36 }
 0x279   :  { %1884 = vrot.lane.b32.xlu0 %v5934_v13, %s11521_s3  ;;  %v6611_v42 = vpop.permute.xlu1 %1190 }
 0x27a   :  { %11842 = vst [vmem:[#allocation162_spill] sm:$0xff] %v6611_v42  ;;  %1647 = vrot.lane.b32.xlu1 %v6002_v47, %s11290_s26 }
 0x27b   :  { %v6615_v14 = vpop.permute.xlu0 %5019 }
 0x27c   :  { %11843 = vst [vmem:[#allocation163_spill] sm:$0xff] %v6615_v14 }
 0x27d   :  { %1888 = vrot.lane.b32.xlu0 %v5970_v41, %s11521_s3  ;;  %v6619_v9 = vpop.permute.xlu1 %1192 }
 0x27e   :  { %11844 = vst [vmem:[#allocation164_spill] sm:$0xff] %v6619_v9  ;;  %1859 = vperm.xlu1 %5041, %v6559_v55  }
 0x27f   :  { %v6622_v54 = vpop.permute.xlu0 %1479 }
 0x280   :  { %11845 = vst [vmem:[#allocation165_spill] sm:$0xff] %v6622_v54  ;;  %v11269_v54 = vmov 21  }
 0x281   :  { %1738 = vrot.lane.b32.xlu0 %v6096_v53, %s11306_s30  ;;  %v6626_v36 = vpop.permute.xlu1 %1265 }
 0x282   :  { %11846 = vst [vmem:[#allocation166_spill] sm:$0xff] %v6626_v36  ;;  %5053 = vset.pattern.permute.xlu1 %v5642_v25 }
 0x283   :  { %v6628_v42 = vpop.permute.xlu0 %1483  ;;  %1932 = vperm.xlu1 %5053, %v6503_v21  }
 0x284   :  { %11847 = vst [vmem:[#allocation167_spill] sm:$0xff] %v6628_v42 }
 0x285   :  { %2025 = vperm.xlu0 %5076, %v6482_v19   ;;  %v6632_v14 = vpop.permute.xlu1 %1458 }
 0x286   :  { %11848 = vst [vmem:[#allocation168_spill] sm:$0xff] %v6632_v14 }
 0x287   :  { %1576 = vrot.lane.b32.xlu1 %v6096_v53, %s11301_s25  ;;  %v6636_v9 = vpop.permute.xlu0 %1620 }
 0x288   :  { %11849 = vst [vmem:[#allocation169_spill] sm:$0xff] %v6636_v9 }
 0x289   :  { %5088 = vset.pattern.permute.xlu0 %v11269_v54 }
 0x28a   :  { %2098 = vperm.xlu0 %5088, %v6493_v15   ;;  %v6640_v36 = vpop.permute.xlu1 %1608 }
 0x28b   :  { %11850 = vst [vmem:[#allocation170_spill] sm:$0xff] %v6640_v36  ;;  %1578 = vrot.lane.b32.xlu1 %v6118_v24, %s11301_s25  ;;  %s11515_s25 = smov 95  }
 0x28c   :  { %v6644_v25 = vpop.permute.xlu0 %1693 }
 0x28d   :  { %11851 = vst [vmem:[#allocation171_spill] sm:$0xff] %v6644_v25 }
 0x28e   :  { %1894 = vrot.lane.b32.xlu0 %v6038_v49, %s11521_s3  ;;  %v6648_v14 = vpop.permute.xlu1 %1271 }
 0x28f   :  { %11852 = vst [vmem:[#allocation172_spill] sm:$0xff] %v6648_v14  ;;  %1653 = vrot.lane.b32.xlu1 %v6062_v50, %s11290_s26  ;;  %v11278_v14 = vmov 22  }
 0x290   :  { %v6652_v9 = vpop.permute.xlu0 %1489 }
 0x291   :  { %11853 = vst [vmem:[#allocation173_spill] sm:$0xff] %v6652_v9 }
 0x292   :  { %5091 = vrot.lane.b32.xlu0 %v11742_v4, %s11521_s3  ;;  %v6656_v54 = vpop.permute.xlu1 %1273 }
 0x293   :  { %11854 = vst [vmem:[#allocation174_spill] sm:$0xff] %v6656_v54  ;;  %1720 = vrot.lane.b32.xlu1 %v5901_v63, %s11306_s30 }
 0x294   :  { %v6660_v36 = vpop.permute.xlu0 %5031 }
 0x295   :  { %11855 = vst [vmem:[#allocation175_spill] sm:$0xff] %v6660_v36 }
 0x296   :  { %1965 = vrot.lane.b32.xlu0 %v5934_v13, %s11519_s27  ;;  %v6664_v25 = vpop.permute.xlu1 %1398 }
 0x297   :  { %11856 = vst [vmem:[#allocation176_spill] sm:$0xff] %v6664_v25  ;;  %5060 = vrot.lane.b32.xlu1 %v11742_v4, %s11306_s30 }
 0x298   :  { %v6668_v9 = vpop.permute.xlu0 %1560 }
 0x299   :  { %11857 = vst [vmem:[#allocation177_spill] sm:$0xff] %v6668_v9 }
 0x29a   :  { %1969 = vrot.lane.b32.xlu0 %v5970_v41, %s11519_s27  ;;  %v6672_v42 = vpop.permute.xlu1 %1402 }
 0x29b   :  { %11858 = vst [vmem:[#allocation178_spill] sm:$0xff] %v6672_v42  ;;  %1728 = vrot.lane.b32.xlu1 %v6002_v47, %s11306_s30 }
 0x29c   :  { %v6676_v36 = vpop.permute.xlu0 %1564 }
 0x29d   :  { %11859 = vst [vmem:[#allocation179_spill] sm:$0xff] %v6676_v36 }
 0x29e   :  { %2106 = vperm.xlu0 %5088, %v6482_v19   ;;  %v6679_v54 = vpop.permute.xlu1 %1539 }
 0x29f   :  { %11860 = vst [vmem:[#allocation180_spill] sm:$0xff] %v6679_v54  ;;  %1940 = vperm.xlu1 %5053, %v6559_v55  }
 0x2a0   :  { %v6682_v25 = vpop.permute.xlu0 %1701 }
 0x2a1   :  { %11861 = vst [vmem:[#allocation181_spill] sm:$0xff] %v6682_v25 }
 0x2a2   :  { %5100 = vset.pattern.permute.xlu0 %v11278_v14 }
 0x2a3   :  { %2179 = vperm.xlu0 %5100, %v6493_v15   ;;  %5065 = vset.pattern.permute.xlu1 %v5644_v18  ;;  %v6686_v9 = vpop.permute.xlu1 %1689 }
 0x2a4   :  { %11862 = vst [vmem:[#allocation182_spill] sm:$0xff] %v6686_v9  ;;  %2013 = vperm.xlu1 %5065, %v6503_v21  }
 0x2a5   :  { %v6689_v42 = vpop.permute.xlu0 %1774 }
 0x2a6   :  { %11863 = vst [vmem:[#allocation183_spill] sm:$0xff] %v6689_v42 }
 0x2a7   :  { %1975 = vrot.lane.b32.xlu0 %v6038_v49, %s11519_s27  ;;  %v6693_v54 = vpop.permute.xlu1 %1408 }
 0x2a8   :  { %11864 = vst [vmem:[#allocation184_spill] sm:$0xff] %v6693_v54  ;;  %1657 = vrot.lane.b32.xlu1 %v6096_v53, %s11290_s26 }
 0x2a9   :  { %v6697_v25 = vpop.permute.xlu0 %1570 }
 0x2aa   :  { %11865 = vst [vmem:[#allocation185_spill] sm:$0xff] %v6697_v25 }
 0x2ab   :  { %5103 = vrot.lane.b32.xlu0 %v11742_v4, %s11519_s27  ;;  %v6701_v18 = vpop.permute.xlu1 %1410 }
 0x2ac   :  { %11866 = vst [vmem:[#allocation186_spill] sm:$0xff] %v6701_v18  ;;  %1659 = vrot.lane.b32.xlu1 %v6118_v24, %s11290_s26  ;;  %v11289_v18 = vmov 23   ;;  %s11517_s26 = smov 96  }
 0x2ad   :  { %v6705_v14 = vpop.permute.xlu0 %5043 }
 0x2ae   :  { %11867 = vst [vmem:[#allocation187_spill] sm:$0xff] %v6705_v14 }
 0x2af   :  { %2046 = vrot.lane.b32.xlu0 %v5934_v13, %s11399_s28  ;;  %v6709_v42 = vpop.permute.xlu1 %1477 }
 0x2b0   :  { %11868 = vst [vmem:[#allocation188_spill] sm:$0xff] %v6709_v42  ;;  %1803 = vrot.lane.b32.xlu1 %v5934_v13, %s5643_s12 }
 0x2b1   :  { %v6713_v9 = vpop.permute.xlu0 %1641 }
 0x2b2   :  { %11869 = vst [vmem:[#allocation189_spill] sm:$0xff] %v6713_v9  ;;  %v11286_v9 = vmov 24  }
 0x2b3   :  { %2050 = vrot.lane.b32.xlu0 %v5970_v41, %s11399_s28  ;;  %v6717_v25 = vpop.permute.xlu1 %5024 }
 0x2b4   :  { %11870 = vst [vmem:[#allocation190_spill] sm:$0xff] %v6717_v25  ;;  %1807 = vrot.lane.b32.xlu1 %v5970_v41, %s5643_s12 }
 0x2b5   :  { %v6721_v36 = vpop.permute.xlu0 %1645 }
 0x2b6   :  { %11871 = vst [vmem:[#allocation191_spill] sm:$0xff] %v6721_v36 }
 0x2b7   :  { %2187 = vperm.xlu0 %5100, %v6482_v19   ;;  %v6724_v14 = vpop.permute.xlu1 %1485 }
 0x2b8   :  { %11872 = vst [vmem:[#allocation192_spill] sm:$0xff] %v6724_v14  ;;  %1732 = vrot.lane.b32.xlu1 %v6038_v49, %s11306_s30 }
 0x2b9   :  { %v6728_v42 = vpop.permute.xlu0 %1782 }
 0x2ba   :  { %11873 = vst [vmem:[#allocation193_spill] sm:$0xff] %v6728_v42 }
 0x2bb   :  { %5113 = vset.pattern.permute.xlu0 %v11286_v9  ;;  %v6731_v54 = vpop.permute.xlu1 %1697  ;;  %v11878_v9 = vmov 21  }
 0x2bc   :  { %11874 = vst [vmem:[#allocation194_spill] sm:$0xff] %v6731_v54  ;;  %2341 = vperm.xlu0 %5113, %v6493_v15   ;;  %5072 = vrot.lane.b32.xlu1 %v11742_v4, %s11306_s30 }
 0x2be   :  { %v6736_v36 = vpop.permute.xlu0 %1855 }
 0x2bf   :  { %11875 = vst [vmem:[#allocation195_spill] sm:$0xff] %v6736_v36 }
 0x2c0   :  { %5114 = vset.pattern.permute.xlu0 %v11289_v18  ;;  %2021 = vperm.xlu1 %5065, %v6559_v55   ;;  %v6740_v14 = vpop.permute.xlu1 %1770 }
 0x2c1   :  { %11876 = vst [vmem:[#allocation196_spill] sm:$0xff] %v6740_v14  ;;  %2260 = vperm.xlu0 %5114, %v6493_v15  }
 0x2c2   :  { %v6743_v42 = vpop.permute.xlu0 %1651 }
 0x2c3   :  { %11877 = vst [vmem:[#allocation197_spill] sm:$0xff] %v6743_v42 }
 0x2c4   :  { %5077 = vset.pattern.permute.xlu1 %v11878_v9  ;;  %v6746_v54 = vpop.permute.xlu1 %1414 }
 0x2c5   :  { %11879 = vst [vmem:[#allocation198_spill] sm:$0xff] %v6746_v54  ;;  %2056 = vrot.lane.b32.xlu0 %v6038_v49, %s11399_s28  ;;  %2094 = vperm.xlu1 %5077, %v6503_v21  }
 0x2c6   :  { %v6751_v36 = vpop.permute.xlu0 %5055 }
 0x2c7   :  { %11880 = vst [vmem:[#allocation199_spill] sm:$0xff] %v6751_v36 }
 0x2c8   :  { %v6753_v18 = vpop.permute.xlu1 %1416 }
 0x2c9   :  { %11881 = vst [vmem:[#allocation200_spill] sm:$0xff] %v6753_v18  ;;  %5116 = vrot.lane.b32.xlu0 %v11742_v4, %s11399_s28  ;;  %1813 = vrot.lane.b32.xlu1 %v6038_v49, %s5643_s12 }
 0x2ca   :  { %v6759_v15 = vpop.permute.xlu0 %1722 }
 0x2cb   :  { %11882 = vst [vmem:[#allocation201_spill] sm:$0xff] %v6759_v15 }
 0x2cc   :  { %v6761_v9 = vpop.permute.xlu1 %1491 }
 0x2cd   :  { %11883 = vst [vmem:[#allocation202_spill] sm:$0xff] %v6761_v9  ;;  %2127 = vrot.lane.b32.xlu0 %v5934_v13, %s11517_s26  ;;  %1815 = vrot.lane.b32.xlu1 %v6062_v50, %s5643_s12 }
 0x2ce   :  { %v6767_v14 = vpop.permute.xlu0 %1726 }
 0x2cf   :  { %11884 = vst [vmem:[#allocation203_spill] sm:$0xff] %v6767_v14 }
 0x2d0   :  { %v6769_v42 = vpop.permute.xlu1 %1558 }
 0x2d1   :  { %11885 = vst [vmem:[#allocation204_spill] sm:$0xff] %v6769_v42  ;;  %2131 = vrot.lane.b32.xlu0 %v5970_v41, %s11517_s26  ;;  %1882 = vrot.lane.b32.xlu1 %v5901_v63, %s11521_s3  ;;  %v11890_v42 = vmov 0  }
 0x2d2   :  { %v6775_v15 = vpop.permute.xlu0 %1863 }
 0x2d3   :  { %11886 = vst [vmem:[#allocation205_spill] sm:$0xff] %v6775_v15 }
 0x2d4   :  { %v6777_v9 = vpop.permute.xlu1 %5036 }
 0x2d5   :  { %11887 = vst [vmem:[#allocation206_spill] sm:$0xff] %v6777_v9  ;;  %2268 = vperm.xlu0 %5114, %v6482_v19   ;;  %5084 = vrot.lane.b32.xlu1 %v11742_v4, %s11521_s3 }
 0x2d7   :  { %v6782_v36 = vpop.permute.xlu0 %1936 }
 0x2d8   :  { %11888 = vst [vmem:[#allocation207_spill] sm:$0xff] %v6782_v36  ;;  %v6784_v14 = vpop.permute.xlu1 %1566 }
 0x2d9   :  { %11889 = vst [vmem:[#allocation208_spill] sm:$0xff] %v6784_v14  ;;  %5125 = vset.pattern.permute.xlu0 %v11890_v42  ;;  %1890 = vrot.lane.b32.xlu1 %v6002_v47, %s11521_s3  ;;  %v4929_v42 = vunpack.i.l.bf16 %v6008_v8 }
 0x2da   :  { %392 = vperm.xlu0 %5125, %v6503_v21  }
 0x2db   :  { %v6790_v54 = vpop.permute.xlu0 %1801 }
 0x2dc   :  { %11891 = vst [vmem:[#allocation209_spill] sm:$0xff] %v6790_v54  ;;  %v6792_v15 = vpop.permute.xlu1 %1778  ;;  %v11897_v54 = vmov 22  }
 0x2dd   :  { %11892 = vst [vmem:[#allocation210_spill] sm:$0xff] %v6792_v15  ;;  %1740 = vrot.lane.b32.xlu1 %v6118_v24, %s11306_s30  ;;  %s12401_s30 = smov 126  }
 0x2de   :  { %402 = vperm.xlu0 %5125, %v6559_v55  }
 0x2df   :  { %v6797_v9 = vpop.permute.xlu0 %5067 }
 0x2e0   :  { %11893 = vst [vmem:[#allocation211_spill] sm:$0xff] %v6797_v9 }
 0x2e1   :  { %v6799_v36 = vpop.permute.xlu1 %1851  ;;  %2102 = vperm.xlu1 %5077, %v6559_v55  }
 0x2e2   :  { %11894 = vst [vmem:[#allocation212_spill] sm:$0xff] %v6799_v36  ;;  %2064 = vrot.lane.b32.xlu0 %v6118_v24, %s11399_s28 }
 0x2e3   :  { %v6806_v18 = vpop.permute.xlu0 %1809 }
 0x2e4   :  { %11896 = vst [vmem:[#allocation214_spill] sm:$0xff] %v6806_v18 }
 0x2e5   :  { %v6804_v14 = vpop.permute.xlu1 %1495  ;;  %5089 = vset.pattern.permute.xlu1 %v11897_v54 }
 0x2e6   :  { %11895 = vst [vmem:[#allocation213_spill] sm:$0xff] %v6804_v14  ;;  %2208 = vrot.lane.b32.xlu0 %v5934_v13, %s11515_s25  ;;  %2175 = vperm.xlu1 %5089, %v6503_v21  }
 0x2e7   :  { %v6818_v36 = vpop.permute.xlu0 %1734 }
 0x2e8   :  { %11899 = vst [vmem:[#allocation216_spill] sm:$0xff] %v6818_v36  ;;  %v59_v36 = vld [vmem:[%s11149_s4] sm:$0xff] }
 0x2e9   :  { %v6812_v15 = vpop.permute.xlu1 %1497 }
 0x2ea   :  { %11898 = vst [vmem:[#allocation215_spill] sm:$0xff] %v6812_v15  ;;  %2212 = vrot.lane.b32.xlu0 %v5970_v41, %s11515_s25  ;;  %1819 = vrot.lane.b32.xlu1 %v6096_v53, %s5643_s12 }
 0x2eb   :  { %v6828_v18 = vpop.permute.xlu0 %1944 }
 0x2ec   :  { %11902 = vst [vmem:[#allocation219_spill] sm:$0xff] %v6828_v18 }
 0x2ed   :  { %v6820_v14 = vpop.permute.xlu1 %1572 }
 0x2ee   :  { %11900 = vst [vmem:[#allocation217_spill] sm:$0xff] %v6820_v14  ;;  %2137 = vrot.lane.b32.xlu0 %v6038_v49, %s11517_s26  ;;  %1821 = vrot.lane.b32.xlu1 %v6118_v24, %s5643_s12 }
 0x2f0   :  { %v6841_v15 = vpop.permute.xlu0 %2017 }
 0x2f1   :  { %v6826_v54 = vpop.permute.xlu1 %1639  ;;  %11904 = vst [vmem:[#allocation221_spill] sm:$0xff] %v6841_v15 }
 0x2f2   :  { %11901 = vst [vmem:[#allocation218_spill] sm:$0xff] %v6826_v54  ;;  %5132 = vrot.lane.b32.xlu0 %v11742_v4, %s11517_s26  ;;  %1896 = vrot.lane.b32.xlu1 %v6062_v50, %s11521_s3 }
 0x2f4   :  { %v6851_v9 = vpop.permute.xlu0 %5079 }
 0x2f5   :  { %v6837_v14 = vpop.permute.xlu1 %5048  ;;  %11907 = vst [vmem:[#allocation224_spill] sm:$0xff] %v6851_v9  ;;  %v11911_v9 = vmov 23  }
 0x2f6   :  { %11903 = vst [vmem:[#allocation220_spill] sm:$0xff] %v6837_v14  ;;  %2370 = vperm.xlu0 %5125, %v59_v36   ;;  %1963 = vrot.lane.b32.xlu1 %v5901_v63, %s11519_s27 }
 0x2f8   :  { %v6862_v15 = vpop.permute.xlu0 %1884 }
 0x2f9   :  { %v6843_v54 = vpop.permute.xlu1 %1647  ;;  %11909 = vst [vmem:[#allocation226_spill] sm:$0xff] %v6862_v15 }
 0x2fa   :  { %11905 = vst [vmem:[#allocation222_spill] sm:$0xff] %v6843_v54  ;;  %2220 = vrot.lane.b32.xlu0 %v6062_v50, %s11515_s25  ;;  %5096 = vrot.lane.b32.xlu1 %v11742_v4, %s11519_s27 }
 0x2fc   :  { %v6870_v54 = vpop.permute.xlu0 %1888 }
 0x2fd   :  { %v6849_v18 = vpop.permute.xlu1 %1859  ;;  %11912 = vst [vmem:[#allocation228_spill] sm:$0xff] %v6870_v54 }
 0x2fe   :  { %11906 = vst [vmem:[#allocation223_spill] sm:$0xff] %v6849_v18  ;;  %2287 = vrot.lane.b32.xlu0 %v5901_v63, %s11513_s24  ;;  %1971 = vrot.lane.b32.xlu1 %v6002_v47, %s11519_s27 }
 0x300   :  { %v6882_v15 = vpop.permute.xlu0 %1738 }
 0x301   :  { %11915 = vst [vmem:[#allocation231_spill] sm:$0xff] %v6882_v15 }
 0x302   :  { %5143 = vrot.lane.b32.xlu0 %v11742_v4, %s11513_s24  ;;  %v6859_v36 = vpop.permute.xlu1 %1932  ;;  %2183 = vperm.xlu1 %5089, %v6559_v55  }
 0x303   :  { %11908 = vst [vmem:[#allocation225_spill] sm:$0xff] %v6859_v36 }
 0x304   :  { %v6892_v54 = vpop.permute.xlu0 %2025 }
 0x305   :  { %11917 = vst [vmem:[#allocation233_spill] sm:$0xff] %v6892_v54 }
 0x306   :  { %2295 = vrot.lane.b32.xlu0 %v6002_v47, %s11513_s24  ;;  %v6866_v18 = vpop.permute.xlu1 %1576  ;;  %5101 = vset.pattern.permute.xlu1 %v11911_v9 }
 0x307   :  { %11910 = vst [vmem:[#allocation227_spill] sm:$0xff] %v6866_v18  ;;  %2256 = vperm.xlu1 %5101, %v6503_v21  }
 0x30a   :  { %2145 = vrot.lane.b32.xlu0 %v6118_v24, %s11517_s26  ;;  %v6874_v14 = vpop.permute.xlu1 %1578 }
 0x30b   :  { %11913 = vst [vmem:[#allocation229_spill] sm:$0xff] %v6874_v14  ;;  %1900 = vrot.lane.b32.xlu1 %v6096_v53, %s11521_s3  ;;  %v11926_v14 = vmov 24  }
 0x30e   :  { %2224 = vrot.lane.b32.xlu0 %v6096_v53, %s11515_s25  ;;  %v6880_v36 = vpop.permute.xlu1 %1653 }
 0x30f   :  { %11914 = vst [vmem:[#allocation230_spill] sm:$0xff] %v6880_v36  ;;  %1902 = vrot.lane.b32.xlu1 %v6118_v24, %s11521_s3  ;;  %v6904_v36 = vpop.permute.xlu0 %2098 }
 0x310   :  { %11920 = vst [vmem:[#allocation236_spill] sm:$0xff] %v6904_v36 }
 0x312   :  { %2299 = vrot.lane.b32.xlu0 %v6038_v49, %s11513_s24  ;;  %v6888_v9 = vpop.permute.xlu1 %1720 }
 0x313   :  { %11916 = vst [vmem:[#allocation232_spill] sm:$0xff] %v6888_v9  ;;  %1977 = vrot.lane.b32.xlu1 %v6062_v50, %s11519_s27  ;;  %v6914_v54 = vpop.permute.xlu0 %1894 }
 0x314   :  { %11922 = vst [vmem:[#allocation238_spill] sm:$0xff] %v6914_v54  ;;  %v4860_v54 = vunpack.i.h.bf16 %v5894_v56 }
 0x316   :  { %2303 = vrot.lane.b32.xlu0 %v11742_v4, %s11513_s24  ;;  %v6896_v18 = vpop.permute.xlu1 %5060  ;;  %v368_v41 = vsel %vm11492_vm3, %v4860_v54, %v6187_v32 }
 0x317   :  { %11918 = vst [vmem:[#allocation234_spill] sm:$0xff] %v6896_v18  ;;  %2044 = vrot.lane.b32.xlu1 %v5901_v63, %s11399_s28  ;;  %v6921_v36 = vpop.permute.xlu0 %5091 }
 0x318   :  { %11925 = vst [vmem:[#allocation241_spill] sm:$0xff] %v6921_v36 }
 0x31a   :  { %2305 = vrot.lane.b32.xlu0 %v6096_v53, %s11513_s24  ;;  %v6902_v15 = vpop.permute.xlu1 %1728 }
 0x31b   :  { %11919 = vst [vmem:[#allocation235_spill] sm:$0xff] %v6902_v15  ;;  %5108 = vrot.lane.b32.xlu1 %v11742_v4, %s11399_s28 }
 0x31e   :  { %v6908_v9 = vpop.permute.xlu1 %1940  ;;  %2309 = vrot.lane.b32.xlu0 %v11742_v4, %s11513_s24 }
 0x31f   :  { %11921 = vst [vmem:[#allocation237_spill] sm:$0xff] %v6908_v9  ;;  %2052 = vrot.lane.b32.xlu1 %v6002_v47, %s11399_s28  ;;  %v11340_v9 = vlaneseq }
 0x323   :  { %v6916_v18 = vpop.permute.xlu1 %2013  ;;  %2264 = vperm.xlu1 %5101, %v6559_v55  }
 0x324   :  { %11923 = vst [vmem:[#allocation239_spill] sm:$0xff] %v6916_v18 }
 0x327   :  { %v6919_v15 = vpop.permute.xlu1 %1657  ;;  %5112 = vset.pattern.permute.xlu1 %v11926_v14 }
 0x328   :  { %11924 = vst [vmem:[#allocation240_spill] sm:$0xff] %v6919_v15  ;;  %2337 = vperm.xlu1 %5112, %v6503_v21   ;;  %v4870_v21 = vunpack.i.h.bf16 %v5898_v59  ;;  %v81_v15 = vand.u32 127, %v11340_v9 }
 0x32a   :  { %v82_v19 = vadd.s32 128, %v81_v15  ;;  %v83_v26 = vand.u32 15, %v81_v15  ;;  %v457_v18 = vsel %vm11502_vm1, %v4870_v21, %v6194_v46 }
 0x32b   :  { %v6925_v25 = vpop.permute.xlu1 %1659 }
 0x32c   :  { %11927 = vst [vmem:[#allocation242_spill] sm:$0xff] %v6925_v25  ;;  %1981 = vrot.lane.b32.xlu1 %v6096_v53, %s11519_s27  ;;  %v6937_v25 = vpop.permute.xlu0 %1965  ;;  %v6966_v36 = vadd.s32 4294967295, %v83_v26  ;;  %v6982_v15 = vadd.s32 1, %v83_v26 }
 0x32d   :  { %11928 = vst [vmem:[#allocation243_spill] sm:$0xff] %v6937_v25  ;;  %v84_v25 = vand.u32 15, %v82_v19 }
 0x32e   :  { %11933 = vst [vmem:[#allocation248_spill] sm:$0xff] %v6982_v15  ;;  %vm95_vm4 = vcmp.ge.s32.totalorder %v6966_v36, 0  ;;  %vm111_vm9 = vcmp.lt.s32.totalorder %v6982_v15, 16 }
 0x32f   :  { %v6943_v49 = vpop.permute.xlu1 %1803  ;;  %v6991_v0 = vadd.s32 4294967294, %v84_v25  ;;  %v6993_v21 = vadd.s32 4294967295, %v84_v25  ;;  %v473_v9 = vsel %vm95_vm4, %v457_v18, 0.0  ;;  %v7004_v54 = vadd.s32 1, %v84_v25 }
 0x330   :  { %11929 = vst [vmem:[#allocation244_spill] sm:$0xff] %v6943_v49  ;;  %1983 = vrot.lane.b32.xlu1 %v6118_v24, %s11519_s27  ;;  %v6968_v14 = vpop.permute.xlu0 %1969  ;;  %v6975_v49 = vadd.s32 4294967294, %v83_v26  ;;  %v6977_v24 = vadd.s32 2, %v83_v26  ;;  %v497_v62 = vmul.f32 %v5868_v34, %v473_v9  ;;  %v11940_v9 = vunpack.i.l.bf16 %v5894_v56  ;;  %s12406_s27 = smov 98  }
 0x331   :  { %11931 = vst [vmem:[#allocation246_spill] sm:$0xff] %v6968_v14  ;;  %11935 = vst [vmem:[#allocation250_spill] sm:$0xff] %v6991_v0  ;;  %vm88_vm13 = vcmp.ge.s32.totalorder %v6991_v0, 0  ;;  %vm96_vm14 = vcmp.ge.s32.totalorder %v6993_v21, 0  ;;  %vm112_vm15 = vcmp.lt.s32.totalorder %v7004_v54, 16  ;;  %v369_v56 = vsel %vm11492_vm3, %v6187_v32, %v6214_v5 }
 0x332   :  { %11932 = vst [vmem:[#allocation247_spill] sm:$0xff] %v6975_v49  ;;  %vm87_vm5 = vcmp.ge.s32.totalorder %v6975_v49, 0  ;;  %vm119_vm6 = vcmp.lt.s32.totalorder %v6977_v24, 16  ;;  %11937 = vst [vmem:[#allocation252_spill] sm:$0xff] %v7004_v54 }
 0x333   :  { %v6961_v13 = vpop.permute.xlu1 %1807  ;;  %v384_v19 = vsel %vm87_vm5, %v368_v41, 0.0  ;;  %v11939_v41 = vunpack.i.l.bf16 %v5875_v40 }
 0x334   :  { %11930 = vst [vmem:[#allocation245_spill] sm:$0xff] %v6961_v13  ;;  %2058 = vrot.lane.b32.xlu1 %v6062_v50, %s11399_s28  ;;  %v7001_v26 = vpop.permute.xlu0 %2106  ;;  %v412_v38 = vmul.f32 %v5862_v31, %v384_v19  ;;  %v11945_v19 = vunpack.i.l.bf16 %v5930_v10 }
 0x335   :  { %11936 = vst [vmem:[#allocation251_spill] sm:$0xff] %v7001_v26  ;;  %v458_v26 = vsel %vm11502_vm1, %v6194_v46, %v6222_v44  ;;  %v540_v13 = vsel %vm539_vm2, %v11939_v41, %v6120_v27  ;;  %v627_v46 = vsel %vm11420_vm10, %v11941_v43, %v6202_v51  ;;  %v7034_v44 = vadd.s32 2, %v84_v25 }
 0x336   :  { %v542_v41 = vsel %vm539_vm2, %v11943_v48, %v6185_v28  ;;  %v710_v43 = vsel %vm11411_vm7, %v11945_v19, %v6128_v57  ;;  %v11946_v25 = vunpack.i.l.bf16 %v5898_v59  ;;  %v505_v50 = vadd.f32 %v497_v62, %v412_v38 }
 0x337   :  { %v6984_v14 = vpop.permute.xlu1 %1732  ;;  %11942 = vst [vmem:[#allocation254_spill] sm:$0xff] %v7034_v44  ;;  %v474_v40 = vsel %vm96_vm14, %v458_v26, 0.0  ;;  %v7058_v32 = vmul.f32 %v5878_v45, %v540_v13  ;;  %v872_v19 = vsel %vm11415_vm8, %v4929_v42, %v6136_v16  ;;  %v643_v59 = vsel %vm111_vm9, %v627_v46, 0.0 }
 0x338   :  { %11934 = vst [vmem:[#allocation249_spill] sm:$0xff] %v6984_v14  ;;  %2125 = vrot.lane.b32.xlu1 %v5901_v63, %s11517_s26  ;;  %v4953_v14 = vunpack.i.l.bf16 %v6088_v6  ;;  %v455_v11 = vsel %vm11502_vm1, %v11946_v25, %v6130_v60  ;;  %v7055_v48 = vpop.permute.xlu0 %2179  ;;  %v11948_v62 = vunpack.i.l.bf16 %v5954_v23  ;;  %v582_v26 = vmul.f32 %v5942_v20, %v542_v41 }
 0x339   :  { %11947 = vst [vmem:[#allocation256_spill] sm:$0xff] %v7055_v48  ;;  %v726_v42 = vsel %vm119_vm6, %v710_v43, 0.0  ;;  %v471_v46 = vsel %vm95_vm4, %v455_v11, 0.0  ;;  %v11949_v25 = vunpack.i.l.bf16 %v6010_v12  ;;  %v11950_v41 = vunpack.i.h.bf16 %v5930_v10 }
 0x33a   :  { %v625_v38 = vsel %vm11420_vm10, %v11948_v62, %v6138_v29  ;;  %v1033_v13 = vsel %vm11364_vm11, %v4953_v14, %v6144_v39  ;;  %v498_v62 = vmul.f32 %v5868_v34, %v474_v40  ;;  %v888_v14 = vsel %vm95_vm4, %v872_v19, 0.0 }
 0x33b   :  { %v7008_v18 = vpop.permute.xlu1 %5072  ;;  %v791_v23 = vsel %vm11381_vm12, %v11949_v25, %v6146_v3  ;;  %v667_v43 = vmul.f32 %v5907_v1, %v643_v59  ;;  %v641_v11 = vsel %vm111_vm9, %v625_v38, 0.0  ;;  %v1049_v25 = vsel %vm111_vm9, %v1033_v13, 0.0 }
 0x33c   :  { %11938 = vst [vmem:[#allocation253_spill] sm:$0xff] %v7008_v18  ;;  %5121 = vrot.lane.b32.xlu1 %v11742_v4, %s11517_s26  ;;  %v366_v18 = vsel %vm11492_vm3, %v11940_v9, %v6122_v52  ;;  %vm11374_vm11 = vcmp.lt.s32.totalorder %v7034_v44, 16  ;;  %v628_v10 = vsel %vm11420_vm10, %v6202_v51, %v6230_v22  ;;  %v807_v19 = vsel %vm87_vm5, %v791_v23, 0.0  ;;  %v11955_v22 = vld [vmem:[#allocation35_spill] sm:$0xff] }
 0x33d   :  { %v7062_v5 = vsel %vm87_vm5, %v366_v18, 0.0  ;;  %v385_v18 = vsel %vm88_vm13, %v369_v56, 0.0  ;;  %v712_v56 = vsel %vm11411_vm7, %v11950_v41, %v6192_v37  ;;  %v11953_v59 = vunpack.i.h.bf16 %v6010_v12  ;;  %v11957_v23 = vld [vmem:[#allocation27_spill] sm:$0xff]  ;;  %v11958_v41 = vld [vmem:[#allocation49_spill] sm:$0xff] }
 0x33e   :  { %v413_v40 = vmul.f32 %v5862_v31, %v385_v18  ;;  %v543_v13 = vsel %vm539_vm2, %v6185_v28, %v6224_v61  ;;  %v7122_v51 = vmul.f32 %v5909_v2, %v471_v46  ;;  %v728_v18 = vsel %vm119_vm6, %v712_v56, 0.0  ;;  %v11961_v46 = vld [vmem:[#allocation36_spill] sm:$0xff] }
 0x33f   :  { %v7043_v9 = vpop.permute.xlu1 %2021  ;;  %v793_v38 = vsel %vm11381_vm12, %v11953_v59, %v6209_v35  ;;  %v7130_v12 = vmul.f32 %v11957_v23, %v641_v11  ;;  %v7133_v59 = vmul.f32 %v11958_v41, %v1049_v25  ;;  %v644_v61 = vsel %vm112_vm15, %v628_v10, 0.0 }
 0x340   :  { %11944 = vst [vmem:[#allocation255_spill] sm:$0xff] %v7043_v9  ;;  %2133 = vrot.lane.b32.xlu1 %v6002_v47, %s11517_s26  ;;  %v590_v9 = vadd.f32 %v582_v26, %v505_v50  ;;  %v7108_v50 = vmul.f32 %v5940_v17, %v726_v42  ;;  %v7119_v26 = vpop.permute.xlu0 %1975  ;;  %v506_v42 = vadd.f32 %v498_v62, %v413_v40  ;;  %v809_v62 = vsel %vm87_vm5, %v793_v38, 0.0  ;;  %v11966_v40 = vld [vmem:[#allocation56_spill] sm:$0xff] }
 0x341   :  { %11954 = vst [vmem:[#allocation259_spill] sm:$0xff] %v7119_v26  ;;  %11959 = vst [vmem:[#allocation261_spill] sm:$0xff] %v7133_v59  ;;  %v7140_v34 = vmul.f32 %v11961_v46, %v807_v19  ;;  %v583_v11 = vmul.f32 %v5942_v20, %v543_v13  ;;  %v456_v10 = vsel %vm11502_vm1, %v6130_v60, %v11966_v40  ;;  %v11967_v19 = vld [vmem:[#allocation57_spill] sm:$0xff]  ;;  %v11969_v26 = vld [vmem:[#allocation58_spill] sm:$0xff] }
 0x342   :  { %11952 = vst [vmem:[#allocation258_spill] sm:$0xff] %v7108_v50  ;;  %v675_v31 = vadd.f32 %v667_v43, %v590_v9  ;;  %v11964_v9 = vld [vmem:[#allocation55_spill] sm:$0xff]  ;;  %v11965_v43 = vunpack.i.l.bf16 %v6070_v7  ;;  %v626_v13 = vsel %vm11420_vm10, %v6138_v29, %v11969_v26  ;;  %v11971_v40 = vld [vmem:[#allocation64_spill] sm:$0xff] }
 0x343   :  { %11962 = vst [vmem:[#allocation263_spill] sm:$0xff] %v7140_v34  ;;  %v591_v20 = vadd.f32 %v583_v11, %v506_v42  ;;  %v11973_v59 = vld [vmem:[#allocation31_spill] sm:$0xff]  ;;  %v472_v42 = vsel %vm96_vm14, %v456_v10, 0.0  ;;  %v642_v11 = vsel %vm112_vm15, %v626_v13, 0.0  ;;  %v12058_v34 = vld [vmem:[#allocation25_spill] sm:$0xff] }
 0x344   :  { %v7095_v48 = vpop.permute.xlu1 %2094  ;;  %2345 = vperm.xlu1 %5112, %v6559_v55   ;;  %v7125_v55 = vmul.f32 %v11955_v22, %v888_v14  ;;  %v11963_v14 = vld [vmem:[#allocation54_spill] sm:$0xff]  ;;  %v952_v25 = vsel %vm147_vm0, %v11965_v43, %v11964_v9  ;;  %v7177_v29 = vpop.permute.xlu0 %5103 }
 0x345   :  { %11951 = vst [vmem:[#allocation257_spill] sm:$0xff] %v7095_v48  ;;  %v367_v56 = vsel %vm11492_vm3, %v6122_v52, %v11963_v14  ;;  %v541_v52 = vsel %vm539_vm2, %v6120_v27, %v11967_v19  ;;  %v11968_v14 = vld [vmem:[#allocation34_spill] sm:$0xff]  ;;  %v668_v48 = vmul.f32 %v5907_v1, %v644_v61  ;;  %v11972_v27 = vunpack.i.h.bf16 %v6008_v8  ;;  %11974 = vst [vmem:[#allocation54_spill] sm:$0xff] %v7177_v29  ;;  %v60_v29 = vld [vmem:[%s11149_s4 + $0x8] sm:$0xff] }
 0x346   :  { %11956 = vst [vmem:[#allocation260_spill] sm:$0xff] %v7125_v55  ;;  %v752_v38 = vmul.f32 %v11968_v14, %v728_v18  ;;  %v7170_v60 = vsel %vm88_vm13, %v367_v56, 0.0  ;;  %v833_v55 = vmul.f32 %v11973_v59, %v809_v62  ;;  %v7195_v62 = vmul.f32 %v5878_v45, %v541_v52  ;;  %v11992_v45 = vld [vmem:[#allocation88_spill] sm:$0xff] }
 0x347   :  { %v874_v18 = vsel %vm11415_vm8, %v11972_v27, %v11971_v40  ;;  %v7210_v52 = vmul.f32 %v5909_v2, %v472_v42  ;;  %v11986_v42 = vunpack.i.h.bf16 %v5866_v33  ;;  %v11994_v2 = vld [vmem:[#allocation65_spill] sm:$0xff] }
 0x348   :  { %v7137_v28 = vpop.permute.xlu1 %1813  ;;  %2062 = vrot.lane.b32.xlu1 %v6096_v53, %s11399_s28  ;;  %v760_v19 = vadd.f32 %v752_v38, %v675_v31  ;;  %v11978_v31 = vld [vmem:[#allocation47_spill] sm:$0xff] }
 0x349   :  { %11960 = vst [vmem:[#allocation262_spill] sm:$0xff] %v7137_v28  ;;  %v11970_v28 = vld [vmem:[#allocation67_spill] sm:$0xff]  ;;  %v7192_v56 = vmul.f32 %v11978_v31, %v952_v25  ;;  %v890_v25 = vsel %vm95_vm4, %v874_v18, 0.0  ;;  %v11985_v18 = vld [vmem:[#allocation90_spill] sm:$0xff] }
 0x34a   :  { %v713_v43 = vsel %vm11411_vm7, %v6192_v37, %v11970_v28  ;;  %v11976_v37 = vld [vmem:[#allocation59_spill] sm:$0xff]  ;;  %v11977_v28 = vld [vmem:[#allocation68_spill] sm:$0xff] }
 0x34b   :  { %v711_v61 = vsel %vm11411_vm7, %v6128_v57, %v11976_v37  ;;  %v794_v8 = vsel %vm11381_vm12, %v6209_v35, %v11977_v28  ;;  %11979 = vst [vmem:[#allocation56_spill] sm:$0xff] %v7192_v56  ;;  %v729_v10 = vsel %vm11374_vm11, %v713_v43, 0.0  ;;  %v11980_v57 = vld [vmem:[#allocation60_spill] sm:$0xff]  ;;  %v11981_v35 = vld [vmem:[#allocation61_spill] sm:$0xff]  ;;  %v676_v37 = vadd.f32 %v668_v48, %v591_v20 }
 0x34c   :  { %v7179_v26 = vpop.permute.xlu1 %1815  ;;  %2206 = vrot.lane.b32.xlu1 %v5901_v63, %s11515_s25  ;;  %v792_v38 = vsel %vm11381_vm12, %v6146_v3, %v11980_v57  ;;  %v873_v27 = vsel %vm11415_vm8, %v6136_v16, %v11981_v35  ;;  %v727_v13 = vsel %vm11374_vm11, %v711_v61, 0.0  ;;  %v841_v28 = vadd.f32 %v833_v55, %v760_v19  ;;  %v11983_v16 = vld [vmem:[#allocation66_spill] sm:$0xff]  ;;  %v7240_v35 = vpop.permute.xlu0 %2046 }
 0x34d   :  { %11975 = vst [vmem:[#allocation55_spill] sm:$0xff] %v7179_v26  ;;  %v810_v43 = vsel %vm88_vm13, %v794_v8, 0.0  ;;  %v7219_v3 = vmul.f32 %v11957_v23, %v642_v11  ;;  %v11984_v57 = vunpack.i.h.bf16 %v6070_v7  ;;  %v753_v48 = vmul.f32 %v11968_v14, %v729_v10  ;;  %v11987_v8 = vld [vmem:[#allocation43_spill] sm:$0xff]  ;;  %v11988_v11 = vld [vmem:[#allocation69_spill] sm:$0xff]  ;;  %11989 = vst [vmem:[#allocation58_spill] sm:$0xff] %v7240_v35 }
 0x34e   :  { %v461_v55 = vsel %vm11502_vm1, %v11986_v42, %v11985_v18  ;;  %v808_v19 = vsel %vm88_vm13, %v792_v38, 0.0  ;;  %v889_v61 = vsel %vm96_vm14, %v873_v27, 0.0  ;;  %v914_v7 = vmul.f32 %v11987_v8, %v890_v25 }
 0x34f   :  { %v954_v20 = vsel %vm147_vm0, %v11984_v57, %v11983_v16  ;;  %v875_v10 = vsel %vm11415_vm8, %v11971_v40, %v11988_v11  ;;  %v11990_v57 = vld [vmem:[#allocation63_spill] sm:$0xff]  ;;  %vm11991_vm11 = vcmask 121856   ;;  %v761_v14 = vadd.f32 %v753_v48, %v676_v37  ;;  %v11997_v11 = vld [vmem:[#allocation45_spill] sm:$0xff] }
 0x350   :  { %v7216_v1 = vpop.permute.xlu1 %1882  ;;  %5127 = vrot.lane.b32.xlu1 %v11742_v4, %s11515_s25  ;;  %v1034_v42 = vsel %vm11991_vm11, %v6144_v39, %v11990_v57  ;;  %v834_v23 = vmul.f32 %v11973_v59, %v810_v43  ;;  %v11993_v38 = vunpack.i.h.bf16 %v5860_v30  ;;  %v11995_v25 = vunpack.i.h.bf16 %v6088_v6  ;;  %vm11996_vm12 = vmmov %vm11991_vm11 }
 0x351   :  { %11982 = vst [vmem:[#allocation57_spill] sm:$0xff] %v7216_v1  ;;  %v922_v40 = vadd.f32 %v914_v7, %v841_v28  ;;  %v994_v35 = vmul.f32 %v11997_v11, %v954_v20  ;;  %v477_v26 = vsel %vm95_vm4, %v461_v55, 0.0  ;;  %v7260_v37 = vmul.f32 %v5940_v17, %v727_v13  ;;  %v12002_v28 = vld [vmem:[#allocation62_spill] sm:$0xff]  ;;  %v12003_v55 = vld [vmem:[#allocation71_spill] sm:$0xff]  ;;  %v12004_v7 = vld [vmem:[#allocation97_spill] sm:$0xff] }
 0x352   :  { %v372_v27 = vsel %vm11492_vm3, %v11993_v38, %v11992_v45  ;;  %v1035_v1 = vsel %vm11996_vm12, %v11995_v25, %v11994_v2  ;;  %v7263_v43 = vmul.f32 %v11961_v46, %v808_v19  ;;  %v7266_v48 = vmul.f32 %v11955_v22, %v889_v61  ;;  %v12005_v25 = vld [vmem:[#allocation20_spill] sm:$0xff] }
 0x353   :  { %11999 = vst [vmem:[#allocation64_spill] sm:$0xff] %v7260_v37  ;;  %v891_v6 = vsel %vm96_vm14, %v875_v10, 0.0  ;;  %v953_v20 = vsel %vm147_vm0, %v11964_v9, %v12002_v28  ;;  %v1036_v13 = vsel %vm11991_vm11, %v11994_v2, %v12003_v55  ;;  %v388_v19 = vsel %vm87_vm5, %v372_v27, 0.0  ;;  %v12006_v2 = vld [vmem:[#allocation70_spill] sm:$0xff]  ;;  %v12007_v55 = vld [vmem:[#allocation95_spill] sm:$0xff] }
 0x354   :  { %v7257_v39 = vpop.permute.xlu1 %5084  ;;  %12000 = vst [vmem:[#allocation59_spill] sm:$0xff] %v7263_v43  ;;  %12001 = vst [vmem:[#allocation68_spill] sm:$0xff] %v7266_v48  ;;  %2214 = vrot.lane.b32.xlu1 %v6002_v47, %s11515_s25  ;;  %v462_v61 = vsel %vm11502_vm1, %v11985_v18, %v12004_v7  ;;  %v1050_v10 = vsel %vm112_vm15, %v1034_v42, 0.0  ;;  %v1051_v57 = vsel %vm111_vm9, %v1035_v1, 0.0  ;;  %v842_v38 = vadd.f32 %v834_v23, %v761_v14  ;;  %v7295_v7 = vpop.permute.xlu0 %2050  ;;  %v12010_v23 = vld [vmem:[#allocation9_spill] sm:$0xff] }
 0x355   :  { %11998 = vst [vmem:[#allocation67_spill] sm:$0xff] %v7257_v39  ;;  %v501_v9 = vmul.f32 %v12005_v25, %v477_v26  ;;  %v1002_v28 = vadd.f32 %v994_v35, %v922_v40  ;;  %v915_v59 = vmul.f32 %v11987_v8, %v891_v6  ;;  %v955_v27 = vsel %vm147_vm0, %v11983_v16, %v12006_v2  ;;  %v12011_v26 = vld [vmem:[#allocation92_spill] sm:$0xff]  ;;  %v12018_v8 = vld [vmem:[#allocation21_spill] sm:$0xff]  ;;  %v12037_v39 = vld [vmem:[#allocation30_spill] sm:$0xff] }
 0x356   :  { %v373_v18 = vsel %vm11492_vm3, %v11992_v45, %v12007_v55  ;;  %12008 = vst [vmem:[#allocation60_spill] sm:$0xff] %v7295_v7  ;;  %v1052_v1 = vsel %vm112_vm15, %v1036_v13, 0.0  ;;  %v416_v14 = vmul.f32 %v12010_v23, %v388_v19  ;;  %v12012_v35 = vunpack.i.h.bf16 %v5896_v58  ;;  %v12013_v6 = vld [vmem:[#allocation44_spill] sm:$0xff]  ;;  %v12017_v19 = vld [vmem:[#allocation89_spill] sm:$0xff] }
 0x357   :  { %v478_v16 = vsel %vm96_vm14, %v462_v61, 0.0  ;;  %v7311_v45 = vmul.f32 %v11978_v31, %v953_v20  ;;  %v7314_v2 = vmul.f32 %v11958_v41, %v1050_v10  ;;  %v12016_v13 = vld [vmem:[#allocation52_spill] sm:$0xff]  ;;  %v12019_v22 = vunpack.i.h.bf16 %v12018_v8 }
 0x358   :  { %v7297_v42 = vpop.permute.xlu1 %1890  ;;  %v631_v40 = vsel %vm11420_vm10, %v12012_v35, %v12011_v26  ;;  %2139 = vrot.lane.b32.xlu1 %v12013_v6, %s11517_s26  ;;  %v1075_v55 = vmul.f32 %v12016_v13, %v1051_v57  ;;  %v923_v35 = vadd.f32 %v915_v59, %v842_v38  ;;  %v995_v17 = vmul.f32 %v11997_v11, %v955_v27  ;;  %v7330_v41 = vpop.permute.xlu0 %2187  ;;  %v12031_v11 = vld [vmem:[#allocation75_spill] sm:$0xff] }
 0x359   :  { %12009 = vst [vmem:[#allocation61_spill] sm:$0xff] %v7297_v42  ;;  %12014 = vst [vmem:[#allocation66_spill] sm:$0xff] %v7311_v45  ;;  %v546_v46 = vsel %vm539_vm2, %v12019_v22, %v12017_v19  ;;  %v509_v61 = vadd.f32 %v501_v9, %v416_v14  ;;  %v389_v7 = vsel %vm88_vm13, %v373_v18, 0.0  ;;  %v1076_v20 = vmul.f32 %v12016_v13, %v1052_v1  ;;  %v12022_v22 = vld [vmem:[#allocation72_spill] sm:$0xff]  ;;  %v12024_v9 = vld [vmem:[#allocation74_spill] sm:$0xff] }
 0x35a   :  { %12015 = vst [vmem:[#allocation90_spill] sm:$0xff] %v7314_v2  ;;  %v7324_v42 = vadd.f32 %v1075_v55, %v1002_v28  ;;  %v647_v10 = vsel %vm111_vm9, %v631_v40, 0.0  ;;  %v502_v57 = vmul.f32 %v12005_v25, %v478_v16  ;;  %12020 = vst [vmem:[#allocation69_spill] sm:$0xff] %v7330_v41  ;;  %v12023_v59 = vunpack.i.l.bf16 %v5860_v30  ;;  %v12026_v18 = vld [vmem:[#allocation16_spill] sm:$0xff]  ;;  %v12027_v14 = vld [vmem:[#allocation98_spill] sm:$0xff] }
 0x35b   :  { %v12025_v28 = vunpack.i.l.bf16 %v5866_v33  ;;  %v586_v1 = vmul.f32 %v12026_v18, %v546_v46  ;;  %v547_v40 = vsel %vm539_vm2, %v12017_v19, %v12027_v14  ;;  %v12028_v16 = vld [vmem:[#allocation131_spill] sm:$0xff]  ;;  %v12029_v55 = vld [vmem:[#allocation73_spill] sm:$0xff]  ;;  %v12030_v13 = vunpack.i.l.bf16 %v12018_v8  ;;  %v12051_v45 = vld [vmem:[#allocation100_spill] sm:$0xff] }
 0x35c   :  { %v7332_v31 = vpop.permute.xlu1 %1740  ;;  %v370_v38 = vsel %vm11492_vm3, %v12023_v59, %v12022_v22  ;;  %2349 = vperm.xlu1 %5112, %v12028_v16   ;;  %v12032_v59 = vld [vmem:[#allocation32_spill] sm:$0xff]  ;;  %v12034_v41 = vld [vmem:[#allocation99_spill] sm:$0xff]  ;;  %vm12043_vm12 = vcmask 146432  }
 0x35d   :  { %12021 = vst [vmem:[#allocation63_spill] sm:$0xff] %v7332_v31  ;;  %v459_v27 = vsel %vm11502_vm1, %v12025_v28, %v12024_v9  ;;  %v544_v30 = vsel %vm539_vm2, %v12030_v13, %v12029_v55  ;;  %v12033_v25 = vunpack.i.l.bf16 %v12032_v59  ;;  %v417_v28 = vmul.f32 %v12010_v23, %v389_v7  ;;  %v12035_v19 = vld [vmem:[#allocation91_spill] sm:$0xff]  ;;  %vm12057_vm11 = vmmov %vm12043_vm12 }
 0x35e   :  { %v632_v46 = vsel %vm11420_vm10, %v12011_v26, %v12034_v41  ;;  %v1003_v31 = vadd.f32 %v995_v17, %v923_v35  ;;  %v12036_v14 = vunpack.i.h.bf16 %v12032_v59  ;;  %v594_v8 = vadd.f32 %v586_v1, %v509_v61  ;;  %v12038_v26 = vld [vmem:[#allocation14_spill] sm:$0xff]  ;;  %v12041_v1 = vld [vmem:[#allocation29_spill] sm:$0xff] }
 0x35f   :  { %v714_v33 = vsel %vm11411_vm7, %v12033_v25, %v12031_v11  ;;  %v671_v13 = vmul.f32 %v12037_v39, %v647_v10  ;;  %v7369_v25 = vsel %vm87_vm5, %v370_v38, 0.0  ;;  %v475_v41 = vsel %vm95_vm4, %v459_v27, 0.0  ;;  %v12040_v10 = vld [vmem:[#allocation94_spill] sm:$0xff] }
 0x360   :  { %v716_v16 = vsel %vm11411_vm7, %v12036_v14, %v12035_v19  ;;  %v510_v17 = vadd.f32 %v502_v57, %v417_v28  ;;  %v587_v7 = vmul.f32 %v12026_v18, %v547_v40  ;;  %v7375_v35 = vmul.f32 %v12038_v26, %v544_v30  ;;  %v7386_v27 = vpop.permute.xlu1 %2102  ;;  %v12046_v57 = vld [vmem:[#allocation76_spill] sm:$0xff]  ;;  %v12048_v28 = vld [vmem:[#allocation77_spill] sm:$0xff] }
 0x361   :  { %v730_v61 = vsel %vm119_vm6, %v714_v33, 0.0  ;;  %v12042_v59 = vunpack.i.h.bf16 %v12041_v1  ;;  %v648_v38 = vsel %vm112_vm15, %v632_v46, 0.0  ;;  %v12044_v23 = vmov 0   ;;  %12045 = vst [vmem:[#allocation65_spill] sm:$0xff] %v7386_v27  ;;  %v12049_v18 = vld [vmem:[#allocation41_spill] sm:$0xff] }
 0x362   :  { %12039 = vst [vmem:[#allocation88_spill] sm:$0xff] %v7375_v35  ;;  %5136 = vset.pattern.permute.xlu1 %v12044_v23  ;;  %v12047_v40 = vunpack.i.l.bf16 %v5896_v58  ;;  %v12050_v33 = vunpack.i.l.bf16 %v12049_v18  ;;  %v717_v46 = vsel %vm11411_vm7, %v12035_v19, %v12051_v45  ;;  %v7401_v23 = vpop.permute.xlu0 %2341  ;;  %v7403_v27 = vadd.f32 %v1076_v20, %v1003_v31  ;;  %v12053_v58 = vld [vmem:[#allocation11_spill] sm:$0xff] }
 0x363   :  { %v797_v14 = vsel %vm12043_vm12, %v12042_v59, %v12040_v10  ;;  %v732_v59 = vsel %vm119_vm6, %v716_v16, 0.0  ;;  %12052 = vst [vmem:[#allocation62_spill] sm:$0xff] %v7401_v23  ;;  %2375 = vperm.xlu1 %5136, %v60_v29   ;;  %v7406_v56 = vmul.f32 %v12053_v58, %v475_v41  ;;  %v12056_v48 = vunpack.i.l.bf16 %v12041_v1  ;;  %v12060_v41 = vld [vmem:[#allocation26_spill] sm:$0xff]  ;;  %v12072_v35 = vld [vmem:[#allocation19_spill] sm:$0xff] }
 0x364   :  { %v629_v30 = vsel %vm11420_vm10, %v12047_v40, %v12046_v57  ;;  %v876_v2 = vsel %vm11415_vm8, %v12050_v33, %v12048_v28  ;;  %v12055_v40 = vld [vmem:[#allocation78_spill] sm:$0xff]  ;;  %v679_v43 = vadd.f32 %v671_v13, %v594_v8  ;;  %v7413_v16 = vmul.f32 %v12058_v34, %v730_v61  ;;  %v12062_v13 = vld [vmem:[#allocation79_spill] sm:$0xff] }
 0x365   :  { %12054 = vst [vmem:[#allocation71_spill] sm:$0xff] %v7406_v56  ;;  %v795_v33 = vsel %vm12057_vm11, %v12056_v48, %v12055_v40  ;;  %v813_v45 = vsel %vm87_vm5, %v797_v14, 0.0  ;;  %v595_v19 = vadd.f32 %v587_v7, %v510_v17  ;;  %v672_v29 = vmul.f32 %v12037_v39, %v648_v38  ;;  %v12063_v7 = vld [vmem:[#allocation81_spill] sm:$0xff]  ;;  %v12064_v14 = vld [vmem:[#allocation39_spill] sm:$0xff]  ;;  %v12066_v38 = vld [vmem:[#allocation80_spill] sm:$0xff] }
 0x366   :  { %12059 = vst [vmem:[#allocation97_spill] sm:$0xff] %v7413_v16  ;;  %v645_v31 = vsel %vm111_vm9, %v629_v30, 0.0  ;;  %v892_v20 = vsel %vm95_vm4, %v876_v2, 0.0  ;;  %v756_v1 = vmul.f32 %v12060_v41, %v732_v59  ;;  %vm12061_vm12 = vcmp.lt.s32.totalorder %v7034_v44, 16  ;;  %v7435_v2 = vpop.permute.xlu1 %2175  ;;  %v12067_v30 = vld [vmem:[#allocation42_spill] sm:$0xff]  ;;  %v12069_v39 = vld [vmem:[#allocation93_spill] sm:$0xff] }
 0x367   :  { %v733_v48 = vsel %vm12061_vm12, %v717_v46, 0.0  ;;  %v811_v8 = vsel %vm87_vm5, %v795_v33, 0.0  ;;  %v371_v17 = vsel %vm11492_vm3, %v12022_v22, %v12062_v13  ;;  %v460_v61 = vsel %vm11502_vm1, %v12024_v9, %v12063_v7  ;;  %2218 = vrot.lane.b32.xlu1 %v12064_v14, %s11515_s25  ;;  %12065 = vst [vmem:[#allocation70_spill] sm:$0xff] %v7435_v2  ;;  %v12071_v13 = vld [vmem:[#allocation38_spill] sm:$0xff]  ;;  %v12073_v2 = vld [vmem:[#allocation101_spill] sm:$0xff] }
 0x368   :  { %v12068_v59 = vunpack.i.l.bf16 %v12067_v30  ;;  %v12070_v33 = vunpack.i.h.bf16 %v12049_v18  ;;  %v764_v22 = vadd.f32 %v756_v1, %v679_v43  ;;  %v837_v16 = vmul.f32 %v12071_v13, %v813_v45  ;;  %v12075_v56 = vld [vmem:[#allocation37_spill] sm:$0xff] }
 0x369   :  { %v7447_v9 = vmul.f32 %v12072_v35, %v645_v31  ;;  %v680_v7 = vadd.f32 %v672_v29, %v595_v19  ;;  %v757_v37 = vmul.f32 %v12060_v41, %v733_v48  ;;  %v798_v50 = vsel %vm12057_vm11, %v12040_v10, %v12073_v2  ;;  %v12077_v29 = vld [vmem:[#allocation46_spill] sm:$0xff]  ;;  %v12079_v10 = vld [vmem:[#allocation83_spill] sm:$0xff] }
 0x36a   :  { %v956_v46 = vsel %vm147_vm0, %v12068_v59, %v12066_v38  ;;  %v878_v23 = vsel %vm11415_vm8, %v12070_v33, %v12069_v39  ;;  %vm11452_vm12 = vcmask 113664   ;;  %v7453_v59 = vpop.permute.xlu0 %2260  ;;  %v7456_v18 = vmul.f32 %v12075_v56, %v892_v20  ;;  %v12076_v33 = vld [vmem:[#allocation33_spill] sm:$0xff]  ;;  %v12080_v48 = vld [vmem:[#allocation102_spill] sm:$0xff] }
 0x36b   :  { %12074 = vst [vmem:[#allocation95_spill] sm:$0xff] %v7453_v59  ;;  %v7459_v43 = vmul.f32 %v12076_v33, %v811_v8  ;;  %v7463_v45 = vsel %vm88_vm13, %v371_v17, 0.0  ;;  %v476_v19 = vsel %vm96_vm14, %v460_v61, 0.0  ;;  %v7468_v31 = vmul.f32 %v12077_v29, %v956_v46  ;;  %5138 = vrot.lane.b32.xlu1 %v11742_v4, %s11515_s25  ;;  %v7480_v17 = vpop.permute.xlu1 %1819  ;;  %v12082_v61 = vld [vmem:[#allocation84_spill] sm:$0xff]  ;;  %v12083_v46 = vld [vmem:[#allocation85_spill] sm:$0xff] }
 0x36c   :  { %v630_v1 = vsel %vm11420_vm10, %v12046_v57, %v12079_v10  ;;  %v894_v20 = vsel %vm95_vm4, %v878_v23, 0.0  ;;  %v879_v8 = vsel %vm11415_vm8, %v12069_v39, %v12080_v48  ;;  %12081 = vst [vmem:[#allocation44_spill] sm:$0xff] %v7480_v17  ;;  %v715_v2 = vsel %vm11411_vm7, %v12031_v11, %v12082_v61  ;;  %v12084_v39 = vld [vmem:[#allocation82_spill] sm:$0xff]  ;;  %v12085_v4 = vld [vmem:[#allocation96_spill] sm:$0xff] }
 0x36d   :  { %12078 = vst [vmem:[#allocation92_spill] sm:$0xff] %v7468_v31  ;;  %v796_v57 = vsel %vm12057_vm11, %v12055_v40, %v12083_v46  ;;  %v845_v10 = vadd.f32 %v837_v16, %v764_v22  ;;  %v814_v23 = vsel %vm88_vm13, %v798_v50, 0.0  ;;  %v7491_v41 = vmul.f32 %v12053_v58, %v476_v19  ;;  %v12087_v17 = vld [vmem:[#allocation86_spill] sm:$0xff]  ;;  %v12088_v16 = vld [vmem:[#allocation40_spill] sm:$0xff] }
 0x36e   :  { %v545_v48 = vsel %vm539_vm2, %v12029_v55, %v12084_v39  ;;  %v12086_v59 = vunpack.i.h.bf16 %v12067_v30  ;;  %v765_v61 = vadd.f32 %v757_v37, %v680_v7  ;;  %v877_v40 = vsel %vm11415_vm8, %v12048_v28, %v12087_v17  ;;  %v12089_v19 = vld [vmem:[#allocation112_spill] sm:$0xff]  ;;  %v7514_v28 = vpop.permute.xlu0 %2056 }
 0x36f   :  { %v918_v22 = vmul.f32 %v12088_v16, %v894_v20  ;;  %v895_v50 = vsel %vm96_vm14, %v879_v8, 0.0  ;;  %v4975_v46 = vunpack.i.h.bf16 %v12089_v19  ;;  %v646_v55 = vsel %vm112_vm15, %v630_v1, 0.0  ;;  %12091 = vst [vmem:[#allocation89_spill] sm:$0xff] %v7514_v28  ;;  %v7518_v20 = vpop.permute.xlu1 %1821  ;;  %v12094_v8 = vld [vmem:[#allocation87_spill] sm:$0xff]  ;;  %v12095_v39 = vld [vmem:[#allocation48_spill] sm:$0xff] }
 0x370   :  { %v958_v11 = vsel %vm147_vm0, %v12086_v59, %v12085_v4  ;;  %vm12090_vm11 = vcmp.lt.s32.totalorder %v7034_v44, 16  ;;  %v812_v37 = vsel %vm88_vm13, %v796_v57, 0.0  ;;  %v838_v7 = vmul.f32 %v12071_v13, %v814_v23  ;;  %v12092_v59 = vld [vmem:[#allocation22_spill] sm:$0xff]  ;;  %12093 = vst [vmem:[#allocation21_spill] sm:$0xff] %v7518_v20 }
 0x371   :  { %v731_v30 = vsel %vm12090_vm11, %v715_v2, 0.0  ;;  %vm11451_vm7 = vcmask 15360   ;;  %2289 = vrot.lane.b32.xlu1 %v12092_v59, %s11513_s24  ;;  %v957_v1 = vsel %vm147_vm0, %v12066_v38, %v12094_v8  ;;  %v926_v17 = vadd.f32 %v918_v22, %v845_v10  ;;  %v12096_v38 = vld [vmem:[#allocation123_spill] sm:$0xff] }
 0x372   :  { %v998_v2 = vmul.f32 %v12095_v39, %v958_v11  ;;  %v4974_v58 = vunpack.i.l.bf16 %v12089_v19  ;;  %v7526_v57 = vmul.f32 %v12038_v26, %v545_v48  ;;  %v893_v23 = vsel %vm96_vm14, %v877_v40, 0.0  ;;  %v12097_v11 = vld [vmem:[#allocation116_spill] sm:$0xff]  ;;  %v12099_v40 = vld [vmem:[#allocation103_spill] sm:$0xff]  ;;  %v12100_v19 = vld [vmem:[#allocation117_spill] sm:$0xff] }
 0x373   :  { %v846_v13 = vadd.f32 %v838_v7, %v765_v61  ;;  %v919_v28 = vmul.f32 %v12088_v16, %v895_v50  ;;  %v7532_v20 = vmul.f32 %v12072_v35, %v646_v55  ;;  %v7535_v31 = vmul.f32 %v12058_v34, %v731_v30  ;;  %v12101_v55 = vld [vmem:[#allocation50_spill] sm:$0xff]  ;;  %v7557_v8 = vpop.permute.xlu1 %1896 }
 0x374   :  { %v1116_v10 = vsel %vm11452_vm12, %v4975_v46, %v12096_v38  ;;  %v1117_v48 = vsel %vm11452_vm12, %v12096_v38, %v12097_v11  ;;  %v7543_v22 = vmul.f32 %v12076_v33, %v812_v37  ;;  %v7546_v61 = vmul.f32 %v12077_v29, %v957_v1  ;;  %v12104_v46 = vld [vmem:[#allocation28_spill] sm:$0xff]  ;;  %12105 = vst [vmem:[#allocation74_spill] sm:$0xff] %v7557_v8  ;;  %v12106_v1 = vld [vmem:[#allocation119_spill] sm:$0xff]  ;;  %v12108_v29 = vld [vmem:[#allocation121_spill] sm:$0xff] }
 0x375   :  { %v959_v50 = vsel %vm147_vm0, %v12085_v4, %v12099_v40  ;;  %v12102_v30 = vunpack.i.l.bf16 %v12101_v55  ;;  %vm12103_vm11 = vcmask 121856   ;;  %2293 = vrot.lane.b32.xlu1 %v12104_v46, %s11513_s24  ;;  %v7560_v37 = vmul.f32 %v12075_v56, %v893_v23  ;;  %v12110_v33 = vld [vmem:[#allocation129_spill] sm:$0xff]  ;;  %v12117_v56 = vld [vmem:[#allocation132_spill] sm:$0xff] }
 0x376   :  { %12098 = vst [vmem:[#allocation72_spill] sm:$0xff] %v7546_v61  ;;  %v1006_v38 = vadd.f32 %v998_v2, %v926_v17  ;;  %vm12107_vm8 = vmmov %vm12103_vm11  ;;  %v1114_v4 = vsel %vm11452_vm12, %v4974_v58, %v12108_v29  ;;  %v927_v40 = vadd.f32 %v919_v28, %v846_v13  ;;  %v12111_v34 = vunpack.i.h.bf16 %v12101_v55  ;;  %v7575_v17 = vpop.permute.xlu0 %5116  ;;  %v12114_v58 = vld [vmem:[#allocation114_spill] sm:$0xff]  ;;  %v12115_v28 = vld [vmem:[#allocation136_spill] sm:$0xff] }
 0x377   :  { %v1037_v7 = vsel %vm12103_vm11, %v12102_v30, %v12100_v19  ;;  %v1038_v11 = vsel %vm12107_vm8, %v12100_v19, %v12106_v1  ;;  %v1132_v30 = vsel %vm119_vm6, %v1116_v10, 0.0  ;;  %vm12109_vm11 = vcmp.lt.s32.totalorder %v7034_v44, 16  ;;  %vm12112_vm10 = vmmov %vm12107_vm8  ;;  %12113 = vst [vmem:[#allocation98_spill] sm:$0xff] %v7575_v17  ;;  %v12116_v1 = vld [vmem:[#allocation120_spill] sm:$0xff]  ;;  %v12127_v17 = vld [vmem:[#allocation134_spill] sm:$0xff] }
 0x378   :  { %v1133_v16 = vsel %vm12109_vm11, %v1117_v48, 0.0  ;;  %v1039_v23 = vsel %vm12112_vm10, %v12111_v34, %v12110_v33  ;;  %v999_v2 = vmul.f32 %v12095_v39, %v959_v50  ;;  %v1053_v19 = vsel %vm111_vm9, %v1037_v7, 0.0  ;;  %v7594_v7 = vpop.permute.xlu1 %1963 }
 0x379   :  { %v1115_v13 = vsel %vm11452_vm12, %v12108_v29, %v12114_v58  ;;  %v4987_v10 = vunpack.i.h.bf16 %v12115_v28  ;;  %v1054_v48 = vsel %vm112_vm15, %v1038_v11, 0.0  ;;  %v4981_v55 = vunpack.i.l.bf16 %v12116_v1  ;;  %2143 = vrot.lane.b32.xlu1 %v6096_v53, %s11517_s26  ;;  %12118 = vst [vmem:[#allocation131_spill] sm:$0xff] %v7594_v7  ;;  %v12119_v29 = vld [vmem:[#allocation105_spill] sm:$0xff]  ;;  %v12125_v7 = vld [vmem:[#allocation126_spill] sm:$0xff]  ;;  %s12405_s26 = smov 110  }
 0x37a   :  { %v1130_v34 = vsel %vm119_vm6, %v1114_v4, 0.0  ;;  %v1040_v50 = vsel %vm12107_vm8, %v12110_v33, %v12117_v56  ;;  %v1156_v58 = vmul.f32 %v12119_v29, %v1132_v30  ;;  %v1157_v39 = vmul.f32 %v12119_v29, %v1133_v16  ;;  %v61_v4 = vld [vmem:[%s11149_s4 + $0x10] sm:$0xff]  ;;  %v12120_v33 = vld [vmem:[#allocation51_spill] sm:$0xff] }
 0x37b   :  { %v1055_v11 = vsel %vm111_vm9, %v1039_v23, 0.0  ;;  %v4986_v35 = vunpack.i.l.bf16 %v12115_v28  ;;  %vm11450_vm10 = vcmask 7168   ;;  %v1007_v56 = vadd.f32 %v999_v2, %v927_v40  ;;  %v12123_v23 = vld [vmem:[#allocation104_spill] sm:$0xff]  ;;  %v12126_v2 = vld [vmem:[#allocation106_spill] sm:$0xff] }
 0x37c   :  { %v7605_v26 = vmul.f32 %v12120_v33, %v1053_v19  ;;  %v4982_v8 = vunpack.i.h.bf16 %v12116_v1  ;;  %v1131_v30 = vsel %vm12109_vm11, %v1115_v13, 0.0  ;;  %v7611_v16 = vmul.f32 %v12120_v33, %v1054_v48  ;;  %v12129_v48 = vld [vmem:[#allocation140_spill] sm:$0xff]  ;;  %v7629_v33 = vpop.permute.xlu0 %2127 }
 0x37d   :  { %v7614_v29 = vmul.f32 %v12123_v23, %v1130_v34  ;;  %v1056_v28 = vsel %vm112_vm15, %v1040_v50, 0.0  ;;  %v1197_v40 = vsel %vm11451_vm7, %v4987_v10, %v12125_v7  ;;  %v1079_v19 = vmul.f32 %v12126_v2, %v1055_v11  ;;  %12130 = vst [vmem:[#allocation99_spill] sm:$0xff] %v7629_v33  ;;  %2380 = vperm.xlu1 %5136, %v61_v4   ;;  %v7631_v50 = vpop.permute.xlu1 %5096 }
 0x37e   :  { %12121 = vst [vmem:[#allocation73_spill] sm:$0xff] %v7605_v26  ;;  %12122 = vst [vmem:[#allocation75_spill] sm:$0xff] %v7611_v16  ;;  %v1118_v1 = vsel %vm11452_vm12, %v4981_v55, %v12127_v17  ;;  %v12128_v26 = vld [vmem:[#allocation122_spill] sm:$0xff]  ;;  %v1198_v34 = vsel %vm11451_vm7, %v12125_v7, %v12129_v48  ;;  %v7634_v10 = vmul.f32 %v12123_v23, %v1131_v30  ;;  %v12133_v16 = vld [vmem:[#allocation124_spill] sm:$0xff]  ;;  %v1213_v4 = vsel %vm87_vm5, %v1197_v40, 0.0 }
 0x37f   :  { %12124 = vst [vmem:[#allocation32_spill] sm:$0xff] %v7614_v29  ;;  %v1119_v13 = vsel %vm11452_vm12, %v12127_v17, %v12128_v26  ;;  %12131 = vst [vmem:[#allocation91_spill] sm:$0xff] %v7631_v50  ;;  %v1164_v11 = vadd.f32 %v1156_v58, %v7324_v42  ;;  %v1165_v55 = vadd.f32 %v1157_v39, %v7403_v27  ;;  %v12134_v26 = vld [vmem:[#allocation127_spill] sm:$0xff]  ;;  %v12136_v48 = vld [vmem:[#allocation138_spill] sm:$0xff]  ;;  %vm11464_vm8 = vcmask 1039360  }
 0x380   :  { %12132 = vst [vmem:[#allocation94_spill] sm:$0xff] %v7634_v10  ;;  %v1195_v61 = vsel %vm11451_vm7, %v4986_v35, %v12133_v16  ;;  %v7642_v17 = vmul.f32 %v12134_v26, %v5901_v63  ;;  %v1080_v7 = vmul.f32 %v12126_v2, %v1056_v28  ;;  %v1196_v30 = vsel %vm11451_vm7, %v12133_v16, %v12136_v48  ;;  %v12138_v58 = vld [vmem:[#allocation133_spill] sm:$0xff]  ;;  %v12139_v40 = vld [vmem:[#allocation152_spill] sm:$0xff]  ;;  %v7687_v50 = vpop.permute.xlu0 %2131 }
 0x381   :  { %v7652_v42 = vmul.f32 %v12134_v26, %v12092_v59  ;;  %v1134_v35 = vsel %vm119_vm6, %v1118_v1, 0.0  ;;  %v1135_v63 = vsel %vm12109_vm11, %v1119_v13, 0.0  ;;  %v1214_v27 = vsel %vm88_vm13, %v1198_v34, 0.0  ;;  %v12140_v48 = vld [vmem:[#allocation53_spill] sm:$0xff]  ;;  %v7669_v1 = vpop.permute.xlu1 %1971  ;;  %v12142_v34 = vld [vmem:[#allocation111_spill] sm:$0xff]  ;;  %12147 = vst [vmem:[#allocation78_spill] sm:$0xff] %v7687_v50 }
 0x382   :  { %12135 = vst [vmem:[#allocation29_spill] sm:$0xff] %v7642_v17  ;;  %v1087_v39 = vadd.f32 %v1079_v19, %v1006_v38  ;;  %v7662_v28 = vmul.f32 %v12138_v58, %v12104_v46  ;;  %v1211_v16 = vsel %vm87_vm5, %v1195_v61, 0.0  ;;  %v5000_v59 = vunpack.i.h.bf16 %v12139_v40  ;;  %2226 = vrot.lane.b32.xlu1 %v12140_v48, %s11515_s25  ;;  %12141 = vst [vmem:[#allocation77_spill] sm:$0xff] %v7669_v1  ;;  %v12143_v19 = vld [vmem:[#allocation146_spill] sm:$0xff]  ;;  %v12144_v26 = vld [vmem:[#allocation109_spill] sm:$0xff]  ;;  %s12404_s25 = smov 112  }
 0x383   :  { %12137 = vst [vmem:[#allocation76_spill] sm:$0xff] %v7652_v42  ;;  %v7673_v13 = vmul.f32 %v12138_v58, %v6002_v47  ;;  %v1237_v38 = vmul.f32 %v12142_v34, %v1213_v4  ;;  %v1212_v46 = vsel %vm88_vm13, %v1196_v30, 0.0  ;;  %v1120_v2 = vsel %vm11452_vm12, %v4982_v8, %v12143_v19  ;;  %v12148_v47 = vld [vmem:[#allocation135_spill] sm:$0xff]  ;;  %v12151_v17 = vld [vmem:[#allocation156_spill] sm:$0xff]  ;;  %v12152_v8 = vld [vmem:[#allocation141_spill] sm:$0xff] }
 0x384   :  { %v1088_v61 = vadd.f32 %v1080_v7, %v1007_v56  ;;  %v7681_v23 = vmul.f32 %v12144_v26, %v1134_v35  ;;  %v7684_v33 = vmul.f32 %v12144_v26, %v1135_v63  ;;  %v1238_v1 = vmul.f32 %v12142_v34, %v1214_v27  ;;  %v12149_v42 = vld [vmem:[#allocation107_spill] sm:$0xff]  ;;  %v12154_v63 = vld [vmem:[#allocation148_spill] sm:$0xff]  ;;  %v12157_v26 = vld [vmem:[#allocation157_spill] sm:$0xff] }
 0x385   :  { %v4995_v58 = vunpack.i.h.bf16 %v12148_v47  ;;  %v4994_v4 = vunpack.i.l.bf16 %v12148_v47  ;;  %v7692_v30 = vmul.f32 %v12149_v42, %v1211_v16  ;;  %v1279_v56 = vsel %vm11450_vm10, %v12152_v8, %v12151_v17  ;;  %v7709_v16 = vpop.permute.xlu1 %2183  ;;  %v12156_v34 = vld [vmem:[#allocation147_spill] sm:$0xff] }
 0x386   :  { %12145 = vst [vmem:[#allocation41_spill] sm:$0xff] %v7681_v23  ;;  %12146 = vst [vmem:[#allocation100_spill] sm:$0xff] %v7684_v33  ;;  %v7698_v7 = vmul.f32 %v12149_v42, %v1212_v46  ;;  %v1136_v35 = vsel %vm119_vm6, %v1120_v2, 0.0  ;;  %v1121_v27 = vsel %vm11452_vm12, %v12143_v19, %v12154_v63  ;;  %v1278_v47 = vsel %vm11450_vm10, %v5000_v59, %v12152_v8  ;;  %v62_v2 = vld [vmem:[%s11149_s4 + $0x18] sm:$0xff]  ;;  %v12158_v63 = vld [vmem:[#allocation142_spill] sm:$0xff]  ;;  %s12403_s4 = smov 113  }
 0x387   :  { %12150 = vst [vmem:[#allocation79_spill] sm:$0xff] %v7692_v30  ;;  %2301 = vrot.lane.b32.xlu1 %v12013_v6, %s11513_s24  ;;  %12155 = vst [vmem:[#allocation39_spill] sm:$0xff] %v7709_v16  ;;  %v5007_v17 = vunpack.i.h.bf16 %v12156_v34  ;;  %v4999_v46 = vunpack.i.l.bf16 %v12139_v40  ;;  %v5015_v42 = vunpack.i.h.bf16 %v12157_v26  ;;  %v1245_v50 = vadd.f32 %v1237_v38, %v1164_v11  ;;  %v12161_v40 = vld [vmem:[#allocation113_spill] sm:$0xff]  ;;  %v12168_v23 = vld [vmem:[#allocation110_spill] sm:$0xff] }
 0x388   :  { %12153 = vst [vmem:[#allocation81_spill] sm:$0xff] %v7698_v7  ;;  %v1246_v19 = vadd.f32 %v1238_v1, %v1165_v55  ;;  %v7719_v59 = vmul.f32 %v12158_v63, %v12064_v14  ;;  %v7723_v8 = vmul.f32 %v12158_v63, %v12013_v6  ;;  %v1295_v16 = vsel %vm96_vm14, %v1279_v56, 0.0  ;;  %v12162_v55 = vld [vmem:[#allocation162_spill] sm:$0xff]  ;;  %v12163_v14 = vld [vmem:[#allocation143_spill] sm:$0xff]  ;;  %v12165_v63 = vld [vmem:[#allocation137_spill] sm:$0xff] }
 0x389   :  { %v1160_v33 = vmul.f32 %v12161_v40, %v1136_v35  ;;  %v1137_v11 = vsel %vm12109_vm11, %v1121_v27, 0.0  ;;  %v1294_v38 = vsel %vm95_vm4, %v1278_v47, 0.0  ;;  %v1201_v1 = vsel %vm11451_vm7, %v4995_v58, %v12162_v55  ;;  %v12164_v56 = vld [vmem:[#allocation150_spill] sm:$0xff]  ;;  %v12167_v47 = vld [vmem:[#allocation139_spill] sm:$0xff]  ;;  %v7756_v29 = vpop.permute.xlu1 %2256 }
 0x38a   :  { %12159 = vst [vmem:[#allocation80_spill] sm:$0xff] %v7719_v59  ;;  %12160 = vst [vmem:[#allocation42_spill] sm:$0xff] %v7723_v8  ;;  %v7736_v59 = vmul.f32 %v12163_v14, %v6096_v53  ;;  %v7740_v6 = vmul.f32 %v12163_v14, %v12140_v48  ;;  %v1199_v35 = vsel %vm11451_vm7, %v4994_v4, %v12164_v56  ;;  %v7747_v8 = vpop.permute.xlu0 %2268  ;;  %v12169_v7 = vld [vmem:[#allocation159_spill] sm:$0xff]  ;;  %v12170_v14 = vld [vmem:[#allocation172_spill] sm:$0xff]  ;;  %vm11490_vm11 = vcmask 1031168  }
 0x38b   :  { %v1200_v27 = vsel %vm11451_vm7, %v12164_v56, %v12165_v63  ;;  %12166 = vst [vmem:[#allocation93_spill] sm:$0xff] %v7747_v8  ;;  %2385 = vperm.xlu1 %5136, %v62_v2   ;;  %v1276_v58 = vsel %vm11450_vm10, %v4999_v46, %v12167_v47  ;;  %v1319_v53 = vmul.f32 %v12168_v23, %v1295_v16  ;;  %12171 = vst [vmem:[#allocation101_spill] sm:$0xff] %v7756_v29  ;;  %v12172_v56 = vld [vmem:[#allocation164_spill] sm:$0xff] }
 0x38c   :  { %v1424_v30 = vsel %vm11464_vm8, %v12169_v7, %v5015_v42  ;;  %v1282_v10 = vsel %vm11450_vm10, %v5007_v17, %v12170_v14  ;;  %v1161_v4 = vmul.f32 %v12161_v40, %v1137_v11  ;;  %v1318_v63 = vmul.f32 %v12168_v23, %v1294_v38  ;;  %v12173_v38 = vld [vmem:[#allocation154_spill] sm:$0xff] }
 0x38d   :  { %v1217_v2 = vsel %vm87_vm5, %v1201_v1, 0.0  ;;  %v1202_v46 = vsel %vm11451_vm7, %v12162_v55, %v12172_v56  ;;  %v1168_v16 = vadd.f32 %v1160_v33, %v1087_v39  ;;  %v5006_v8 = vunpack.i.l.bf16 %v12156_v34  ;;  %v12174_v34 = vld [vmem:[#allocation125_spill] sm:$0xff]  ;;  %v12180_v40 = vld [vmem:[#allocation166_spill] sm:$0xff] }
 0x38e   :  { %v1215_v42 = vsel %vm87_vm5, %v1199_v35, 0.0  ;;  %v1216_v17 = vsel %vm88_vm13, %v1200_v27, 0.0  ;;  %v1292_v11 = vsel %vm95_vm4, %v1276_v58, 0.0  ;;  %v1277_v1 = vsel %vm11450_vm10, %v12167_v47, %v12173_v38  ;;  %v12175_v27 = vld [vmem:[#allocation174_spill] sm:$0xff]  ;;  %v7787_v47 = vpop.permute.xlu1 %1900 }
 0x38f   :  { %v1440_v23 = vsel %vm112_vm15, %v1424_v30, 0.0  ;;  %v1298_v33 = vsel %vm95_vm4, %v1282_v10, 0.0  ;;  %2307 = vrot.lane.b32.xlu1 %v12140_v48, %s11513_s24  ;;  %v1327_v39 = vadd.f32 %v1319_v53, %v1246_v19  ;;  %v1241_v55 = vmul.f32 %v12174_v34, %v1217_v2  ;;  %12176 = vst [vmem:[#allocation83_spill] sm:$0xff] %v7787_v47  ;;  %v12177_v30 = vld [vmem:[#allocation108_spill] sm:$0xff]  ;;  %v7795_v19 = vpop.permute.xlu0 %392  ;;  %v12179_v2 = vld [vmem:[#allocation130_spill] sm:$0xff]  ;;  %v12237_v47 = vld [vmem:[#allocation97_spill] sm:$0xff] }
 0x390   :  { %v1218_v35 = vsel %vm88_vm13, %v1202_v46, 0.0  ;;  %v1283_v58 = vsel %vm11450_vm10, %v12170_v14, %v12175_v27  ;;  %v1169_v56 = vadd.f32 %v1161_v4, %v1088_v61  ;;  %v7790_v38 = vmul.f32 %v12177_v30, %v1215_v42  ;;  %12178 = vst [vmem:[#allocation102_spill] sm:$0xff] %v7795_v19  ;;  %v12181_v27 = vld [vmem:[#allocation128_spill] sm:$0xff]  ;;  %v12182_v4 = vld [vmem:[#allocation115_spill] sm:$0xff] }
 0x391   :  { %v7793_v10 = vmul.f32 %v12177_v30, %v1216_v17  ;;  %v1326_v48 = vadd.f32 %v1318_v63, %v1245_v50  ;;  %v1293_v53 = vsel %vm96_vm14, %v1277_v1, 0.0  ;;  %v1464_v46 = vmul.f32 %v12179_v2, %v1440_v23  ;;  %v12183_v30 = vld [vmem:[#allocation149_spill] sm:$0xff] }
 0x392   :  { %v1280_v14 = vsel %vm11450_vm10, %v5006_v8, %v12180_v40  ;;  %v1322_v61 = vmul.f32 %v12181_v27, %v1298_v33  ;;  %v7804_v42 = vmul.f32 %v12182_v4, %v1292_v11  ;;  %v1242_v17 = vmul.f32 %v12174_v34, %v1218_v35  ;;  %v7816_v33 = vpop.permute.xlu1 %1902  ;;  %v12186_v34 = vld [vmem:[#allocation176_spill] sm:$0xff] }
 0x393   :  { %v1281_v50 = vsel %vm11450_vm10, %v12180_v40, %v12183_v30  ;;  %v1299_v63 = vsel %vm96_vm14, %v1283_v58, 0.0  ;;  %v1367_v1 = vadd.f32 %v7673_v13, %v1327_v39  ;;  %v5014_v23 = vunpack.i.l.bf16 %v12157_v26  ;;  %12184 = vst [vmem:[#allocation84_spill] sm:$0xff] %v7816_v33  ;;  %v12185_v39 = vld [vmem:[#allocation163_spill] sm:$0xff] }
 0x394   :  { %v1249_v29 = vadd.f32 %v1241_v55, %v1168_v16  ;;  %v410_v8 = vmul.f32 %v7795_v19, %v7062_v5  ;;  %v7819_v11 = vmul.f32 %v12182_v4, %v1293_v53  ;;  %v1296_v35 = vsel %vm95_vm4, %v1280_v14, 0.0  ;;  %v12187_v14 = vld [vmem:[#allocation155_spill] sm:$0xff] }
 0x395   :  { %v1366_v40 = vadd.f32 %v7662_v28, %v1326_v48  ;;  %v411_v58 = vmul.f32 %v7795_v19, %v7170_v60  ;;  %v7826_v13 = vadd.f32 %v1464_v46, %v1367_v1  ;;  %v1297_v26 = vsel %vm96_vm14, %v1281_v50, 0.0  ;;  %v12188_v48 = vld [vmem:[#allocation118_spill] sm:$0xff] }
 0x396   :  { %v1330_v16 = vadd.f32 %v1322_v61, %v1249_v29  ;;  %v1323_v5 = vmul.f32 %v12181_v27, %v1299_v63  ;;  %v5022_v55 = vunpack.i.h.bf16 %v12185_v39  ;;  %v5021_v30 = vunpack.i.l.bf16 %v12185_v39  ;;  %v12189_v46 = vld [vmem:[#allocation178_spill] sm:$0xff]  ;;  %v7845_v50 = vpop.permute.xlu1 %1977  ;;  %v12197_v63 = vld [vmem:[#allocation184_spill] sm:$0xff] }
 0x397   :  { %v1250_v53 = vadd.f32 %v1242_v17, %v1169_v56  ;;  %v1421_v28 = vsel %vm11464_vm8, %v12187_v14, %v12186_v34  ;;  %v7837_v4 = vmul.f32 %v12188_v48, %v1296_v35  ;;  %v1422_v60 = vsel %vm11464_vm8, %v12186_v34, %v5014_v23  ;;  %12190 = vst [vmem:[#allocation85_spill] sm:$0xff] %v7845_v50  ;;  %v12191_v17 = vld [vmem:[#allocation175_spill] sm:$0xff]  ;;  %v12192_v1 = vld [vmem:[#allocation190_spill] sm:$0xff]  ;;  %v12199_v34 = vld [vmem:[#allocation188_spill] sm:$0xff] }
 0x398   :  { %v1423_v29 = vsel %vm11464_vm8, %v12189_v46, %v12169_v7  ;;  %v503_v61 = vadd.f32 %v7122_v51, %v410_v8  ;;  %v7848_v56 = vmul.f32 %v12188_v48, %v1297_v26  ;;  %v5026_v39 = vunpack.i.l.bf16 %v12192_v1  ;;  %v7859_v51 = vpop.permute.xlu0 %402 }
 0x399   :  { %v504_v35 = vadd.f32 %v7210_v52, %v411_v58  ;;  %v1331_v14 = vadd.f32 %v1323_v5, %v1250_v53  ;;  %v1437_v23 = vsel %vm111_vm9, %v1421_v28, 0.0  ;;  %v7857_v7 = vadd.f32 %v7736_v59, %v1330_v16  ;;  %12193 = vst [vmem:[#allocation82_spill] sm:$0xff] %v7859_v51  ;;  %v12194_v52 = vld [vmem:[#allocation192_spill] sm:$0xff]  ;;  %v12195_v58 = vld [vmem:[#allocation167_spill] sm:$0xff]  ;;  %v12196_v53 = vld [vmem:[#allocation186_spill] sm:$0xff] }
 0x39a   :  { %v1438_v8 = vsel %vm112_vm15, %v1422_v60, 0.0  ;;  %v1439_v26 = vsel %vm111_vm9, %v1423_v29, 0.0  ;;  %v5027_v46 = vunpack.i.h.bf16 %v12192_v1  ;;  %v1504_v5 = vsel %vm11490_vm11, %v12195_v58, %v12194_v52  ;;  %v12198_v16 = vld [vmem:[#allocation165_spill] sm:$0xff]  ;;  %v7878_v29 = vpop.permute.xlu1 %2044 }
 0x39b   :  { %v1425_v28 = vsel %vm11464_vm8, %v12197_v63, %v12196_v53  ;;  %v1426_v59 = vsel %vm11464_vm8, %v12196_v53, %v5021_v30  ;;  %v1502_v60 = vsel %vm11490_vm11, %v12199_v34, %v12198_v16  ;;  %v588_v27 = vadd.f32 %v7058_v32, %v503_v61  ;;  %12200 = vst [vmem:[#allocation96_spill] sm:$0xff] %v7878_v29  ;;  %v12239_v29 = vld [vmem:[#allocation214_spill] sm:$0xff] }
 0x39c   :  { %v1503_v1 = vsel %vm11490_vm11, %v12198_v16, %v5026_v39  ;;  %v1505_v58 = vsel %vm11490_vm11, %v12194_v52, %v5027_v46  ;;  %vm11488_vm10 = vcmask 932864   ;;  %v589_v63 = vadd.f32 %v7195_v62, %v504_v35  ;;  %v12201_v39 = vld [vmem:[#allocation144_spill] sm:$0xff] }
 0x39d   :  { %v414_v30 = vmul.f32 %v7859_v51, %v7369_v25  ;;  %v7888_v53 = vadd.f32 %v7740_v6, %v1331_v14  ;;  %v1463_v34 = vmul.f32 %v12179_v2, %v1439_v26  ;;  %v1520_v32 = vsel %vm119_vm6, %v1504_v5, 0.0  ;;  %v12206_v52 = vld [vmem:[#allocation200_spill] sm:$0xff]  ;;  %v12207_v5 = vld [vmem:[#allocation198_spill] sm:$0xff]  ;;  %v12208_v2 = vld [vmem:[#allocation71_spill] sm:$0xff] }
 0x39e   :  { %v415_v61 = vmul.f32 %v7859_v51, %v7463_v45  ;;  %v7896_v16 = vmul.f32 %v12201_v39, %v1437_v23  ;;  %v7899_v46 = vmul.f32 %v12201_v39, %v1438_v8  ;;  %v1441_v62 = vsel %vm111_vm9, %v1425_v28, 0.0  ;;  %v7912_v23 = vpop.permute.xlu1 %5108  ;;  %v12205_v8 = vld [vmem:[#allocation145_spill] sm:$0xff]  ;;  %v12209_v51 = vld [vmem:[#allocation158_spill] sm:$0xff] }
 0x39f   :  { %v1442_v25 = vsel %vm112_vm15, %v1426_v59, 0.0  ;;  %v1518_v6 = vsel %vm119_vm6, %v1502_v60, 0.0  ;;  %vm12202_vm7 = vcmp.lt.s32.totalorder %v7034_v44, 16  ;;  %v673_v14 = vadd.f32 %v7130_v12, %v588_v27  ;;  %12204 = vst [vmem:[#allocation86_spill] sm:$0xff] %v7912_v23  ;;  %v12210_v27 = vld [vmem:[#allocation187_spill] sm:$0xff] }
 0x3a0   :  { %v1519_v35 = vsel %vm12202_vm7, %v1503_v1, 0.0  ;;  %vm12203_vm12 = vmmov %vm12202_vm7  ;;  %v1544_v26 = vmul.f32 %v12205_v8, %v1520_v32  ;;  %v1427_v28 = vsel %vm11464_vm8, %v12207_v5, %v12206_v52  ;;  %v674_v59 = vadd.f32 %v7219_v3, %v589_v63  ;;  %v12215_v5 = vld [vmem:[#allocation64_spill] sm:$0xff] }
 0x3a1   :  { %v1521_v45 = vsel %vm12203_vm12, %v1505_v58, 0.0  ;;  %v507_v60 = vadd.f32 %v12208_v2, %v414_v30  ;;  %v1471_v48 = vadd.f32 %v1463_v34, %v1366_v40  ;;  %v7921_v1 = vmul.f32 %v12209_v51, %v1441_v62  ;;  %v12211_v2 = vld [vmem:[#allocation160_spill] sm:$0xff] }
 0x3a2   :  { %v7924_v58 = vmul.f32 %v12209_v51, %v1442_v25  ;;  %v508_v12 = vadd.f32 %v7491_v41, %v415_v61  ;;  %v1545_v19 = vmul.f32 %v12205_v8, %v1521_v45  ;;  %v1428_v3 = vsel %vm11464_vm8, %v12206_v52, %v5022_v55  ;;  %v12212_v41 = vld [vmem:[#allocation258_spill] sm:$0xff]  ;;  %v7941_v61 = vpop.permute.xlu1 %2052  ;;  %v12216_v55 = vld [vmem:[#allocation88_spill] sm:$0xff]  ;;  %v12218_v8 = vld [vmem:[#allocation179_spill] sm:$0xff] }
 0x3a3   :  { %vm11498_vm7 = vcmask 908288   ;;  %v7933_v40 = vmul.f32 %v12211_v2, %v1518_v6  ;;  %v7936_v63 = vmul.f32 %v12211_v2, %v1519_v35  ;;  %v1443_v30 = vsel %vm111_vm9, %v1427_v28, 0.0  ;;  %12213 = vst [vmem:[#allocation112_spill] sm:$0xff] %v7941_v61  ;;  %v12214_v25 = vld [vmem:[#allocation206_spill] sm:$0xff]  ;;  %v12217_v32 = vld [vmem:[#allocation208_spill] sm:$0xff] }
 0x3a4   :  { %v758_v34 = vadd.f32 %v12212_v41, %v673_v14  ;;  %v1552_v62 = vadd.f32 %v1544_v26, %v1471_v48  ;;  %v5039_v45 = vunpack.i.h.bf16 %v12214_v25  ;;  %v759_v39 = vadd.f32 %v12215_v5, %v674_v59  ;;  %v12219_v48 = vld [vmem:[#allocation199_spill] sm:$0xff]  ;;  %v12220_v51 = vld [vmem:[#allocation168_spill] sm:$0xff]  ;;  %v12222_v5 = vld [vmem:[#allocation173_spill] sm:$0xff] }
 0x3a5   :  { %v592_v52 = vadd.f32 %v12216_v55, %v507_v60  ;;  %v1444_v6 = vsel %vm112_vm15, %v1428_v3, 0.0  ;;  %v5038_v35 = vunpack.i.l.bf16 %v12214_v25  ;;  %v1585_v28 = vsel %vm11488_vm10, %v12218_v8, %v12217_v32  ;;  %v12221_v60 = vld [vmem:[#allocation202_spill] sm:$0xff]  ;;  %v12224_v55 = vld [vmem:[#allocation177_spill] sm:$0xff] }
 0x3a6   :  { %v593_v14 = vadd.f32 %v7526_v57, %v508_v12  ;;  %v1553_v41 = vadd.f32 %v1545_v19, %v7826_v13  ;;  %v1467_v2 = vmul.f32 %v12220_v51, %v1443_v30  ;;  %v1586_v59 = vsel %vm11488_vm10, %v12217_v32, %v5039_v45  ;;  %v12225_v57 = vld [vmem:[#allocation204_spill] sm:$0xff]  ;;  %v12226_v13 = vld [vmem:[#allocation263_spill] sm:$0xff]  ;;  %v7969_v26 = vpop.permute.xlu1 %2264 }
 0x3a7   :  { %v1506_v3 = vsel %vm11490_vm11, %v12222_v5, %v12221_v60  ;;  %v12223_v25 = vunpack.i.l.bf16 %v12191_v17  ;;  %v1583_v19 = vsel %vm11488_vm10, %v12225_v57, %v12224_v55  ;;  %v839_v12 = vadd.f32 %v12226_v13, %v758_v34  ;;  %12227 = vst [vmem:[#allocation22_spill] sm:$0xff] %v7969_v26  ;;  %v12228_v45 = vld [vmem:[#allocation59_spill] sm:$0xff]  ;;  %v12236_v26 = vld [vmem:[#allocation68_spill] sm:$0xff] }
 0x3a8   :  { %v1468_v30 = vmul.f32 %v12220_v51, %v1444_v6  ;;  %v1601_v32 = vsel %vm87_vm5, %v1585_v28, 0.0  ;;  %vm11484_vm12 = vcmask 924672   ;;  %v840_v5 = vadd.f32 %v12228_v45, %v759_v39  ;;  %v12229_v57 = vld [vmem:[#allocation211_spill] sm:$0xff]  ;;  %v12233_v45 = vld [vmem:[#allocation213_spill] sm:$0xff] }
 0x3a9   :  { %v1507_v8 = vsel %vm11490_vm11, %v12221_v60, %v12223_v25  ;;  %v677_v50 = vadd.f32 %v7447_v9, %v592_v52  ;;  %v1584_v60 = vsel %vm11488_vm10, %v12224_v55, %v5038_v35  ;;  %v1602_v25 = vsel %vm88_vm13, %v1586_v59, 0.0  ;;  %v12231_v52 = vld [vmem:[#allocation153_spill] sm:$0xff]  ;;  %v12232_v55 = vld [vmem:[#allocation215_spill] sm:$0xff] }
 0x3aa   :  { %v5070_v34 = vunpack.i.h.bf16 %v12229_v57  ;;  %v678_v13 = vadd.f32 %v7532_v20, %v593_v14  ;;  %v1522_v28 = vsel %vm119_vm6, %v1506_v3, 0.0  ;;  %vm12230_vm8 = vcmp.lt.s32.totalorder %v7034_v44, 16  ;;  %v12235_v14 = vld [vmem:[#allocation260_spill] sm:$0xff]  ;;  %v8003_v33 = vpop.permute.xlu1 %2337 }
 0x3ab   :  { %v1523_v39 = vsel %vm12230_vm8, %v1507_v8, 0.0  ;;  %v1599_v9 = vsel %vm87_vm5, %v1583_v19, 0.0  ;;  %v1625_v35 = vmul.f32 %v12231_v52, %v1601_v32  ;;  %v1508_v59 = vsel %vm11490_vm11, %v12233_v45, %v12232_v55  ;;  %12238 = vst [vmem:[#allocation87_spill] sm:$0xff] %v8003_v33 }
 0x3ac   :  { %v12234_v51 = vunpack.i.h.bf16 %v12191_v17  ;;  %v920_v6 = vadd.f32 %v12235_v14, %v839_v12  ;;  %v1600_v3 = vsel %vm88_vm13, %v1584_v60, 0.0  ;;  %v1626_v8 = vmul.f32 %v12231_v52, %v1602_v25 }
 0x3ad   :  { %v921_v19 = vadd.f32 %v12236_v26, %v840_v5  ;;  %v762_v32 = vadd.f32 %v12237_v47, %v677_v50  ;;  %v1475_v45 = vadd.f32 %v1467_v2, %v7857_v7  ;;  %v1476_v17 = vadd.f32 %v1468_v30, %v7888_v53  ;;  %v8020_v7 = vpop.permute.xlu0 %2064  ;;  %v12241_v53 = vld [vmem:[#allocation170_spill] sm:$0xff]  ;;  %v12242_v30 = vld [vmem:[#allocation56_spill] sm:$0xff] }
 0x3ae   :  { %v1509_v20 = vsel %vm11490_vm11, %v12232_v55, %v12234_v51  ;;  %v1829_v51 = vsel %vm11498_vm7, %v12239_v29, %v5070_v34  ;;  %v763_v12 = vadd.f32 %v7535_v31, %v678_v13  ;;  %v12240_v55 = vld [vmem:[#allocation151_spill] sm:$0xff]  ;;  %v1524_v47 = vsel %vm119_vm6, %v1508_v59, 0.0  ;;  %v12243_v13 = vld [vmem:[#allocation66_spill] sm:$0xff]  ;;  %v8035_v59 = vpop.permute.xlu1 %1981 }
 0x3af   :  { %v8011_v14 = vmul.f32 %v12240_v55, %v1522_v28  ;;  %v8014_v60 = vmul.f32 %v12240_v55, %v1523_v39  ;;  %v1525_v50 = vsel %vm12230_vm8, %v1509_v20, 0.0  ;;  %v8023_v2 = vmul.f32 %v12241_v53, %v1599_v9  ;;  %12244 = vst [vmem:[#allocation123_spill] sm:$0xff] %v8035_v59  ;;  %v12245_v20 = vld [vmem:[#allocation180_spill] sm:$0xff]  ;;  %v12254_v9 = vld [vmem:[#allocation191_spill] sm:$0xff]  ;;  %v12255_v55 = vld [vmem:[#allocation261_spill] sm:$0xff] }
 0x3b0   :  { %v8026_v26 = vmul.f32 %v12241_v53, %v1600_v3  ;;  %v1633_v31 = vadd.f32 %v1625_v35, %v1552_v62  ;;  %v1000_v5 = vadd.f32 %v12242_v30, %v920_v6  ;;  %v8029_v25 = vadd.f32 %v1626_v8, %v1553_v41  ;;  %v12246_v6 = vld [vmem:[#allocation217_spill] sm:$0xff]  ;;  %v12250_v30 = vld [vmem:[#allocation195_spill] sm:$0xff] }
 0x3b1   :  { %v1845_v34 = vsel %vm112_vm15, %v1829_v51, 0.0  ;;  %v1001_v28 = vadd.f32 %v12243_v13, %v921_v19  ;;  %v843_v39 = vadd.f32 %v7459_v43, %v762_v32  ;;  %v1548_v52 = vmul.f32 %v12245_v20, %v1524_v47  ;;  %v12247_v41 = vld [vmem:[#allocation185_spill] sm:$0xff]  ;;  %v12249_v43 = vld [vmem:[#allocation220_spill] sm:$0xff]  ;;  %v12257_v53 = vld [vmem:[#allocation227_spill] sm:$0xff]  ;;  %v8067_v61 = vpop.permute.xlu0 %2208 }
 0x3b2   :  { %v1549_v3 = vmul.f32 %v12245_v20, %v1525_v50  ;;  %v844_v62 = vadd.f32 %v7543_v22, %v763_v12  ;;  %v1587_v35 = vsel %vm11488_vm10, %v12247_v41, %v12246_v6  ;;  %v12248_v8 = vunpack.i.l.bf16 %v12210_v27  ;;  %v12251_v47 = vld [vmem:[#allocation189_spill] sm:$0xff]  ;;  %v12252_v50 = vld [vmem:[#allocation218_spill] sm:$0xff]  ;;  %12259 = vst [vmem:[#allocation116_spill] sm:$0xff] %v8067_v61 }
 0x3b3   :  { %v5051_v32 = vunpack.i.h.bf16 %v12249_v43  ;;  %v5050_v51 = vunpack.i.l.bf16 %v12249_v43  ;;  %v8051_v13 = vmul.f32 %v12250_v30, %v1845_v34  ;;  %v1664_v22 = vsel %vm11484_vm12, %v12252_v50, %v12251_v47  ;;  %v12253_v12 = vld [vmem:[#allocation222_spill] sm:$0xff]  ;;  %v8069_v50 = vpop.permute.xlu1 %1983 }
 0x3b4   :  { %v1588_v19 = vsel %vm11488_vm10, %v12246_v6, %v12248_v8  ;;  %v1666_v41 = vsel %vm11484_vm12, %v12254_v9, %v12253_v12  ;;  %v1081_v20 = vadd.f32 %v12255_v55, %v1000_v5  ;;  %v12256_v8 = vld [vmem:[#allocation229_spill] sm:$0xff]  ;;  %vm11501_vm8 = vcmask 916480   ;;  %v12258_v34 = vld [vmem:[#allocation90_spill] sm:$0xff]  ;;  %12260 = vst [vmem:[#allocation103_spill] sm:$0xff] %v8069_v50 }
 0x3b5   :  { %v1667_v6 = vsel %vm11484_vm12, %v12253_v12, %v5051_v32  ;;  %v1589_v43 = vsel %vm11488_vm10, %v12257_v53, %v12256_v8  ;;  %v1082_v59 = vadd.f32 %v12258_v34, %v1001_v28  ;;  %v924_v33 = vadd.f32 %v7456_v18, %v843_v39  ;;  %v12271_v34 = vld [vmem:[#allocation72_spill] sm:$0xff] }
 0x3b6   :  { %v1556_v23 = vadd.f32 %v1548_v52, %v1475_v45  ;;  %v1603_v55 = vsel %vm87_vm5, %v1587_v35, 0.0  ;;  %v1604_v5 = vsel %vm88_vm13, %v1588_v19, 0.0  ;;  %v925_v9 = vadd.f32 %v7560_v37, %v844_v62  ;;  %v12263_v62 = vld [vmem:[#allocation161_spill] sm:$0xff] }
 0x3b7   :  { %v1557_v32 = vadd.f32 %v1549_v3, %v1476_v17  ;;  %v1680_v53 = vsel %vm95_vm4, %v1664_v22, 0.0  ;;  %v1665_v18 = vsel %vm11484_vm12, %v12251_v47, %v5050_v51  ;;  %v1682_v28 = vsel %vm95_vm4, %v1666_v41, 0.0  ;;  %v12262_v17 = vld [vmem:[#allocation32_spill] sm:$0xff]  ;;  %v12266_v51 = vld [vmem:[#allocation94_spill] sm:$0xff]  ;;  %v8099_v41 = vpop.permute.xlu1 %2058 }
 0x3b8   :  { %v1683_v52 = vsel %vm96_vm14, %v1667_v6, 0.0  ;;  %v12261_v45 = vunpack.i.h.bf16 %v12210_v27  ;;  %v1605_v37 = vsel %vm87_vm5, %v1589_v43, 0.0  ;;  %v1162_v3 = vadd.f32 %v12262_v17, %v1081_v20  ;;  %v12267_v22 = vld [vmem:[#allocation92_spill] sm:$0xff]  ;;  %12268 = vst [vmem:[#allocation28_spill] sm:$0xff] %v8099_v41  ;;  %v12269_v27 = vld [vmem:[#allocation182_spill] sm:$0xff]  ;;  %v12270_v43 = vld [vmem:[#allocation171_spill] sm:$0xff] }
 0x3b9   :  { %v8092_v35 = vmul.f32 %v12263_v62, %v1603_v55  ;;  %v8095_v19 = vmul.f32 %v12263_v62, %v1604_v5  ;;  %v1163_v47 = vadd.f32 %v12266_v51, %v1082_v59  ;;  %v1004_v12 = vadd.f32 %v12267_v22, %v924_v33  ;;  %v12273_v33 = vld [vmem:[#allocation169_spill] sm:$0xff]  ;;  %v8113_v22 = vpop.permute.xlu0 %2212  ;;  %v12279_v17 = vld [vmem:[#allocation79_spill] sm:$0xff] }
 0x3ba   :  { %v1590_v39 = vsel %vm11488_vm10, %v12256_v8, %v12261_v45  ;;  %v8102_v6 = vmul.f32 %v12269_v27, %v1680_v53  ;;  %v1681_v8 = vsel %vm96_vm14, %v1665_v18, 0.0  ;;  %v1706_v20 = vmul.f32 %v12270_v43, %v1682_v28  ;;  %v12272_v45 = vld [vmem:[#allocation224_spill] sm:$0xff]  ;;  %12274 = vst [vmem:[#allocation119_spill] sm:$0xff] %v8113_v22  ;;  %v12275_v53 = vld [vmem:[#allocation230_spill] sm:$0xff]  ;;  %v12276_v62 = vld [vmem:[#allocation197_spill] sm:$0xff] }
 0x3bb   :  { %12264 = vst [vmem:[#allocation117_spill] sm:$0xff] %v8092_v35  ;;  %12265 = vst [vmem:[#allocation50_spill] sm:$0xff] %v8095_v19  ;;  %v1005_v55 = vadd.f32 %v12271_v34, %v925_v9  ;;  %v1707_v5 = vmul.f32 %v12270_v43, %v1683_v52  ;;  %v1606_v59 = vsel %vm88_vm13, %v1590_v39, 0.0  ;;  %v1629_v51 = vmul.f32 %v12273_v33, %v1605_v37  ;;  %v12278_v28 = vld [vmem:[#allocation234_spill] sm:$0xff]  ;;  %v12280_v37 = vld [vmem:[#allocation81_spill] sm:$0xff]  ;;  %v8130_v0 = vpop.permute.xlu1 %2125 }
 0x3bc   :  { %v1668_v50 = vsel %vm11484_vm12, %v12276_v62, %v12275_v53  ;;  %v12277_v18 = vunpack.i.l.bf16 %v12219_v48  ;;  %v5063_v34 = vunpack.i.h.bf16 %v12278_v28  ;;  %v1243_v52 = vadd.f32 %v12279_v17, %v1162_v3  ;;  %v12281_v22 = vld [vmem:[#allocation73_spill] sm:$0xff]  ;;  %v12282_v19 = vld [vmem:[#allocation235_spill] sm:$0xff] }
 0x3bd   :  { %v8126_v39 = vmul.f32 %v12269_v27, %v1681_v8  ;;  %v1244_v41 = vadd.f32 %v12280_v37, %v1163_v47  ;;  %v1085_v61 = vadd.f32 %v12281_v22, %v1004_v12  ;;  %v1714_v62 = vadd.f32 %v1706_v20, %v1633_v31  ;;  %v12284_v31 = vld [vmem:[#allocation203_spill] sm:$0xff]  ;;  %v12286_v22 = vld [vmem:[#allocation240_spill] sm:$0xff]  ;;  %v12298_v43 = vld [vmem:[#allocation209_spill] sm:$0xff] }
 0x3be   :  { %v1669_v9 = vsel %vm11484_vm12, %v12275_v53, %v12277_v18  ;;  %v1630_v49 = vmul.f32 %v12273_v33, %v1606_v59  ;;  %v1748_v53 = vsel %vm11501_vm8, %v12282_v19, %v5063_v34  ;;  %v12283_v18 = vld [vmem:[#allocation75_spill] sm:$0xff]  ;;  %v1715_v3 = vadd.f32 %v1707_v5, %v8029_v25  ;;  %v12285_v59 = vld [vmem:[#allocation242_spill] sm:$0xff] }
 0x3bf   :  { %v1086_v35 = vadd.f32 %v12283_v18, %v1005_v55  ;;  %v1637_v17 = vadd.f32 %v1629_v51, %v1556_v23  ;;  %v1684_v8 = vsel %vm95_vm4, %v1668_v50, 0.0  ;;  %v1685_v47 = vsel %vm96_vm14, %v1669_v9, 0.0  ;;  %v12287_v25 = vld [vmem:[#allocation183_spill] sm:$0xff]  ;;  %v12289_v51 = vld [vmem:[#allocation41_spill] sm:$0xff] }
 0x3c0   :  { %v5062_v12 = vunpack.i.l.bf16 %v12278_v28  ;;  %v1747_v20 = vsel %vm11501_vm8, %v12284_v31, %v12282_v19  ;;  %v1670_v34 = vsel %vm11484_vm12, %v12286_v22, %v12285_v59  ;;  %v1324_v55 = vadd.f32 %v7804_v42, %v1243_v52  ;;  %v8155_v28 = vpop.permute.xlu0 %2137  ;;  %v8158_v19 = vpop.permute.xlu1 %5121  ;;  %v12290_v31 = vld [vmem:[#allocation194_spill] sm:$0xff]  ;;  %v12291_v52 = vld [vmem:[#allocation100_spill] sm:$0xff] }
 0x3c1   :  { %v1788_v23 = vmul.f32 %v12287_v25, %v1748_v53  ;;  %v12288_v5 = vunpack.i.h.bf16 %v12219_v48  ;;  %v1166_v9 = vadd.f32 %v12289_v51, %v1085_v61  ;;  %v1325_v37 = vadd.f32 %v7819_v11, %v1244_v41  ;;  %v12292_v53 = vld [vmem:[#allocation241_spill] sm:$0xff] }
 0x3c2   :  { %v1638_v18 = vadd.f32 %v1630_v49, %v1557_v32  ;;  %v8161_v22 = vmul.f32 %v12290_v31, %v1684_v8  ;;  %v8164_v42 = vmul.f32 %v12290_v31, %v1685_v47  ;;  %v1167_v48 = vadd.f32 %v12291_v52, %v1086_v35  ;;  %v12295_v41 = vld [vmem:[#allocation245_spill] sm:$0xff] }
 0x3c3   :  { %v1671_v50 = vsel %vm11484_vm12, %v12285_v59, %v12288_v5  ;;  %v12293_v59 = vld [vmem:[#allocation201_spill] sm:$0xff]  ;;  %v12294_v5 = vld [vmem:[#allocation232_spill] sm:$0xff]  ;;  %v1787_v51 = vmul.f32 %v12287_v25, %v1747_v20  ;;  %v1686_v11 = vsel %vm95_vm4, %v1670_v34, 0.0  ;;  %v1828_v35 = vsel %vm11498_vm7, %v12295_v41, %v12239_v29 }
 0x3c4   :  { %v1745_v61 = vsel %vm11501_vm8, %v12294_v5, %v12293_v59  ;;  %v1746_v49 = vsel %vm11501_vm8, %v12293_v59, %v5062_v12  ;;  %v1687_v32 = vsel %vm96_vm14, %v1671_v50, 0.0  ;;  %vm11509_vm12 = vcmask 900096   ;;  %v12296_v8 = vld [vmem:[#allocation29_spill] sm:$0xff]  ;;  %v12297_v5 = vld [vmem:[#allocation244_spill] sm:$0xff]  ;;  %v8187_v12 = vpop.permute.xlu1 %2133 }
 0x3c5   :  { %v1364_v47 = vadd.f32 %v12296_v8, %v1324_v55  ;;  %v1796_v52 = vadd.f32 %v1788_v23, %v1715_v3  ;;  %v1826_v20 = vsel %vm11498_vm7, %v12298_v43, %v12297_v5  ;;  %v1247_v34 = vadd.f32 %v7790_v38, %v1166_v9  ;;  %v12299_v25 = vld [vmem:[#allocation76_spill] sm:$0xff]  ;;  %v12301_v29 = vld [vmem:[#allocation181_spill] sm:$0xff] }
 0x3c6   :  { %v1365_v31 = vadd.f32 %v12299_v25, %v1325_v37  ;;  %v12300_v59 = vld [vmem:[#allocation196_spill] sm:$0xff]  ;;  %v1710_v41 = vmul.f32 %v12301_v29, %v1686_v11  ;;  %v1248_v55 = vadd.f32 %v7793_v10, %v1167_v48  ;;  %v1795_v23 = vadd.f32 %v1787_v51, %v1714_v62  ;;  %v8201_v25 = vpop.permute.xlu0 %5132  ;;  %v12303_v10 = vld [vmem:[#allocation253_spill] sm:$0xff]  ;;  %v12304_v51 = vld [vmem:[#allocation54_spill] sm:$0xff] }
 0x3c7   :  { %v8191_v33 = vmul.f32 %v12300_v59, %v1745_v61  ;;  %v8196_v3 = vmul.f32 %v12300_v59, %v1746_v49  ;;  %v1711_v43 = vmul.f32 %v12301_v29, %v1687_v32  ;;  %v1844_v38 = vsel %vm111_vm9, %v1828_v35, 0.0  ;;  %v12314_v8 = vld [vmem:[#allocation80_spill] sm:$0xff]  ;;  %v12317_v29 = vld [vmem:[#allocation210_spill] sm:$0xff] }
 0x3c8   :  { %v12302_v9 = vunpack.i.l.bf16 %v12229_v57  ;;  %v1842_v61 = vsel %vm111_vm9, %v1826_v20, 0.0  ;;  %v5074_v48 = vunpack.i.l.bf16 %v12303_v10  ;;  %v1469_v11 = vadd.f32 %v7896_v16, %v1364_v47  ;;  %v8217_v57 = vpop.permute.xlu1 %2345  ;;  %v12306_v47 = vld [vmem:[#allocation212_spill] sm:$0xff] }
 0x3c9   :  { %v8212_v62 = vadd.f32 %v8051_v13, %v1796_v52  ;;  %v1328_v32 = vadd.f32 %v7837_v4, %v1247_v34  ;;  %v1470_v35 = vadd.f32 %v7899_v46, %v1365_v31  ;;  %12305 = vst [vmem:[#allocation121_spill] sm:$0xff] %v8217_v57  ;;  %v1868_v20 = vmul.f32 %v12250_v30, %v1844_v38  ;;  %v12307_v4 = vld [vmem:[#allocation216_spill] sm:$0xff]  ;;  %v12308_v46 = vld [vmem:[#allocation249_spill] sm:$0xff]  ;;  %v12309_v34 = vld [vmem:[#allocation55_spill] sm:$0xff] }
 0x3ca   :  { %v1827_v37 = vsel %vm11498_vm7, %v12297_v5, %v12302_v9  ;;  %v8220_v5 = vadd.f32 %v1710_v41, %v1637_v17  ;;  %v1329_v9 = vadd.f32 %v7848_v56, %v1248_v55  ;;  %v8224_v16 = vadd.f32 %v1711_v43, %v1638_v18  ;;  %v12310_v41 = vld [vmem:[#allocation262_spill] sm:$0xff]  ;;  %v12311_v56 = vld [vmem:[#allocation67_spill] sm:$0xff]  ;;  %v8246_v50 = vpop.permute.xlu0 %2370  ;;  %v12329_v59 = vld [vmem:[#allocation44_spill] sm:$0xff] }
 0x3cb   :  { %v1843_v13 = vsel %vm112_vm15, %v1827_v37, 0.0  ;;  %v8229_v52 = vmul.f32 %v12306_v47, %v1842_v61  ;;  %v1749_v31 = vsel %vm11501_vm8, %v12308_v46, %v12307_v4  ;;  %v1750_v17 = vsel %vm11501_vm8, %v12307_v4, %v5074_v48  ;;  %v12312_v37 = vld [vmem:[#allocation61_spill] sm:$0xff]  ;;  %v12313_v61 = vld [vmem:[#allocation228_spill] sm:$0xff]  ;;  %12315 = vst [vmem:[#allocation129_spill] sm:$0xff] %v8246_v50 }
 0x3cc   :  { %v1830_v38 = vsel %vm11498_vm7, %v12310_v41, %v12309_v34  ;;  %v5087_v18 = vunpack.i.h.bf16 %v12311_v56  ;;  %vm2068_vm10 = vcmask 793600   ;;  %v1550_v55 = vadd.f32 %v7933_v40, %v1469_v11  ;;  %v8249_v4 = vpop.permute.xlu1 %2062  ;;  %v12316_v11 = vld [vmem:[#allocation42_spill] sm:$0xff] }
 0x3cd   :  { %v5086_v43 = vunpack.i.l.bf16 %v12311_v56  ;;  %v1909_v49 = vsel %vm11509_vm12, %v12313_v61, %v12312_v37  ;;  %v1368_v46 = vadd.f32 %v12314_v8, %v1328_v32  ;;  %v1551_v48 = vadd.f32 %v7936_v63, %v1470_v35 }
 0x3ce   :  { %v8252_v41 = vmul.f32 %v12306_v47, %v1843_v13  ;;  %v1876_v30 = vadd.f32 %v1868_v20, %v1795_v23  ;;  %v1910_v40 = vsel %vm11509_vm12, %v12312_v37, %v5087_v18  ;;  %v1369_v56 = vadd.f32 %v12316_v11, %v1329_v9  ;;  %v12319_v20 = vld [vmem:[#allocation226_spill] sm:$0xff]  ;;  %v12320_v13 = vld [vmem:[#allocation57_spill] sm:$0xff] }
 0x3cf   :  { %vm1987_vm11 = vcmask 801792   ;;  %v8258_v61 = vmul.f32 %v12317_v29, %v1749_v31  ;;  %v5075_v32 = vunpack.i.h.bf16 %v12303_v10  ;;  %v8262_v8 = vmul.f32 %v12317_v29, %v1750_v17  ;;  %v12322_v11 = vld [vmem:[#allocation98_spill] sm:$0xff]  ;;  %v12323_v29 = vld [vmem:[#allocation63_spill] sm:$0xff] }
 0x3d0   :  { %v12318_v63 = vunpack.i.l.bf16 %v12272_v45  ;;  %v1846_v23 = vsel %vm111_vm9, %v1830_v38, 0.0  ;;  %v1907_v9 = vsel %vm11509_vm12, %v12320_v13, %v12319_v20  ;;  %v1925_v31 = vsel %vm119_vm6, %v1909_v49, 0.0  ;;  %v8282_v38 = vpop.permute.xlu1 %2206  ;;  %v12324_v49 = vld [vmem:[#allocation231_spill] sm:$0xff] }
 0x3d1   :  { %v1631_v10 = vadd.f32 %v8023_v2, %v1550_v55  ;;  %v1908_v17 = vsel %vm11509_vm12, %v12319_v20, %v5086_v43  ;;  %vm12321_vm3 = vcmp.lt.s32.totalorder %v7034_v44, 16  ;;  %v1632_v37 = vadd.f32 %v8026_v26, %v1551_v48  ;;  %v12326_v20 = vld [vmem:[#allocation223_spill] sm:$0xff] }
 0x3d2   :  { %v1831_v35 = vsel %vm11498_vm7, %v12309_v34, %v12318_v63  ;;  %v1926_v18 = vsel %vm12321_vm3, %v1910_v40, 0.0  ;;  %v1473_v34 = vadd.f32 %v7921_v1, %v1368_v46  ;;  %v5119_v63 = vunpack.i.h.bf16 %v12322_v11  ;;  %v12325_v46 = vld [vmem:[#allocation207_spill] sm:$0xff]  ;;  %v8297_v40 = vpop.permute.xlu0 %2220 }
 0x3d3   :  { %v1751_v2 = vsel %vm11501_vm8, %v12324_v49, %v12323_v29  ;;  %v1474_v55 = vadd.f32 %v7924_v58, %v1369_v56  ;;  %v1847_v43 = vsel %vm112_vm15, %v1831_v35, 0.0  ;;  %v1923_v1 = vsel %vm119_vm6, %v1907_v9, 0.0  ;;  %v12327_v35 = vld [vmem:[#allocation193_spill] sm:$0xff] }
 0x3d4   :  { %v1949_v26 = vmul.f32 %v12325_v46, %v1925_v31  ;;  %v1752_v48 = vsel %vm11501_vm8, %v12323_v29, %v5075_v32  ;;  %v8300_v13 = vmul.f32 %v12326_v20, %v1846_v23  ;;  %v1924_v49 = vsel %vm12321_vm3, %v1908_v17, 0.0  ;;  %v12328_v9 = vld [vmem:[#allocation21_spill] sm:$0xff]  ;;  %v8312_v27 = vpop.permute.xlu1 %5127 }
 0x3d5   :  { %v1950_v58 = vmul.f32 %v12325_v46, %v1926_v18  ;;  %v1712_v56 = vadd.f32 %v8102_v6, %v1631_v10  ;;  %v1791_v47 = vmul.f32 %v12327_v35, %v1751_v2  ;;  %v1832_v31 = vsel %vm11498_vm7, %v12329_v59, %v12328_v9  ;;  %v12330_v17 = vld [vmem:[#allocation225_spill] sm:$0xff] }
 0x3d6   :  { %v1554_v29 = vadd.f32 %v8011_v14, %v1473_v34  ;;  %v1713_v32 = vadd.f32 %v8126_v39, %v1632_v37  ;;  %v8315_v23 = vmul.f32 %v12326_v20, %v1847_v43  ;;  %v1947_v57 = vmul.f32 %v12330_v17, %v1923_v1  ;;  %v12333_v1 = vld [vmem:[#allocation117_spill] sm:$0xff] }
 0x3d7   :  { %v1792_v18 = vmul.f32 %v12327_v35, %v1752_v48  ;;  %v1555_v6 = vadd.f32 %v8014_v60, %v1474_v55  ;;  %v1948_v10 = vmul.f32 %v12330_v17, %v1924_v49  ;;  %v8321_v2 = vadd.f32 %v1949_v26, %v1876_v30  ;;  %v12332_v55 = vld [vmem:[#allocation91_spill] sm:$0xff]  ;;  %v12350_v35 = vld [vmem:[#allocation221_spill] sm:$0xff] }
 0x3d8   :  { %v2076_v14 = vsel %vm2068_vm10, %v8020_v7, %v5119_v63  ;;  %v12331_v39 = vunpack.i.h.bf16 %v12272_v45  ;;  %v8330_v34 = vadd.f32 %v1950_v58, %v8212_v62  ;;  %v1848_v37 = vsel %vm111_vm9, %v1832_v31, 0.0  ;;  %v12334_v63 = vld [vmem:[#allocation243_spill] sm:$0xff]  ;;  %v8344_v62 = vpop.permute.xlu1 %2214  ;;  %v12337_v31 = vld [vmem:[#allocation205_spill] sm:$0xff] }
 0x3d9   :  { %v1793_v60 = vadd.f32 %v8191_v33, %v1712_v56  ;;  %v5098_v43 = vunpack.i.l.bf16 %v12332_v55  ;;  %v1799_v30 = vadd.f32 %v1791_v47, %v8220_v5  ;;  %v1635_v26 = vadd.f32 %v12333_v1, %v1554_v29  ;;  %v12335_v48 = vld [vmem:[#allocation131_spill] sm:$0xff]  ;;  %v12336_v47 = vld [vmem:[#allocation50_spill] sm:$0xff] }
 0x3da   :  { %v1833_v59 = vsel %vm11498_vm7, %v12328_v9, %v12331_v39  ;;  %v1988_v45 = vsel %vm1987_vm11, %v12335_v48, %v12334_v63  ;;  %v1794_v49 = vadd.f32 %v8196_v3, %v1713_v32  ;;  %v8342_v9 = vpop.permute.xlu0 %2287  ;;  %v8347_v58 = vadd.f32 %v1792_v18, %v8224_v16  ;;  %v12338_v3 = vld [vmem:[#allocation74_spill] sm:$0xff]  ;;  %v12342_v48 = vld [vmem:[#allocation77_spill] sm:$0xff] }
 0x3db   :  { %v8351_v33 = vsel %vm96_vm14, %v2076_v14, 0.0  ;;  %v1849_v5 = vsel %vm112_vm15, %v1833_v59, 0.0  ;;  %v1636_v56 = vadd.f32 %v12336_v47, %v1555_v6  ;;  %vm11672_vm3 = vcmask 777216   ;;  %v12339_v32 = vld [vmem:[#allocation238_spill] sm:$0xff] }
 0x3dc   :  { %v1872_v29 = vmul.f32 %v12337_v31, %v1848_v37  ;;  %v1911_v39 = vsel %vm11509_vm12, %v12339_v32, %v12338_v3  ;;  %v12340_v1 = vunpack.i.l.bf16 %v12292_v53  ;;  %v5099_v18 = vunpack.i.h.bf16 %v12332_v55  ;;  %v12343_v47 = vld [vmem:[#allocation246_spill] sm:$0xff] }
 0x3dd   :  { %vm11670_vm7 = vcmask 785408   ;;  %v1874_v14 = vadd.f32 %v8229_v52, %v1793_v60  ;;  %v2004_v6 = vsel %vm87_vm5, %v1988_v45, 0.0  ;;  %v1989_v37 = vsel %vm1987_vm11, %v12334_v63, %v5098_v43  ;;  %v8378_v60 = vpop.permute.xlu1 %2139 }
 0x3de   :  { %v1912_v16 = vsel %vm11509_vm12, %v12338_v3, %v12340_v1  ;;  %v1990_v32 = vsel %vm1987_vm11, %v12343_v47, %v12342_v48  ;;  %v1716_v46 = vadd.f32 %v8161_v22, %v1635_v26  ;;  %v1875_v20 = vadd.f32 %v8252_v41, %v1794_v49  ;;  %v12344_v3 = vld [vmem:[#allocation86_spill] sm:$0xff]  ;;  %v8392_v49 = vpop.permute.xlu0 %5143  ;;  %v12347_v47 = vld [vmem:[#allocation239_spill] sm:$0xff] }
 0x3df   :  { %v1991_v55 = vsel %vm1987_vm11, %v12342_v48, %v5099_v18  ;;  %vm11665_vm8 = vcmask 769024   ;;  %v5111_v52 = vunpack.i.h.bf16 %v12344_v3  ;;  %v8381_v45 = vmul.f32 %v12337_v31, %v1849_v5  ;;  %v12345_v18 = vld [vmem:[#allocation112_spill] sm:$0xff] }
 0x3e0   :  { %v1717_v1 = vadd.f32 %v8164_v42, %v1636_v56  ;;  %v8386_v22 = vadd.f32 %v1872_v29, %v1799_v30  ;;  %v1927_v41 = vsel %vm119_vm6, %v1911_v39, 0.0  ;;  %v2006_v26 = vsel %vm87_vm5, %v1990_v32, 0.0 }
 0x3e1   :  { %v2072_v5 = vsel %vm2068_vm10, %v12345_v18, %v5111_v52  ;;  %vm12346_vm1 = vcmp.lt.s32.totalorder %v7034_v44, 16  ;;  %v2028_v43 = vmul.f32 %v12347_v47, %v2004_v6  ;;  %v2005_v42 = vsel %vm88_vm13, %v1989_v37, 0.0  ;;  %v8405_v31 = vpop.permute.xlu1 %2349 }
 0x3e2   :  { %v1928_v48 = vsel %vm12346_vm1, %v1912_v16, 0.0  ;;  %v2007_v30 = vsel %vm88_vm13, %v1991_v55, 0.0  ;;  %v1797_v56 = vadd.f32 %v8258_v61, %v1716_v46  ;;  %v1955_v29 = vadd.f32 %v1947_v57, %v1874_v14  ;;  %12349 = vst [vmem:[#allocation114_spill] sm:$0xff] %v8405_v31  ;;  %v12351_v46 = vld [vmem:[#allocation237_spill] sm:$0xff] }
 0x3e3   :  { %v1956_v39 = vadd.f32 %v1948_v10, %v1875_v20  ;;  %v5130_v32 = vunpack.i.h.bf16 %v8312_v27  ;;  %v1798_v52 = vadd.f32 %v8262_v8, %v1717_v1  ;;  %v2030_v16 = vmul.f32 %v12350_v35, %v2006_v26 }
 0x3e4   :  { %v2088_v6 = vsel %vm96_vm14, %v2072_v5, 0.0  ;;  %v5124_v37 = vunpack.i.h.bf16 %v8158_v19  ;;  %v2029_v17 = vmul.f32 %v12347_v47, %v2005_v42  ;;  %v2031_v55 = vmul.f32 %v12350_v35, %v2007_v30  ;;  %v8423_v42 = vpop.permute.xlu0 %2295  ;;  %v12352_v30 = vld [vmem:[#allocation236_spill] sm:$0xff] }
 0x3e5   :  { %v5110_v57 = vunpack.i.l.bf16 %v12344_v3  ;;  %v2234_v61 = vsel %vm11672_vm3, %v8344_v62, %v5130_v32  ;;  %v1951_v20 = vmul.f32 %v12351_v46, %v1927_v41  ;;  %v1952_v8 = vmul.f32 %v12351_v46, %v1928_v48  ;;  %v12353_v41 = vld [vmem:[#allocation58_spill] sm:$0xff]  ;;  %v12354_v47 = vld [vmem:[#allocation96_spill] sm:$0xff] }
 0x3e6   :  { %v5146_v10 = vunpack.i.h.bf16 %v8392_v49  ;;  %v2153_v14 = vsel %vm11670_vm7, %v8187_v12, %v5124_v37  ;;  %v1878_v1 = vadd.f32 %v8300_v13, %v1797_v56  ;;  %v2036_v26 = vadd.f32 %v2028_v43, %v1955_v29  ;;  %v8433_v37 = vpop.permute.xlu1 %2375  ;;  %v12356_v43 = vld [vmem:[#allocation256_spill] sm:$0xff] }
 0x3e7   :  { %v2037_v5 = vadd.f32 %v2029_v17, %v1956_v39  ;;  %v2112_v3 = vmul.f32 %v12352_v30, %v2088_v6  ;;  %v1879_v35 = vadd.f32 %v8315_v23, %v1798_v52  ;;  %v2038_v32 = vadd.f32 %v2030_v16, %v8321_v2  ;;  %12355 = vst [vmem:[#allocation136_spill] sm:$0xff] %v8433_v37  ;;  %v12358_v39 = vld [vmem:[#allocation83_spill] sm:$0xff] }
 0x3e8   :  { %v2069_v48 = vsel %vm2068_vm10, %v12354_v47, %v12353_v41  ;;  %v2250_v46 = vsel %vm112_vm15, %v2234_v61, 0.0  ;;  %v2039_v13 = vadd.f32 %v2031_v55, %v8330_v34  ;;  %v2070_v17 = vsel %vm2068_vm10, %v12353_v41, %v5110_v57  ;;  %v12357_v47 = vld [vmem:[#allocation84_spill] sm:$0xff]  ;;  %v12360_v57 = vld [vmem:[#allocation95_spill] sm:$0xff] }
 0x3e9   :  { %v2193_v56 = vmul.f32 %v12356_v43, %v2153_v14  ;;  %v5129_v23 = vunpack.i.l.bf16 %v8312_v27  ;;  %v5145_v2 = vunpack.i.l.bf16 %v8392_v49  ;;  %v2315_v29 = vsel %vm11665_vm8, %v8423_v42, %v5146_v10  ;;  %v12361_v14 = vld [vmem:[#allocation60_spill] sm:$0xff] }
 0x3ea   :  { %v1913_v52 = vsel %vm11509_vm12, %v12358_v39, %v12357_v47  ;;  %v5123_v16 = vunpack.i.l.bf16 %v8158_v19  ;;  %v12359_v34 = vunpack.i.h.bf16 %v12292_v53  ;;  %v2085_v55 = vsel %vm95_vm4, %v2069_v48, 0.0  ;;  %v12362_v41 = vld [vmem:[#allocation116_spill] sm:$0xff]  ;;  %v12363_v48 = vld [vmem:[#allocation99_spill] sm:$0xff] }
 0x3eb   :  { %v2120_v27 = vadd.f32 %v2112_v3, %v2039_v13  ;;  %v2274_v49 = vmul.f32 %v12360_v57, %v2250_v46  ;;  %v8454_v61 = vadd.f32 %v1951_v20, %v1878_v1  ;;  %v2086_v10 = vsel %vm96_vm14, %v2070_v17, 0.0 }
 0x3ec   :  { %v1914_v6 = vsel %vm11509_vm12, %v12357_v47, %v12359_v34  ;;  %v2071_v19 = vsel %vm2068_vm10, %v12361_v14, %v12345_v18  ;;  %v2231_v53 = vsel %vm11672_vm3, %v8282_v38, %v12362_v41  ;;  %v8464_v47 = vpop.permute.xlu1 %2218  ;;  %v2331_v3 = vsel %vm12346_vm1, %v2315_v29, 0.0  ;;  %vm12364_vm12 = vmmov %vm12346_vm1  ;;  %v12365_v38 = vld [vmem:[#allocation257_spill] sm:$0xff]  ;;  %v12367_v14 = vld [vmem:[#allocation70_spill] sm:$0xff] }
 0x3ed   :  { %v2150_v46 = vsel %vm11670_vm7, %v8130_v0, %v12363_v48  ;;  %v2201_v20 = vadd.f32 %v2193_v56, %v2120_v27  ;;  %v2232_v1 = vsel %vm11672_vm3, %v12362_v41, %v5129_v23  ;;  %v1929_v18 = vsel %vm119_vm6, %v1913_v52, 0.0  ;;  %v12366_v52 = vld [vmem:[#allocation62_spill] sm:$0xff] }
 0x3ee   :  { %v1930_v13 = vsel %vm12364_vm12, %v1914_v6, 0.0  ;;  %v2109_v17 = vmul.f32 %v12365_v38, %v2085_v55  ;;  %v2151_v39 = vsel %vm11670_vm7, %v12363_v48, %v5123_v16  ;;  %v2110_v29 = vmul.f32 %v12365_v38, %v2086_v10  ;;  %v12368_v16 = vld [vmem:[#allocation219_spill] sm:$0xff]  ;;  %v12369_v48 = vld [vmem:[#allocation78_spill] sm:$0xff]  ;;  %v12372_v38 = vld [vmem:[#allocation85_spill] sm:$0xff] }
 0x3ef   :  { %v2087_v0 = vsel %vm95_vm4, %v2071_v19, 0.0  ;;  %v2247_v56 = vsel %vm111_vm9, %v2231_v53, 0.0  ;;  %v2282_v23 = vadd.f32 %v2274_v49, %v2201_v20  ;;  %v8485_v34 = vadd.f32 %v1952_v8, %v1879_v35  ;;  %v12370_v35 = vld [vmem:[#allocation119_spill] sm:$0xff]  ;;  %v8503_v53 = vpop.permute.xlu0 %2145  ;;  %vm12375_vm12 = vmmov %vm12346_vm1 }
 0x3f0   :  { %v2355_v27 = vmul.f32 %v12366_v52, %v2331_v3  ;;  %v2190_v6 = vmul.f32 %v12367_v14, %v2150_v46  ;;  %v2248_v55 = vsel %vm112_vm15, %v2232_v1, 0.0  ;;  %v8491_v41 = vpop.permute.xlu1 %5138  ;;  %v8494_v10 = vmul.f32 %v12368_v16, %v1929_v18  ;;  %v12371_v1 = vld [vmem:[#allocation101_spill] sm:$0xff] }
 0x3f1   :  { %v2191_v19 = vmul.f32 %v12367_v14, %v2151_v39  ;;  %v2152_v49 = vsel %vm11670_vm7, %v12369_v48, %v8187_v12  ;;  %v2233_v8 = vsel %vm11672_vm3, %v12370_v35, %v8344_v62  ;;  %v8506_v3 = vmul.f32 %v12368_v16, %v1930_v13  ;;  %v12373_v39 = vld [vmem:[#allocation259_spill] sm:$0xff] }
 0x3f2   :  { %v2117_v46 = vadd.f32 %v2109_v17, %v2036_v26  ;;  %v2111_v20 = vmul.f32 %v12352_v30, %v2087_v0  ;;  %v2271_v18 = vmul.f32 %v12371_v1, %v2247_v56  ;;  %v1992_v14 = vsel %vm1987_vm11, %v12373_v39, %v12372_v38  ;;  %v12453_v30 = vld [vmem:[#allocation6_spill] sm:$0xff] }
 0x3f3   :  { %v2118_v31 = vadd.f32 %v2110_v29, %v2037_v5  ;;  %v2272_v12 = vmul.f32 %v12371_v1, %v2248_v55  ;;  %v2363_v48 = vadd.f32 %v2355_v27, %v2282_v23  ;;  %v12374_v62 = vunpack.i.l.bf16 %v12304_v51 }
 0x3f4   :  { %v2198_v13 = vadd.f32 %v2190_v6, %v2117_v46  ;;  %v2192_v26 = vmul.f32 %v12356_v43, %v2152_v49  ;;  %v2249_v17 = vsel %vm111_vm9, %v2233_v8, 0.0  ;;  %v2290_v0 = vpop.permute.xlu1 %2289  ;;  %v2119_v23 = vadd.f32 %v2111_v20, %v2038_v32  ;;  %v8534_v8 = vpop.permute.xlu0 %2224  ;;  %v12377_v32 = vld [vmem:[#allocation28_spill] sm:$0xff]  ;;  %v12378_v46 = vld [vmem:[#allocation89_spill] sm:$0xff] }
 0x3f5   :  { %v1993_v35 = vsel %vm1987_vm11, %v12372_v38, %v12374_v62  ;;  %v2199_v56 = vadd.f32 %v2191_v19, %v2118_v31  ;;  %v2312_v39 = vsel %vm11665_vm8, %v8342_v9, %v2290_v0  ;;  %v2313_v5 = vsel %vm11665_vm8, %v2290_v0, %v5145_v2  ;;  %v12376_v31 = vld [vmem:[#allocation87_spill] sm:$0xff] }
 0x3f6   :  { %v8525_v29 = vadd.f32 %v8433_v37, %v2363_v48  ;;  %v2279_v27 = vadd.f32 %v2271_v18, %v2198_v13  ;;  %v2328_v38 = vsel %vm119_vm6, %v2312_v39, 0.0  ;;  %v2329_v6 = vsel %vm12375_vm12, %v2313_v5, 0.0  ;;  %v12380_v39 = vld [vmem:[#allocation103_spill] sm:$0xff]  ;;  %vm12396_vm12 = vmmov %vm12346_vm1 }
 0x3f7   :  { %v2273_v55 = vmul.f32 %v12360_v57, %v2249_v17  ;;  %v2280_v49 = vadd.f32 %v2272_v12, %v2199_v56  ;;  %v2352_v19 = vmul.f32 %v12376_v31, %v2328_v38  ;;  %v2353_v9 = vmul.f32 %v12376_v31, %v2329_v6  ;;  %v12381_v5 = vld [vmem:[#allocation123_spill] sm:$0xff] }
 0x3f8   :  { %v2008_v2 = vsel %vm87_vm5, %v1992_v14, 0.0  ;;  %v2073_v20 = vsel %vm2068_vm10, %v12378_v46, %v12377_v32  ;;  %v12379_v18 = vunpack.i.l.bf16 %v12322_v11  ;;  %v2200_v62 = vadd.f32 %v2192_v26, %v2119_v23  ;;  %v2294_v12 = vpop.permute.xlu1 %2293 }
 0x3f9   :  { %v2360_v13 = vadd.f32 %v2352_v19, %v2279_v27  ;;  %v2361_v17 = vadd.f32 %v2353_v9, %v2280_v49  ;;  %v2314_v0 = vsel %vm11665_vm8, %v2294_v12, %v8423_v42  ;;  %v4735_v56 = vmul.f32 -1.442695, %v8525_v29  ;;  %v12382_v49 = vld [vmem:[#allocation255_spill] sm:$0xff] }
 0x3fa   :  { %v2074_v48 = vsel %vm2068_vm10, %v12377_v32, %v12379_v18  ;;  %v2009_v14 = vsel %vm88_vm13, %v1993_v35, 0.0  ;;  %v1994_v38 = vsel %vm1987_vm11, %v12381_v5, %v12380_v39  ;;  %v5140_v11 = vunpack.i.l.bf16 %v8491_v41 }
 0x3fb   :  { %v2330_v26 = vsel %vm119_vm6, %v2314_v0, 0.0  ;;  %v2281_v23 = vadd.f32 %v2273_v55, %v2200_v62  ;;  %v8558_v6 = vadd.f32 %v8246_v50, %v2360_v13  ;;  %v8561_v42 = vadd.f32 %v8246_v50, %v2361_v17  ;;  %v2300_v13 = vpop.permute.xlu0 %2299 }
 0x3fc   :  { %v2354_v27 = vmul.f32 %v12366_v52, %v2330_v26  ;;  %v2032_v35 = vmul.f32 %v12382_v49, %v2008_v2  ;;  %v12383_v19 = vunpack.i.h.bf16 %v12304_v51  ;;  %v2089_v32 = vsel %vm95_vm4, %v2073_v20, 0.0  ;;  %v2144_v46 = vpop.permute.xlu1 %2143 }
 0x3fd   :  { %v2090_v55 = vsel %vm96_vm14, %v2074_v48, 0.0  ;;  %v4732_v62 = vmul.f32 -1.442695, %v8558_v6  ;;  %v4733_v12 = vmul.f32 -1.442695, %v8561_v42  ;;  %5414 = vpow2.f32 %v4735_v56 }
 0x3fe   :  { %v1995_v9 = vsel %vm1987_vm11, %v12380_v39, %v12383_v19  ;;  %v2362_v18 = vadd.f32 %v2354_v27, %v2281_v23  ;;  %v2033_v2 = vmul.f32 %v12382_v49, %v2009_v14  ;;  %v2010_v51 = vsel %vm87_vm5, %v1994_v38, 0.0  ;;  %v12387_v19 = vld [vmem:[#allocation39_spill] sm:$0xff] }
 0x3ff   :  { %v2235_v20 = vsel %vm11672_vm3, %v8464_v47, %v8297_v40  ;;  %v2236_v48 = vsel %vm11672_vm3, %v8297_v40, %v5140_v11  ;;  %v2154_v17 = vsel %vm11670_vm7, %v8155_v28, %v8378_v60  ;;  %v12384_v0 = vunpack.i.l.bf16 %v8201_v25  ;;  %v12385_v47 = vld [vmem:[#allocation65_spill] sm:$0xff] }
 0x400   :  { %v8590_v14 = vadd.f32 %v8433_v37, %v2362_v18  ;;  %5416 = vpow2.f32 %v4732_v62  ;;  %v2011_v39 = vsel %vm88_vm13, %v1995_v9, 0.0  ;;  %v2113_v5 = vmul.f32 %v12385_v47, %v2089_v32  ;;  %v8596_v38 = vpop.permute.xlu1 %2380  ;;  %v2304_v62 = vpop.permute.xlu0 %2303 }
 0x401   :  { %v2155_v56 = vsel %vm11670_vm7, %v8378_v60, %v12384_v0  ;;  %v2114_v40 = vmul.f32 %v12385_v47, %v2090_v55  ;;  %12386 = vst [vmem:[#allocation120_spill] sm:$0xff] %v8596_v38  ;;  %5418 = vpow2.f32 %v4733_v12  ;;  %v2040_v28 = vadd.f32 %v2032_v35, %v8454_v61  ;;  %v12388_v35 = vld [vmem:[#allocation233_spill] sm:$0xff] }
 0x402   :  { %v2251_v11 = vsel %vm111_vm9, %v2235_v20, 0.0  ;;  %v2252_v60 = vsel %vm112_vm15, %v2236_v48, 0.0  ;;  %v4734_v26 = vmul.f32 -1.442695, %v8590_v14  ;;  %v2041_v23 = vadd.f32 %v2033_v2, %v8485_v34  ;;  %v12389_v34 = vld [vmem:[#allocation22_spill] sm:$0xff] }
 0x403   :  { %v2075_v27 = vsel %vm2068_vm10, %v8249_v4, %v8020_v7  ;;  %v2194_v9 = vmul.f32 %v12387_v19, %v2154_v17  ;;  %v2195_v32 = vmul.f32 %v12387_v19, %v2155_v56  ;;  %v1881_v61 = vadd.f32 %v8381_v45, %v8347_v58  ;;  %v12390_v45 = vld [vmem:[#allocation251_spill] sm:$0xff] }
 0x404   :  { %v2034_v55 = vmul.f32 %v12388_v35, %v2010_v51  ;;  %v2035_v18 = vmul.f32 %v12388_v35, %v2011_v39  ;;  %5420 = vpow2.f32 %v4734_v26  ;;  %v2121_v12 = vadd.f32 %v2113_v5, %v2040_v28  ;;  %v2227_v7 = vpop.permute.xlu1 %2226 }
 0x405   :  { %v2122_v20 = vadd.f32 %v2114_v40, %v2041_v23  ;;  %v2275_v2 = vmul.f32 %v12389_v34, %v2251_v11  ;;  %v2276_v48 = vmul.f32 %v12389_v34, %v2252_v60  ;;  %v1961_v4 = vadd.f32 %v8494_v10, %v8386_v22 }
 0x406   :  { %v1962_v17 = vadd.f32 %v8506_v3, %v1881_v61  ;;  %v2091_v58 = vsel %vm95_vm4, %v2075_v27, 0.0  ;;  %v2116_v51 = vmul.f32 %v12390_v45, %v8351_v33  ;;  %v2202_v0 = vadd.f32 %v2194_v9, %v2121_v12 }
 0x407   :  { %v2203_v56 = vadd.f32 %v2195_v32, %v2122_v20  ;;  %v5415_v39 = vpop.eup %5414  ;;  %v12391_v5 = vunpack.i.h.bf16 %v8201_v25  ;;  %v2042_v28 = vadd.f32 %v2034_v55, %v1961_v4  ;;  %v5141_v22 = vunpack.i.h.bf16 %v8491_v41  ;;  %v2306_v41 = vpop.permute.xlu0 %2305 }
 0x408   :  { %v2043_v11 = vadd.f32 %v2035_v18, %v1962_v17  ;;  %v2115_v10 = vmul.f32 %v12390_v45, %v2091_v58  ;;  %v2283_v3 = vadd.f32 %v2275_v2, %v2202_v0  ;;  %v2237_v60 = vsel %vm11672_vm3, %v8534_v8, %v2227_v7  ;;  %v2302_v26 = vpop.permute.xlu1 %2301 }
 0x409   :  { %v2157_v40 = vsel %vm11670_vm7, %v8503_v53, %v12391_v5  ;;  %v2284_v33 = vadd.f32 %v2276_v48, %v2203_v56  ;;  %v2156_v27 = vsel %vm11670_vm7, %v2144_v46, %v8503_v53  ;;  %v2238_v25 = vsel %vm11672_vm3, %v2227_v7, %v5141_v22  ;;  %v12392_v53 = vld [vmem:[#allocation121_spill] sm:$0xff] }
 0x40a   :  { %v5417_v23 = vpop.eup %5416  ;;  %v2316_v9 = vsel %vm11665_vm8, %v2300_v13, %v2302_v26  ;;  %v2317_v32 = vsel %vm11665_vm8, %v2302_v26, %v2304_v62  ;;  %v2423_v12 = vadd.f32 1.0, %v5415_v39  ;;  %v2253_v20 = vsel %vm111_vm9, %v2237_v60, 0.0  ;;  %v12393_v62 = vld [vmem:[#allocation69_spill] sm:$0xff] }
 0x40b   :  { %v5419_v61 = vpop.eup %5418  ;;  %v2332_v55 = vsel %vm119_vm6, %v2316_v9, 0.0  ;;  %v2333_v8 = vsel %vm12346_vm1, %v2317_v32, 0.0  ;;  %v2420_v18 = vadd.f32 1.0, %v5417_v23  ;;  %v2124_v48 = vadd.f32 %v2116_v51, %v2043_v11  ;;  %v12395_v60 = vld [vmem:[#allocation93_spill] sm:$0xff]  ;;  %v2310_v23 = vpop.permute.xlu0 %2309 }
 0x40c   :  { %v2356_v46 = vmul.f32 %v12392_v53, %v2332_v55  ;;  %v2357_v2 = vmul.f32 %v12392_v53, %v2333_v8  ;;  %v2421_v13 = vadd.f32 1.0, %v5419_v61  ;;  %v2196_v7 = vmul.f32 %v12393_v62, %v2156_v27  ;;  %v8647_v17 = vpop.permute.xlu1 %2385 }
 0x40d   :  { %v2254_v4 = vsel %vm112_vm15, %v2238_v25, 0.0  ;;  %12394 = vst [vmem:[#allocation132_spill] sm:$0xff] %v8647_v17  ;;  %5422 = vrcp.f32 %v2420_v18  ;;  %v2197_v0 = vmul.f32 %v12393_v62, %v2157_v40  ;;  %v2123_v5 = vadd.f32 %v2115_v10, %v2042_v28  ;;  %v12397_v18 = vld [vmem:[#allocation114_spill] sm:$0xff] }
 0x40e   :  { %v5421_v58 = vpop.eup %5420  ;;  %v2364_v56 = vadd.f32 %v2356_v46, %v2283_v3  ;;  %v2365_v39 = vadd.f32 %v2357_v2, %v2284_v33  ;;  %5424 = vrcp.f32 %v2421_v13  ;;  %v2277_v26 = vmul.f32 %v12395_v60, %v2253_v20 }
 0x40f   :  { %v2422_v22 = vadd.f32 1.0, %v5421_v58  ;;  %5426 = vrcp.f32 %v2423_v12  ;;  %v2278_v51 = vmul.f32 %v12395_v60, %v2254_v4  ;;  %v2204_v25 = vadd.f32 %v2196_v7, %v2123_v5 }
 0x410   :  { %v2392_v11 = vadd.f32 %v8596_v38, %v2364_v56  ;;  %v2393_v27 = vadd.f32 %v8596_v38, %v2365_v39  ;;  %v2205_v9 = vadd.f32 %v2197_v0, %v2124_v48  ;;  %v2308_v32 = vpop.permute.xlu1 %2307  ;;  %vm11604_vm1 = vcmask 64512  }
 0x411   :  { %5428 = vrcp.f32 %v2422_v22  ;;  %v2318_v40 = vsel %vm11665_vm8, %v2306_v41, %v2308_v32  ;;  %v2319_v3 = vsel %vm11665_vm8, %v2308_v32, %v2310_v23  ;;  %v2285_v33 = vadd.f32 %v2277_v26, %v2204_v25 }
 0x412   :  { %v4736_v28 = vmul.f32 -1.442695, %v2392_v11  ;;  %v4737_v10 = vmul.f32 -1.442695, %v2393_v27  ;;  %v2334_v61 = vsel %vm119_vm6, %v2318_v40, 0.0  ;;  %v2335_v55 = vsel %vm12396_vm12, %v2319_v3, 0.0 }
 0x413   :  { %v2286_v8 = vadd.f32 %v2278_v51, %v2205_v9  ;;  %v2358_v12 = vmul.f32 %v12397_v18, %v2334_v61  ;;  %v2359_v20 = vmul.f32 %v12397_v18, %v2335_v55  ;;  %vm12537_vm12 = vcmask 269312  }
 0x414   :  { %5430 = vpow2.f32 %v4736_v28  ;;  %vm12680_vm7 = vcmask 277504   ;;  %vm12709_vm3 = vcmask 269312   ;;  %v13163_v24 = vld [vmem:[#allocation132_spill] sm:$0xff] }
 0x415   :  { %5432 = vpow2.f32 %v4737_v10  ;;  %v2366_v46 = vadd.f32 %v2358_v12, %v2285_v33  ;;  %v2367_v41 = vadd.f32 %v2359_v20, %v2286_v8 }
 0x417   :  { %v5423_v2 = vpop.eup %5422  ;;  %v2394_v7 = vadd.f32 %v8647_v17, %v2366_v46  ;;  %v2395_v4 = vadd.f32 %v8647_v17, %v2367_v41 }
 0x418   :  { %v5425_v13 = vpop.eup %5424  ;;  %v8663_v48 = vmul.f32 %v5423_v2, %v8558_v6 }
 0x419   :  { %v5427_v58 = vpop.eup %5426  ;;  %v8668_v0 = vmul.f32 %v5425_v13, %v8561_v42  ;;  %v4738_v56 = vmul.f32 -1.442695, %v2394_v7  ;;  %v4739_v39 = vmul.f32 -1.442695, %v2395_v4 }
 0x41a   :  { %v8676_v6 = vmul.f32 %v5427_v58, %v8525_v29 }
 0x41b   :  { %v5429_v5 = vpop.eup %5428  ;;  %v2452_v22 = vadd.f32 %v8668_v0, %v8663_v48  ;;  %5434 = vpow2.f32 %v4738_v56 }
 0x41c   :  { %v8673_v26 = vmul.f32 %v5429_v5, %v8590_v14  ;;  %5436 = vpow2.f32 %v4739_v39 }
 0x41d   :  { %2453 = vadd.xlane.f32.xlu1 %v2452_v22 }
 0x41e   :  { %v5431_v23 = vpop.eup %5430  ;;  %v2455_v42 = vadd.f32 %v8676_v6, %v8673_v26 }
 0x41f   :  { %v5433_v51 = vpop.eup %5432  ;;  %v2424_v25 = vadd.f32 1.0, %v5431_v23 }
 0x420   :  { %2456 = vadd.xlane.f32.xlu0 %v2455_v42  ;;  %v2425_v9 = vadd.f32 1.0, %v5433_v51  ;;  %v66_v42 = vld [vmem:[%s11150_s5 + $0x18] sm:$0xff] }
 0x421   :  { %5438 = vrcp.f32 %v2424_v25 }
 0x422   :  { %5440 = vrcp.f32 %v2425_v9 }
 0x425   :  { %v5435_v32 = vpop.eup %5434 }
 0x426   :  { %v5437_v40 = vpop.eup %5436  ;;  %v2426_v14 = vadd.f32 1.0, %v5435_v32 }
 0x427   :  { %v2427_v3 = vadd.f32 1.0, %v5437_v40 }
 0x428   :  { %5442 = vrcp.f32 %v2426_v14 }
 0x429   :  { %5444 = vrcp.f32 %v2427_v3 }
 0x42b   :  { %v5439_v29 = vpop.eup %5438 }
 0x42c   :  { %v5441_v28 = vpop.eup %5440  ;;  %v8680_v10 = vmul.f32 %v5439_v29, %v2392_v11 }
 0x42d   :  { %v8682_v33 = vmul.f32 %v5441_v28, %v2393_v27  ;;  %v64_v27 = vld [vmem:[%s11150_s5 + $0x8] sm:$0xff] }
 0x42f   :  { %v2458_v61 = vadd.f32 %v8682_v33, %v8680_v10 }
 0x431   :  { %2459 = vadd.xlane.f32.xlu0 %v2458_v61 }
 0x432   :  { %v5443_v55 = vpop.eup %5442 }
 0x433   :  { %v5445_v8 = vpop.eup %5444  ;;  %v8686_v12 = vmul.f32 %v5443_v55, %v2394_v7  ;;  %v63_v7 = vld [vmem:[%s11150_s5] sm:$0xff] }
 0x434   :  { %v8688_v20 = vmul.f32 %v5445_v8, %v2395_v4  ;;  %v65_v4 = vld [vmem:[%s11150_s5 + $0x10] sm:$0xff] }
 0x436   :  { %v2461_v46 = vadd.f32 %v8688_v20, %v8686_v12 }
 0x438   :  { %2462 = vadd.xlane.f32.xlu1 %v2461_v46 }
 0x4aa   :  { %v2454_v2 = vpop.xlane.xlu1 %2453 }
 0x4ab   :  { %v2464_v58 = vmul.f32 0.00390625, %v2454_v2  ;;  %v67_v2 = vld [vmem:[%s11151_s6] sm:$0x1] }
 0x4ad   :  { %v2457_v41 = vpop.xlane.xlu0 %2456  ;;  %v2468_v5 = vmul.f32 %v2464_v58, %v63_v7  ;;  %v12398_v7 = vlaneseq }
 0x4ae   :  { %v2465_v11 = vmul.f32 0.00390625, %v2457_v41 }
 0x4af   :  { %v2473_v25 = vsel %vm11604_vm1, %v2468_v5, 0.0 }
 0x4b0   :  { %v2469_v39 = vmul.f32 %v2465_v11, %v64_v27 }
 0x4b2   :  { %v2474_v23 = vsel %vm11604_vm1, %v2469_v39, 0.0 }
 0x4b3   :  { %v2475_v40 = vadd.f32 %v2474_v23, %v2473_v25  ;;  %v69_v23 = vld [vmem:[%s11152_s7 + $0x8] sm:$0xff]  ;;  %v71_v25 = vld [vmem:[%s11152_s7 + $0x18] sm:$0xff] }
 0x4be   :  { %v2460_v13 = vpop.xlane.xlu0 %2459 }
 0x4bf   :  { %v2466_v56 = vmul.f32 0.00390625, %v2460_v13 }
 0x4c1   :  { %v2470_v22 = vmul.f32 %v2466_v56, %v65_v4  ;;  %v8712_v4 = vshrl.u32 %v12398_v7, 7 }
 0x4c3   :  { %v2476_v9 = vsel %vm11604_vm1, %v2470_v22, 0.0  ;;  %12399 = vst [vmem:[#allocation126_spill] sm:$0xff] %v8712_v4  ;;  %v11523_v39 = vsub.s32 0, %v8712_v4 }
 0x4c4   :  { %v2477_v3 = vadd.f32 %v2476_v9, %v2475_v40  ;;  %v70_v9 = vld [vmem:[%s11152_s7 + $0x10] sm:$0xff] }
 0x4c5   :  { %v2463_v51 = vpop.xlane.xlu1 %2462 }
 0x4c6   :  { %v2467_v32 = vmul.f32 0.00390625, %v2463_v51 }
 0x4c8   :  { %v2471_v14 = vmul.f32 %v2467_v32, %v66_v42  ;;  %v68_v42 = vld [vmem:[%s11152_s7] sm:$0xff] }
 0x4ca   :  { %v2478_v29 = vsel %vm11604_vm1, %v2471_v14, 0.0 }
 0x4cb   :  { %v2479_v28 = vadd.f32 %v2478_v29, %v2477_v3 }
 0x4cd   :  { %v2480_v61 = vrot.slane %v2479_v28, 4 }
 0x4cf   :  { %v2481_v55 = vadd.f32 %v2480_v61, %v2479_v28 }
 0x4d1   :  { %v2482_v8 = vrot.slane %v2481_v55, 2 }
 0x4d3   :  { %v2483_v46 = vadd.f32 %v2482_v8, %v2481_v55  ;;  %v73_v8 = vld [vmem:[%s11153_s8 + $0x8] sm:$0xff] }
 0x4d5   :  { %v2484_v41 = vrot.slane %v2483_v46, 1 }
 0x4d7   :  { %v2485_v11 = vadd.f32 %v2484_v41, %v2483_v46  ;;  %v72_v46 = vld [vmem:[%s11153_s8] sm:$0xff] }
 0x4d9   :  { %v2486_v27 = vadd.f32 %v2485_v11, %v67_v2 }
 0x4db   :  { %v4740_v13 = vmul.f32 -1.442695, %v2486_v27 }
 0x4dd   :  { %5446 = vpow2.f32 %v4740_v13  ;;  %v75_v13 = vld [vmem:[%s11153_s8 + $0x18] sm:$0xff] }
 0x4e7   :  { %v5447_v58 = vpop.eup %5446 }
 0x4e8   :  { %v2490_v56 = vadd.f32 1.0, %v5447_v58  ;;  %v74_v58 = vld [vmem:[%s11153_s8 + $0x10] sm:$0xff] }
 0x4ea   :  { %5448 = vrcp.f32 %v2490_v56 }
 0x4f4   :  { %v5449_v5 = vpop.eup %5448 }
 0x4f5   :  { %v2493_v22 = vmul.f32 %v5449_v5, %v2486_v27 }
 0x4f7   :  { %v2497_v51 = vrot.slane %v2493_v22, %v11523_v39 }
 0x4f9   :  { %v2499_v32 = vmul.f32 %v2497_v51, %v69_v23  ;;  %v2498_v40 = vmul.f32 %v2497_v51, %v68_v42  ;;  %v2501_v29 = vmul.f32 %v2497_v51, %v71_v25  ;;  %v2500_v28 = vmul.f32 %v2497_v51, %v70_v9 }
 0x4fb   :  { %v2505_v14 = vsel %vm11604_vm1, %v2499_v32, 0.0  ;;  %v2502_v3 = vsel %vm11604_vm1, %v2498_v40, 0.0  ;;  %v2511_v61 = vsel %vm11604_vm1, %v2501_v29, 0.0  ;;  %v2508_v55 = vsel %vm11604_vm1, %v2500_v28, 0.0 }
 0x4fc   :  { %2506 = vadd.xlane.f32.xlu1 %v2505_v14  ;;  %2503 = vadd.xlane.f32.xlu0 %v2502_v3  ;;  %vm12538_vm1 = vcmask 277504  }
 0x500   :  { %2512 = vadd.xlane.f32.xlu1 %v2511_v61  ;;  %2509 = vadd.xlane.f32.xlu0 %v2508_v55 }
 0x589   :  { %v2507_v41 = vpop.xlane.xlu1 %2506  ;;  %v2504_v2 = vpop.xlane.xlu0 %2503 }
 0x58a   :  { %v2515_v11 = vadd.f32 %v2507_v41, %v73_v8  ;;  %v2514_v27 = vadd.f32 %v2504_v2, %v72_v46  ;;  %v12400_v2 = vmov 0.0  }
 0x58c   :  { %v4742_v56 = vmul.f32 -1.442695, %v2515_v11  ;;  %v4741_v7 = vmul.f32 -1.442695, %v2514_v27 }
 0x58d   :  { %v2513_v5 = vpop.xlane.xlu1 %2512  ;;  %v2510_v22 = vpop.xlane.xlu0 %2509 }
 0x58e   :  { %5450 = vpow2.f32 %v4742_v56  ;;  %v2517_v23 = vadd.f32 %v2513_v5, %v75_v13  ;;  %v2516_v42 = vadd.f32 %v2510_v22, %v74_v58 }
 0x58f   :  { %5452 = vpow2.f32 %v4741_v7 }
 0x590   :  { %v4744_v51 = vmul.f32 -1.442695, %v2517_v23  ;;  %v4743_v25 = vmul.f32 -1.442695, %v2516_v42 }
 0x592   :  { %5454 = vpow2.f32 %v4744_v51  ;;  %v4748_v51 = vld [vmem:[%s11145_s0 + $0x28] sm:$0xff] }
 0x593   :  { %5456 = vpow2.f32 %v4743_v25  ;;  %v4750_v25 = vld [vmem:[%s11145_s0 + $0x38] sm:$0xff] }
 0x598   :  { %v5451_v9 = vpop.eup %5450 }
 0x599   :  { %v5453_v32 = vpop.eup %5452  ;;  %v2531_v40 = vadd.f32 1.0, %v5451_v9 }
 0x59a   :  { %v2530_v14 = vadd.f32 1.0, %v5453_v32 }
 0x59b   :  { %5458 = vrcp.f32 %v2531_v40  ;;  %v4790_v40 = vpack.c.bf16 %v4750_v25, %v4748_v51 }
 0x59c   :  { %v5455_v3 = vpop.eup %5454  ;;  %5460 = vrcp.f32 %v2530_v14  ;;  %v4747_v14 = vld [vmem:[%s11145_s0 + $0x20] sm:$0xff] }
 0x59d   :  { %v5457_v29 = vpop.eup %5456  ;;  %v2533_v28 = vadd.f32 1.0, %v5455_v3  ;;  %v4749_v3 = vld [vmem:[%s11145_s0 + $0x30] sm:$0xff] }
 0x59e   :  { %v2532_v61 = vadd.f32 1.0, %v5457_v29  ;;  %v5555_v29 = vld [vmem:[%s11146_s1 + $0x8] sm:$0xff] }
 0x59f   :  { %5462 = vrcp.f32 %v2533_v28  ;;  %v5556_v28 = vld [vmem:[%s11146_s1 + $0x10] sm:$0xff] }
 0x5a0   :  { %5464 = vrcp.f32 %v2532_v61  ;;  %v5557_v61 = vld [vmem:[%s11146_s1 + $0x18] sm:$0xff] }
 0x5a5   :  { %v5459_v55 = vpop.eup %5458 }
 0x5a6   :  { %v5461_v8 = vpop.eup %5460  ;;  %2549 = vperm.xlu1 %5136, %v5459_v55  }
 0x5a7   :  { %2544 = vperm.xlu0 %5125, %v5461_v8  }
 0x5a9   :  { %v5463_v46 = vpop.eup %5462 }
 0x5aa   :  { %v5465_v41 = vpop.eup %5464 }
 0x5ab   :  { %2559 = vperm.xlu0 %5125, %v5463_v46   ;;  %2554 = vperm.xlu1 %5136, %v5465_v41  }
 0x5af   :  { %5148 = vrot.lane.b32.xlu1 %v12400_v2, %s5607_s18  ;;  %5153 = vrot.lane.b32.xlu0 %v12400_v2, %s5609_s22 }
 0x5b3   :  { %5158 = vrot.lane.b32.xlu1 %v12400_v2, %s5607_s18  ;;  %5163 = vrot.lane.b32.xlu0 %v12400_v2, %s5609_s22 }
 0x5b7   :  { %5168 = vrot.lane.b32.xlu1 %v12400_v2, %s5610_s29  ;;  %5173 = vrot.lane.b32.xlu0 %v12400_v2, %s5612_s13 }
 0x5bb   :  { %5178 = vrot.lane.b32.xlu1 %v12400_v2, %s5610_s29  ;;  %5183 = vrot.lane.b32.xlu0 %v12400_v2, %s5612_s13 }
 0x5bf   :  { %5188 = vrot.lane.b32.xlu1 %v12400_v2, %s5614_s14  ;;  %5193 = vrot.lane.b32.xlu0 %v12400_v2, %s5614_s14 }
 0x5c3   :  { %5198 = vrot.lane.b32.xlu1 %v12400_v2, %s5616_s15  ;;  %5203 = vrot.lane.b32.xlu0 %v12400_v2, %s5616_s15 }
 0x5c7   :  { %5208 = vrot.lane.b32.xlu1 %v12400_v2, %s5618_s16  ;;  %5213 = vrot.lane.b32.xlu0 %v12400_v2, %s5618_s16 }
 0x5cb   :  { %5218 = vrot.lane.b32.xlu1 %v12400_v2, %s5620_s17  ;;  %5223 = vrot.lane.b32.xlu0 %v12400_v2, %s5623_s2 }
 0x5cf   :  { %5228 = vrot.lane.b32.xlu1 %v12400_v2, %s5620_s17  ;;  %5233 = vrot.lane.b32.xlu0 %v12400_v2, %s5623_s2 }
 0x5d3   :  { %5238 = vrot.lane.b32.xlu1 %v12400_v2, %s5627_s19  ;;  %5243 = vrot.lane.b32.xlu0 %v12400_v2, %s5627_s19 }
 0x5d7   :  { %5248 = vrot.lane.b32.xlu1 %v12400_v2, %s5628_s20  ;;  %5253 = vrot.lane.b32.xlu0 %v12400_v2, %s5628_s20 }
 0x5db   :  { %5258 = vrot.lane.b32.xlu1 %v12400_v2, %s5631_s21  ;;  %5263 = vrot.lane.b32.xlu0 %v12400_v2, %s5631_s21 }
 0x5df   :  { %5268 = vrot.lane.b32.xlu1 %v12400_v2, %s5634_s23  ;;  %5273 = vrot.lane.b32.xlu0 %v12400_v2, %s5634_s23 }
 0x5e3   :  { %5278 = vrot.lane.b32.xlu1 %v12400_v2, %s12401_s30  ;;  %5283 = vrot.lane.b32.xlu0 %v12400_v2, %s12401_s30 }
 0x625   :  { %v2550_v11 = vpop.permute.xlu1 %2549 }
 0x626   :  { %v2545_v27 = vpop.permute.xlu0 %2544  ;;  %v2565_v13 = vmul.f32 %v2550_v11, %v8676_v6  ;;  %v2564_v58 = vmul.f32 %v2550_v11, %v8673_v26 }
 0x627   :  { %v2563_v56 = vmul.f32 %v2545_v27, %v8668_v0  ;;  %v2562_v7 = vmul.f32 %v2545_v27, %v8663_v48  ;;  %v12411_v27 = vld [vmem:[#allocation12_spill] sm:$0xff] }
 0x629   :  { %v4782_v5 = vpack.c.bf16 %v2565_v13, %v2563_v56  ;;  %v4784_v22 = vpack.c.bf16 %v2564_v58, %v2562_v7 }
 0x62a   :  { %v2555_v23 = vpop.permute.xlu1 %2554  ;;  %v2560_v42 = vpop.permute.xlu0 %2559 }
 0x62b   :  { %v2566_v6 = vmul.f32 %v2555_v23, %v8680_v10  ;;  %v2567_v26 = vmul.f32 %v2555_v23, %v8682_v33  ;;  %v2568_v0 = vmul.f32 %v2560_v42, %v8686_v12  ;;  %v2569_v48 = vmul.f32 %v2560_v42, %v8688_v20  ;;  %4783 = vmatprep.subr.bf16.mxu1 %v4782_v5  ;;  %v76_v10 = vld [vmem:[%s11154_s9] sm:$0xff]  ;;  %v77_v12 = vld [vmem:[%s11154_s9 + $0x8] sm:$0xff] }
 0x62c   :  { %4785 = vmatpush1.bf16.msra.mxu1 %v4784_v22  ;;  %v4792_v33 = vpack.c.bf16 %v4749_v3, %v4747_v14  ;;  %v5554_v20 = vld [vmem:[%s11146_s1] sm:$0xff]  ;;  %s12402_s1 = smov 114  }
 0x62d   :  { %v4786_v9 = vpack.c.bf16 %v2569_v48, %v2567_v26  ;;  %v4788_v32 = vpack.c.bf16 %v2568_v0, %v2566_v6  ;;  %5288 = vrot.lane.b32.xlu1 %v12400_v2, %s12402_s1  ;;  %5293 = vrot.lane.b32.xlu0 %v12400_v2, %s12402_s1 }
 0x62e   :  { %v8891_v26 = vpop.permute.xlu1 %5148 }
 0x62f   :  { %4787 = vmatprep.subr.bf16.mxu1 %v4786_v9  ;;  %12412 = vst [vmem:[#allocation138_spill] sm:$0xff] %v8891_v26 }
 0x630   :  { %4789 = vmatpush1.bf16.msra.mxu1 %v4788_v32 }
 0x631   :  { %4791 = vmatprep.subr.bf16.mxu1 %v4790_v40  ;;  %5298 = vrot.lane.b32.xlu1 %v12400_v2, %s12403_s4  ;;  %v8902_v40 = vpop.permute.xlu0 %5153 }
 0x632   :  { %5303 = vrot.lane.b32.xlu0 %v12400_v2, %s12403_s4  ;;  %v8900_v32 = vpop.permute.xlu1 %5158 }
 0x633   :  { %4745 = vmatmul.mubr.msk.f32.vlgmr.msra.gmra.mrb[0].mxu1 %vm539_vm2, %v76_v10  ;;  %12413 = vst [vmem:[#allocation152_spill] sm:$0xff] %v8900_v32 }
 0x634   :  { %2656 = vmatprep.mubr.f32.mxu1 %v12400_v2  ;;  %4793 = vmatpush1.bf16.msra.mxu1 %v4792_v33 }
 0x635   :  { %5308 = vrot.lane.b32.xlu1 %v12400_v2, %s12404_s25  ;;  %v8910_v10 = vpop.permute.xlu0 %5163 }
 0x636   :  { %5313 = vrot.lane.b32.xlu0 %v12400_v2, %s5643_s12  ;;  %v8908_v3 = vpop.permute.xlu1 %5168  ;;  %12415 = vst [vmem:[#allocation146_spill] sm:$0xff] %v8910_v10 }
 0x637   :  { %4746 = vmatmul.mubr.msk.f32.gmra.mrb[2].mxu1 %vm539_vm2, %v77_v12  ;;  %12414 = vst [vmem:[#allocation53_spill] sm:$0xff] %v8908_v3 }
 0x638   :  { %2740 = vmatprep.mubr.f32.mxu1 %v12400_v2 }
 0x639   :  { %5318 = vrot.lane.b32.xlu1 %v12400_v2, %s12404_s25  ;;  %v8922_v12 = vpop.permute.xlu0 %5173 }
 0x63a   :  { %5323 = vrot.lane.b32.xlu0 %v12400_v2, %s5643_s12  ;;  %v8920_v33 = vpop.permute.xlu1 %5178 }
 0x63b   :  { %4751 = vmatmul.mubr.msk.f32.vlgmr.msra.gmra.mrb[4].mxu1 %vm147_vm0, %v5554_v20  ;;  %12416 = vst [vmem:[#allocation135_spill] sm:$0xff] %v8920_v33 }
 0x63c   :  { %2746 = vmatprep.mubr.f32.mxu1 %v12400_v2 }
 0x63d   :  { %5328 = vrot.lane.b32.xlu1 %v12400_v2, %s12405_s26 }
 0x63e   :  { %5333 = vrot.lane.b32.xlu0 %v12400_v2, %s12405_s26 }
 0x63f   :  { %4752 = vmatmul.mubr.msk.f32.gmra.mrb[6].mxu1 %vm147_vm0, %v5555_v29  ;;  %v8928_v29 = vpop.permute.xlu1 %5188 }
 0x640   :  { %2752 = vmatprep.mubr.f32.mxu1 %v12400_v2  ;;  %12417 = vst [vmem:[#allocation156_spill] sm:$0xff] %v8928_v29 }
 0x641   :  { %5338 = vrot.lane.b32.xlu1 %v12400_v2, %s12406_s27 }
 0x643   :  { %4753 = vmatmul.mubr.msk.f32.gmra.mrb[8].mxu1 %vm147_vm0, %v5556_v28  ;;  %v8930_v28 = vpop.permute.xlu0 %5183 }
 0x644   :  { %2758 = vmatprep.mubr.f32.mxu1 %v12400_v2  ;;  %12418 = vst [vmem:[#allocation141_spill] sm:$0xff] %v8930_v28 }
 0x647   :  { %4754 = vmatmul.mubr.msk.f32.gmra.mrb[10].mxu1 %vm147_vm0, %v5557_v61 }
 0x706   :  { %v8872_v55 = vpop.f32.mrb[0].mxu1 }
 0x707   :  { %12407 = vst [vmem:[#allocation134_spill] sm:$0xff] %v8872_v55  ;;  %v8874_v8 = vpop.f32.mrb[1].mxu1 }
 0x708   :  { %12408 = vst [vmem:[#allocation122_spill] sm:$0xff] %v8874_v8 }
 0x70a   :  { %v8876_v46 = vpop.f32.mrb[2].mxu1 }
 0x70b   :  { %12409 = vst [vmem:[#allocation140_spill] sm:$0xff] %v8876_v46  ;;  %v8878_v41 = vpop.f32.mrb[3].mxu1 }
 0x70c   :  { %12410 = vst [vmem:[#allocation124_spill] sm:$0xff] %v8878_v41 }
 0x70e   :  { %v2742_v11 = vpop.f32.mrb[4].mxu1 }
 0x70f   :  { %v2743_v13 = vadd.f32 %v2742_v11, %v12411_v27  ;;  %v2744_v58 = vpop.f32.mrb[5].mxu1  ;;  %v8940_v11 = vpop.permute.xlu1 %5198 }
 0x710   :  { %v2745_v9 = vadd.f32 %v2744_v58, %v12411_v27  ;;  %12419 = vst [vmem:[#allocation148_spill] sm:$0xff] %v8940_v11  ;;  %v8942_v27 = vpop.permute.xlu0 %5193 }
 0x711   :  { %v4755_v56 = vmul.f32 -1.442695, %v2743_v13  ;;  %12420 = vst [vmem:[#allocation147_spill] sm:$0xff] %v8942_v27 }
 0x712   :  { %v2748_v7 = vpop.f32.mrb[6].mxu1  ;;  %v4756_v14 = vmul.f32 -1.442695, %v2745_v9 }
 0x713   :  { %5466 = vpow2.f32 %v4755_v56  ;;  %v8881_v5 = vpop.f32.mrb[7].mxu1 }
 0x714   :  { %v8950_v58 = vpop.permute.xlu0 %5203 }
 0x715   :  { %12422 = vst [vmem:[#allocation162_spill] sm:$0xff] %v8950_v58 }
 0x716   :  { %v8883_v22 = vpop.f32.mrb[8].mxu1 }
 0x717   :  { %v8885_v23 = vpop.f32.mrb[9].mxu1  ;;  %v2755_v35 = vadd.f32 %v8883_v22, %v12453_v30 }
 0x71a   :  { %v8887_v42 = vpop.f32.mrb[10].mxu1 }
 0x71b   :  { %v8889_v51 = vpop.f32.mrb[11].mxu1 }
 0x71d   :  { %v5467_v25 = vpop.eup %5466 }
 0x71e   :  { %v2789_v6 = vadd.f32 1.0, %v5467_v25 }
 0x720   :  { %5468 = vrcp.f32 %v2789_v6  ;;  %v8962_v6 = vpop.permute.xlu0 %5213 }
 0x721   :  { %5470 = vpow2.f32 %v4756_v14  ;;  %12424 = vst [vmem:[#allocation137_spill] sm:$0xff] %v8962_v6  ;;  %v12425_v14 = vld [vmem:[#allocation15_spill] sm:$0xff] }
 0x724   :  { %v8973_v39 = vpop.permute.xlu0 %5223 }
 0x725   :  { %12427 = vst [vmem:[#allocation159_spill] sm:$0xff] %v8973_v39 }
 0x72a   :  { %v5469_v0 = vpop.eup %5468 }
 0x72b   :  { %v8893_v48 = vmul.f32 %v5469_v0, %v2743_v13  ;;  %v5471_v20 = vpop.eup %5470  ;;  %v8948_v13 = vpop.permute.xlu1 %5208 }
 0x72c   :  { %v2790_v61 = vadd.f32 1.0, %v5471_v20  ;;  %12421 = vst [vmem:[#allocation157_spill] sm:$0xff] %v8948_v13  ;;  %v2749_v20 = vadd.f32 %v2748_v7, %v12425_v14 }
 0x72d   :  { %2919 = vrot.lane.b32.xlu1 %v8893_v48, %s5609_s22  ;;  %2855 = vrot.lane.b32.xlu0 %v8893_v48, %s5607_s18 }
 0x72e   :  { %5472 = vrcp.f32 %v2790_v61  ;;  %v4757_v41 = vmul.f32 -1.442695, %v2749_v20 }
 0x72f   :  { %v8960_v25 = vpop.permute.xlu1 %5218 }
 0x730   :  { %12423 = vst [vmem:[#allocation150_spill] sm:$0xff] %v8960_v25  ;;  %5474 = vpow2.f32 %v4757_v41  ;;  %v2751_v41 = vadd.f32 %v8881_v5, %v12425_v14 }
 0x731   :  { %3047 = vrot.lane.b32.xlu1 %v8893_v48, %s5612_s13  ;;  %2983 = vrot.lane.b32.xlu0 %v8893_v48, %s5610_s29 }
 0x732   :  { %v4758_v55 = vmul.f32 -1.442695, %v2751_v41 }
 0x733   :  { %v8971_v61 = vpop.permute.xlu1 %5228 }
 0x734   :  { %12426 = vst [vmem:[#allocation139_spill] sm:$0xff] %v8971_v61  ;;  %5476 = vpow2.f32 %v4758_v55 }
 0x735   :  { %3367 = vrot.lane.b32.xlu1 %v8893_v48, %s5623_s2  ;;  %3111 = vrot.lane.b32.xlu0 %v8893_v48, %s5614_s14 }
 0x737   :  { %v8983_v7 = vpop.permute.xlu1 %5238 }
 0x738   :  { %v5473_v56 = vpop.eup %5472  ;;  %12428 = vst [vmem:[#allocation172_spill] sm:$0xff] %v8983_v7 }
 0x739   :  { %3669 = vrot.lane.b32.xlu1 %v8893_v48, %s5634_s23  ;;  %3175 = vrot.lane.b32.xlu0 %v8893_v48, %s5616_s15  ;;  %v8964_v0 = vmul.f32 %v5473_v56, %v2745_v9  ;;  %v8985_v9 = vpop.permute.xlu0 %5233 }
 0x73a   :  { %12429 = vst [vmem:[#allocation164_spill] sm:$0xff] %v8985_v9  ;;  %v5475_v8 = vpop.eup %5474 }
 0x73b   :  { %v8991_v56 = vpop.permute.xlu1 %5248  ;;  %v2791_v18 = vadd.f32 1.0, %v5475_v8 }
 0x73c   :  { %12430 = vst [vmem:[#allocation154_spill] sm:$0xff] %v8991_v56 }
 0x73d   :  { %3733 = vrot.lane.b32.xlu1 %v8893_v48, %s12401_s30  ;;  %3239 = vrot.lane.b32.xlu0 %v8893_v48, %s5618_s16  ;;  %v8993_v46 = vpop.permute.xlu0 %5243  ;;  %5478 = vrcp.f32 %v2791_v18 }
 0x73e   :  { %12431 = vst [vmem:[#allocation174_spill] sm:$0xff] %v8993_v46  ;;  %v5477_v18 = vpop.eup %5476 }
 0x73f   :  { %v9005_v4 = vpop.permute.xlu1 %5258  ;;  %v2792_v60 = vadd.f32 1.0, %v5477_v18 }
 0x740   :  { %12432 = vst [vmem:[#allocation166_spill] sm:$0xff] %v9005_v4 }
 0x741   :  { %3797 = vrot.lane.b32.xlu1 %v8893_v48, %s12402_s1  ;;  %3303 = vrot.lane.b32.xlu0 %v8893_v48, %s5620_s17  ;;  %v9007_v17 = vpop.permute.xlu0 %5253  ;;  %5480 = vrcp.f32 %v2792_v60 }
 0x742   :  { %12433 = vst [vmem:[#allocation149_spill] sm:$0xff] %v9007_v17 }
 0x743   :  { %v9013_v5 = vpop.permute.xlu1 %5268 }
 0x744   :  { %12434 = vst [vmem:[#allocation163_spill] sm:$0xff] %v9013_v5 }
 0x745   :  { %3861 = vrot.lane.b32.xlu1 %v8893_v48, %s12403_s4  ;;  %3431 = vrot.lane.b32.xlu0 %v8893_v48, %s5627_s19  ;;  %v9015_v14 = vpop.permute.xlu0 %5263 }
 0x746   :  { %12435 = vst [vmem:[#allocation176_spill] sm:$0xff] %v9015_v14 }
 0x747   :  { %v9025_v55 = vpop.permute.xlu1 %5278  ;;  %v5479_v38 = vpop.eup %5478 }
 0x748   :  { %12436 = vst [vmem:[#allocation155_spill] sm:$0xff] %v9025_v55  ;;  %v9033_v53 = vmul.f32 %v5479_v38, %v2749_v20 }
 0x749   :  { %3925 = vrot.lane.b32.xlu1 %v8893_v48, %s12404_s25  ;;  %3495 = vrot.lane.b32.xlu0 %v8893_v48, %s5628_s20  ;;  %v9027_v8 = vpop.permute.xlu0 %5273 }
 0x74a   :  { %12437 = vst [vmem:[#allocation178_spill] sm:$0xff] %v9027_v8  ;;  %12438 = vst [vmem:[#allocation175_spill] sm:$0xff] %v9033_v53  ;;  %v5190_v8 = vunpack.i.l.bf16 %v8928_v29 }
 0x74b   :  { %v9035_v62 = vpop.permute.xlu1 %5288  ;;  %v5481_v60 = vpop.eup %5480 }
 0x74c   :  { %12439 = vst [vmem:[#allocation190_spill] sm:$0xff] %v9035_v62  ;;  %v9063_v19 = vmul.f32 %v5481_v60, %v2751_v41 }
 0x74d   :  { %4053 = vrot.lane.b32.xlu1 %v8893_v48, %s12405_s26  ;;  %3559 = vrot.lane.b32.xlu0 %v8893_v48, %s5631_s21  ;;  %v9037_v34 = vpop.permute.xlu0 %5283 }
 0x74e   :  { %12440 = vst [vmem:[#allocation192_spill] sm:$0xff] %v9037_v34  ;;  %12445 = vst [vmem:[#allocation188_spill] sm:$0xff] %v9063_v19 }
 0x74f   :  { %v9047_v18 = vpop.permute.xlu1 %5298 }
 0x750   :  { %12441 = vst [vmem:[#allocation167_spill] sm:$0xff] %v9047_v18  ;;  %v2757_v18 = vadd.f32 %v8885_v23, %v12453_v30 }
 0x751   :  { %4117 = vrot.lane.b32.xlu1 %v8893_v48, %s12406_s27  ;;  %3989 = vrot.lane.b32.xlu0 %v8893_v48, %s5643_s12  ;;  %v9049_v38 = vpop.permute.xlu0 %5293 }
 0x752   :  { %12442 = vst [vmem:[#allocation186_spill] sm:$0xff] %v9049_v38  ;;  %v4760_v34 = vmul.f32 -1.442695, %v2757_v18 }
 0x753   :  { %v9055_v20 = vpop.permute.xlu1 %5308 }
 0x754   :  { %12443 = vst [vmem:[#allocation184_spill] sm:$0xff] %v9055_v20 }
 0x755   :  { %2857 = vrot.lane.b32.xlu1 %v8964_v0, %s5607_s18  ;;  %2921 = vrot.lane.b32.xlu0 %v8964_v0, %s5609_s22  ;;  %v9057_v45 = vpop.permute.xlu0 %5303  ;;  %v12574_v9 = vld [vmem:[#allocation188_spill] sm:$0xff] }
 0x756   :  { %12444 = vst [vmem:[#allocation165_spill] sm:$0xff] %v9057_v45 }
 0x757   :  { %v9069_v37 = vpop.permute.xlu1 %5318  ;;  %v12582_v27 = vld [vmem:[#allocation167_spill] sm:$0xff] }
 0x758   :  { %12446 = vst [vmem:[#allocation200_spill] sm:$0xff] %v9069_v37 }
 0x759   :  { %2985 = vrot.lane.b32.xlu1 %v8964_v0, %s5610_s29  ;;  %3049 = vrot.lane.b32.xlu0 %v8964_v0, %s5612_s13  ;;  %v9071_v52 = vpop.permute.xlu0 %5313 }
 0x75a   :  { %12447 = vst [vmem:[#allocation198_spill] sm:$0xff] %v9071_v52 }
 0x75b   :  { %v9077_v50 = vpop.permute.xlu1 %5328 }
 0x75c   :  { %12448 = vst [vmem:[#allocation71_spill] sm:$0xff] %v9077_v50 }
 0x75d   :  { %3113 = vrot.lane.b32.xlu1 %v8964_v0, %s5614_s14  ;;  %3369 = vrot.lane.b32.xlu0 %v8964_v0, %s5623_s2  ;;  %v9079_v41 = vpop.permute.xlu0 %5323 }
 0x75e   :  { %12449 = vst [vmem:[#allocation187_spill] sm:$0xff] %v9079_v41 }
 0x75f   :  { %v9089_v60 = vpop.permute.xlu1 %5338 }
 0x760   :  { %12450 = vst [vmem:[#allocation258_spill] sm:$0xff] %v9089_v60 }
 0x761   :  { %3177 = vrot.lane.b32.xlu1 %v8964_v0, %s5616_s15  ;;  %3671 = vrot.lane.b32.xlu0 %v8964_v0, %s5634_s23  ;;  %v9091_v31 = vpop.permute.xlu0 %5333 }
 0x762   :  { %12451 = vst [vmem:[#allocation206_spill] sm:$0xff] %v9091_v31  ;;  %v4759_v31 = vmul.f32 -1.442695, %v2755_v35 }
 0x764   :  { %5482 = vpow2.f32 %v4759_v31 }
 0x765   :  { %3241 = vrot.lane.b32.xlu1 %v8964_v0, %s5618_s16  ;;  %3735 = vrot.lane.b32.xlu0 %v8964_v0, %s12401_s30 }
 0x769   :  { %3305 = vrot.lane.b32.xlu1 %v8964_v0, %s5620_s17  ;;  %3799 = vrot.lane.b32.xlu0 %v8964_v0, %s12402_s1 }
 0x76d   :  { %3433 = vrot.lane.b32.xlu1 %v8964_v0, %s5627_s19  ;;  %3863 = vrot.lane.b32.xlu0 %v8964_v0, %s12403_s4 }
 0x76e   :  { %v5483_v31 = vpop.eup %5482 }
 0x771   :  { %3497 = vrot.lane.b32.xlu1 %v8964_v0, %s5628_s20  ;;  %3927 = vrot.lane.b32.xlu0 %v8964_v0, %s12404_s25 }
 0x775   :  { %3561 = vrot.lane.b32.xlu1 %v8964_v0, %s5631_s21  ;;  %4055 = vrot.lane.b32.xlu0 %v8964_v0, %s12405_s26 }
 0x779   :  { %3991 = vrot.lane.b32.xlu1 %v8964_v0, %s5643_s12  ;;  %4119 = vrot.lane.b32.xlu0 %v8964_v0, %s12406_s27 }
 0x77d   :  { %2925 = vrot.lane.b32.xlu1 %v9033_v53, %s5609_s22  ;;  %2861 = vrot.lane.b32.xlu0 %v9033_v53, %s5607_s18 }
 0x781   :  { %3053 = vrot.lane.b32.xlu1 %v9033_v53, %s5612_s13  ;;  %2989 = vrot.lane.b32.xlu0 %v9033_v53, %s5610_s29 }
 0x785   :  { %3373 = vrot.lane.b32.xlu1 %v9033_v53, %s5623_s2  ;;  %3117 = vrot.lane.b32.xlu0 %v9033_v53, %s5614_s14 }
 0x789   :  { %3995 = vrot.lane.b32.xlu1 %v9033_v53, %s5643_s12  ;;  %3181 = vrot.lane.b32.xlu0 %v9033_v53, %s5616_s15 }
 0x78d   :  { %2863 = vrot.lane.b32.xlu1 %v9063_v19, %s5607_s18  ;;  %3245 = vrot.lane.b32.xlu0 %v9033_v53, %s5618_s16 }
 0x791   :  { %2991 = vrot.lane.b32.xlu1 %v9063_v19, %s5610_s29  ;;  %3309 = vrot.lane.b32.xlu0 %v9033_v53, %s5620_s17 }
 0x795   :  { %3119 = vrot.lane.b32.xlu1 %v9063_v19, %s5614_s14  ;;  %3437 = vrot.lane.b32.xlu0 %v9033_v53, %s5627_s19 }
 0x799   :  { %3183 = vrot.lane.b32.xlu1 %v9063_v19, %s5616_s15  ;;  %3501 = vrot.lane.b32.xlu0 %v9033_v53, %s5628_s20 }
 0x79d   :  { %3247 = vrot.lane.b32.xlu1 %v9063_v19, %s5618_s16  ;;  %3565 = vrot.lane.b32.xlu0 %v9033_v53, %s5631_s21 }
 0x79f   :  { %v9097_v57 = vpop.permute.xlu1 %2919  ;;  %v9099_v1 = vpop.permute.xlu0 %2855 }
 0x7a1   :  { %3311 = vrot.lane.b32.xlu1 %v9063_v19, %s5620_s17  ;;  %3675 = vrot.lane.b32.xlu0 %v9033_v53, %s5634_s23 }
 0x7a3   :  { %v9105_v47 = vpop.permute.xlu1 %3047  ;;  %v9107_v43 = vpop.permute.xlu0 %2983 }
 0x7a4   :  { %12452 = vst [vmem:[#allocation64_spill] sm:$0xff] %v9105_v47 }
 0x7a5   :  { %3439 = vrot.lane.b32.xlu1 %v9063_v19, %s5627_s19  ;;  %3739 = vrot.lane.b32.xlu0 %v9033_v53, %s12401_s30 }
 0x7a7   :  { %v9115_v49 = vpop.permute.xlu1 %3367  ;;  %v9117_v16 = vpop.permute.xlu0 %3111 }
 0x7a9   :  { %3503 = vrot.lane.b32.xlu1 %v9063_v19, %s5628_s20  ;;  %3803 = vrot.lane.b32.xlu0 %v9033_v53, %s12402_s1 }
 0x7ab   :  { %v9123_v60 = vpop.permute.xlu1 %3669  ;;  %v9125_v22 = vpop.permute.xlu0 %3175 }
 0x7ac   :  { %12454 = vst [vmem:[#allocation88_spill] sm:$0xff] %v9123_v60 }
 0x7ad   :  { %3567 = vrot.lane.b32.xlu1 %v9063_v19, %s5631_s21  ;;  %3867 = vrot.lane.b32.xlu0 %v9033_v53, %s12403_s4 }
 0x7af   :  { %v9131_v41 = vpop.permute.xlu1 %3733  ;;  %v9133_v50 = vpop.permute.xlu0 %3239 }
 0x7b0   :  { %12455 = vst [vmem:[#allocation208_spill] sm:$0xff] %v9131_v41 }
 0x7b1   :  { %3677 = vrot.lane.b32.xlu1 %v9063_v19, %s5634_s23  ;;  %3931 = vrot.lane.b32.xlu0 %v9033_v53, %s12404_s25 }
 0x7b3   :  { %v9139_v52 = vpop.permute.xlu1 %3797  ;;  %v9141_v60 = vpop.permute.xlu0 %3303 }
 0x7b4   :  { %12456 = vst [vmem:[#allocation179_spill] sm:$0xff] %v9139_v52  ;;  %v2793_v52 = vadd.f32 1.0, %v5483_v31 }
 0x7b5   :  { %3741 = vrot.lane.b32.xlu1 %v9063_v19, %s12401_s30  ;;  %4059 = vrot.lane.b32.xlu0 %v9033_v53, %s12405_s26 }
 0x7b6   :  { %5484 = vrcp.f32 %v2793_v52 }
 0x7b7   :  { %v9147_v41 = vpop.permute.xlu1 %3861  ;;  %v9149_v37 = vpop.permute.xlu0 %3431  ;;  %5486 = vpow2.f32 %v4760_v34 }
 0x7b8   :  { %12457 = vst [vmem:[#allocation199_spill] sm:$0xff] %v9147_v41  ;;  %12458 = vst [vmem:[#allocation202_spill] sm:$0xff] %v9149_v37 }
 0x7b9   :  { %3805 = vrot.lane.b32.xlu1 %v9063_v19, %s12402_s1  ;;  %4123 = vrot.lane.b32.xlu0 %v9033_v53, %s12406_s27 }
 0x7bb   :  { %v9155_v45 = vpop.permute.xlu1 %3925  ;;  %v9157_v20 = vpop.permute.xlu0 %3495 }
 0x7bc   :  { %12459 = vst [vmem:[#allocation173_spill] sm:$0xff] %v9155_v45  ;;  %12460 = vst [vmem:[#allocation177_spill] sm:$0xff] %v9157_v20 }
 0x7bd   :  { %3869 = vrot.lane.b32.xlu1 %v9063_v19, %s12403_s4  ;;  %2927 = vrot.lane.b32.xlu0 %v9063_v19, %s5609_s22 }
 0x7bf   :  { %v9163_v41 = vpop.permute.xlu1 %4053  ;;  %v9165_v44 = vpop.permute.xlu0 %3559 }
 0x7c0   :  { %12461 = vst [vmem:[#allocation204_spill] sm:$0xff] %v9163_v41  ;;  %12462 = vst [vmem:[#allocation263_spill] sm:$0xff] %v9165_v44  ;;  %v5485_v44 = vpop.eup %5484 }
 0x7c1   :  { %3933 = vrot.lane.b32.xlu1 %v9063_v19, %s12404_s25  ;;  %3055 = vrot.lane.b32.xlu0 %v9063_v19, %s5612_s13  ;;  %v5487_v34 = vpop.eup %5486 }
 0x7c3   :  { %v9171_v31 = vpop.permute.xlu1 %4117  ;;  %v9173_v45 = vpop.permute.xlu0 %3989 }
 0x7c4   :  { %12463 = vst [vmem:[#allocation59_spill] sm:$0xff] %v9171_v31  ;;  %12464 = vst [vmem:[#allocation211_spill] sm:$0xff] %v9173_v45  ;;  %v9187_v31 = vmul.f32 %v5485_v44, %v2755_v35 }
 0x7c5   :  { %4061 = vrot.lane.b32.xlu1 %v9063_v19, %s12405_s26  ;;  %3375 = vrot.lane.b32.xlu0 %v9063_v19, %s5623_s2 }
 0x7c6   :  { %12465 = vst [vmem:[#allocation215_spill] sm:$0xff] %v9187_v31 }
 0x7c7   :  { %v9179_v52 = vpop.permute.xlu1 %2857  ;;  %v9181_v41 = vpop.permute.xlu0 %2921 }
 0x7c9   :  { %4125 = vrot.lane.b32.xlu1 %v9063_v19, %s12406_s27  ;;  %3997 = vrot.lane.b32.xlu0 %v9063_v19, %s5643_s12 }
 0x7cb   :  { %v9189_v45 = vpop.permute.xlu1 %2985  ;;  %v9191_v38 = vpop.permute.xlu0 %3049 }
 0x7cc   :  { %12466 = vst [vmem:[#allocation213_spill] sm:$0xff] %v9191_v38 }
 0x7cd   :  { %2931 = vrot.lane.b32.xlu1 %v9187_v31, %s5609_s22  ;;  %2867 = vrot.lane.b32.xlu0 %v9187_v31, %s5607_s18 }
 0x7cf   :  { %v9199_v54 = vpop.permute.xlu1 %3113  ;;  %v9201_v20 = vpop.permute.xlu0 %3369 }
 0x7d0   :  { %12467 = vst [vmem:[#allocation260_spill] sm:$0xff] %v9199_v54  ;;  %12468 = vst [vmem:[#allocation68_spill] sm:$0xff] %v9201_v20  ;;  %v12488_v54 = vld [vmem:[#allocation7_spill] sm:$0xff] }
 0x7d1   :  { %3059 = vrot.lane.b32.xlu1 %v9187_v31, %s5612_s13  ;;  %2995 = vrot.lane.b32.xlu0 %v9187_v31, %s5610_s29  ;;  %v2761_v53 = vadd.f32 %v8887_v42, %v12488_v54 }
 0x7d3   :  { %v9207_v44 = vpop.permute.xlu1 %3177  ;;  %v9209_v30 = vpop.permute.xlu0 %3671 }
 0x7d4   :  { %12469 = vst [vmem:[#allocation97_spill] sm:$0xff] %v9207_v44  ;;  %12470 = vst [vmem:[#allocation214_spill] sm:$0xff] %v9209_v30 }
 0x7d5   :  { %3123 = vrot.lane.b32.xlu1 %v9187_v31, %s5614_s14  ;;  %3315 = vrot.lane.b32.xlu0 %v9187_v31, %s5620_s17 }
 0x7d7   :  { %v9215_v35 = vpop.permute.xlu1 %3241  ;;  %v9217_v23 = vpop.permute.xlu0 %3735 }
 0x7d8   :  { %12471 = vst [vmem:[#allocation56_spill] sm:$0xff] %v9215_v35  ;;  %12472 = vst [vmem:[#allocation66_spill] sm:$0xff] %v9217_v23 }
 0x7d9   :  { %3187 = vrot.lane.b32.xlu1 %v9187_v31, %s5616_s15  ;;  %3681 = vrot.lane.b32.xlu0 %v9187_v31, %s5634_s23 }
 0x7db   :  { %v9223_v20 = vpop.permute.xlu1 %3305  ;;  %v9225_v30 = vpop.permute.xlu0 %3799 }
 0x7dc   :  { %12473 = vst [vmem:[#allocation217_spill] sm:$0xff] %v9223_v20  ;;  %12474 = vst [vmem:[#allocation185_spill] sm:$0xff] %v9225_v30  ;;  %v2794_v20 = vadd.f32 1.0, %v5487_v34 }
 0x7dd   :  { %3251 = vrot.lane.b32.xlu1 %v9187_v31, %s5618_s16  ;;  %3745 = vrot.lane.b32.xlu0 %v9187_v31, %s12401_s30 }
 0x7de   :  { %5488 = vrcp.f32 %v2794_v20 }
 0x7df   :  { %v9231_v35 = vpop.permute.xlu1 %3433  ;;  %v9233_v23 = vpop.permute.xlu0 %3863 }
 0x7e0   :  { %12475 = vst [vmem:[#allocation220_spill] sm:$0xff] %v9231_v35  ;;  %12476 = vst [vmem:[#allocation189_spill] sm:$0xff] %v9233_v23 }
 0x7e1   :  { %3379 = vrot.lane.b32.xlu1 %v9187_v31, %s5623_s2  ;;  %3809 = vrot.lane.b32.xlu0 %v9187_v31, %s12402_s1 }
 0x7e3   :  { %v9239_v44 = vpop.permute.xlu1 %3497  ;;  %v9241_v30 = vpop.permute.xlu0 %3927 }
 0x7e4   :  { %12477 = vst [vmem:[#allocation218_spill] sm:$0xff] %v9239_v44  ;;  %12478 = vst [vmem:[#allocation222_spill] sm:$0xff] %v9241_v30 }
 0x7e5   :  { %3443 = vrot.lane.b32.xlu1 %v9187_v31, %s5627_s19  ;;  %3873 = vrot.lane.b32.xlu0 %v9187_v31, %s12403_s4 }
 0x7e7   :  { %v9247_v35 = vpop.permute.xlu1 %3561  ;;  %v9249_v23 = vpop.permute.xlu0 %4055 }
 0x7e8   :  { %12479 = vst [vmem:[#allocation191_spill] sm:$0xff] %v9247_v35  ;;  %12480 = vst [vmem:[#allocation261_spill] sm:$0xff] %v9249_v23  ;;  %v5489_v23 = vpop.eup %5488 }
 0x7e9   :  { %3507 = vrot.lane.b32.xlu1 %v9187_v31, %s5628_s20  ;;  %4001 = vrot.lane.b32.xlu0 %v9187_v31, %s5643_s12 }
 0x7eb   :  { %v9255_v34 = vpop.permute.xlu1 %3991  ;;  %v9257_v30 = vpop.permute.xlu0 %4119 }
 0x7ec   :  { %12481 = vst [vmem:[#allocation229_spill] sm:$0xff] %v9255_v34  ;;  %12482 = vst [vmem:[#allocation227_spill] sm:$0xff] %v9257_v30  ;;  %v9271_v34 = vmul.f32 %v5489_v23, %v2757_v18  ;;  %v2763_v18 = vadd.f32 %v8889_v51, %v12488_v54 }
 0x7ed   :  { %3571 = vrot.lane.b32.xlu1 %v9187_v31, %s5631_s21  ;;  %4065 = vrot.lane.b32.xlu0 %v9187_v31, %s12405_s26 }
 0x7ee   :  { %12485 = vst [vmem:[#allocation94_spill] sm:$0xff] %v9271_v34 }
 0x7ef   :  { %v9263_v20 = vpop.permute.xlu1 %2925  ;;  %v9265_v35 = vpop.permute.xlu0 %2861 }
 0x7f0   :  { %12483 = vst [vmem:[#allocation90_spill] sm:$0xff] %v9263_v20  ;;  %12484 = vst [vmem:[#allocation32_spill] sm:$0xff] %v9265_v35 }
 0x7f1   :  { %3937 = vrot.lane.b32.xlu1 %v9187_v31, %s12404_s25  ;;  %4129 = vrot.lane.b32.xlu0 %v9187_v31, %s12406_s27  ;;  %v4761_v31 = vmul.f32 -1.442695, %v2761_v53 }
 0x7f3   :  { %v9273_v30 = vpop.permute.xlu1 %3053  ;;  %v9275_v44 = vpop.permute.xlu0 %2989  ;;  %5490 = vpow2.f32 %v4761_v31 }
 0x7f4   :  { %12486 = vst [vmem:[#allocation92_spill] sm:$0xff] %v9273_v30  ;;  %12487 = vst [vmem:[#allocation72_spill] sm:$0xff] %v9275_v44  ;;  %v4762_v44 = vmul.f32 -1.442695, %v2763_v18  ;;  %v12541_v30 = vld [vmem:[#allocation18_spill] sm:$0xff] }
 0x7f5   :  { %2869 = vrot.lane.b32.xlu1 %v9271_v34, %s5607_s18  ;;  %2933 = vrot.lane.b32.xlu0 %v9271_v34, %s5609_s22 }
 0x7f6   :  { %5492 = vpow2.f32 %v4762_v44 }
 0x7f7   :  { %v9283_v35 = vpop.permute.xlu1 %3373  ;;  %v9285_v20 = vpop.permute.xlu0 %3117 }
 0x7f8   :  { %12489 = vst [vmem:[#allocation224_spill] sm:$0xff] %v9283_v35  ;;  %12490 = vst [vmem:[#allocation230_spill] sm:$0xff] %v9285_v20 }
 0x7f9   :  { %2997 = vrot.lane.b32.xlu1 %v9271_v34, %s5610_s29  ;;  %3061 = vrot.lane.b32.xlu0 %v9271_v34, %s5612_s13 }
 0x7fb   :  { %v9293_v42 = vpop.permute.xlu1 %3995  ;;  %v9295_v23 = vpop.permute.xlu0 %3181 }
 0x7fc   :  { %12491 = vst [vmem:[#allocation197_spill] sm:$0xff] %v9293_v42  ;;  %12492 = vst [vmem:[#allocation234_spill] sm:$0xff] %v9295_v23 }
 0x7fd   :  { %3317 = vrot.lane.b32.xlu1 %v9271_v34, %s5620_s17  ;;  %3125 = vrot.lane.b32.xlu0 %v9271_v34, %s5614_s14  ;;  %v5491_v42 = vpop.eup %5490 }
 0x7ff   :  { %v9301_v20 = vpop.permute.xlu1 %2863  ;;  %v9303_v54 = vpop.permute.xlu0 %3245 }
 0x800   :  { %12493 = vst [vmem:[#allocation79_spill] sm:$0xff] %v9301_v20  ;;  %12494 = vst [vmem:[#allocation81_spill] sm:$0xff] %v9303_v54  ;;  %v5493_v54 = vpop.eup %5492 }
 0x801   :  { %3683 = vrot.lane.b32.xlu1 %v9271_v34, %s5634_s23  ;;  %3189 = vrot.lane.b32.xlu0 %v9271_v34, %s5616_s15 }
 0x803   :  { %v9309_v51 = vpop.permute.xlu1 %2991  ;;  %v9311_v31 = vpop.permute.xlu0 %3309 }
 0x804   :  { %12495 = vst [vmem:[#allocation73_spill] sm:$0xff] %v9309_v51  ;;  %12496 = vst [vmem:[#allocation235_spill] sm:$0xff] %v9311_v31  ;;  %v2795_v51 = vadd.f32 1.0, %v5491_v42 }
 0x805   :  { %3747 = vrot.lane.b32.xlu1 %v9271_v34, %s12401_s30  ;;  %3253 = vrot.lane.b32.xlu0 %v9271_v34, %s5618_s16 }
 0x806   :  { %5494 = vrcp.f32 %v2795_v51 }
 0x807   :  { %v9317_v20 = vpop.permute.xlu1 %3119  ;;  %v9319_v44 = vpop.permute.xlu0 %3437 }
 0x808   :  { %12497 = vst [vmem:[#allocation75_spill] sm:$0xff] %v9317_v20  ;;  %12498 = vst [vmem:[#allocation203_spill] sm:$0xff] %v9319_v44  ;;  %v2796_v44 = vadd.f32 1.0, %v5493_v54 }
 0x809   :  { %3811 = vrot.lane.b32.xlu1 %v9271_v34, %s12402_s1  ;;  %3381 = vrot.lane.b32.xlu0 %v9271_v34, %s5623_s2 }
 0x80a   :  { %5496 = vrcp.f32 %v2796_v44 }
 0x80b   :  { %v9325_v31 = vpop.permute.xlu1 %3183  ;;  %v9327_v23 = vpop.permute.xlu0 %3501 }
 0x80c   :  { %12499 = vst [vmem:[#allocation242_spill] sm:$0xff] %v9325_v31  ;;  %12500 = vst [vmem:[#allocation240_spill] sm:$0xff] %v9327_v23 }
 0x80d   :  { %3875 = vrot.lane.b32.xlu1 %v9271_v34, %s12403_s4  ;;  %3445 = vrot.lane.b32.xlu0 %v9271_v34, %s5627_s19 }
 0x80f   :  { %v9333_v20 = vpop.permute.xlu1 %3247  ;;  %v9335_v35 = vpop.permute.xlu0 %3565 }
 0x810   :  { %12501 = vst [vmem:[#allocation41_spill] sm:$0xff] %v9333_v20  ;;  %12502 = vst [vmem:[#allocation100_spill] sm:$0xff] %v9335_v35  ;;  %v5495_v35 = vpop.eup %5494 }
 0x811   :  { %4003 = vrot.lane.b32.xlu1 %v9271_v34, %s5643_s12  ;;  %3509 = vrot.lane.b32.xlu0 %v9271_v34, %s5628_s20  ;;  %v9357_v44 = vmul.f32 %v5495_v35, %v2761_v53 }
 0x813   :  { %v9341_v42 = vpop.permute.xlu1 %3311  ;;  %v9343_v23 = vpop.permute.xlu0 %3675 }
 0x814   :  { %12503 = vst [vmem:[#allocation241_spill] sm:$0xff] %v9341_v42  ;;  %12504 = vst [vmem:[#allocation201_spill] sm:$0xff] %v9343_v23  ;;  %v5497_v20 = vpop.eup %5496 }
 0x815   :  { %4067 = vrot.lane.b32.xlu1 %v9271_v34, %s12405_s26  ;;  %3573 = vrot.lane.b32.xlu0 %v9271_v34, %s5631_s21 }
 0x817   :  { %v9349_v54 = vpop.permute.xlu1 %3439  ;;  %v9351_v51 = vpop.permute.xlu0 %3739 }
 0x818   :  { %12505 = vst [vmem:[#allocation232_spill] sm:$0xff] %v9349_v54  ;;  %12506 = vst [vmem:[#allocation245_spill] sm:$0xff] %v9351_v51  ;;  %v9367_v51 = vmul.f32 %v5497_v20, %v2763_v18 }
 0x819   :  { %4131 = vrot.lane.b32.xlu1 %v9271_v34, %s12406_s27  ;;  %3939 = vrot.lane.b32.xlu0 %v9271_v34, %s12404_s25  ;;  %v12542_v34 = vld [vmem:[#allocation102_spill] sm:$0xff] }
 0x81b   :  { %v9359_v23 = vpop.permute.xlu1 %3503  ;;  %v9361_v42 = vpop.permute.xlu0 %3803 }
 0x81c   :  { %12507 = vst [vmem:[#allocation29_spill] sm:$0xff] %v9359_v23  ;;  %12508 = vst [vmem:[#allocation244_spill] sm:$0xff] %v9361_v42 }
 0x81d   :  { %3577 = vrot.lane.b32.xlu1 %v9357_v44, %s5631_s21  ;;  %2873 = vrot.lane.b32.xlu0 %v9357_v44, %s5607_s18 }
 0x81f   :  { %v9369_v54 = vpop.permute.xlu1 %3567  ;;  %v9371_v31 = vpop.permute.xlu0 %3867 }
 0x820   :  { %12509 = vst [vmem:[#allocation209_spill] sm:$0xff] %v9369_v54  ;;  %12510 = vst [vmem:[#allocation76_spill] sm:$0xff] %v9371_v31 }
 0x821   :  { %2875 = vrot.lane.b32.xlu1 %v9367_v51, %s5607_s18  ;;  %2937 = vrot.lane.b32.xlu0 %v9357_v44, %s5609_s22  ;;  %s12559_s18 = smov 97  }
 0x823   :  { %v9377_v53 = vpop.permute.xlu1 %3677  ;;  %v9379_v35 = vpop.permute.xlu0 %3931 }
 0x824   :  { %12511 = vst [vmem:[#allocation253_spill] sm:$0xff] %v9377_v53  ;;  %12512 = vst [vmem:[#allocation54_spill] sm:$0xff] %v9379_v35 }
 0x825   :  { %2939 = vrot.lane.b32.xlu1 %v9367_v51, %s5609_s22  ;;  %3001 = vrot.lane.b32.xlu0 %v9357_v44, %s5610_s29  ;;  %s12615_s22 = smov 96  }
 0x827   :  { %v9385_v20 = vpop.permute.xlu1 %3741  ;;  %v9387_v18 = vpop.permute.xlu0 %4059 }
 0x828   :  { %12513 = vst [vmem:[#allocation216_spill] sm:$0xff] %v9385_v20  ;;  %12514 = vst [vmem:[#allocation249_spill] sm:$0xff] %v9387_v18 }
 0x829   :  { %3003 = vrot.lane.b32.xlu1 %v9367_v51, %s5610_s29  ;;  %3065 = vrot.lane.b32.xlu0 %v9357_v44, %s5612_s13  ;;  %s12681_s29 = smov 95  }
 0x82b   :  { %v9393_v31 = vpop.permute.xlu1 %3805  ;;  %v9395_v42 = vpop.permute.xlu0 %4123 }
 0x82c   :  { %12515 = vst [vmem:[#allocation55_spill] sm:$0xff] %v9393_v31  ;;  %12516 = vst [vmem:[#allocation262_spill] sm:$0xff] %v9395_v42 }
 0x82d   :  { %3067 = vrot.lane.b32.xlu1 %v9367_v51, %s5612_s13  ;;  %3129 = vrot.lane.b32.xlu0 %v9357_v44, %s5614_s14  ;;  %s12754_s13 = smov 94  }
 0x82f   :  { %v9401_v35 = vpop.permute.xlu1 %3869  ;;  %v9403_v20 = vpop.permute.xlu0 %2927 }
 0x830   :  { %12517 = vst [vmem:[#allocation67_spill] sm:$0xff] %v9401_v35  ;;  %12518 = vst [vmem:[#allocation61_spill] sm:$0xff] %v9403_v20 }
 0x831   :  { %3131 = vrot.lane.b32.xlu1 %v9367_v51, %s5614_s14  ;;  %3193 = vrot.lane.b32.xlu0 %v9357_v44, %s5616_s15 }
 0x833   :  { %v9409_v18 = vpop.permute.xlu1 %3933  ;;  %v9411_v31 = vpop.permute.xlu0 %3055 }
 0x834   :  { %12519 = vst [vmem:[#allocation228_spill] sm:$0xff] %v9409_v18  ;;  %12520 = vst [vmem:[#allocation80_spill] sm:$0xff] %v9411_v31 }
 0x835   :  { %3195 = vrot.lane.b32.xlu1 %v9367_v51, %s5616_s15  ;;  %3257 = vrot.lane.b32.xlu0 %v9357_v44, %s5618_s16 }
 0x837   :  { %v9417_v42 = vpop.permute.xlu1 %4061  ;;  %v9419_v35 = vpop.permute.xlu0 %3375 }
 0x838   :  { %12521 = vst [vmem:[#allocation42_spill] sm:$0xff] %v9417_v42  ;;  %12522 = vst [vmem:[#allocation226_spill] sm:$0xff] %v9419_v35 }
 0x839   :  { %3259 = vrot.lane.b32.xlu1 %v9367_v51, %s5618_s16  ;;  %3321 = vrot.lane.b32.xlu0 %v9357_v44, %s5620_s17 }
 0x83b   :  { %v9425_v53 = vpop.permute.xlu1 %4125  ;;  %v9427_v18 = vpop.permute.xlu0 %3997 }
 0x83c   :  { %12523 = vst [vmem:[#allocation57_spill] sm:$0xff] %v9425_v53  ;;  %12524 = vst [vmem:[#allocation98_spill] sm:$0xff] %v9427_v18 }
 0x83d   :  { %3323 = vrot.lane.b32.xlu1 %v9367_v51, %s5620_s17  ;;  %3385 = vrot.lane.b32.xlu0 %v9357_v44, %s5623_s2 }
 0x83f   :  { %v9433_v54 = vpop.permute.xlu1 %2931  ;;  %v9435_v42 = vpop.permute.xlu0 %2867 }
 0x840   :  { %12525 = vst [vmem:[#allocation63_spill] sm:$0xff] %v9433_v54  ;;  %12526 = vst [vmem:[#allocation231_spill] sm:$0xff] %v9435_v42 }
 0x841   :  { %3387 = vrot.lane.b32.xlu1 %v9367_v51, %s5623_s2  ;;  %3449 = vrot.lane.b32.xlu0 %v9357_v44, %s5627_s19 }
 0x843   :  { %v9441_v23 = vpop.permute.xlu1 %3059  ;;  %v9443_v53 = vpop.permute.xlu0 %2995 }
 0x844   :  { %12527 = vst [vmem:[#allocation21_spill] sm:$0xff] %v9441_v23  ;;  %12528 = vst [vmem:[#allocation44_spill] sm:$0xff] %v9443_v53 }
 0x845   :  { %3451 = vrot.lane.b32.xlu1 %v9367_v51, %s5627_s19  ;;  %3513 = vrot.lane.b32.xlu0 %v9357_v44, %s5628_s20 }
 0x847   :  { %v9449_v18 = vpop.permute.xlu1 %3123  ;;  %v9451_v35 = vpop.permute.xlu0 %3315 }
 0x848   :  { %12529 = vst [vmem:[#allocation91_spill] sm:$0xff] %v9449_v18  ;;  %12530 = vst [vmem:[#allocation117_spill] sm:$0xff] %v9451_v35  ;;  %v5150_v35 = vunpack.i.l.bf16 %v8891_v26 }
 0x849   :  { %3515 = vrot.lane.b32.xlu1 %v9367_v51, %s5628_s20  ;;  %3687 = vrot.lane.b32.xlu0 %v9357_v44, %s5634_s23 }
 0x84b   :  { %v9457_v31 = vpop.permute.xlu1 %3187  ;;  %v9459_v20 = vpop.permute.xlu0 %3681 }
 0x84c   :  { %12531 = vst [vmem:[#allocation243_spill] sm:$0xff] %v9457_v31  ;;  %12532 = vst [vmem:[#allocation131_spill] sm:$0xff] %v9459_v20  ;;  %v5155_v20 = vunpack.i.l.bf16 %v8902_v40 }
 0x84d   :  { %3689 = vrot.lane.b32.xlu1 %v9367_v51, %s5634_s23  ;;  %3751 = vrot.lane.b32.xlu0 %v9357_v44, %s12401_s30 }
 0x84e   :  { %v2941_v54 = vsel %vm12537_vm12, %v5155_v20, %v9097_v57  ;;  %v5175_v20 = vunpack.i.l.bf16 %v8922_v12  ;;  %vm12549_vm12 = vcmask 244736  }
 0x84f   :  { %v9465_v23 = vpop.permute.xlu1 %3251  ;;  %v9467_v18 = vpop.permute.xlu0 %3745 }
 0x850   :  { %12533 = vst [vmem:[#allocation50_spill] sm:$0xff] %v9465_v23  ;;  %12534 = vst [vmem:[#allocation74_spill] sm:$0xff] %v9467_v18  ;;  %v2877_v18 = vsel %vm12538_vm1, %v5150_v35, %v9099_v1  ;;  %v5170_v35 = vunpack.i.l.bf16 %v8908_v3  ;;  %vm12545_vm1 = vcmask 252928   ;;  %v12627_v3 = vld [vmem:[#allocation199_spill] sm:$0xff] }
 0x851   :  { %3753 = vrot.lane.b32.xlu1 %v9367_v51, %s12401_s30  ;;  %3815 = vrot.lane.b32.xlu0 %v9357_v44, %s12402_s1  ;;  %v3069_v38 = vsel %vm12545_vm1, %v5175_v20, %v9105_v47  ;;  %v12546_v20 = vld [vmem:[#allocation13_spill] sm:$0xff]  ;;  %vm12551_vm1 = vcmask 146432  }
 0x852   :  { %v3085_v37 = vsel %vm111_vm9, %v3069_v38, 0.0 }
 0x853   :  { %v9475_v31 = vpop.permute.xlu1 %3379  ;;  %v9477_v53 = vpop.permute.xlu0 %3809 }
 0x854   :  { %12535 = vst [vmem:[#allocation238_spill] sm:$0xff] %v9475_v31  ;;  %12536 = vst [vmem:[#allocation247_spill] sm:$0xff] %v9477_v53  ;;  %v2957_v31 = vsel %vm95_vm4, %v2941_v54, 0.0  ;;  %v2893_v53 = vsel %vm87_vm5, %v2877_v18, 0.0  ;;  %v3005_v18 = vsel %vm539_vm2, %v5170_v35, %v9107_v43  ;;  %v5210_v35 = vunpack.i.l.bf16 %v8948_v13 }
 0x855   :  { %3817 = vrot.lane.b32.xlu1 %v9367_v51, %s12402_s1  ;;  %3879 = vrot.lane.b32.xlu0 %v9357_v44, %s12403_s4  ;;  %v5220_v13 = vunpack.i.l.bf16 %v8960_v25 }
 0x857   :  { %v9487_v23 = vpop.permute.xlu1 %3443  ;;  %v9489_v42 = vpop.permute.xlu0 %3873 }
 0x858   :  { %12539 = vst [vmem:[#allocation77_spill] sm:$0xff] %v9487_v23  ;;  %12540 = vst [vmem:[#allocation246_spill] sm:$0xff] %v9489_v42  ;;  %v2965_v23 = vmul.f32 %v2957_v31, %v12541_v30  ;;  %v2901_v42 = vmul.f32 %v2893_v53, %v12542_v34  ;;  %v12550_v53 = vld [vmem:[#allocation27_spill] sm:$0xff] }
 0x859   :  { %3881 = vrot.lane.b32.xlu1 %v9367_v51, %s12403_s4  ;;  %3943 = vrot.lane.b32.xlu0 %v9357_v44, %s12404_s25  ;;  %v3093_v31 = vmul.f32 %v3085_v37, %v12550_v53  ;;  %v5225_v37 = vunpack.i.l.bf16 %v8973_v39 }
 0x85b   :  { %v9503_v19 = vpop.permute.xlu1 %3507  ;;  %v9505_v54 = vpop.permute.xlu0 %4001 }
 0x85c   :  { %12543 = vst [vmem:[#allocation86_spill] sm:$0xff] %v9503_v19  ;;  %12544 = vst [vmem:[#allocation112_spill] sm:$0xff] %v9505_v54  ;;  %v2973_v54 = vadd.f32 %v2965_v23, %v2901_v42  ;;  %v3029_v19 = vmul.f32 %v3005_v18, %v12546_v20  ;;  %v5200_v23 = vunpack.i.l.bf16 %v8940_v11  ;;  %v3133_v42 = vsel %vm12549_vm12, %v5190_v8, %v9117_v16  ;;  %v12555_v18 = vld [vmem:[#allocation23_spill] sm:$0xff] }
 0x85d   :  { %3945 = vrot.lane.b32.xlu1 %v9367_v51, %s12404_s25  ;;  %4007 = vrot.lane.b32.xlu0 %v9357_v44, %s5643_s12  ;;  %v3149_v62 = vsel %vm119_vm6, %v3133_v42, 0.0  ;;  %vm12554_vm12 = vcmask 138240  }
 0x85e   :  { %v3197_v8 = vsel %vm12551_vm1, %v5200_v23, %v9125_v22  ;;  %vm12556_vm1 = vcmask 277504  }
 0x85f   :  { %v9525_v32 = vpop.permute.xlu1 %3571  ;;  %v9527_v26 = vpop.permute.xlu0 %4065  ;;  %v3213_v42 = vsel %vm87_vm5, %v3197_v8, 0.0  ;;  %v2878_v8 = vsel %vm12556_vm1, %v9099_v1, %v9179_v52  ;;  %v5250_v52 = vunpack.i.l.bf16 %v8991_v56  ;;  %v5260_v56 = vunpack.i.l.bf16 %v9005_v4  ;;  %v12575_v1 = vld [vmem:[#allocation175_spill] sm:$0xff] }
 0x860   :  { %12547 = vst [vmem:[#allocation250_spill] sm:$0xff] %v9525_v32  ;;  %12548 = vst [vmem:[#allocation58_spill] sm:$0xff] %v9527_v26  ;;  %v3037_v26 = vadd.f32 %v3029_v19, %v2973_v54  ;;  %v3261_v19 = vsel %vm12554_vm12, %v5210_v35, %v9133_v50  ;;  %vm12557_vm12 = vcmask 269312   ;;  %v12560_v54 = vld [vmem:[#allocation35_spill] sm:$0xff]  ;;  %vm12563_vm1 = vcmask 121856  }
 0x861   :  { %4009 = vrot.lane.b32.xlu1 %v9367_v51, %s5643_s12  ;;  %4071 = vrot.lane.b32.xlu0 %v9357_v44, %s12405_s26  ;;  %v3277_v23 = vsel %vm95_vm4, %v3261_v19, 0.0  ;;  %v2942_v47 = vsel %vm12557_vm12, %v9097_v57, %v9181_v41  ;;  %vm12569_vm12 = vcmask 252928   ;;  %v12571_v19 = vld [vmem:[#allocation190_spill] sm:$0xff] }
 0x862   :  { %v3101_v35 = vadd.f32 %v3093_v31, %v3037_v26  ;;  %v5240_v26 = vunpack.i.l.bf16 %v8983_v7  ;;  %v12558_v31 = vld [vmem:[#allocation36_spill] sm:$0xff]  ;;  %v3285_v7 = vmul.f32 %v3277_v23, %v12560_v54 }
 0x863   :  { %v9551_v32 = vpop.permute.xlu1 %3937  ;;  %v9553_v28 = vpop.permute.xlu0 %4129  ;;  %v3221_v38 = vmul.f32 %v3213_v42, %v12558_v31  ;;  %v2894_v42 = vsel %vm88_vm13, %v2878_v8, 0.0  ;;  %v12564_v8 = vld [vmem:[#allocation47_spill] sm:$0xff] }
 0x864   :  { %12552 = vst [vmem:[#allocation96_spill] sm:$0xff] %v9551_v32  ;;  %12553 = vst [vmem:[#allocation84_spill] sm:$0xff] %v9553_v28  ;;  %v3157_v28 = vmul.f32 %v3149_v62, %v12555_v18  ;;  %v2958_v62 = vsel %vm96_vm14, %v2942_v47, 0.0  ;;  %v2902_v57 = vmul.f32 %v2894_v42, %v12542_v34  ;;  %v12568_v42 = vld [vmem:[#allocation64_spill] sm:$0xff] }
 0x865   :  { %4073 = vrot.lane.b32.xlu1 %v9367_v51, %s12405_s26  ;;  %3579 = vrot.lane.b32.xlu0 %v9367_v51, %s5631_s21 }
 0x866   :  { %v3165_v41 = vadd.f32 %v3157_v28, %v3101_v35  ;;  %v3325_v28 = vsel %vm147_vm0, %v5220_v13, %v9141_v60  ;;  %v2966_v13 = vmul.f32 %v2958_v62, %v12541_v30  ;;  %v3389_v35 = vsel %vm12563_vm1, %v5225_v37, %v9115_v49  ;;  %v12567_v62 = vld [vmem:[#allocation213_spill] sm:$0xff]  ;;  %v12587_v30 = vld [vmem:[#allocation263_spill] sm:$0xff] }
 0x867   :  { %v9576_v32 = vpop.permute.xlu1 %2869  ;;  %v9578_v25 = vpop.permute.xlu0 %2933  ;;  %vm12573_vm1 = vcmask 113664   ;;  %v12577_v37 = vld [vmem:[#allocation177_spill] sm:$0xff] }
 0x868   :  { %v3229_v47 = vadd.f32 %v3221_v38, %v3165_v41  ;;  %v3349_v38 = vmul.f32 %v3325_v28, %v12564_v8  ;;  %v3006_v41 = vsel %vm539_vm2, %v9107_v43, %v9189_v45  ;;  %v12572_v45 = vld [vmem:[#allocation202_spill] sm:$0xff] }
 0x869   :  { %4181 = vrot.lane.b32.xlu1 %v8893_v48, %s12559_s18  ;;  %5343 = vrot.lane.b32.xlu0 %v12400_v2, %s12406_s27  ;;  %v3453_v46 = vsel %vm12573_vm1, %v5240_v26, %v12572_v45  ;;  %v3030_v28 = vmul.f32 %v3006_v41, %v12546_v20  ;;  %vm12584_vm1 = vcmask 244736   ;;  %v12586_v41 = vld [vmem:[#allocation49_spill] sm:$0xff] }
 0x86a   :  { %v3293_v23 = vadd.f32 %v3285_v7, %v3229_v47  ;;  %v3070_v7 = vsel %vm12569_vm12, %v12568_v42, %v12567_v62  ;;  %v3405_v62 = vsel %vm111_vm9, %v3389_v35, 0.0  ;;  %v2974_v42 = vadd.f32 %v2966_v13, %v2902_v57  ;;  %v12583_v57 = vld [vmem:[#allocation260_spill] sm:$0xff]  ;;  %v12592_v47 = vld [vmem:[#allocation254_spill] sm:$0xff] }
 0x86b   :  { %v9605_v61 = vpop.permute.xlu1 %2997  ;;  %v9607_v6 = vpop.permute.xlu0 %3061  ;;  %vm12578_vm12 = vcmask 15360   ;;  %v3469_v20 = vsel %vm119_vm6, %v3453_v46, 0.0  ;;  %v12610_v13 = vld [vmem:[#allocation198_spill] sm:$0xff]  ;;  %vm12648_vm8 = vcmp.lt.s32.totalorder %v12592_v47, 16 }
 0x86c   :  { %12561 = vst [vmem:[#allocation83_spill] sm:$0xff] %v9605_v61  ;;  %12562 = vst [vmem:[#allocation60_spill] sm:$0xff] %v9607_v6  ;;  %v3357_v43 = vadd.f32 %v3349_v38, %v3293_v23  ;;  %v3517_v26 = vsel %vm12578_vm12, %v5250_v52, %v12577_v37  ;;  %v3134_v23 = vsel %vm12584_vm1, %v9117_v16, %v12583_v57  ;;  %vm12588_vm12 = vcmask 7168   ;;  %v12589_v57 = vld [vmem:[#allocation97_spill] sm:$0xff]  ;;  %v12606_v61 = vld [vmem:[#allocation88_spill] sm:$0xff] }
 0x86d   :  { %5348 = vrot.lane.b32.xlu1 %v12400_v2, %s12559_s18  ;;  %4183 = vrot.lane.b32.xlu0 %v8964_v0, %s12559_s18  ;;  %v3533_v46 = vsel %vm87_vm5, %v3517_v26, 0.0  ;;  %v3038_v35 = vadd.f32 %v3030_v28, %v2974_v42  ;;  %vm12590_vm1 = vcmask 146432   ;;  %v12596_v26 = vld [vmem:[#allocation184_spill] sm:$0xff]  ;;  %v12602_v28 = vld [vmem:[#allocation215_spill] sm:$0xff] }
 0x86e   :  { %v3198_v38 = vsel %vm12590_vm1, %v9125_v22, %v12589_v57  ;;  %v12597_v22 = vld [vmem:[#allocation56_spill] sm:$0xff]  ;;  %vm12598_vm1 = vcmask 138240  }
 0x86f   :  { %v9631_v4 = vpop.permute.xlu1 %3317  ;;  %v9633_v17 = vpop.permute.xlu0 %3125 }
 0x870   :  { %12565 = vst [vmem:[#allocation116_spill] sm:$0xff] %v9631_v4  ;;  %12566 = vst [vmem:[#allocation99_spill] sm:$0xff] %v9633_v17  ;;  %v3086_v4 = vsel %vm112_vm15, %v3070_v7, 0.0  ;;  %v3413_v7 = vmul.f32 %v3405_v62, %v12586_v41  ;;  %v12601_v62 = vld [vmem:[#allocation94_spill] sm:$0xff] }
 0x871   :  { %4189 = vrot.lane.b32.xlu1 %v12574_v9, %s12559_s18  ;;  %4187 = vrot.lane.b32.xlu0 %v12575_v1, %s12559_s18  ;;  %v3094_v16 = vmul.f32 %v3086_v4, %v12550_v53 }
 0x872   :  { %v3421_v34 = vadd.f32 %v3413_v7, %v3357_v43  ;;  %v3262_v43 = vsel %vm12598_vm1, %v9133_v50, %v12597_v22  ;;  %v12600_v7 = vld [vmem:[#allocation107_spill] sm:$0xff]  ;;  %vm12614_vm1 = vcmask 1031168  }
 0x873   :  { %v9659_v58 = vpop.permute.xlu1 %3683  ;;  %v9661_v11 = vpop.permute.xlu0 %3189  ;;  %v3541_v57 = vmul.f32 %v3533_v46, %v12600_v7  ;;  %v12605_v46 = vld [vmem:[#allocation214_spill] sm:$0xff]  ;;  %v3278_v29 = vsel %vm96_vm14, %v3262_v43, 0.0 }
 0x874   :  { %12580 = vst [vmem:[#allocation78_spill] sm:$0xff] %v9659_v58  ;;  %12581 = vst [vmem:[#allocation119_spill] sm:$0xff] %v9661_v11  ;;  %v3581_v58 = vsel %vm12588_vm12, %v5260_v56, %v12587_v30  ;;  %v12591_v56 = vld [vmem:[#allocation104_spill] sm:$0xff]  ;;  %vm12593_vm12 = vcmp.lt.s32.totalorder %v12592_v47, 16 }
 0x875   :  { %4137 = vrot.lane.b32.xlu1 %v9367_v51, %s12406_s27  ;;  %4135 = vrot.lane.b32.xlu0 %v9357_v44, %s12406_s27  ;;  %v3477_v52 = vmul.f32 %v3469_v20, %v12591_v56  ;;  %v3150_v11 = vsel %vm12593_vm12, %v3134_v23, 0.0  ;;  %v3597_v53 = vsel %vm95_vm4, %v3581_v58, 0.0  ;;  %v3214_v23 = vsel %vm88_vm13, %v3198_v38, 0.0  ;;  %v12604_v20 = vld [vmem:[#allocation115_spill] sm:$0xff] }
 0x876   :  { %v3158_v50 = vmul.f32 %v3150_v11, %v12555_v18  ;;  %vm12607_vm12 = vcmask 1039360   ;;  %v3222_v18 = vmul.f32 %v3214_v23, %v12558_v31  ;;  %v3286_v31 = vmul.f32 %v3278_v29, %v12560_v54  ;;  %v12618_v11 = vld [vmem:[#allocation185_spill] sm:$0xff]  ;;  %v12619_v58 = vld [vmem:[#allocation179_spill] sm:$0xff]  ;;  %v12633_v23 = vld [vmem:[#allocation160_spill] sm:$0xff] }
 0x877   :  { %v9689_v17 = vpop.permute.xlu1 %3747  ;;  %v9691_v6 = vpop.permute.xlu0 %3253  ;;  %v3485_v22 = vadd.f32 %v3477_v52, %v3421_v34  ;;  %v3693_v38 = vsel %vm12607_vm12, %v12606_v61, %v12605_v46  ;;  %v12611_v34 = vld [vmem:[#allocation71_spill] sm:$0xff]  ;;  %v12613_v61 = vld [vmem:[#allocation208_spill] sm:$0xff]  ;;  %v12617_v52 = vld [vmem:[#allocation217_spill] sm:$0xff]  ;;  %vm12620_vm12 = vcmask 932864   ;;  %v12631_v54 = vunpack.i.l.bf16 %v9013_v5 }
 0x878   :  { %12594 = vst [vmem:[#allocation85_spill] sm:$0xff] %v9689_v17  ;;  %12595 = vst [vmem:[#allocation259_spill] sm:$0xff] %v9691_v6  ;;  %v3102_v17 = vadd.f32 %v3094_v16, %v3038_v35  ;;  %v3605_v6 = vmul.f32 %v3597_v53, %v12604_v20  ;;  %v12612_v53 = vld [vmem:[#allocation66_spill] sm:$0xff]  ;;  %v3709_v4 = vsel %vm111_vm9, %v3693_v38, 0.0  ;;  %v12677_v5 = vld [vmem:[#allocation32_spill] sm:$0xff] }
 0x879   :  { %4195 = vrot.lane.b32.xlu1 %v12601_v62, %s12559_s18  ;;  %4193 = vrot.lane.b32.xlu0 %v12602_v28, %s12559_s18  ;;  %v3549_v16 = vadd.f32 %v3541_v57, %v3485_v22  ;;  %v3757_v42 = vsel %vm12614_vm1, %v12613_v61, %v12612_v53  ;;  %v3326_v61 = vsel %vm147_vm0, %v9141_v60, %v12617_v52  ;;  %v12625_v52 = vld [vmem:[#allocation144_spill] sm:$0xff]  ;;  %vm12628_vm1 = vcmask 924672  }
 0x87a   :  { %v3166_v35 = vadd.f32 %v3158_v50, %v3102_v17  ;;  %v3717_v57 = vmul.f32 %v3709_v4, %v12625_v52  ;;  %v3350_v38 = vmul.f32 %v3326_v61, %v12564_v8  ;;  %v12635_v8 = vld [vmem:[#allocation220_spill] sm:$0xff] }
 0x87b   :  { %v9717_v39 = vpop.permute.xlu1 %3811  ;;  %v9719_v33 = vpop.permute.xlu0 %3381  ;;  %v3613_v22 = vadd.f32 %v3605_v6, %v3549_v16  ;;  %v3773_v6 = vsel %vm119_vm6, %v3757_v42, 0.0  ;;  %v12624_v16 = vld [vmem:[#allocation127_spill] sm:$0xff] }
 0x87c   :  { %12608 = vst [vmem:[#allocation28_spill] sm:$0xff] %v9717_v39  ;;  %12609 = vst [vmem:[#allocation89_spill] sm:$0xff] %v9719_v33  ;;  %v3821_v39 = vsel %vm12620_vm12, %v12619_v58, %v12618_v11  ;;  %v3230_v29 = vadd.f32 %v3222_v18, %v3166_v35  ;;  %v3629_v60 = vmul.f32 %v8893_v48, %v12624_v16  ;;  %v12626_v58 = vld [vmem:[#allocation189_spill] sm:$0xff]  ;;  %v12629_v35 = vld [vmem:[#allocation68_spill] sm:$0xff]  ;;  %vm12630_vm12 = vcmask 121856  }
 0x87d   :  { %4245 = vrot.lane.b32.xlu1 %v8893_v48, %s12615_s22  ;;  %5353 = vrot.lane.b32.xlu0 %v12400_v2, %s12559_s18  ;;  %v3390_v42 = vsel %vm12630_vm12, %v9115_v49, %v12629_v35  ;;  %v3837_v4 = vsel %vm87_vm5, %v3821_v39, 0.0  ;;  %v3781_v50 = vmul.f32 %v3773_v6, %v12633_v23  ;;  %vm12636_vm12 = vcmask 113664  }
 0x87e   :  { %v3294_v18 = vadd.f32 %v3286_v31, %v3230_v29  ;;  %v3637_v17 = vadd.f32 %v3629_v60, %v3613_v22  ;;  %v3454_v39 = vsel %vm12636_vm12, %v12572_v45, %v12635_v8  ;;  %v12637_v22 = vld [vmem:[#allocation133_spill] sm:$0xff]  ;;  %v3406_v29 = vsel %vm112_vm15, %v3390_v42, 0.0  ;;  %v12641_v60 = vld [vmem:[#allocation142_spill] sm:$0xff] }
 0x87f   :  { %v9744_v33 = vpop.permute.xlu1 %3875  ;;  %v9746_v43 = vpop.permute.xlu0 %3445  ;;  %v9793_v61 = vmul.f32 %v12574_v9, %v12637_v22  ;;  %v9800_v45 = vmul.f32 %v12602_v28, %v12641_v60  ;;  %v12643_v8 = vld [vmem:[#allocation218_spill] sm:$0xff]  ;;  %v12646_v42 = vunpack.i.l.bf16 %v9025_v55  ;;  %vm12647_vm12 = vcmask 1031168   ;;  %v12658_v55 = vld [vmem:[#allocation173_spill] sm:$0xff] }
 0x880   :  { %12621 = vst [vmem:[#allocation103_spill] sm:$0xff] %v9744_v33  ;;  %12622 = vst [vmem:[#allocation123_spill] sm:$0xff] %v9746_v43  ;;  %v3885_v33 = vsel %vm12628_vm1, %v12627_v3, %v12626_v58  ;;  %vm12632_vm1 = vcmask 1039360   ;;  %v9776_v43 = vmul.f32 %v8964_v0, %v12624_v16  ;;  %v3725_v6 = vadd.f32 %v3717_v57, %v3637_v17 }
 0x881   :  { %5358 = vrot.lane.b32.xlu1 %v12400_v2, %s12615_s22  ;;  %4247 = vrot.lane.b32.xlu0 %v8964_v0, %s12615_s22  ;;  %v3694_v3 = vsel %vm12632_vm1, %v12605_v46, %v12631_v54  ;;  %v3901_v31 = vsel %vm95_vm4, %v3885_v33, 0.0  ;;  %v9789_v46 = vmul.f32 %v12575_v1, %v12637_v22  ;;  %12639 = vst [vmem:[#allocation6_spill] sm:$0xff] %v9793_v61  ;;  %v12640_v54 = vld [vmem:[#allocation170_spill] sm:$0xff]  ;;  %12642 = vst [vmem:[#allocation7_spill] sm:$0xff] %v9800_v45  ;;  %vm12644_vm1 = vcmask 15360   ;;  %v12653_v61 = vld [vmem:[#allocation191_spill] sm:$0xff] }
 0x882   :  { %v3845_v16 = vmul.f32 %v3837_v4, %v12640_v54  ;;  %v3710_v33 = vsel %vm112_vm15, %v3694_v3, 0.0  ;;  %v3358_v35 = vadd.f32 %v3350_v38, %v3294_v18  ;;  %v3518_v57 = vsel %vm12644_vm1, %v12577_v37, %v12643_v8 }
 0x883   :  { %v9778_v15 = vpop.permute.xlu1 %4003  ;;  %v9780_v49 = vpop.permute.xlu0 %3509  ;;  %12638 = vst [vmem:[#allocation15_spill] sm:$0xff] %v9789_v46  ;;  %v9813_v17 = vmul.f32 %v12601_v62, %v12641_v60  ;;  %v3758_v4 = vsel %vm12647_vm12, %v12612_v53, %v12646_v42  ;;  %v3789_v22 = vadd.f32 %v3781_v50, %v3725_v6  ;;  %v3470_v45 = vsel %vm12648_vm8, %v3454_v39, 0.0  ;;  %v12649_v46 = vld [vmem:[#allocation182_spill] sm:$0xff]  ;;  %v12655_v50 = vld [vmem:[#allocation143_spill] sm:$0xff] }
 0x884   :  { %12634 = vst [vmem:[#allocation12_spill] sm:$0xff] %v9778_v15  ;;  %v3909_v3 = vmul.f32 %v3901_v31, %v12649_v46  ;;  %v3414_v37 = vmul.f32 %v3406_v29, %v12586_v41  ;;  %v12651_v60 = vunpack.i.l.bf16 %v12571_v19  ;;  %vm12652_vm1 = vcmask 932864   ;;  %v12657_v42 = vld [vmem:[#allocation222_spill] sm:$0xff]  ;;  %v12724_v15 = vld [vmem:[#allocation17_spill] sm:$0xff] }
 0x885   :  { %4253 = vrot.lane.b32.xlu1 %v12574_v9, %s12615_s22  ;;  %4251 = vrot.lane.b32.xlu0 %v12575_v1, %s12615_s22  ;;  %12645 = vst [vmem:[#allocation18_spill] sm:$0xff] %v9813_v17  ;;  %vm12654_vm12 = vcmask 7168   ;;  %v9836_v39 = vmul.f32 %v9357_v44, %v12655_v50  ;;  %v3853_v31 = vadd.f32 %v3845_v16, %v3789_v22  ;;  %v3534_v6 = vsel %vm88_vm13, %v3518_v57, 0.0 }
 0x886   :  { %v3822_v8 = vsel %vm12652_vm1, %v12618_v11, %v12651_v60  ;;  %v3582_v53 = vsel %vm12654_vm12, %v12587_v30, %v12653_v61  ;;  %vm12659_vm8 = vcmask 916480   ;;  %v9849_v30 = vmul.f32 %v9367_v51, %v12655_v50 }
 0x887   :  { %v9822_v38 = vpop.permute.xlu1 %4067  ;;  %v9824_v18 = vpop.permute.xlu0 %3573  ;;  %12656 = vst [vmem:[#allocation13_spill] sm:$0xff] %v9836_v39  ;;  %v3949_v41 = vsel %vm12659_vm8, %v12658_v55, %v12657_v42  ;;  %v9852_v11 = vmul.f32 %v3710_v33, %v12625_v52  ;;  %vm12662_vm1 = vcmp.lt.s32.totalorder %v12592_v47, 16  ;;  %v3422_v29 = vadd.f32 %v3414_v37, %v3358_v35  ;;  %v12669_v37 = vld [vmem:[#allocation204_spill] sm:$0xff]  ;;  %v12740_v39 = vld [vmem:[#allocation21_spill] sm:$0xff] }
 0x888   :  { %12650 = vst [vmem:[#allocation102_spill] sm:$0xff] %v9822_v38  ;;  %12660 = vst [vmem:[#allocation27_spill] sm:$0xff] %v9849_v30  ;;  %v3774_v61 = vsel %vm12662_vm1, %v3758_v4, 0.0  ;;  %v3478_v16 = vmul.f32 %v3470_v45, %v12591_v56  ;;  %v3838_v55 = vsel %vm88_vm13, %v3822_v8, 0.0  ;;  %v12663_v57 = vunpack.i.l.bf16 %v12582_v27  ;;  %v12667_v4 = vld [vmem:[#allocation196_spill] sm:$0xff]  ;;  %v12668_v45 = vld [vmem:[#allocation261_spill] sm:$0xff] }
 0x889   :  { %4201 = vrot.lane.b32.xlu1 %v9367_v51, %s12559_s18  ;;  %4199 = vrot.lane.b32.xlu0 %v9357_v44, %s12559_s18  ;;  %12661 = vst [vmem:[#allocation23_spill] sm:$0xff] %v9852_v11  ;;  %vm12664_vm12 = vcmask 924672   ;;  %v3917_v60 = vadd.f32 %v3909_v3, %v3853_v31  ;;  %v3598_v50 = vsel %vm96_vm14, %v3582_v53, 0.0  ;;  %v3542_v35 = vmul.f32 %v3534_v6, %v12600_v7  ;;  %v12674_v53 = vld [vmem:[#allocation90_spill] sm:$0xff]  ;;  %v12737_v11 = vld [vmem:[#allocation83_spill] sm:$0xff] }
 0x88a   :  { %v3886_v22 = vsel %vm12664_vm12, %v12626_v58, %v12663_v57  ;;  %v3973_v56 = vmul.f32 %v3949_v41, %v12667_v4  ;;  %vm12670_vm8 = vcmask 900096   ;;  %v12671_v27 = vunpack.i.l.bf16 %v12611_v34  ;;  %v12678_v7 = vld [vmem:[#allocation138_spill] sm:$0xff] }
 0x88b   :  { %v9865_v52 = vpop.permute.xlu1 %4131  ;;  %v9867_v33 = vpop.permute.xlu0 %3939  ;;  %v4077_v8 = vsel %vm12670_vm8, %v12669_v37, %v12668_v45  ;;  %vm12672_vm1 = vmmov %vm12670_vm8  ;;  %v12675_v57 = vunpack.i.h.bf16 %v8902_v40  ;;  %vm12676_vm12 = vcmask 269312   ;;  %v12679_v6 = vunpack.i.h.bf16 %v12678_v7 }
 0x88c   :  { %12665 = vst [vmem:[#allocation36_spill] sm:$0xff] %v9865_v52  ;;  %12666 = vst [vmem:[#allocation35_spill] sm:$0xff] %v9867_v33  ;;  %v4078_v58 = vsel %vm12672_vm1, %v12668_v45, %v12671_v27  ;;  %v3486_v37 = vadd.f32 %v3478_v16, %v3422_v29  ;;  %v3902_v27 = vsel %vm96_vm14, %v3886_v22, 0.0  ;;  %v12682_v45 = vunpack.i.l.bf16 %v12596_v26  ;;  %v12719_v26 = vld [vmem:[#allocation9_spill] sm:$0xff] }
 0x88d   :  { %v2943_v19 = vsel %vm12676_vm12, %v12675_v57, %v12674_v53  ;;  %v2879_v41 = vsel %vm12680_vm7, %v12679_v6, %v12677_v5  ;;  %4311 = vrot.lane.b32.xlu1 %v8964_v0, %s12681_s29  ;;  %4309 = vrot.lane.b32.xlu0 %v8893_v48, %s12681_s29  ;;  %vm12683_vm8 = vcmask 916480   ;;  %v3606_v57 = vmul.f32 %v3598_v50, %v12604_v20 }
 0x88e   :  { %v3950_v40 = vsel %vm12683_vm8, %v12657_v42, %v12682_v45  ;;  %v9899_v7 = vmul.f32 %v3774_v61, %v12633_v23  ;;  %v9902_v6 = vmul.f32 %v3838_v55, %v12640_v54  ;;  %v4093_v31 = vsel %vm119_vm6, %v4077_v8, 0.0  ;;  %v12687_v23 = vld [vmem:[#allocation152_spill] sm:$0xff] }
 0x88f   :  { %vm12686_vm7 = vcmp.lt.s32.totalorder %v12592_v47, 16  ;;  %v9908_v16 = vpop.permute.xlu1 %3577  ;;  %v2874_v22 = vpop.permute.xlu0 %2873  ;;  %v3550_v34 = vadd.f32 %v3542_v35, %v3486_v37  ;;  %v2959_v42 = vsel %vm95_vm4, %v2943_v19, 0.0  ;;  %v2895_v20 = vsel %vm87_vm5, %v2879_v41, 0.0  ;;  %v12693_v35 = vld [vmem:[#allocation225_spill] sm:$0xff]  ;;  %v12700_v45 = vld [vmem:[#allocation8_spill] sm:$0xff] }
 0x890   :  { %12684 = vst [vmem:[#allocation47_spill] sm:$0xff] %v9899_v7  ;;  %12685 = vst [vmem:[#allocation213_spill] sm:$0xff] %v9902_v6  ;;  %v4094_v29 = vsel %vm12686_vm7, %v4078_v58, 0.0  ;;  %v12688_v61 = vunpack.i.h.bf16 %v12687_v23  ;;  %vm12689_vm1 = vcmask 277504   ;;  %v9919_v50 = vmul.f32 %v3902_v27, %v12649_v46  ;;  %v12696_v46 = vld [vmem:[#allocation229_spill] sm:$0xff]  ;;  %v12697_v27 = vld [vmem:[#allocation211_spill] sm:$0xff] }
 0x891   :  { %v9922_v8 = vmul.f32 %v3950_v40, %v12667_v4  ;;  %v9924_v58 = vadd.f32 %v3973_v56, %v3917_v60  ;;  %4315 = vrot.lane.b32.xlu1 %v12575_v1, %s12681_s29  ;;  %5363 = vrot.lane.b32.xlu0 %v12400_v2, %s12681_s29  ;;  %v9930_v19 = vadd.f32 %v3606_v57, %v3550_v34  ;;  %vm12698_vm12 = vcmask 908288   ;;  %v12699_v60 = vld [vmem:[#allocation10_spill] sm:$0xff] }
 0x892   :  { %v2883_v54 = vsel %vm12689_vm1, %v12688_v61, %v2874_v22  ;;  %12690 = vst [vmem:[#allocation64_spill] sm:$0xff] %v9919_v50  ;;  %v9933_v41 = vmul.f32 %v4093_v31, %v12693_v35  ;;  %v9936_v37 = vmul.f32 %v4094_v29, %v12693_v35  ;;  %v4013_v4 = vsel %vm12698_vm12, %v12697_v27, %v12696_v46  ;;  %v12701_v61 = vld [vmem:[#allocation92_spill] sm:$0xff]  ;;  %vm12705_vm7 = vmmov %vm12698_vm12  ;;  %v12706_v27 = vld [vmem:[#allocation231_spill] sm:$0xff] }
 0x893   :  { %12691 = vst [vmem:[#allocation202_spill] sm:$0xff] %v9922_v8  ;;  %12692 = vst [vmem:[#allocation188_spill] sm:$0xff] %v9924_v58  ;;  %v2967_v56 = vmul.f32 %v2959_v42, %v12699_v60  ;;  %v2903_v40 = vmul.f32 %v2895_v20, %v12700_v45  ;;  %v12702_v55 = vunpack.i.h.bf16 %v8922_v12  ;;  %vm12703_vm8 = vcmask 252928   ;;  %v2876_v57 = vpop.permute.xlu1 %2875  ;;  %v12711_v58 = vld [vmem:[#allocation59_spill] sm:$0xff] }
 0x894   :  { %12694 = vst [vmem:[#allocation175_spill] sm:$0xff] %v9933_v41  ;;  %12695 = vst [vmem:[#allocation177_spill] sm:$0xff] %v9936_v37  ;;  %v2899_v31 = vsel %vm87_vm5, %v2883_v54, 0.0  ;;  %v2938_v41 = vpop.permute.xlu0 %2937  ;;  %v12704_v29 = vunpack.i.l.bf16 %v12610_v13  ;;  %v2882_v42 = vsel %vm12689_vm1, %v12706_v27, %v9576_v32  ;;  %v12708_v12 = vunpack.i.h.bf16 %v8910_v10  ;;  %v12710_v37 = vld [vmem:[#allocation227_spill] sm:$0xff] }
 0x895   :  { %v3071_v34 = vsel %vm12703_vm8, %v12702_v55, %v12701_v61  ;;  %vm12707_vm12 = vmmov %vm12689_vm1  ;;  %v9963_v54 = vsel %vm1987_vm11, %v12711_v58, %v12710_v37  ;;  %v12713_v8 = vld [vmem:[#allocation63_spill] sm:$0xff]  ;;  %4257 = vrot.lane.b32.xlu1 %v12602_v28, %s12615_s22  ;;  %4317 = vrot.lane.b32.xlu0 %v12574_v9, %s12681_s29  ;;  %v2907_v50 = vmul.f32 %v2899_v31, %v12719_v26  ;;  %v2898_v52 = vsel %vm88_vm13, %v2882_v42, 0.0 }
 0x896   :  { %v4014_v35 = vsel %vm12705_vm7, %v12696_v46, %v12704_v29  ;;  %v2884_v20 = vsel %vm12707_vm12, %v2874_v22, %v2876_v57  ;;  %v2947_v55 = vsel %vm12709_vm3, %v12708_v12, %v2938_v41  ;;  %12712 = vst [vmem:[#allocation252_spill] sm:$0xff] %v9963_v54  ;;  %vm12714_vm8 = vmmov %vm12709_vm3  ;;  %v3087_v22 = vsel %vm111_vm9, %v3071_v34, 0.0  ;;  %v12716_v57 = vld [vmem:[#allocation72_spill] sm:$0xff]  ;;  %v12717_v29 = vld [vmem:[#allocation53_spill] sm:$0xff] }
 0x897   :  { %v2946_v13 = vsel %vm12714_vm8, %v12713_v8, %v9578_v25  ;;  %v2963_v46 = vsel %vm95_vm4, %v2947_v55, 0.0  ;;  %v12718_v58 = vunpack.i.h.bf16 %v12717_v29  ;;  %v12720_v25 = vld [vmem:[#allocation20_spill] sm:$0xff]  ;;  %v9984_v55 = vsel %vm111_vm9, %v4013_v4, 0.0  ;;  %v2940_v30 = vpop.permute.xlu1 %2939  ;;  %v12736_v10 = vld [vmem:[#allocation11_spill] sm:$0xff] }
 0x898   :  { %v2971_v6 = vmul.f32 %v2963_v46, %v12720_v25  ;;  %12721 = vst [vmem:[#allocation260_spill] sm:$0xff] %v9984_v55  ;;  %v2975_v7 = vadd.f32 %v2967_v56, %v2903_v40  ;;  %v2900_v34 = vsel %vm88_vm13, %v2884_v20, 0.0  ;;  %v3002_v38 = vpop.permute.xlu0 %3001  ;;  %v2962_v29 = vsel %vm96_vm14, %v2946_v13, 0.0  ;;  %v12722_v46 = vld [vmem:[#allocation135_spill] sm:$0xff]  ;;  %v12725_v40 = vld [vmem:[#allocation24_spill] sm:$0xff] }
 0x899   :  { %v3007_v12 = vsel %vm539_vm2, %v12718_v58, %v12716_v57  ;;  %v2948_v31 = vsel %vm12709_vm3, %v2938_v41, %v2940_v30  ;;  %v12723_v3 = vunpack.i.h.bf16 %v12722_v46  ;;  %v3095_v56 = vmul.f32 %v3087_v22, %v12724_v15  ;;  %v12726_v20 = vld [vmem:[#allocation16_spill] sm:$0xff]  ;;  %5368 = vrot.lane.b32.xlu1 %v12400_v2, %s12615_s22  ;;  %4259 = vrot.lane.b32.xlu0 %v12601_v62, %s12615_s22  ;;  %v12728_v30 = vld [vmem:[#allocation159_spill] sm:$0xff]  ;;  %v12735_v46 = vld [vmem:[#allocation82_spill] sm:$0xff] }
 0x89a   :  { %v2979_v58 = vadd.f32 %v2971_v6, %v2907_v50  ;;  %v3031_v33 = vmul.f32 %v3007_v12, %v12725_v40  ;;  %v2964_v42 = vsel %vm96_vm14, %v2948_v31, 0.0  ;;  %v12727_v13 = vld [vmem:[#allocation224_spill] sm:$0xff]  ;;  %v12729_v6 = vunpack.i.h.bf16 %v12728_v30  ;;  %v12731_v50 = vld [vmem:[#allocation230_spill] sm:$0xff] }
 0x89b   :  { %v3011_v4 = vsel %vm539_vm2, %v12723_v3, %v3002_v38  ;;  %vm12730_vm7 = vcmask 121856   ;;  %v12732_v41 = vld [vmem:[#allocation156_spill] sm:$0xff]  ;;  %vm12734_vm1 = vcmask 244736   ;;  %v2908_v31 = vmul.f32 %v2900_v34, %v12719_v26  ;;  %v3004_v17 = vpop.permute.xlu1 %3003  ;;  %v12742_v34 = vld [vmem:[#allocation141_spill] sm:$0xff] }
 0x89c   :  { %v3035_v23 = vmul.f32 %v3011_v4, %v12726_v20  ;;  %v3391_v3 = vsel %vm12730_vm7, %v12729_v6, %v12727_v13  ;;  %v12733_v22 = vunpack.i.h.bf16 %v12732_v41  ;;  %v2972_v4 = vmul.f32 %v2964_v42, %v12720_v25  ;;  %v12738_v55 = vld [vmem:[#allocation44_spill] sm:$0xff]  ;;  %v3066_v6 = vpop.permute.xlu0 %3065  ;;  %vm12750_vm3 = vmmov %vm12734_vm1 }
 0x89d   :  { %v2906_v27 = vmul.f32 %v2898_v52, %v12735_v46  ;;  %v2970_v8 = vmul.f32 %v2962_v29, %v12736_v10  ;;  %v3010_v54 = vsel %vm539_vm2, %v12738_v55, %v12737_v11  ;;  %v12739_v13 = vld [vmem:[#allocation60_spill] sm:$0xff]  ;;  %vm12741_vm12 = vcmask 252928   ;;  %4323 = vrot.lane.b32.xlu1 %v12601_v62, %s12681_s29  ;;  %4321 = vrot.lane.b32.xlu0 %v12602_v28, %s12681_s29  ;;  %v12752_v46 = vld [vmem:[#allocation147_spill] sm:$0xff] }
 0x89e   :  { %v3135_v12 = vsel %vm12734_vm1, %v12733_v22, %v12731_v50  ;;  %v3043_v30 = vadd.f32 %v3035_v23, %v2979_v58  ;;  %v3074_v41 = vsel %vm12741_vm12, %v12740_v39, %v12739_v13  ;;  %v2980_v22 = vadd.f32 %v2972_v4, %v2908_v31  ;;  %vm12744_vm8 = vmmov %vm12741_vm12 }
 0x89f   :  { %v3012_v26 = vsel %vm539_vm2, %v3002_v38, %v3004_v17  ;;  %v12743_v25 = vunpack.i.h.bf16 %v12742_v34  ;;  %v3039_v42 = vadd.f32 %v3031_v33, %v2975_v7  ;;  %v10036_v23 = vsel %vm112_vm15, %v4014_v35, 0.0  ;;  %v12746_v33 = vld [vmem:[#allocation30_spill] sm:$0xff]  ;;  %v12748_v35 = vld [vmem:[#allocation99_spill] sm:$0xff]  ;;  %vm12751_vm7 = vmmov %vm12744_vm8 }
 0x8a0   :  { %v3036_v29 = vmul.f32 %v3012_v26, %v12726_v20  ;;  %12745 = vst [vmem:[#allocation49_spill] sm:$0xff] %v10036_v23  ;;  %v10040_v17 = vsel %vm111_vm9, %v3391_v3, 0.0  ;;  %v3151_v38 = vsel %vm119_vm6, %v3135_v12, 0.0  ;;  %v2978_v58 = vadd.f32 %v2970_v8, %v2906_v27  ;;  %v12747_v20 = vld [vmem:[#allocation14_spill] sm:$0xff]  ;;  %v3068_v26 = vpop.permute.xlu1 %3067 }
 0x8a1   :  { %v3075_v52 = vsel %vm12744_vm8, %v12743_v25, %v3066_v6  ;;  %v3034_v13 = vmul.f32 %v3010_v54, %v12747_v20  ;;  %v3090_v31 = vsel %vm112_vm15, %v3074_v41, 0.0  ;;  %v3130_v25 = vpop.permute.xlu0 %3129  ;;  %v3076_v55 = vsel %vm12751_vm7, %v3066_v6, %v3068_v26  ;;  %4373 = vrot.lane.b32.xlu1 %v8893_v48, %s12754_s13  ;;  %5373 = vrot.lane.b32.xlu0 %v12400_v2, %s12681_s29  ;;  %v12756_v41 = vld [vmem:[#allocation148_spill] sm:$0xff]  ;;  %v12763_v48 = vld [vmem:[#allocation243_spill] sm:$0xff] }
 0x8a2   :  { %v3091_v11 = vsel %vm111_vm9, %v3075_v52, 0.0  ;;  %v3044_v4 = vadd.f32 %v3036_v29, %v2980_v22  ;;  %v12749_v52 = vld [vmem:[#allocation91_spill] sm:$0xff]  ;;  %v12753_v12 = vunpack.i.h.bf16 %v12752_v46  ;;  %v3103_v8 = vadd.f32 %v3095_v56, %v3039_v42  ;;  %v12760_v42 = vld [vmem:[#allocation26_spill] sm:$0xff] }
 0x8a3   :  { %v3099_v7 = vmul.f32 %v3091_v11, %v12746_v33  ;;  %v3138_v23 = vsel %vm12750_vm3, %v12749_v52, %v12748_v35  ;;  %v3092_v27 = vsel %vm112_vm15, %v3076_v55, 0.0  ;;  %v12757_v6 = vunpack.i.h.bf16 %v12756_v41  ;;  %v12759_v29 = vld [vmem:[#allocation19_spill] sm:$0xff]  ;;  %v12766_v52 = vld [vmem:[#allocation50_spill] sm:$0xff] }
 0x8a4   :  { %v3139_v11 = vsel %vm12734_vm1, %v12753_v12, %v3130_v25  ;;  %vm12758_vm12 = vcmask 146432   ;;  %v3100_v56 = vmul.f32 %v3092_v27, %v12746_v33  ;;  %v3042_v26 = vadd.f32 %v3034_v13, %v2978_v58  ;;  %v12762_v12 = vld [vmem:[#allocation119_spill] sm:$0xff]  ;;  %v3132_v20 = vpop.permute.xlu1 %3131  ;;  %v12768_v27 = vld [vmem:[#allocation162_spill] sm:$0xff] }
 0x8a5   :  { %v3107_v3 = vadd.f32 %v3099_v7, %v3043_v30  ;;  %v3155_v54 = vsel %vm119_vm6, %v3139_v11, 0.0  ;;  %v12755_v30 = vld [vmem:[#allocation234_spill] sm:$0xff]  ;;  %v3098_v7 = vmul.f32 %v3090_v31, %v12759_v29  ;;  %vm12761_vm8 = vcmp.lt.s32.totalorder %v12592_v47, 16  ;;  %vm12764_vm3 = vmmov %vm12758_vm12  ;;  %v12765_v46 = vld [vmem:[#allocation259_spill] sm:$0xff]  ;;  %5378 = vrot.lane.b32.xlu1 %v12400_v2, %s12754_s13  ;;  %4375 = vrot.lane.b32.xlu0 %v8964_v0, %s12754_s13 }
 0x8a6   :  { %v3199_v22 = vsel %vm12758_vm12, %v12757_v6, %v12755_v30  ;;  %v3163_v55 = vmul.f32 %v3155_v54, %v12760_v42  ;;  %v3154_v35 = vsel %vm12761_vm8, %v3138_v23, 0.0  ;;  %v3202_v11 = vsel %vm12764_vm3, %v12763_v48, %v12762_v12  ;;  %v3194_v6 = vpop.permute.xlu0 %3193  ;;  %vm12770_vm12 = vmmov %vm12764_vm3  ;;  %v12771_v13 = vld [vmem:[#allocation34_spill] sm:$0xff] }
 0x8a7   :  { %vm12767_vm7 = vcmask 138240   ;;  %v3108_v10 = vadd.f32 %v3100_v56, %v3044_v4  ;;  %v3140_v33 = vsel %vm12734_vm1, %v3130_v25, %v3132_v20  ;;  %v12769_v54 = vunpack.i.h.bf16 %v12768_v27  ;;  %v12772_v20 = vld [vmem:[#allocation79_spill] sm:$0xff]  ;;  %v12775_v56 = vld [vmem:[#allocation81_spill] sm:$0xff]  ;;  %vm12779_vm1 = vmmov %vm12770_vm12 }
 0x8a8   :  { %v3266_v41 = vsel %vm12767_vm7, %v12766_v52, %v12765_v46  ;;  %v3171_v31 = vadd.f32 %v3163_v55, %v3107_v3  ;;  %v3159_v23 = vmul.f32 %v3151_v38, %v12771_v13  ;;  %v3215_v29 = vsel %vm87_vm5, %v3199_v22, 0.0  ;;  %v12774_v3 = vld [vmem:[#allocation38_spill] sm:$0xff]  ;;  %v12776_v55 = vld [vmem:[#allocation157_spill] sm:$0xff]  ;;  %v3196_v48 = vpop.permute.xlu1 %3195 }
 0x8a9   :  { %v3203_v58 = vsel %vm12770_vm12, %v12769_v54, %v3194_v6  ;;  %v3156_v12 = vsel %vm12761_vm8, %v3140_v33, 0.0  ;;  %vm12773_vm3 = vcmask 277504   ;;  %v3218_v38 = vsel %vm88_vm13, %v3202_v11, 0.0  ;;  %v12778_v52 = vld [vmem:[#allocation25_spill] sm:$0xff]  ;;  %vm12782_vm12 = vmmov %vm12767_vm7  ;;  %4381 = vrot.lane.b32.xlu1 %v12574_v9, %s12754_s13  ;;  %4379 = vrot.lane.b32.xlu0 %v12575_v1, %s12754_s13  ;;  %v12788_v9 = vld [vmem:[#allocation238_spill] sm:$0xff] }
 0x8aa   :  { %v3219_v46 = vsel %vm87_vm5, %v3203_v58, 0.0  ;;  %v2880_v4 = vsel %vm12773_vm3, %v12677_v5, %v12772_v20  ;;  %v3164_v25 = vmul.f32 %v3156_v12, %v12760_v42  ;;  %v12777_v33 = vunpack.i.h.bf16 %v12776_v55  ;;  %v3258_v5 = vpop.permute.xlu0 %3257  ;;  %v12780_v42 = vld [vmem:[#allocation137_spill] sm:$0xff]  ;;  %vm12790_vm3 = vmmov %vm12767_vm7 }
 0x8ab   :  { %v3227_v22 = vmul.f32 %v3219_v46, %v12774_v3  ;;  %v3106_v58 = vadd.f32 %v3098_v7, %v3042_v26  ;;  %v3162_v27 = vmul.f32 %v3154_v35, %v12778_v52  ;;  %v3282_v0 = vsel %vm96_vm14, %v3266_v41, 0.0  ;;  %v12783_v55 = vld [vmem:[#allocation33_spill] sm:$0xff]  ;;  %v12785_v41 = vld [vmem:[#allocation40_spill] sm:$0xff] }
 0x8ac   :  { %v3263_v54 = vsel %vm12767_vm7, %v12777_v33, %v12775_v56  ;;  %v3172_v20 = vadd.f32 %v3164_v25, %v3108_v10  ;;  %v3204_v11 = vsel %vm12779_vm1, %v3194_v6, %v3196_v48  ;;  %v12781_v12 = vunpack.i.h.bf16 %v12780_v42  ;;  %v12784_v10 = vld [vmem:[#allocation31_spill] sm:$0xff]  ;;  %v3260_v1 = vpop.permute.xlu1 %3259 }
 0x8ad   :  { %v3235_v34 = vadd.f32 %v3227_v22, %v3171_v31  ;;  %v3167_v39 = vadd.f32 %v3159_v23, %v3103_v8  ;;  %v3226_v13 = vmul.f32 %v3218_v38, %v12783_v55  ;;  %v3220_v7 = vsel %vm88_vm13, %v3204_v11, 0.0  ;;  %v12786_v38 = vld [vmem:[#allocation37_spill] sm:$0xff]  ;;  %4265 = vrot.lane.b32.xlu1 %v9367_v51, %s12615_s22  ;;  %4263 = vrot.lane.b32.xlu0 %v9357_v44, %s12615_s22 }
 0x8ae   :  { %v3267_v46 = vsel %vm12782_vm12, %v12781_v12, %v3258_v5  ;;  %v3223_v35 = vmul.f32 %v3215_v29, %v12784_v10  ;;  %v3279_v48 = vsel %vm95_vm4, %v3263_v54, 0.0  ;;  %v3228_v8 = vmul.f32 %v3220_v7, %v12774_v3  ;;  %v12787_v22 = vld [vmem:[#allocation89_spill] sm:$0xff]  ;;  %v3322_v11 = vpop.permute.xlu0 %3321 }
 0x8af   :  { %v3283_v26 = vsel %vm95_vm4, %v3267_v46, 0.0  ;;  %v2896_v31 = vsel %vm88_vm13, %v2880_v4, 0.0  ;;  %v3170_v23 = vadd.f32 %v3162_v27, %v3106_v58  ;;  %v3290_v25 = vmul.f32 %v3282_v0, %v12786_v38  ;;  %v12791_v46 = vld [vmem:[#allocation139_spill] sm:$0xff]  ;;  %v12794_v58 = vld [vmem:[#allocation48_spill] sm:$0xff] }
 0x8b0   :  { %v3291_v6 = vmul.f32 %v3283_v26, %v12785_v41  ;;  %vm12789_vm8 = vcmask 121856   ;;  %v3236_v29 = vadd.f32 %v3228_v8, %v3172_v20  ;;  %v3268_v54 = vsel %vm12790_vm3, %v3258_v5, %v3260_v1  ;;  %v12793_v26 = vld [vmem:[#allocation43_spill] sm:$0xff]  ;;  %v12795_v20 = vld [vmem:[#allocation116_spill] sm:$0xff]  ;;  %v12796_v8 = vld [vmem:[#allocation117_spill] sm:$0xff] }
 0x8b1   :  { %v3394_v33 = vsel %vm12789_vm8, %v12788_v9, %v12787_v22  ;;  %v12792_v3 = vunpack.i.h.bf16 %v12791_v46  ;;  %v3287_v55 = vmul.f32 %v3279_v48, %v12793_v26  ;;  %v3234_v4 = vadd.f32 %v3226_v13, %v3170_v23  ;;  %v12797_v48 = vld [vmem:[#allocation61_spill] sm:$0xff]  ;;  %v12802_v9 = vld [vmem:[#allocation164_spill] sm:$0xff]  ;;  %vm12804_vm12 = vmmov %vm12789_vm8  ;;  %4329 = vrot.lane.b32.xlu1 %v9367_v51, %s12681_s29  ;;  %4327 = vrot.lane.b32.xlu0 %v9357_v44, %s12681_s29 }
 0x8b2   :  { %v3299_v12 = vadd.f32 %v3291_v6, %v3235_v34  ;;  %v3284_v27 = vsel %vm96_vm14, %v3268_v54, 0.0  ;;  %v3231_v34 = vadd.f32 %v3223_v35, %v3167_v39  ;;  %v2904_v5 = vmul.f32 %v2896_v31, %v12700_v45  ;;  %v12799_v39 = vld [vmem:[#allocation123_spill] sm:$0xff]  ;;  %v12800_v35 = vld [vmem:[#allocation77_spill] sm:$0xff] }
 0x8b3   :  { %v3331_v7 = vsel %vm147_vm0, %v12792_v3, %v3322_v11  ;;  %v3330_v6 = vsel %vm147_vm0, %v12796_v8, %v12795_v20  ;;  %v3292_v13 = vmul.f32 %v3284_v27, %v12785_v41  ;;  %vm12798_vm7 = vcmask 269312   ;;  %v3324_v3 = vpop.permute.xlu1 %3323  ;;  %v12934_v8 = vld [vmem:[#allocation12_spill] sm:$0xff] }
 0x8b4   :  { %v3355_v0 = vmul.f32 %v3331_v7, %v12794_v58  ;;  %v2944_v23 = vsel %vm12798_vm7, %v12674_v53, %v12797_v48  ;;  %v3298_v22 = vadd.f32 %v3290_v25, %v3234_v4  ;;  %v3410_v1 = vsel %vm112_vm15, %v3394_v33, 0.0  ;;  %v3386_v7 = vpop.permute.xlu0 %3385  ;;  %v12805_v53 = vld [vmem:[#allocation46_spill] sm:$0xff]  ;;  %v12807_v4 = vld [vmem:[#allocation51_spill] sm:$0xff] }
 0x8b5   :  { %vm12801_vm1 = vcmask 113664   ;;  %v3300_v31 = vadd.f32 %v3292_v13, %v3236_v29  ;;  %v3332_v20 = vsel %vm147_vm0, %v3322_v11, %v3324_v3  ;;  %v12803_v41 = vunpack.i.h.bf16 %v12802_v9  ;;  %v12806_v11 = vld [vmem:[#allocation73_spill] sm:$0xff]  ;;  %v12810_v48 = vld [vmem:[#allocation86_spill] sm:$0xff]  ;;  %4387 = vrot.lane.b32.xlu1 %v12601_v62, %s12754_s13  ;;  %4385 = vrot.lane.b32.xlu0 %v12602_v28, %s12754_s13  ;;  %v12932_v9 = vld [vmem:[#allocation187_spill] sm:$0xff] }
 0x8b6   :  { %v3363_v54 = vadd.f32 %v3355_v0, %v3299_v12  ;;  %v3458_v45 = vsel %vm12801_vm1, %v12800_v35, %v12799_v39  ;;  %v10160_v46 = vadd.f32 %v3287_v55, %v3231_v34  ;;  %v3354_v25 = vmul.f32 %v3330_v6, %v12805_v53  ;;  %v12808_v34 = vld [vmem:[#allocation106_spill] sm:$0xff]  ;;  %vm12814_vm1 = vmmov %vm12804_vm12 }
 0x8b7   :  { %v3395_v27 = vsel %vm12804_vm12, %v12803_v41, %v3386_v7  ;;  %v3356_v33 = vmul.f32 %v3332_v20, %v12794_v58  ;;  %v3008_v29 = vsel %vm539_vm2, %v12716_v57, %v12806_v11  ;;  %v2960_v55 = vsel %vm96_vm14, %v2944_v23, 0.0  ;;  %v3388_v20 = vpop.permute.xlu1 %3387  ;;  %v12812_v57 = vld [vmem:[#allocation250_spill] sm:$0xff] }
 0x8b8   :  { %v3411_v12 = vsel %vm111_vm9, %v3395_v27, 0.0  ;;  %v3418_v0 = vmul.f32 %v3410_v1, %v12807_v4  ;;  %v3362_v6 = vadd.f32 %v3354_v25, %v3298_v22  ;;  %vm12809_vm8 = vcmp.lt.s32.totalorder %v12592_v47, 16  ;;  %v3450_v41 = vpop.permute.xlu0 %3449  ;;  %v12815_v11 = vld [vmem:[#allocation174_spill] sm:$0xff]  ;;  %v12818_v25 = vld [vmem:[#allocation235_spill] sm:$0xff] }
 0x8b9   :  { %v3419_v58 = vmul.f32 %v3411_v12, %v12808_v34  ;;  %v3474_v13 = vsel %vm12809_vm8, %v3458_v45, 0.0  ;;  %vm12811_vm3 = vcmask 15360   ;;  %v3364_v39 = vadd.f32 %v3356_v33, %v3300_v31  ;;  %v12819_v45 = vld [vmem:[#allocation150_spill] sm:$0xff]  ;;  %4391 = vrot.lane.b32.xlu1 %v9357_v44, %s12754_s13  ;;  %4389 = vrot.lane.b32.xlu0 %v12400_v2, %s12754_s13 }
 0x8ba   :  { %v3522_v3 = vsel %vm12811_vm3, %v12810_v48, %v9780_v49  ;;  %vm12813_vm7 = vcmask 7168   ;;  %v3396_v1 = vsel %vm12814_vm1, %v3386_v7, %v3388_v20  ;;  %v12816_v12 = vunpack.i.h.bf16 %v12815_v11  ;;  %v12821_v7 = vld [vmem:[#allocation176_spill] sm:$0xff]  ;;  %v12829_v48 = vld [vmem:[#allocation149_spill] sm:$0xff] }
 0x8bb   :  { %v3586_v27 = vsel %vm12813_vm7, %v12812_v57, %v9824_v18  ;;  %v3427_v23 = vadd.f32 %v3419_v58, %v3363_v54  ;;  %vm12817_vm12 = vcmask 113664   ;;  %v12820_v4 = vunpack.i.h.bf16 %v12819_v45  ;;  %vm12823_vm8 = vmmov %vm12813_vm7  ;;  %v12825_v20 = vld [vmem:[#allocation80_spill] sm:$0xff] }
 0x8bc   :  { %v3459_v22 = vsel %vm12817_vm12, %v12816_v12, %v3450_v41  ;;  %v2968_v49 = vmul.f32 %v2960_v55, %v12699_v60  ;;  %v3412_v31 = vsel %vm112_vm15, %v3396_v1, 0.0  ;;  %v3538_v54 = vsel %vm88_vm13, %v3522_v3, 0.0  ;;  %v12827_v12 = vld [vmem:[#allocation109_spill] sm:$0xff]  ;;  %v3452_v3 = vpop.permute.xlu1 %3451  ;;  %v3514_v45 = vpop.permute.xlu0 %3513  ;;  %vm12828_vm7 = vmmov %vm12817_vm12 }
 0x8bd   :  { %v3327_v53 = vsel %vm147_vm0, %v12820_v4, %v12818_v25  ;;  %v3475_v18 = vsel %vm119_vm6, %v3459_v22, 0.0  ;;  %v12822_v33 = vunpack.i.h.bf16 %v12821_v7  ;;  %v3420_v55 = vmul.f32 %v3412_v31, %v12808_v34  ;;  %v12824_v4 = vld [vmem:[#allocation113_spill] sm:$0xff]  ;;  %4395 = vrot.lane.b32.xlu1 %v12400_v2, %s12754_s13  ;;  %4393 = vrot.lane.b32.xlu0 %v9367_v51, %s12754_s13 }
 0x8be   :  { %v3483_v58 = vmul.f32 %v3475_v18, %v12824_v4  ;;  %vm12826_vm3 = vcmask 252928   ;;  %v3426_v62 = vadd.f32 %v3418_v0, %v3362_v6  ;;  %v3482_v22 = vmul.f32 %v3474_v13, %v12827_v12  ;;  %v12832_v18 = vld [vmem:[#allocation108_spill] sm:$0xff] }
 0x8bf   :  { %v3587_v60 = vsel %vm12823_vm8, %v12822_v33, %v9908_v16  ;;  %v3072_v1 = vsel %vm12826_vm3, %v12701_v61, %v12825_v20  ;;  %v3602_v28 = vsel %vm96_vm14, %v3586_v27, 0.0  ;;  %v3428_v57 = vadd.f32 %v3420_v55, %v3364_v39  ;;  %v12834_v27 = vld [vmem:[#allocation125_spill] sm:$0xff]  ;;  %v12836_v20 = vld [vmem:[#allocation118_spill] sm:$0xff] }
 0x8c0   :  { %v3491_v7 = vadd.f32 %v3483_v58, %v3427_v23  ;;  %v3460_v33 = vsel %vm12828_vm7, %v3450_v41, %v3452_v3  ;;  %v12830_v34 = vunpack.i.h.bf16 %v12829_v48  ;;  %vm12831_vm1 = vcmask 15360   ;;  %v3688_v44 = vpop.permute.xlu0 %3687 }
 0x8c1   :  { %v3546_v11 = vmul.f32 %v3538_v54, %v12832_v18  ;;  %v3603_v61 = vsel %vm95_vm4, %v3587_v60, 0.0  ;;  %vm12833_vm12 = vcmp.lt.s32.totalorder %v12592_v47, 16  ;;  %v3032_v13 = vmul.f32 %v3008_v29, %v12725_v40  ;;  %v12835_v54 = vld [vmem:[#allocation45_spill] sm:$0xff]  ;;  %vm12838_vm8 = vmmov %vm12831_vm1 }
 0x8c2   :  { %v3523_v31 = vsel %vm12831_vm1, %v12830_v34, %v3514_v45  ;;  %v3476_v0 = vsel %vm12833_vm12, %v3460_v33, 0.0  ;;  %v2976_v39 = vadd.f32 %v2968_v49, %v2904_v5  ;;  %v3351_v60 = vmul.f32 %v3327_v53, %v12835_v54  ;;  %v3516_v33 = vpop.permute.xlu1 %3515  ;;  %v12837_v34 = vld [vmem:[#allocation128_spill] sm:$0xff]  ;;  %v12839_v5 = vld [vmem:[#allocation75_spill] sm:$0xff] }
 0x8c3   :  { %v3539_v6 = vsel %vm87_vm5, %v3523_v31, 0.0  ;;  %v3484_v41 = vmul.f32 %v3476_v0, %v12824_v4  ;;  %v3088_v55 = vsel %vm112_vm15, %v3072_v1, 0.0  ;;  %v3490_v58 = vadd.f32 %v3482_v22, %v3426_v62  ;;  %v12841_v49 = vld [vmem:[#allocation203_spill] sm:$0xff]  ;;  %v12842_v53 = vld [vmem:[#allocation172_spill] sm:$0xff] }
 0x8c4   :  { %v3547_v23 = vmul.f32 %v3539_v6, %v12834_v27  ;;  %v3610_v3 = vmul.f32 %v3602_v28, %v12836_v20  ;;  %v3611_v31 = vmul.f32 %v3603_v61, %v12837_v34  ;;  %v3524_v40 = vsel %vm12838_vm8, %v3514_v45, %v3516_v33  ;;  %v12844_v45 = vld [vmem:[#allocation258_spill] sm:$0xff] }
 0x8c5   :  { %v3492_v18 = vadd.f32 %v3484_v41, %v3428_v57  ;;  %vm12840_vm3 = vcmask 244736   ;;  %v12843_v4 = vunpack.i.h.bf16 %v12842_v53  ;;  %v3554_v62 = vadd.f32 %v3546_v11, %v3490_v58  ;;  %v12847_v6 = vld [vmem:[#allocation178_spill] sm:$0xff] }
 0x8c6   :  { %v3555_v12 = vadd.f32 %v3547_v23, %v3491_v7  ;;  %v3136_v29 = vsel %vm12840_vm3, %v12731_v50, %v12839_v5  ;;  %v3540_v22 = vsel %vm88_vm13, %v3524_v40, 0.0  ;;  %v3040_v57 = vadd.f32 %v3032_v13, %v2976_v39  ;;  %v12849_v23 = vld [vmem:[#allocation78_spill] sm:$0xff]  ;;  %v10266_v13 = vpop.permute.xlu1 %3689 }
 0x8c7   :  { %v3455_v1 = vsel %vm12828_vm7, %v12843_v4, %v12841_v49  ;;  %v3096_v7 = vmul.f32 %v3088_v55, %v12724_v15  ;;  %v3548_v50 = vmul.f32 %v3540_v22, %v12834_v27  ;;  %v12845_v61 = vunpack.i.l.bf16 %v12844_v45  ;;  %v3752_v15 = vpop.permute.xlu0 %3751  ;;  %v12858_v4 = vld [vmem:[#allocation192_spill] sm:$0xff] }
 0x8c8   :  { %v3619_v28 = vadd.f32 %v3611_v31, %v3555_v12  ;;  %v3359_v0 = vadd.f32 %v3351_v60, %v10160_v46  ;;  %v12848_v41 = vunpack.i.l.bf16 %v12847_v6  ;;  %vm12850_vm1 = vcmask 1039360   ;;  %v12852_v46 = vld [vmem:[#allocation52_spill] sm:$0xff]  ;;  %v12855_v31 = vld [vmem:[#allocation13_spill] sm:$0xff] }
 0x8c9   :  { %v10259_v11 = vsel %vm1987_vm11, %v12710_v37, %v12845_v61  ;;  %v3618_v51 = vadd.f32 %v3610_v3, %v3554_v62  ;;  %v3638_v12 = vadd.f32 %v9776_v43, %v9930_v19  ;;  %v3152_v39 = vsel %vm12833_vm12, %v3136_v29, 0.0  ;;  %vm12851_vm8 = vmmov %vm12850_vm1  ;;  %v12853_v3 = vld [vmem:[#allocation242_spill] sm:$0xff]  ;;  %v12860_v62 = vld [vmem:[#allocation85_spill] sm:$0xff] }
 0x8ca   :  { %12846 = vst [vmem:[#allocation263_spill] sm:$0xff] %v10259_v11  ;;  %v3698_v58 = vsel %vm12850_vm1, %v12849_v23, %v12848_v41  ;;  %v10272_v27 = vadd.f32 %v3548_v50, %v3492_v18  ;;  %v3699_v37 = vsel %vm12851_vm8, %v3688_v44, %v10266_v13  ;;  %v3415_v60 = vmul.f32 %v10040_v17, %v12852_v46  ;;  %v12856_v44 = vld [vmem:[#allocation168_spill] sm:$0xff]  ;;  %v12857_v17 = vld [vmem:[#allocation34_spill] sm:$0xff]  ;;  %v10295_v61 = vpop.permute.xlu1 %3753  ;;  %v12900_v23 = vld [vmem:[#allocation231_spill] sm:$0xff] }
 0x8cb   :  { %v3471_v55 = vsel %vm119_vm6, %v3455_v1, 0.0  ;;  %vm12854_vm3 = vcmask 146432   ;;  %v3715_v43 = vsel %vm111_vm9, %v3699_v37, 0.0  ;;  %v3104_v19 = vadd.f32 %v3096_v7, %v3040_v57  ;;  %v3816_v57 = vpop.permute.xlu0 %3815  ;;  %v12863_v7 = vld [vmem:[#allocation105_spill] sm:$0xff]  ;;  %v12865_v37 = vld [vmem:[#allocation154_spill] sm:$0xff]  ;;  %v12905_v11 = vld [vmem:[#allocation100_spill] sm:$0xff] }
 0x8cc   :  { %v3200_v33 = vsel %vm12854_vm3, %v12755_v30, %v12853_v3  ;;  %v3714_v18 = vsel %vm112_vm15, %v3698_v58, 0.0  ;;  %v3643_v40 = vadd.f32 %v12855_v31, %v3619_v28  ;;  %v3723_v5 = vmul.f32 %v3715_v43, %v12856_v44  ;;  %v12862_v30 = vld [vmem:[#allocation18_spill] sm:$0xff]  ;;  %v12864_v58 = vld [vmem:[#allocation240_spill] sm:$0xff]  ;;  %v12869_v43 = vld [vmem:[#allocation41_spill] sm:$0xff] }
 0x8cd   :  { %v3423_v29 = vadd.f32 %v3415_v60, %v3359_v0  ;;  %v3160_v53 = vmul.f32 %v3152_v39, %v12857_v17  ;;  %v12859_v1 = vunpack.i.l.bf16 %v12858_v4  ;;  %vm12861_vm7 = vcmask 1031168   ;;  %v12871_v31 = vld [vmem:[#allocation158_spill] sm:$0xff] }
 0x8ce   :  { %v3642_v50 = vadd.f32 %v12862_v30, %v3618_v51  ;;  %v3479_v41 = vmul.f32 %v3471_v55, %v12863_v7  ;;  %v12866_v28 = vunpack.i.h.bf16 %v12865_v37  ;;  %vm12867_vm1 = vcmask 15360   ;;  %vm12868_vm12 = vmmov %vm12861_vm7  ;;  %v12876_v37 = vld [vmem:[#allocation212_spill] sm:$0xff] }
 0x8cf   :  { %v3762_v22 = vsel %vm12861_vm7, %v12860_v62, %v12859_v1  ;;  %v3731_v0 = vadd.f32 %v3723_v5, %v3643_v40  ;;  %v3763_v39 = vsel %vm12868_vm12, %v3752_v15, %v10295_v61  ;;  %v3216_v60 = vsel %vm88_vm13, %v3200_v33, 0.0  ;;  %v12872_v1 = vld [vmem:[#allocation252_spill] sm:$0xff]  ;;  %v12887_v62 = vld [vmem:[#allocation151_spill] sm:$0xff] }
 0x8d0   :  { %v3519_v3 = vsel %vm12867_vm1, %v12866_v28, %v12864_v58  ;;  %vm12870_vm8 = vcmask 138240   ;;  %v3722_v17 = vmul.f32 %v3714_v18, %v12871_v31  ;;  %v3779_v55 = vsel %vm119_vm6, %v3763_v39, 0.0  ;;  %v12875_v5 = vld [vmem:[#allocation180_spill] sm:$0xff]  ;;  %v12879_v18 = vld [vmem:[#allocation186_spill] sm:$0xff]  ;;  %v10330_v31 = vpop.permute.xlu1 %3817 }
 0x8d1   :  { %v3264_v51 = vsel %vm12870_vm8, %v12775_v56, %v12869_v43  ;;  %v10315_v30 = vsel %vm87_vm5, %v12872_v1, 0.0  ;;  %v3168_v40 = vadd.f32 %v3160_v53, %v3104_v19  ;;  %vm12874_vm3 = vcmp.lt.s32.totalorder %v12592_v47, 16  ;;  %v12877_v28 = vld [vmem:[#allocation260_spill] sm:$0xff]  ;;  %v3880_v19 = vpop.permute.xlu0 %3879 }
 0x8d2   :  { %12873 = vst [vmem:[#allocation97_spill] sm:$0xff] %v10315_v30  ;;  %v3778_v15 = vsel %vm12874_vm3, %v3762_v22, 0.0  ;;  %v3787_v33 = vmul.f32 %v3779_v55, %v12875_v5  ;;  %v10322_v2 = vmul.f32 %v12877_v28, %v12876_v37  ;;  %v3535_v56 = vsel %vm87_vm5, %v3519_v3, 0.0  ;;  %v12881_v43 = vld [vmem:[#allocation28_spill] sm:$0xff] }
 0x8d3   :  { %v12880_v39 = vunpack.i.l.bf16 %v12879_v18  ;;  %vm12882_vm7 = vcmask 932864   ;;  %v3730_v1 = vadd.f32 %v3722_v17, %v3642_v50  ;;  %v3224_v53 = vmul.f32 %v3216_v60, %v12784_v10  ;;  %v12888_v17 = vld [vmem:[#allocation111_spill] sm:$0xff]  ;;  %v12890_v60 = vld [vmem:[#allocation169_spill] sm:$0xff] }
 0x8d4   :  { %12878 = vst [vmem:[#allocation104_spill] sm:$0xff] %v10322_v2  ;;  %v3280_v22 = vsel %vm96_vm14, %v3264_v51, 0.0  ;;  %v3795_v55 = vadd.f32 %v3787_v33, %v3731_v0  ;;  %vm12883_vm1 = vmmov %vm12882_vm7  ;;  %v12884_v2 = vld [vmem:[#allocation23_spill] sm:$0xff]  ;;  %v10340_v30 = vadd.f32 %v3479_v41, %v3423_v29  ;;  %v12892_v29 = vld [vmem:[#allocation165_spill] sm:$0xff]  ;;  %vm12895_vm12 = vcmask 924672  }
 0x8d5   :  { %v3826_v45 = vsel %vm12882_vm7, %v12881_v43, %v12880_v39  ;;  %v3827_v28 = vsel %vm12883_vm1, %v3816_v57, %v10330_v31  ;;  %v10338_v3 = vadd.f32 %v12884_v2, %v3638_v12  ;;  %v3786_v39 = vmul.f32 %v3778_v15, %v12887_v62  ;;  %v12891_v2 = vld [vmem:[#allocation241_spill] sm:$0xff]  ;;  %v12894_v15 = vld [vmem:[#allocation103_spill] sm:$0xff]  ;;  %v12897_v62 = vld [vmem:[#allocation146_spill] sm:$0xff] }
 0x8d6   :  { %12886 = vst [vmem:[#allocation56_spill] sm:$0xff] %v10340_v30  ;;  %v3843_v50 = vsel %vm87_vm5, %v3827_v28, 0.0  ;;  %v10346_v43 = vmul.f32 %v3535_v56, %v12888_v17  ;;  %v3232_v10 = vadd.f32 %v3224_v53, %v3168_v40  ;;  %v3842_v0 = vsel %vm88_vm13, %v3826_v45, 0.0  ;;  %v10359_v56 = vpop.permute.xlu1 %3881  ;;  %v3944_v40 = vpop.permute.xlu0 %3943  ;;  %v12896_v53 = vld [vmem:[#allocation63_spill] sm:$0xff]  ;;  %vm12904_vm7 = vmmov %vm12895_vm12  ;;  %v12925_v30 = vld [vmem:[#allocation193_spill] sm:$0xff] }
 0x8d7   :  { %12885 = vst [vmem:[#allocation254_spill] sm:$0xff] %v10338_v3  ;;  %v3851_v51 = vmul.f32 %v3843_v50, %v12890_v60  ;;  %v3288_v57 = vmul.f32 %v3280_v22, %v12793_v26  ;;  %v3328_v12 = vsel %vm147_vm0, %v12818_v25, %v12891_v2  ;;  %v12893_v41 = vunpack.i.l.bf16 %v12892_v29  ;;  %v12901_v26 = vld [vmem:[#allocation152_spill] sm:$0xff]  ;;  %v12926_v3 = vld [vmem:[#allocation11_spill] sm:$0xff] }
 0x8d8   :  { %12889 = vst [vmem:[#allocation107_spill] sm:$0xff] %v10346_v43  ;;  %v3794_v28 = vadd.f32 %v3786_v39, %v3730_v1  ;;  %v12898_v45 = vunpack.i.l.bf16 %v12897_v62  ;;  %vm12899_vm8 = vcmask 269312   ;;  %v12902_v22 = vunpack.i.l.bf16 %v12901_v26 }
 0x8d9   :  { %v3890_v33 = vsel %vm12895_vm12, %v12894_v15, %v12893_v41  ;;  %vm12903_vm3 = vcmask 277504   ;;  %v3859_v25 = vadd.f32 %v3851_v51, %v3795_v55  ;;  %v3891_v2 = vsel %vm12904_vm7, %v3880_v19, %v10359_v56  ;;  %v12906_v41 = vld [vmem:[#allocation166_spill] sm:$0xff]  ;;  %v12909_v15 = vld [vmem:[#allocation232_spill] sm:$0xff] }
 0x8da   :  { %v2945_v50 = vsel %vm12899_vm8, %v12898_v45, %v12896_v53  ;;  %v2881_v20 = vsel %vm12903_vm3, %v12902_v22, %v12900_v23  ;;  %v12907_v1 = vunpack.i.h.bf16 %v12906_v41  ;;  %vm12908_vm1 = vcmask 7168   ;;  %v12911_v53 = vld [vmem:[#allocation161_spill] sm:$0xff]  ;;  %v12912_v55 = vld [vmem:[#allocation226_spill] sm:$0xff]  ;;  %v12913_v51 = vld [vmem:[#allocation224_spill] sm:$0xff] }
 0x8db   :  { %vm12910_vm12 = vcmask 113664   ;;  %v3850_v45 = vmul.f32 %v3842_v0, %v12911_v53  ;;  %v3907_v26 = vsel %vm95_vm4, %v3891_v2, 0.0  ;;  %v3296_v23 = vadd.f32 %v3288_v57, %v3232_v10  ;;  %v12915_v41 = vld [vmem:[#allocation181_spill] sm:$0xff]  ;;  %v10394_v2 = vpop.permute.xlu1 %3945  ;;  %v4008_v10 = vpop.permute.xlu0 %4007 }
 0x8dc   :  { %v10375_v39 = vsel %vm12908_vm1, %v12907_v1, %v12905_v11  ;;  %v3456_v62 = vsel %vm12910_vm12, %v12841_v49, %v12909_v15  ;;  %vm12914_vm8 = vcmask 121856   ;;  %v3906_v22 = vsel %vm96_vm14, %v3890_v33, 0.0 }
 0x8dd   :  { %v3392_v19 = vsel %vm12914_vm8, %v12913_v51, %v12912_v55  ;;  %v3915_v1 = vmul.f32 %v3907_v26, %v12915_v41  ;;  %v3352_v43 = vmul.f32 %v3328_v12, %v12835_v54  ;;  %v2961_v49 = vsel %vm95_vm4, %v2945_v50, 0.0  ;;  %v12917_v55 = vld [vmem:[#allocation29_spill] sm:$0xff]  ;;  %v12924_v51 = vld [vmem:[#allocation194_spill] sm:$0xff] }
 0x8de   :  { %v2897_v0 = vsel %vm87_vm5, %v2881_v20, 0.0  ;;  %v3858_v15 = vadd.f32 %v3850_v45, %v3794_v28  ;;  %vm12916_vm3 = vcmp.lt.s32.totalorder %v12592_v47, 16  ;;  %vm12918_vm7 = vcmask 15360   ;;  %v12920_v50 = vld [vmem:[#allocation21_spill] sm:$0xff] }
 0x8df   :  { %v3472_v57 = vsel %vm12916_vm3, %v3456_v62, 0.0  ;;  %v3520_v33 = vsel %vm12918_vm7, %v12864_v58, %v12917_v55  ;;  %v3923_v26 = vadd.f32 %v3915_v1, %v3859_v25  ;;  %vm12919_vm1 = vcmask 916480   ;;  %v12921_v20 = vld [vmem:[#allocation141_spill] sm:$0xff]  ;;  %v12927_v58 = vld [vmem:[#allocation82_spill] sm:$0xff]  ;;  %v12928_v1 = vld [vmem:[#allocation200_spill] sm:$0xff] }
 0x8e0   :  { %v3955_v54 = vsel %vm12919_vm1, %v3944_v40, %v10394_v2  ;;  %v3408_v12 = vsel %vm112_vm15, %v3392_v19, 0.0  ;;  %v12922_v28 = vunpack.i.l.bf16 %v12921_v20  ;;  %vm12923_vm12 = vcmask 252928   ;;  %v12930_v40 = vld [vmem:[#allocation35_spill] sm:$0xff]  ;;  %vm12931_vm8 = vmmov %vm12919_vm1 }
 0x8e1   :  { %v3914_v53 = vmul.f32 %v3906_v22, %v12924_v51  ;;  %v3979_v62 = vmul.f32 %v3955_v54, %v12925_v30  ;;  %v3360_v37 = vadd.f32 %v3352_v43, %v3296_v23  ;;  %v2969_v48 = vmul.f32 %v2961_v49, %v12926_v3  ;;  %v10422_v54 = vpop.permute.xlu1 %4009  ;;  %v4072_v43 = vpop.permute.xlu0 %4071  ;;  %v12936_v49 = vld [vmem:[#allocation44_spill] sm:$0xff]  ;;  %v12946_v51 = vld [vmem:[#allocation206_spill] sm:$0xff] }
 0x8e2   :  { %v3073_v45 = vsel %vm12923_vm12, %v12922_v28, %v12920_v50  ;;  %v2905_v25 = vmul.f32 %v2897_v0, %v12927_v58  ;;  %v12929_v55 = vunpack.i.l.bf16 %v12928_v1  ;;  %v3480_v19 = vmul.f32 %v3472_v57, %v12863_v7  ;;  %v12937_v0 = vld [vmem:[#allocation135_spill] sm:$0xff]  ;;  %v12948_v30 = vld [vmem:[#allocation102_spill] sm:$0xff] }
 0x8e3   :  { %v12933_v20 = vunpack.i.l.bf16 %v12932_v9  ;;  %vm12935_vm3 = vcmask 908288   ;;  %v3922_v22 = vadd.f32 %v3914_v53, %v3858_v15  ;;  %v3987_v28 = vadd.f32 %v3979_v62, %v3923_v26  ;;  %v12940_v15 = vld [vmem:[#allocation209_spill] sm:$0xff]  ;;  %v12942_v62 = vld [vmem:[#allocation210_spill] sm:$0xff] }
 0x8e4   :  { %v3954_v35 = vsel %vm12931_vm8, %v12930_v40, %v12929_v55  ;;  %v3416_v3 = vmul.f32 %v3408_v12, %v12852_v46  ;;  %v3089_v23 = vsel %vm111_vm9, %v3073_v45, 0.0  ;;  %v12938_v58 = vunpack.i.l.bf16 %v12937_v0  ;;  %vm12939_vm7 = vmmov %vm12935_vm3 }
 0x8e5   :  { %v4018_v50 = vsel %vm12935_vm3, %v12934_v8, %v12933_v20  ;;  %v4019_v57 = vsel %vm12939_vm7, %v4008_v10, %v10422_v54  ;;  %v3536_v53 = vsel %vm88_vm13, %v3520_v33, 0.0  ;;  %vm12941_vm1 = vcmask 7168   ;;  %v12944_v10 = vld [vmem:[#allocation19_spill] sm:$0xff]  ;;  %v12945_v8 = vld [vmem:[#allocation14_spill] sm:$0xff] }
 0x8e6   :  { %v3009_v7 = vsel %vm539_vm2, %v12938_v58, %v12936_v49  ;;  %v3584_v26 = vsel %vm12941_vm1, %v12905_v11, %v12940_v15  ;;  %v3978_v46 = vmul.f32 %v3954_v35, %v12942_v62  ;;  %v4035_v12 = vsel %vm111_vm9, %v4019_v57, 0.0  ;;  %v12943_v49 = vld [vmem:[#allocation205_spill] sm:$0xff]  ;;  %v4074_v15 = vpop.permute.xlu1 %4073  ;;  %v3580_v62 = vpop.permute.xlu0 %3579  ;;  %vm12953_vm7 = vmmov %vm12941_vm1 }
 0x8e7   :  { %v3424_v45 = vadd.f32 %v3416_v3, %v3360_v37  ;;  %v2977_v55 = vadd.f32 %v2969_v48, %v2905_v25  ;;  %v4034_v20 = vsel %vm112_vm15, %v4018_v50, 0.0  ;;  %v4043_v0 = vmul.f32 %v4035_v12, %v12943_v49 }
 0x8e8   :  { %v3097_v58 = vmul.f32 %v3089_v23, %v12944_v10  ;;  %v3033_v33 = vmul.f32 %v3009_v7, %v12945_v8  ;;  %v12947_v40 = vunpack.i.l.bf16 %v12946_v51  ;;  %vm12949_vm12 = vcmask 900096   ;;  %v12954_v8 = vld [vmem:[#allocation91_spill] sm:$0xff]  ;;  %v12964_v10 = vld [vmem:[#allocation162_spill] sm:$0xff] }
 0x8e9   :  { %v3986_v35 = vadd.f32 %v3978_v46, %v3922_v22  ;;  %v12950_v37 = vunpack.i.h.bf16 %v12847_v6  ;;  %vm12951_vm8 = vcmask 1039360   ;;  %v4051_v25 = vadd.f32 %v4043_v0, %v3987_v28  ;;  %vm12952_vm3 = vmmov %vm12949_vm12  ;;  %v12955_v23 = vld [vmem:[#allocation147_spill] sm:$0xff] }
 0x8ea   :  { %v4082_v11 = vsel %vm12949_vm12, %v12948_v30, %v12947_v40  ;;  %v4083_v50 = vsel %vm12952_vm3, %v4072_v43, %v4074_v15  ;;  %v3588_v3 = vsel %vm12953_vm7, %v9908_v16, %v3580_v62  ;;  %v12956_v7 = vunpack.i.l.bf16 %v12955_v23  ;;  %v12958_v40 = vld [vmem:[#allocation223_spill] sm:$0xff] }
 0x8eb   :  { %v3700_v48 = vsel %vm12951_vm8, %v10266_v13, %v12950_v37  ;;  %vm12957_vm1 = vcmask 244736   ;;  %v4042_v22 = vmul.f32 %v4034_v20, %v12958_v40  ;;  %v4099_v46 = vsel %vm119_vm6, %v4083_v50, 0.0  ;;  %v12962_v43 = vld [vmem:[#allocation219_spill] sm:$0xff] }
 0x8ec   :  { %v3137_v57 = vsel %vm12957_vm1, %v12956_v7, %v12954_v8  ;;  %v3604_v6 = vsel %vm96_vm14, %v3588_v3, 0.0  ;;  %vm12959_vm12 = vcmp.lt.s32.totalorder %v12592_v47, 16  ;;  %v12960_v28 = vunpack.i.h.bf16 %v12858_v4  ;;  %v12963_v20 = vld [vmem:[#allocation243_spill] sm:$0xff]  ;;  %v5344_v4 = vpop.permute.xlu0 %5343 }
 0x8ed   :  { %v4098_v13 = vsel %vm12959_vm12, %v4082_v11, 0.0  ;;  %vm12961_vm8 = vcmask 1031168   ;;  %v4107_v62 = vmul.f32 %v4099_v46, %v12962_v43  ;;  %v3612_v12 = vmul.f32 %v3604_v6, %v12837_v34  ;;  %v10480_v11 = vpop.permute.xlu1 %4181  ;;  %v12972_v46 = vld [vmem:[#allocation237_spill] sm:$0xff] }
 0x8ee   :  { %v3764_v16 = vsel %vm12961_vm8, %v10295_v61, %v12960_v28  ;;  %v3041_v0 = vadd.f32 %v3033_v33, %v2977_v55  ;;  %v12965_v37 = vunpack.i.l.bf16 %v12964_v10  ;;  %vm12966_vm3 = vcmask 146432   ;;  %v12975_v28 = vld [vmem:[#allocation27_spill] sm:$0xff] }
 0x8ef   :  { %v4050_v8 = vadd.f32 %v4042_v22, %v3986_v35  ;;  %v3716_v3 = vsel %vm112_vm15, %v3700_v48, 0.0  ;;  %v12967_v23 = vunpack.i.h.bf16 %v12879_v18  ;;  %vm12968_vm7 = vcmask 932864   ;;  %v12969_v35 = vld [vmem:[#allocation50_spill] sm:$0xff] }
 0x8f0   :  { %v3201_v50 = vsel %vm12966_vm3, %v12965_v37, %v12963_v20  ;;  %v10486_v7 = vadd.f32 %v4107_v62, %v4051_v25  ;;  %v3620_v34 = vadd.f32 %v3612_v12, %v10272_v27  ;;  %v5345_v55 = vunpack.i.l.bf16 %v5344_v4 }
 0x8f1   :  { %v3828_v61 = vsel %vm12968_vm7, %v10330_v31, %v12967_v23  ;;  %v3153_v33 = vsel %vm119_vm6, %v3137_v57, 0.0  ;;  %v12970_v22 = vunpack.i.l.bf16 %v12780_v42  ;;  %vm12971_vm1 = vcmask 138240   ;;  %v12976_v57 = vld [vmem:[#allocation36_spill] sm:$0xff] }
 0x8f2   :  { %v4106_v6 = vmul.f32 %v4098_v13, %v12972_v46  ;;  %v3780_v18 = vsel %vm12959_vm12, %v3764_v16, 0.0  ;;  %v3724_v31 = vmul.f32 %v3716_v3, %v12856_v44  ;;  %v12973_v25 = vunpack.i.h.bf16 %v12892_v29  ;;  %v10512_v16 = vpop.permute.xlu1 %5348  ;;  %v10514_v29 = vpop.permute.xlu0 %4183  ;;  %v12977_v3 = vld [vmem:[#allocation255_spill] sm:$0xff] }
 0x8f3   :  { %v3265_v48 = vsel %vm12971_vm1, %v12970_v22, %v12969_v35  ;;  %vm12974_vm8 = vcmask 924672   ;;  %v3644_v62 = vadd.f32 %v12975_v28, %v3620_v34  ;;  %v4146_v12 = vsel %vm1987_vm11, %v12976_v57, %v5345_v55  ;;  %v12987_v28 = vld [vmem:[#allocation193_spill] sm:$0xff] }
 0x8f4   :  { %v3892_v27 = vsel %vm12974_vm8, %v10359_v56, %v12973_v25  ;;  %v3488_v42 = vadd.f32 %v3480_v19, %v3424_v45  ;;  %v3217_v20 = vsel %vm87_vm5, %v3201_v50, 0.0  ;;  %v3844_v13 = vsel %vm88_vm13, %v3828_v61, 0.0  ;;  %v12986_v25 = vld [vmem:[#allocation110_spill] sm:$0xff] }
 0x8f5   :  { %v4162_v44 = vsel %vm88_vm13, %v4146_v12, 0.0  ;;  %v4114_v56 = vadd.f32 %v4106_v6, %v4050_v8  ;;  %v3788_v10 = vmul.f32 %v3780_v18, %v12875_v5  ;;  %v3732_v37 = vadd.f32 %v3724_v31, %v3644_v62 }
 0x8f6   :  { %v4170_v23 = vmul.f32 %v4162_v44, %v12977_v3  ;;  %v3105_v19 = vadd.f32 %v3097_v58, %v3041_v0  ;;  %v3161_v45 = vmul.f32 %v3153_v33, %v12778_v52  ;;  %v3281_v50 = vsel %vm95_vm4, %v3265_v48, 0.0  ;;  %v12981_v0 = vld [vmem:[#allocation33_spill] sm:$0xff]  ;;  %v10538_v48 = vpop.permute.xlu1 %4189  ;;  %v12993_v44 = vld [vmem:[#allocation139_spill] sm:$0xff] }
 0x8f7   :  { %v3908_v61 = vsel %vm96_vm14, %v3892_v27, 0.0  ;;  %v3852_v34 = vmul.f32 %v3844_v13, %v12890_v60  ;;  %v12978_v55 = vunpack.i.h.bf16 %v12932_v9  ;;  %vm12979_vm3 = vcmask 908288   ;;  %v10540_v9 = vpop.permute.xlu0 %4187  ;;  %v12990_v13 = vld [vmem:[#allocation253_spill] sm:$0xff] }
 0x8f8   :  { %v3796_v5 = vadd.f32 %v3788_v10, %v3732_v37  ;;  %v10528_v35 = vadd.f32 %v4170_v23, %v4114_v56  ;;  %v3544_v58 = vmul.f32 %v3536_v53, %v12888_v17  ;;  %v3600_v52 = vsel %vm96_vm14, %v3584_v26, 0.0 }
 0x8f9   :  { %v4020_v8 = vsel %vm12979_vm3, %v10422_v54, %v12978_v55  ;;  %v3225_v33 = vmul.f32 %v3217_v20, %v12981_v0  ;;  %v12982_v22 = vunpack.i.h.bf16 %v12928_v1  ;;  %vm12983_vm7 = vcmask 916480   ;;  %v12988_v20 = vld [vmem:[#allocation163_spill] sm:$0xff]  ;;  %v13000_v0 = vld [vmem:[#allocation77_spill] sm:$0xff] }
 0x8fa   :  { %12980 = vst [vmem:[#allocation94_spill] sm:$0xff] %v10528_v35  ;;  %v3599_v54 = vsel %vm95_vm4, %v10375_v39, 0.0  ;;  %v3916_v17 = vmul.f32 %v3908_v61, %v12915_v41  ;;  %v12984_v53 = vunpack.i.h.bf16 %v12946_v51  ;;  %vm12985_vm1 = vcmask 900096   ;;  %v4138_v37 = vpop.permute.xlu1 %4137  ;;  %v13101_v35 = vld [vmem:[#allocation12_spill] sm:$0xff] }
 0x8fb   :  { %v3956_v60 = vsel %vm12983_vm7, %v10394_v2, %v12982_v22  ;;  %v3860_v6 = vadd.f32 %v3852_v34, %v3796_v5  ;;  %v3552_v18 = vadd.f32 %v3544_v58, %v3488_v42  ;;  %v3169_v1 = vadd.f32 %v3161_v45, %v3105_v19  ;;  %v4136_v23 = vpop.permute.xlu0 %4135  ;;  %v12996_v19 = vld [vmem:[#allocation238_spill] sm:$0xff]  ;;  %v12997_v45 = vld [vmem:[#allocation164_spill] sm:$0xff] }
 0x8fc   :  { %v4084_v26 = vsel %vm12985_vm1, %v4074_v15, %v12984_v53  ;;  %v3289_v31 = vmul.f32 %v3281_v50, %v12786_v38  ;;  %v4036_v2 = vsel %vm112_vm15, %v4020_v8, 0.0  ;;  %v3608_v27 = vmul.f32 %v3600_v52, %v12986_v25  ;;  %v12992_v15 = vld [vmem:[#allocation117_spill] sm:$0xff] }
 0x8fd   :  { %v3980_v62 = vmul.f32 %v3956_v60, %v12987_v28  ;;  %v5346_v12 = vunpack.i.h.bf16 %v5344_v4  ;;  %v3924_v39 = vadd.f32 %v3916_v17, %v3860_v6  ;;  %v12989_v41 = vunpack.i.h.bf16 %v12988_v20 }
 0x8fe   :  { %vm12991_vm12 = vcmask 1039360   ;;  %v12994_v42 = vunpack.i.l.bf16 %v12993_v44  ;;  %v3233_v38 = vadd.f32 %v3225_v33, %v3169_v1  ;;  %vm12995_vm8 = vcmp.lt.s32.totalorder %v12592_v47, 16  ;;  %v13001_v33 = vld [vmem:[#allocation174_spill] sm:$0xff] }
 0x8ff   :  { %v3696_v51 = vsel %vm12991_vm12, %v12990_v13, %v12989_v41  ;;  %v4100_v10 = vsel %vm12995_vm8, %v4084_v26, 0.0  ;;  %v12998_v4 = vunpack.i.l.bf16 %v12997_v45  ;;  %vm12999_vm3 = vcmask 121856   ;;  %v13004_v26 = vld [vmem:[#allocation201_spill] sm:$0xff]  ;;  %vm13005_vm7 = vmmov %vm12991_vm12  ;;  %v10590_v28 = vpop.permute.xlu0 %4193  ;;  %v13018_v45 = vld [vmem:[#allocation51_spill] sm:$0xff] }
 0x900   :  { %v3329_v56 = vsel %vm147_vm0, %v12994_v42, %v12992_v15  ;;  %v4044_v61 = vmul.f32 %v4036_v2, %v12943_v49  ;;  %v3988_v34 = vadd.f32 %v3980_v62, %v3924_v39  ;;  %v4148_v55 = vsel %vm1987_vm11, %v4138_v37, %v5346_v12  ;;  %v13008_v12 = vld [vmem:[#allocation86_spill] sm:$0xff]  ;;  %v13009_v39 = vld [vmem:[#allocation149_spill] sm:$0xff]  ;;  %v13014_v42 = vld [vmem:[#allocation216_spill] sm:$0xff] }
 0x901   :  { %v3393_v50 = vsel %vm12999_vm3, %v12998_v4, %v12996_v19  ;;  %v3616_v8 = vadd.f32 %v3608_v27, %v3552_v18  ;;  %v3297_v5 = vadd.f32 %v3289_v31, %v3233_v38  ;;  %v4164_v58 = vsel %vm88_vm13, %v4148_v55, 0.0  ;;  %v13006_v31 = vld [vmem:[#allocation233_spill] sm:$0xff]  ;;  %v10588_v27 = vpop.permute.xlu1 %4195 }
 0x902   :  { %v4147_v52 = vsel %vm1987_vm11, %v4136_v23, %v4138_v37  ;;  %v13002_v22 = vunpack.i.l.bf16 %v13001_v33  ;;  %vm13003_vm0 = vcmask 113664   ;;  %v4108_v17 = vmul.f32 %v4100_v10, %v12962_v43  ;;  %v13007_v43 = vld [vmem:[#allocation46_spill] sm:$0xff] }
 0x903   :  { %v4052_v53 = vadd.f32 %v4044_v61, %v3988_v34  ;;  %v4163_v49 = vsel %vm87_vm5, %v4147_v52, 0.0  ;;  %v3695_v6 = vsel %vm13005_vm7, %v13004_v26, %v12990_v13  ;;  %v3712_v18 = vsel %vm112_vm15, %v3696_v51, 0.0  ;;  %v13012_v51 = vld [vmem:[#allocation155_spill] sm:$0xff]  ;;  %v13016_v10 = vld [vmem:[#allocation6_spill] sm:$0xff]  ;;  %v13020_v61 = vld [vmem:[#allocation176_spill] sm:$0xff] }
 0x904   :  { %v3457_v60 = vsel %vm13003_vm0, %v13002_v22, %v13000_v0  ;;  %v3409_v1 = vsel %vm111_vm9, %v3393_v50, 0.0  ;;  %v4171_v2 = vmul.f32 %v4163_v49, %v13006_v31  ;;  %v3353_v62 = vmul.f32 %v3329_v56, %v13007_v43  ;;  %v13019_v50 = vld [vmem:[#allocation250_spill] sm:$0xff]  ;;  %v13025_v0 = vld [vmem:[#allocation47_spill] sm:$0xff]  ;;  %v13027_v22 = vld [vmem:[#allocation49_spill] sm:$0xff] }
 0x905   :  { %v13010_v20 = vunpack.i.l.bf16 %v13009_v39  ;;  %vm13011_vm1 = vcmask 15360   ;;  %v4116_v13 = vadd.f32 %v4108_v17, %v4052_v53  ;;  %v4172_v15 = vmul.f32 %v4164_v58, %v13006_v31  ;;  %v13024_v52 = vld [vmem:[#allocation254_spill] sm:$0xff]  ;;  %v10626_v53 = vpop.permute.xlu0 %5353  ;;  %v13028_v49 = vld [vmem:[#allocation56_spill] sm:$0xff]  ;;  %v13029_v26 = vld [vmem:[#allocation107_spill] sm:$0xff] }
 0x906   :  { %v13013_v44 = vunpack.i.h.bf16 %v13012_v51  ;;  %vm13015_vm12 = vcmask 1031168   ;;  %v3640_v37 = vadd.f32 %v13016_v10, %v3616_v8  ;;  %v3473_v23 = vsel %vm119_vm6, %v3457_v60, 0.0  ;;  %v13026_v8 = vld [vmem:[#allocation212_spill] sm:$0xff]  ;;  %v10624_v60 = vpop.permute.xlu1 %4245  ;;  %v13030_v31 = vld [vmem:[#allocation130_spill] sm:$0xff]  ;;  %v13031_v43 = vld [vmem:[#allocation245_spill] sm:$0xff] }
 0x907   :  { %v3521_v41 = vsel %vm13011_vm1, %v13010_v20, %v13008_v12  ;;  %v10606_v56 = vadd.f32 %v4171_v2, %v10486_v7  ;;  %v3361_v19 = vadd.f32 %v3353_v62, %v3297_v5  ;;  %v3417_v4 = vmul.f32 %v3409_v1, %v13018_v45  ;;  %vm13032_vm3 = vmmov %vm13015_vm12  ;;  %v13033_v12 = vld [vmem:[#allocation109_spill] sm:$0xff]  ;;  %v13035_v20 = vld [vmem:[#allocation55_spill] sm:$0xff] }
 0x908   :  { %v3760_v38 = vsel %vm13015_vm12, %v13014_v42, %v13013_v44  ;;  %v13021_v34 = vunpack.i.l.bf16 %v13020_v61  ;;  %vm13022_vm8 = vcmask 7168   ;;  %v10613_v58 = vadd.f32 %v4172_v15, %v4116_v13  ;;  %v13043_v61 = vld [vmem:[#allocation263_spill] sm:$0xff] }
 0x909   :  { %13017 = vst [vmem:[#allocation215_spill] sm:$0xff] %v10606_v56  ;;  %v3790_v33 = vadd.f32 %v13025_v0, %v13024_v52  ;;  %v10619_v17 = vmul.f32 %v13027_v22, %v13026_v8  ;;  %v3607_v7 = vmul.f32 %v3599_v54, %v12986_v25  ;;  %v3537_v5 = vsel %vm87_vm5, %v3521_v41, 0.0  ;;  %v13036_v41 = vld [vmem:[#allocation244_spill] sm:$0xff]  ;;  %v10659_v0 = vpop.permute.xlu0 %4247  ;;  %v13044_v8 = vld [vmem:[#allocation145_spill] sm:$0xff] }
 0x90a   :  { %v3585_v55 = vsel %vm13022_vm8, %v13021_v34, %v13019_v50  ;;  %13023 = vst [vmem:[#allocation115_spill] sm:$0xff] %v10613_v58  ;;  %v3551_v1 = vadd.f32 %v13029_v26, %v13028_v49  ;;  %v3720_v2 = vmul.f32 %v3712_v18, %v13030_v31  ;;  %v3759_v62 = vsel %vm13032_vm3, %v13031_v43, %v13014_v42  ;;  %v13038_v18 = vld [vmem:[#allocation190_spill] sm:$0xff]  ;;  %v10657_v52 = vpop.permute.xlu1 %5358  ;;  %v13050_v43 = vld [vmem:[#allocation76_spill] sm:$0xff] }
 0x90b   :  { %v3481_v39 = vmul.f32 %v3473_v23, %v13033_v12  ;;  %v3711_v54 = vsel %vm111_vm9, %v3695_v6, 0.0  ;;  %vm13034_vm0 = vcmp.lt.s32.totalorder %v12592_v47, 16  ;;  %vm13037_vm7 = vcmask 932864   ;;  %v13041_v23 = vld [vmem:[#allocation108_spill] sm:$0xff]  ;;  %v13042_v6 = vld [vmem:[#allocation213_spill] sm:$0xff]  ;;  %v13052_v12 = vld [vmem:[#allocation167_spill] sm:$0xff] }
 0x90c   :  { %v3776_v25 = vsel %vm13034_vm0, %v3760_v38, 0.0  ;;  %v3823_v13 = vsel %vm13037_vm7, %v13036_v41, %v13035_v20  ;;  %v3601_v15 = vsel %vm95_vm4, %v3585_v55, 0.0  ;;  %v13039_v51 = vunpack.i.h.bf16 %v13038_v18  ;;  %vm13040_vm1 = vmmov %vm13037_vm7  ;;  %v13056_v18 = vld [vmem:[#allocation74_spill] sm:$0xff] }
 0x90d   :  { %v3728_v42 = vadd.f32 %v3720_v2, %v3640_v37  ;;  %v3425_v10 = vadd.f32 %v3417_v4, %v3361_v19  ;;  %v3545_v45 = vmul.f32 %v3537_v5, %v13041_v23  ;;  %v3854_v50 = vadd.f32 %v13042_v6, %v3790_v33  ;;  %v13045_v4 = vld [vmem:[#allocation118_spill] sm:$0xff]  ;;  %v13047_v33 = vld [vmem:[#allocation131_spill] sm:$0xff]  ;;  %vm13064_vm7 = vmmov %vm13040_vm1 }
 0x90e   :  { %v3824_v44 = vsel %vm13040_vm1, %v13035_v20, %v13039_v51  ;;  %v10653_v38 = vsel %vm88_vm13, %v13043_v61, 0.0  ;;  %v3615_v34 = vadd.f32 %v3607_v7, %v3551_v1  ;;  %v3775_v55 = vsel %vm119_vm6, %v3759_v62, 0.0  ;;  %v13046_v5 = vld [vmem:[#allocation78_spill] sm:$0xff]  ;;  %v13049_v2 = vld [vmem:[#allocation67_spill] sm:$0xff]  ;;  %v10689_v61 = vpop.permute.xlu1 %4253 }
 0x90f   :  { %v3784_v37 = vmul.f32 %v3776_v25, %v13044_v8  ;;  %v3489_v19 = vadd.f32 %v3481_v39, %v3425_v10  ;;  %v3609_v22 = vmul.f32 %v3601_v15, %v13045_v4  ;;  %vm13048_vm12 = vcmask 1039360   ;;  %v13055_v15 = vld [vmem:[#allocation85_spill] sm:$0xff]  ;;  %v10691_v4 = vpop.permute.xlu0 %4251 }
 0x910   :  { %v3697_v49 = vsel %vm13048_vm12, %v13047_v33, %v13046_v5  ;;  %v3719_v26 = vmul.f32 %v3711_v54, %v13030_v31  ;;  %v3839_v7 = vsel %vm87_vm5, %v3823_v13, 0.0  ;;  %v3840_v1 = vsel %vm88_vm13, %v3824_v44, 0.0  ;;  %v13058_v54 = vld [vmem:[#allocation239_spill] sm:$0xff]  ;;  %v13059_v13 = vld [vmem:[#allocation97_spill] sm:$0xff]  ;;  %v13062_v5 = vld [vmem:[#allocation28_spill] sm:$0xff] }
 0x911   :  { %vm13051_vm8 = vcmask 924672   ;;  %v13053_v39 = vunpack.i.h.bf16 %v13052_v12  ;;  %v3792_v20 = vadd.f32 %v3784_v37, %v3728_v42  ;;  %v3553_v41 = vadd.f32 %v3545_v45, %v3489_v19  ;;  %v13060_v44 = vld [vmem:[#allocation15_spill] sm:$0xff]  ;;  %v13061_v42 = vld [vmem:[#allocation153_spill] sm:$0xff] }
 0x912   :  { %v3887_v62 = vsel %vm13051_vm8, %v13050_v43, %v13049_v2  ;;  %vm13054_vm3 = vmmov %vm13051_vm8  ;;  %vm13057_vm0 = vcmask 1031168   ;;  %v10683_v51 = vmul.f32 %v13059_v13, %v13058_v54  ;;  %v3639_v10 = vadd.f32 %v13060_v44, %v3615_v34  ;;  %v13063_v33 = vld [vmem:[#allocation247_spill] sm:$0xff]  ;;  %v13065_v43 = vld [vmem:[#allocation64_spill] sm:$0xff] }
 0x913   :  { %v3888_v25 = vsel %vm13054_vm3, %v13049_v2, %v13053_v39  ;;  %v3761_v31 = vsel %vm13057_vm0, %v13056_v18, %v13055_v15  ;;  %v3783_v23 = vmul.f32 %v3775_v55, %v13044_v8  ;;  %v3713_v6 = vsel %vm111_vm9, %v3697_v49, 0.0  ;;  %v13066_v39 = vld [vmem:[#allocation158_spill] sm:$0xff]  ;;  %vm13069_vm1 = vmmov %vm13054_vm3  ;;  %v13070_v13 = vld [vmem:[#allocation171_spill] sm:$0xff] }
 0x914   :  { %v3848_v45 = vmul.f32 %v3840_v1, %v13061_v42  ;;  %v3903_v37 = vsel %vm95_vm4, %v3887_v62, 0.0  ;;  %v3617_v19 = vadd.f32 %v3609_v22, %v3553_v41  ;;  %v3825_v2 = vsel %vm13064_vm7, %v13063_v33, %v13062_v5  ;;  %v13067_v62 = vld [vmem:[#allocation103_spill] sm:$0xff]  ;;  %v13068_v22 = vld [vmem:[#allocation246_spill] sm:$0xff] }
 0x915   :  { %v3727_v34 = vadd.f32 %v3719_v26, %v3639_v10  ;;  %v3847_v55 = vmul.f32 %v3839_v7, %v13061_v42  ;;  %v3904_v8 = vsel %vm96_vm14, %v3888_v25, 0.0  ;;  %v3777_v49 = vsel %vm119_vm6, %v3761_v31, 0.0  ;;  %v13071_v44 = vld [vmem:[#allocation98_spill] sm:$0xff]  ;;  %v13072_v7 = vld [vmem:[#allocation197_spill] sm:$0xff]  ;;  %v10715_v31 = vpop.permute.xlu1 %4201  ;;  %v13154_v32 = vld [vmem:[#allocation115_spill] sm:$0xff] }
 0x916   :  { %v3918_v12 = vadd.f32 %v13065_v43, %v3854_v50  ;;  %v3856_v1 = vadd.f32 %v3848_v45, %v3792_v20  ;;  %v3721_v15 = vmul.f32 %v3713_v6, %v13066_v39  ;;  %v3889_v41 = vsel %vm13069_vm1, %v13068_v22, %v13067_v62  ;;  %v10717_v50 = vpop.permute.xlu0 %4199  ;;  %v13074_v6 = vld [vmem:[#allocation228_spill] sm:$0xff]  ;;  %v13075_v42 = vld [vmem:[#allocation54_spill] sm:$0xff] }
 0x917   :  { %v3791_v18 = vadd.f32 %v3783_v23, %v3727_v34  ;;  %v3911_v26 = vmul.f32 %v3903_v37, %v13070_v13  ;;  %vm13073_vm12 = vcmask 908288   ;;  %v3841_v25 = vsel %vm87_vm5, %v3825_v2, 0.0  ;;  %v13077_v23 = vld [vmem:[#allocation7_spill] sm:$0xff]  ;;  %v13079_v43 = vld [vmem:[#allocation184_spill] sm:$0xff]  ;;  %v13082_v62 = vld [vmem:[#allocation198_spill] sm:$0xff] }
 0x918   :  { %v4015_v10 = vsel %vm13073_vm12, %v13072_v7, %v13071_v44  ;;  %v3912_v20 = vmul.f32 %v3904_v8, %v13070_v13  ;;  %vm13076_vm8 = vcmask 916480   ;;  %v3641_v5 = vadd.f32 %v13077_v23, %v3617_v19  ;;  %v13078_v37 = vld [vmem:[#allocation151_spill] sm:$0xff]  ;;  %vm13084_vm0 = vmmov %vm13073_vm12 }
 0x919   :  { %v3951_v45 = vsel %vm13076_vm8, %v13075_v42, %v13074_v6  ;;  %v3785_v33 = vmul.f32 %v3777_v49, %v13078_v37  ;;  %v3855_v34 = vadd.f32 %v3847_v55, %v3791_v18  ;;  %v13080_v39 = vunpack.i.h.bf16 %v13079_v43  ;;  %vm13081_vm3 = vmmov %vm13076_vm8  ;;  %v13085_v49 = vld [vmem:[#allocation161_spill] sm:$0xff]  ;;  %v13086_v18 = vld [vmem:[#allocation202_spill] sm:$0xff] }
 0x91a   :  { %v13083_v22 = vunpack.i.h.bf16 %v13082_v62  ;;  %v3905_v8 = vsel %vm95_vm4, %v3889_v41, 0.0  ;;  %v3920_v13 = vadd.f32 %v3912_v20, %v3856_v1  ;;  %v4031_v19 = vsel %vm111_vm9, %v4015_v10, 0.0  ;;  %v13087_v43 = vld [vmem:[#allocation183_spill] sm:$0xff]  ;;  %v13089_v62 = vld [vmem:[#allocation96_spill] sm:$0xff]  ;;  %vm13090_vm7 = vmmov %vm13081_vm3 }
 0x91b   :  { %v3952_v2 = vsel %vm13081_vm3, %v13074_v6, %v13080_v39  ;;  %v3729_v42 = vadd.f32 %v3721_v15, %v3641_v5  ;;  %v3849_v55 = vmul.f32 %v3841_v25, %v13085_v49  ;;  %v3982_v23 = vadd.f32 %v13086_v18, %v3918_v12  ;;  %v13088_v39 = vld [vmem:[#allocation35_spill] sm:$0xff]  ;;  %v13091_v41 = vld [vmem:[#allocation42_spill] sm:$0xff]  ;;  %v13092_v10 = vld [vmem:[#allocation249_spill] sm:$0xff] }
 0x91c   :  { %v4016_v7 = vsel %vm13084_vm0, %v13071_v44, %v13083_v22  ;;  %v3919_v37 = vadd.f32 %v3911_v26, %v3855_v34  ;;  %v3975_v6 = vmul.f32 %v3951_v45, %v13087_v43  ;;  %v3953_v56 = vsel %vm13090_vm7, %v13089_v62, %v13088_v39  ;;  %v10743_v44 = vpop.permute.xlu1 %4311  ;;  %v10745_v22 = vpop.permute.xlu0 %4309  ;;  %v13094_v20 = vld [vmem:[#allocation194_spill] sm:$0xff]  ;;  %v13095_v26 = vld [vmem:[#allocation188_spill] sm:$0xff]  ;;  %v13097_v34 = vld [vmem:[#allocation71_spill] sm:$0xff] }
 0x91d   :  { %v3976_v1 = vmul.f32 %v3952_v2, %v13087_v43  ;;  %vm13093_vm1 = vcmask 900096   ;;  %v3793_v25 = vadd.f32 %v3785_v33, %v3729_v42  ;;  %v3913_v12 = vmul.f32 %v3905_v8, %v13094_v20  ;;  %v13096_v5 = vld [vmem:[#allocation104_spill] sm:$0xff]  ;;  %v13100_v62 = vld [vmem:[#allocation195_spill] sm:$0xff]  ;;  %vm13103_vm8 = vmmov %vm13084_vm0 }
 0x91e   :  { %v4079_v15 = vsel %vm13093_vm1, %v13092_v10, %v13091_v41  ;;  %v4045_v45 = vadd.f32 %v13096_v5, %v13095_v26  ;;  %v13098_v49 = vunpack.i.h.bf16 %v13097_v34  ;;  %vm13099_vm12 = vmmov %vm13093_vm1  ;;  %v4032_v39 = vsel %vm112_vm15, %v4016_v7, 0.0  ;;  %v13102_v10 = vld [vmem:[#allocation112_spill] sm:$0xff]  ;;  %v13104_v8 = vld [vmem:[#allocation210_spill] sm:$0xff] }
 0x91f   :  { %v4039_v2 = vmul.f32 %v4031_v19, %v13100_v62  ;;  %v3984_v43 = vadd.f32 %v3976_v1, %v3920_v13  ;;  %v3857_v58 = vadd.f32 %v3849_v55, %v3793_v25  ;;  %v4017_v33 = vsel %vm13103_vm8, %v13102_v10, %v13101_v35  ;;  %v13106_v55 = vld [vmem:[#allocation57_spill] sm:$0xff]  ;;  %v13107_v35 = vld [vmem:[#allocation262_spill] sm:$0xff]  ;;  %v13110_v25 = vld [vmem:[#allocation175_spill] sm:$0xff] }
 0x920   :  { %v4080_v18 = vsel %vm13099_vm12, %v13091_v41, %v13098_v49  ;;  %v3977_v42 = vmul.f32 %v3953_v56, %v13104_v8  ;;  %v4046_v20 = vadd.f32 %v10619_v17, %v3982_v23  ;;  %v4166_v26 = vmul.f32 %v10653_v38, %v13058_v54  ;;  %v10770_v7 = vpop.permute.xlu1 %4315  ;;  %v10772_v19 = vpop.permute.xlu0 %5363  ;;  %v13108_v1 = vld [vmem:[#allocation258_spill] sm:$0xff]  ;;  %vm13112_vm0 = vmmov %vm13093_vm1 }
 0x921   :  { %v3983_v5 = vadd.f32 %v3975_v6, %v3919_v37  ;;  %v4095_v41 = vsel %vm119_vm6, %v4079_v15, 0.0  ;;  %vm13105_vm3 = vcmp.lt.s32.totalorder %v12592_v47, 16  ;;  %v4143_v56 = vsel %vm1987_vm11, %v13107_v35, %v13106_v55 }
 0x922   :  { %v4096_v13 = vsel %vm13105_vm3, %v4080_v18, 0.0  ;;  %v4040_v17 = vmul.f32 %v4032_v39, %v13100_v62  ;;  %v3921_v23 = vadd.f32 %v3913_v12, %v3857_v58  ;;  %v13109_v38 = vunpack.i.h.bf16 %v13108_v1  ;;  %v13111_v18 = vld [vmem:[#allocation58_spill] sm:$0xff]  ;;  %v13113_v58 = vld [vmem:[#allocation177_spill] sm:$0xff]  ;;  %v13114_v62 = vld [vmem:[#allocation207_spill] sm:$0xff] }
 0x923   :  { %v4047_v37 = vadd.f32 %v4039_v2, %v3983_v5  ;;  %v4033_v6 = vsel %vm111_vm9, %v4017_v33, 0.0  ;;  %v5350_v15 = vunpack.i.l.bf16 %v10512_v16  ;;  %v4109_v34 = vadd.f32 %v13110_v25, %v4045_v45  ;;  %v13116_v1 = vld [vmem:[#allocation221_spill] sm:$0xff] }
 0x924   :  { %v4144_v54 = vsel %vm1987_vm11, %v13106_v55, %v13109_v38  ;;  %v4048_v49 = vadd.f32 %v4040_v17, %v3984_v43  ;;  %v4081_v10 = vsel %vm13112_vm0, %v13111_v18, %v12948_v30  ;;  %v3985_v39 = vadd.f32 %v3977_v42, %v3921_v23  ;;  %v10796_v33 = vpop.permute.xlu1 %4257  ;;  %v4318_v5 = vpop.permute.xlu0 %4317 }
 0x925   :  { %v4110_v12 = vadd.f32 %v13113_v58, %v4046_v20  ;;  %v4103_v8 = vmul.f32 %v4095_v41, %v13114_v62  ;;  %v4104_v55 = vmul.f32 %v4096_v13, %v13114_v62  ;;  %v4159_v2 = vsel %vm87_vm5, %v4143_v56, 0.0  ;;  %v13115_v13 = vld [vmem:[#allocation84_spill] sm:$0xff] }
 0x926   :  { %v4160_v45 = vsel %vm88_vm13, %v4144_v54, 0.0  ;;  %v4041_v43 = vmul.f32 %v4033_v6, %v12958_v40  ;;  %v5351_v30 = vunpack.i.h.bf16 %v10512_v16  ;;  %v4205_v42 = vsel %vm2068_vm10, %v10480_v11, %v10514_v29 }
 0x927   :  { %v4111_v20 = vadd.f32 %v4103_v8, %v4047_v37  ;;  %v4097_v41 = vsel %vm119_vm6, %v4081_v10, 0.0  ;;  %v4145_v35 = vsel %vm1987_vm11, %v13115_v13, %v12976_v57  ;;  %v4206_v63 = vsel %vm2068_vm10, %v10514_v29, %v5350_v15 }
 0x928   :  { %v4112_v56 = vadd.f32 %v4104_v55, %v4048_v49  ;;  %v4049_v17 = vadd.f32 %v4041_v43, %v3985_v39  ;;  %v4208_v40 = vsel %vm2068_vm10, %v10538_v48, %v5351_v30  ;;  %v4207_v11 = vsel %vm2068_vm10, %v10540_v9, %v10538_v48  ;;  %v10821_v54 = vpop.permute.xlu1 %5368  ;;  %v10823_v29 = vpop.permute.xlu0 %4259  ;;  %v13117_v49 = vld [vmem:[#allocation257_spill] sm:$0xff]  ;;  %v13118_v55 = vld [vmem:[#allocation236_spill] sm:$0xff] }
 0x929   :  { %v4173_v16 = vadd.f32 %v10683_v51, %v4109_v34  ;;  %v4174_v23 = vadd.f32 %v4166_v26, %v4110_v12  ;;  %v4167_v38 = vmul.f32 %v4159_v2, %v13116_v1  ;;  %v4221_v57 = vsel %vm95_vm4, %v4205_v42, 0.0 }
 0x92a   :  { %v4168_v37 = vmul.f32 %v4160_v45, %v13116_v1  ;;  %v4105_v6 = vmul.f32 %v4097_v41, %v12972_v46  ;;  %v4161_v15 = vsel %vm87_vm5, %v4145_v35, 0.0  ;;  %v4222_v48 = vsel %vm96_vm14, %v4206_v63, 0.0 }
 0x92b   :  { %v4224_v9 = vsel %vm96_vm14, %v4208_v40, 0.0  ;;  %v4223_v51 = vsel %vm95_vm4, %v4207_v11, 0.0  ;;  %v5360_v26 = vunpack.i.l.bf16 %v10657_v52  ;;  %v5365_v25 = vunpack.i.l.bf16 %v10772_v19 }
 0x92c   :  { %v4113_v34 = vadd.f32 %v4105_v6, %v4049_v17  ;;  %v4229_v18 = vmul.f32 %v4221_v57, %v13117_v49  ;;  %v4176_v46 = vadd.f32 %v4168_v37, %v4112_v56  ;;  %v4175_v10 = vadd.f32 %v4167_v38, %v4111_v20  ;;  %v10844_v62 = vpop.permute.xlu1 %4323  ;;  %v10846_v8 = vpop.permute.xlu0 %4321  ;;  %v13126_v56 = vld [vmem:[#allocation70_spill] sm:$0xff]  ;;  %v13130_v6 = vld [vmem:[#allocation101_spill] sm:$0xff] }
 0x92d   :  { %v4169_v59 = vmul.f32 %v4161_v15, %v12977_v3  ;;  %v4230_v39 = vmul.f32 %v4222_v48, %v13117_v49  ;;  %v4209_v58 = vsel %vm2068_vm10, %v10590_v28, %v10588_v27  ;;  %v5355_v12 = vunpack.i.l.bf16 %v10626_v53 }
 0x92e   :  { %v4232_v2 = vmul.f32 %v4224_v9, %v13118_v55  ;;  %v4231_v45 = vmul.f32 %v4223_v51, %v13118_v55  ;;  %v5361_v43 = vunpack.i.h.bf16 %v10657_v52  ;;  %vm13119_vm5 = vcmask 777216  }
 0x92f   :  { %v4333_v3 = vsel %vm13119_vm5, %v10745_v22, %v10743_v44  ;;  %vm13120_vm13 = vcmask 785408   ;;  %v5366_v42 = vunpack.i.h.bf16 %v10772_v19  ;;  %vm13122_vm7 = vmmov %vm13119_vm5  ;;  %v4237_v41 = vadd.f32 %v4229_v18, %v4173_v16 }
 0x930   :  { %v4269_v28 = vsel %vm13120_vm13, %v10624_v60, %v10659_v0  ;;  %vm13121_vm11 = vmmov %vm13120_vm13  ;;  %v4334_v20 = vsel %vm13122_vm7, %v10743_v44, %v5365_v25  ;;  %v10862_v13 = vadd.f32 %v4169_v59, %v4113_v34  ;;  %v4225_v52 = vsel %vm95_vm4, %v4209_v58, 0.0  ;;  %v4374_v35 = vpop.permute.xlu1 %4373  ;;  %v10875_v63 = vpop.permute.xlu0 %5373  ;;  %v13132_v59 = vld [vmem:[#allocation95_spill] sm:$0xff] }
 0x931   :  { %v4270_v30 = vsel %vm13121_vm11, %v10659_v0, %v5360_v26  ;;  %vm13123_vm1 = vmmov %vm13121_vm11  ;;  %v4210_v60 = vsel %vm2068_vm10, %v10588_v27, %v5355_v12  ;;  %v4349_v0 = vsel %vm111_vm9, %v4333_v3, 0.0  ;;  %v4293_v17 = vmul.f32 %v4269_v28, %v13126_v56 }
 0x932   :  { %v4272_v22 = vsel %vm13123_vm1, %v10689_v61, %v5361_v43  ;;  %vm13124_vm12 = vmmov %vm13119_vm5  ;;  %v4294_v40 = vmul.f32 %v4270_v30, %v13126_v56  ;;  %v4350_v27 = vsel %vm112_vm15, %v4334_v20, 0.0  ;;  %v4238_v16 = vadd.f32 %v4230_v39, %v4174_v23 }
 0x933   :  { %v4335_v19 = vsel %vm13124_vm12, %v10770_v7, %v4318_v5  ;;  %vm13125_vm8 = vmmov %vm13119_vm5  ;;  %v4240_v1 = vadd.f32 %v4232_v2, %v4176_v46  ;;  %v4239_v38 = vadd.f32 %v4231_v45, %v4175_v10  ;;  %v13128_v7 = vld [vmem:[#allocation256_spill] sm:$0xff]  ;;  %v4357_v15 = vmul.f32 %v4349_v0, %v13130_v6  ;;  %v13134_v45 = vld [vmem:[#allocation87_spill] sm:$0xff] }
 0x934   :  { %v4336_v44 = vsel %vm13125_vm8, %v4318_v5, %v5366_v42  ;;  %vm13127_vm3 = vmmov %vm13123_vm1  ;;  %v4296_v57 = vmul.f32 %v4272_v22, %v13128_v7  ;;  %v13129_v5 = vld [vmem:[#allocation65_spill] sm:$0xff]  ;;  %v4351_v48 = vsel %vm111_vm9, %v4335_v19, 0.0  ;;  %v4358_v51 = vmul.f32 %v4350_v27, %v13130_v6  ;;  %v5379_v26 = vpop.permute.xlu1 %5378  ;;  %v4376_v25 = vpop.permute.xlu0 %4375  ;;  %v13140_v27 = vld [vmem:[#allocation62_spill] sm:$0xff] }
 0x935   :  { %v4271_v11 = vsel %vm13127_vm3, %v10691_v4, %v10689_v61  ;;  %v4233_v37 = vmul.f32 %v4225_v52, %v13129_v5  ;;  %v4352_v9 = vsel %vm112_vm15, %v4336_v44, 0.0  ;;  %v5356_v61 = vunpack.i.h.bf16 %v10626_v53  ;;  %vm13141_vm12 = vmmov %vm13127_vm3 }
 0x936   :  { %v4226_v4 = vsel %vm96_vm14, %v4210_v60, 0.0  ;;  %v4295_v23 = vmul.f32 %v4271_v11, %v13128_v7  ;;  %v4301_v34 = vadd.f32 %v4293_v17, %v4237_v41  ;;  %v4302_v49 = vadd.f32 %v4294_v40, %v4238_v16  ;;  %v13139_v40 = vld [vmem:[#allocation129_spill] sm:$0xff] }
 0x937   :  { %v5380_v18 = vunpack.i.l.bf16 %v5379_v26  ;;  %vm13131_vm0 = vcmask 769024   ;;  %v4304_v10 = vadd.f32 %v4296_v57, %v4240_v1  ;;  %v4359_v39 = vmul.f32 %v4351_v48, %v13132_v59 }
 0x938   :  { %v4397_v46 = vsel %vm13131_vm0, %v4374_v35, %v4376_v25  ;;  %v4360_v58 = vmul.f32 %v4352_v9, %v13132_v59  ;;  %v4365_v12 = vadd.f32 %v4357_v15, %v4301_v34  ;;  %v5381_v55 = vunpack.i.h.bf16 %v5379_v26  ;;  %vm13133_vm5 = vmmov %vm13131_vm0  ;;  %v4382_v20 = vpop.permute.xlu1 %4381  ;;  %v4380_v41 = vpop.permute.xlu0 %4379  ;;  %v13142_v26 = vld [vmem:[#allocation136_spill] sm:$0xff] }
 0x939   :  { %v4413_v53 = vsel %vm119_vm6, %v4397_v46, 0.0  ;;  %v4398_v2 = vsel %vm13133_vm5, %v4376_v25, %v5380_v18  ;;  %v4303_v3 = vadd.f32 %v4295_v23, %v4239_v38  ;;  %v4212_v28 = vsel %vm2068_vm10, %v10715_v31, %v5356_v61  ;;  %vm13136_vm11 = vmmov %vm13131_vm0 }
 0x93a   :  { %v4421_v43 = vmul.f32 %v4413_v53, %v13134_v45  ;;  %v4366_v30 = vadd.f32 %v4358_v51, %v4302_v49  ;;  %vm13135_vm13 = vcmp.lt.s32.totalorder %v12592_v47, 16  ;;  %v4400_v60 = vsel %vm13136_vm11, %v4382_v20, %v5381_v55  ;;  %vm13137_vm7 = vmmov %vm13131_vm0  ;;  %v13145_v53 = vld [vmem:[#allocation251_spill] sm:$0xff] }
 0x93b   :  { %v4414_v42 = vsel %vm13135_vm13, %v4398_v2, 0.0  ;;  %v4399_v0 = vsel %vm13137_vm7, %v4380_v41, %v4382_v20  ;;  %v4367_v19 = vadd.f32 %v4359_v39, %v4303_v3  ;;  %v4368_v44 = vadd.f32 %v4360_v58, %v4304_v10  ;;  %vm13138_vm1 = vmmov %vm13135_vm13  ;;  %v13148_v2 = vld [vmem:[#allocation22_spill] sm:$0xff] }
 0x93c   :  { %v4422_v52 = vmul.f32 %v4414_v42, %v13134_v45  ;;  %v4429_v22 = vadd.f32 %v4421_v43, %v4365_v12  ;;  %v4416_v35 = vsel %vm13138_vm1, %v4400_v60, 0.0  ;;  %v4415_v56 = vsel %vm119_vm6, %v4399_v0, 0.0  ;;  %v4266_v15 = vpop.permute.xlu1 %4265  ;;  %v4264_v48 = vpop.permute.xlu0 %4263  ;;  %vm13149_vm0 = vmmov %vm13127_vm3  ;;  %v13151_v60 = vld [vmem:[#allocation69_spill] sm:$0xff] }
 0x93d   :  { %v4424_v16 = vmul.f32 %v4416_v35, %v13140_v27  ;;  %v4423_v1 = vmul.f32 %v4415_v56, %v13140_v27  ;;  %v4211_v38 = vsel %vm2068_vm10, %v10717_v50, %v10715_v31  ;;  %v4273_v7 = vsel %vm13141_vm12, %v10796_v33, %v10823_v29  ;;  %vm13147_vm10 = vmmov %vm13125_vm8 }
 0x93e   :  { %v4430_v17 = vadd.f32 %v4422_v52, %v4366_v30  ;;  %v10915_v11 = vadd.f32 %v4429_v22, %v13139_v40  ;;  %v4337_v57 = vsel %vm13125_vm8, %v10846_v8, %v10844_v62  ;;  %v5375_v6 = vunpack.i.l.bf16 %v10875_v63  ;;  %v13150_v52 = vld [vmem:[#allocation94_spill] sm:$0xff]  ;;  %vm13152_vm13 = vmmov %vm13125_vm8 }
 0x93f   :  { %v4432_v23 = vadd.f32 %v4424_v16, %v4368_v44  ;;  %v4431_v51 = vadd.f32 %v4423_v1, %v4367_v19  ;;  %v4241_v31 = vadd.f32 %v4233_v37, %v10862_v13  ;;  %v4228_v50 = vsel %vm96_vm14, %v4212_v28, 0.0  ;;  %v13143_v13 = vld [vmem:[#allocation39_spill] sm:$0xff]  ;;  %vm13144_vm14 = vmmov %vm13125_vm8 }
 0x940   :  { %v10930_v9 = vadd.f32 %v4430_v17, %v13139_v40  ;;  %v4763_v61 = vmul.f32 -1.442695, %v10915_v11  ;;  %v5370_v33 = vunpack.i.l.bf16 %v10821_v54  ;;  %v4234_v49 = vmul.f32 %v4226_v4, %v13129_v5  ;;  %v4330_v46 = vpop.permute.xlu1 %4329  ;;  %v4328_v10 = vpop.permute.xlu0 %4327  ;;  %v13153_v17 = vld [vmem:[#allocation121_spill] sm:$0xff]  ;;  %v13155_v16 = vld [vmem:[#allocation215_spill] sm:$0xff]  ;;  %vm13158_vm11 = vmmov %vm13138_vm1 }
 0x941   :  { %v10939_v25 = vadd.f32 %v4432_v23, %v13142_v26  ;;  %v10942_v34 = vadd.f32 %v4431_v51, %v13142_v26  ;;  %v4227_v18 = vsel %vm95_vm4, %v4211_v38, 0.0  ;;  %v4297_v37 = vmul.f32 %v4273_v7, %v13143_v13  ;;  %vm13146_vm4 = vmmov %vm13127_vm3  ;;  %v13156_v38 = vld [vmem:[#allocation93_spill] sm:$0xff] }
 0x942   :  { %5498 = vpow2.f32 %v4763_v61  ;;  %v4764_v8 = vmul.f32 -1.442695, %v10930_v9  ;;  %v4353_v21 = vsel %vm111_vm9, %v4337_v57, 0.0  ;;  %v4338_v59 = vsel %vm13144_vm14, %v10844_v62, %v5375_v6  ;;  %vm13161_vm7 = vmmov %vm13133_vm5 }
 0x943   :  { %v4766_v39 = vmul.f32 -1.442695, %v10939_v25  ;;  %v4765_v58 = vmul.f32 -1.442695, %v10942_v34  ;;  %v4236_v5 = vmul.f32 %v4228_v50, %v13145_v53  ;;  %v5371_v36 = vunpack.i.h.bf16 %v10821_v54 }
 0x944   :  { %5500 = vpow2.f32 %v4764_v8  ;;  %v4274_v4 = vsel %vm13146_vm4, %v10823_v29, %v5370_v33  ;;  %v4339_v12 = vsel %vm13147_vm10, %v4328_v10, %v4330_v46  ;;  %v4235_v55 = vmul.f32 %v4227_v18, %v13145_v53  ;;  %v4388_v28 = vpop.permute.xlu1 %4387  ;;  %v4386_v30 = vpop.permute.xlu0 %4385 }
 0x945   :  { %v4361_v45 = vmul.f32 %v4353_v21, %v13148_v2  ;;  %5502 = vpow2.f32 %v4766_v39  ;;  %v4275_v62 = vsel %vm13127_vm3, %v4264_v48, %v4266_v15  ;;  %v5376_v43 = vunpack.i.h.bf16 %v10875_v63 }
 0x946   :  { %v4354_v3 = vsel %vm112_vm15, %v4338_v59, 0.0  ;;  %5504 = vpow2.f32 %v4765_v58  ;;  %v4276_v54 = vsel %vm13149_vm0, %v4266_v15, %v5371_v36  ;;  %v4298_v29 = vmul.f32 %v4274_v4, %v13143_v13 }
 0x947   :  { %v4305_v42 = vadd.f32 %v4297_v37, %v4241_v31  ;;  %v4355_v20 = vsel %vm111_vm9, %v4339_v12, 0.0  ;;  %v4401_v41 = vsel %vm13133_vm5, %v4386_v30, %v4388_v28  ;;  %v4242_v22 = vadd.f32 %v4234_v49, %v13150_v52  ;;  %vm13157_vm9 = vmmov %vm13133_vm5  ;;  %v13159_v49 = vld [vmem:[#allocation120_spill] sm:$0xff] }
 0x948   :  { %v4299_v63 = vmul.f32 %v4275_v62, %v13151_v60  ;;  %v4340_v0 = vsel %vm13152_vm13, %v4330_v46, %v5376_v43  ;;  %v4417_v19 = vsel %vm119_vm6, %v4401_v41, 0.0  ;;  %v4362_v35 = vmul.f32 %v4354_v3, %v13148_v2  ;;  %v4392_v57 = vpop.permute.xlu1 %4391  ;;  %v4390_v6 = vpop.permute.xlu0 %4389  ;;  %v13162_v43 = vld [vmem:[#allocation114_spill] sm:$0xff] }
 0x949   :  { %v4369_v44 = vadd.f32 %v4361_v45, %v4305_v42  ;;  %v4300_v56 = vmul.f32 %v4276_v54, %v13151_v60  ;;  %v4425_v40 = vmul.f32 %v4417_v19, %v13153_v17  ;;  %v4244_v27 = vadd.f32 %v4236_v5, %v13154_v32 }
 0x94a   :  { %v4243_v1 = vadd.f32 %v4235_v55, %v13155_v16  ;;  %v4363_v7 = vmul.f32 %v4355_v20, %v13156_v38  ;;  %v4306_v48 = vadd.f32 %v4298_v29, %v4242_v22  ;;  %v4356_v61 = vsel %vm112_vm15, %v4340_v0, 0.0  ;;  %vm13160_vm15 = vmmov %vm13133_vm5 }
 0x94b   :  { %v4433_v23 = vadd.f32 %v4425_v40, %v4369_v44  ;;  %v4402_v51 = vsel %vm13157_vm9, %v4388_v28, %v4390_v6  ;;  %v4308_v26 = vadd.f32 %v4300_v56, %v4244_v27  ;;  %v4364_v14 = vmul.f32 %v4356_v61, %v13156_v38 }
 0x94c   :  { %v5499_v15 = vpop.eup %5498  ;;  %v4307_v50 = vadd.f32 %v4299_v63, %v4243_v1  ;;  %v4418_v33 = vsel %vm13158_vm11, %v4402_v51, 0.0  ;;  %v4370_v13 = vadd.f32 %v4362_v35, %v4306_v48  ;;  %v4396_v10 = vpop.permute.xlu1 %4395 }
 0x94d   :  { %v4469_v31 = vadd.f32 1.0, %v5499_v15  ;;  %v10987_v18 = vadd.f32 %v4433_v23, %v13159_v49  ;;  %v4426_v37 = vmul.f32 %v4418_v33, %v13153_v17  ;;  %v4394_v59 = vpop.permute.xlu0 %4393  ;;  %v4372_v54 = vadd.f32 %v4364_v14, %v4308_v26 }
 0x94e   :  { %v5501_v8 = vpop.eup %5500  ;;  %v4371_v46 = vadd.f32 %v4363_v7, %v4307_v50  ;;  %v4403_v5 = vsel %vm13160_vm15, %v4392_v57, %v4394_v59  ;;  %v4404_v36 = vsel %vm13161_vm7, %v4394_v59, %v4396_v10 }
 0x94f   :  { %v4470_v21 = vadd.f32 1.0, %v5501_v8  ;;  %5506 = vrcp.f32 %v4469_v31  ;;  %v5503_v39 = vpop.eup %5502  ;;  %v4767_v58 = vmul.f32 -1.442695, %v10987_v18  ;;  %v4434_v53 = vadd.f32 %v4426_v37, %v4370_v13 }
 0x950   :  { %v5505_v4 = vpop.eup %5504  ;;  %v4472_v12 = vadd.f32 1.0, %v5503_v39  ;;  %v4419_v55 = vsel %vm119_vm6, %v4403_v5, 0.0  ;;  %v4420_v2 = vsel %vm13138_vm1, %v4404_v36, 0.0  ;;  %vm13164_vm6 = vcmask 64512  }
 0x951   :  { %5508 = vrcp.f32 %v4470_v21  ;;  %v4471_v45 = vadd.f32 1.0, %v5505_v4  ;;  %v4442_v62 = vadd.f32 %v4434_v53, %v13159_v49  ;;  %v4427_v3 = vmul.f32 %v4419_v55, %v13162_v43  ;;  %v5558_v49 = vld [vmem:[%s11150_s5 + $0x8] sm:$0xff]  ;;  %v5559_v21 = vld [vmem:[%s11150_s5] sm:$0xff]  ;;  %vm13165_vm12 = vmmov %vm13164_vm6 }
 0x952   :  { %5510 = vpow2.f32 %v4767_v58  ;;  %v4428_v28 = vmul.f32 %v4420_v2, %v13162_v43  ;;  %vm13166_vm8 = vmmov %vm13164_vm6  ;;  %v5561_v4 = vld [vmem:[%s11150_s5 + $0x18] sm:$0xff] }
 0x953   :  { %5512 = vrcp.f32 %v4472_v12  ;;  %v4768_v30 = vmul.f32 -1.442695, %v4442_v62  ;;  %v4435_v29 = vadd.f32 %v4427_v3, %v4371_v46  ;;  %v5560_v46 = vld [vmem:[%s11150_s5 + $0x10] sm:$0xff]  ;;  %vm13167_vm14 = vmmov %vm13164_vm6 }
 0x954   :  { %5514 = vrcp.f32 %v4471_v45  ;;  %v4436_v42 = vadd.f32 %v4428_v28, %v4372_v54  ;;  %vm13170_vm4 = vmmov %vm13164_vm6 }
 0x955   :  { %5516 = vpow2.f32 %v4768_v30  ;;  %v4443_v20 = vadd.f32 %v4435_v29, %v13163_v24  ;;  %v5562_v29 = vld [vmem:[%s11151_s6] sm:$0x1]  ;;  %vm13171_vm10 = vmmov %vm13170_vm4 }
 0x956   :  { %v4444_v47 = vadd.f32 %v4436_v42, %v13163_v24  ;;  %vm13172_vm3 = vmmov %vm13170_vm4 }
 0x957   :  { %v4769_v41 = vmul.f32 -1.442695, %v4443_v20  ;;  %vm13173_vm0 = vmmov %vm13172_vm3 }
 0x958   :  { %v4770_v22 = vmul.f32 -1.442695, %v4444_v47 }
 0x959   :  { %v5507_v52 = vpop.eup %5506  ;;  %5518 = vpow2.f32 %v4769_v41 }
 0x95a   :  { %5520 = vpow2.f32 %v4770_v22  ;;  %v11004_v0 = vmul.f32 %v5507_v52, %v10915_v11  ;;  %v13168_v22 = vld [vmem:[#allocation126_spill] sm:$0xff] }
 0x95b   :  { %v5509_v60 = vpop.eup %5508 }
 0x95c   :  { %v5511_v63 = vpop.eup %5510  ;;  %v11007_v19 = vmul.f32 %v5509_v60, %v10930_v9  ;;  %v13169_v60 = vsub.s32 0, %v13168_v22  ;;  %v13175_v22 = vld [vmem:[#allocation122_spill] sm:$0xff] }
 0x95d   :  { %v5513_v44 = vpop.eup %5512  ;;  %v4473_v35 = vadd.f32 1.0, %v5511_v63 }
 0x95e   :  { %v5515_v56 = vpop.eup %5514  ;;  %v4501_v17 = vadd.f32 %v11007_v19, %v11004_v0  ;;  %v11012_v40 = vmul.f32 %v5513_v44, %v10939_v25  ;;  %v5563_v44 = vld [vmem:[%s11152_s7 + $0x8] sm:$0xff] }
 0x95f   :  { %v11015_v32 = vmul.f32 %v5515_v56, %v10942_v34  ;;  %v5517_v27 = vpop.eup %5516  ;;  %5522 = vrcp.f32 %v4473_v35  ;;  %v5564_v56 = vld [vmem:[%s11152_s7] sm:$0xff] }
 0x960   :  { %4502 = vadd.xlane.f32.xlu0 %v4501_v17  ;;  %v4474_v11 = vadd.f32 1.0, %v5517_v27 }
 0x961   :  { %v4504_v9 = vadd.f32 %v11012_v40, %v11015_v32 }
 0x962   :  { %5524 = vrcp.f32 %v4474_v11 }
 0x963   :  { %4505 = vadd.xlane.f32.xlu1 %v4504_v9  ;;  %v5519_v16 = vpop.eup %5518  ;;  %v5565_v9 = vld [vmem:[%s11152_s7 + $0x18] sm:$0xff] }
 0x964   :  { %v5521_v1 = vpop.eup %5520  ;;  %v4475_v38 = vadd.f32 1.0, %v5519_v16 }
 0x965   :  { %v4476_v7 = vadd.f32 1.0, %v5521_v1  ;;  %v5566_v1 = vld [vmem:[%s11152_s7 + $0x10] sm:$0xff] }
 0x966   :  { %5526 = vrcp.f32 %v4475_v38 }
 0x967   :  { %5528 = vrcp.f32 %v4476_v7 }
 0x969   :  { %v5523_v25 = vpop.eup %5522 }
 0x96a   :  { %v11020_v34 = vmul.f32 %v5523_v25, %v10987_v18 }
 0x96c   :  { %v5525_v57 = vpop.eup %5524 }
 0x96d   :  { %v11022_v6 = vmul.f32 %v5525_v57, %v4442_v62 }
 0x96f   :  { %v4507_v15 = vadd.f32 %v11022_v6, %v11020_v34 }
 0x970   :  { %v5527_v48 = vpop.eup %5526 }
 0x971   :  { %v5529_v61 = vpop.eup %5528  ;;  %4508 = vadd.xlane.f32.xlu0 %v4507_v15  ;;  %v11026_v23 = vmul.f32 %v5527_v48, %v4443_v20  ;;  %v5567_v48 = vld [vmem:[%s11153_s8 + $0x8] sm:$0xff] }
 0x972   :  { %v11028_v51 = vmul.f32 %v5529_v61, %v4444_v47 }
 0x974   :  { %v4510_v31 = vadd.f32 %v11028_v51, %v11026_v23 }
 0x976   :  { %4511 = vadd.xlane.f32.xlu0 %v4510_v31  ;;  %v5568_v31 = vld [vmem:[%s11153_s8] sm:$0xff] }
 0x9ed   :  { %v4503_v33 = vpop.xlane.xlu0 %4502 }
 0x9ee   :  { %v4513_v26 = vmul.f32 0.00390625, %v4503_v33 }
 0x9f0   :  { %v4506_v50 = vpop.xlane.xlu1 %4505  ;;  %v4517_v14 = vmul.f32 %v5559_v21, %v4513_v26 }
 0x9f1   :  { %v4514_v8 = vmul.f32 0.00390625, %v4506_v50 }
 0x9f2   :  { %v4521_v58 = vsel %vm13165_vm12, %v4517_v14, 0.0 }
 0x9f3   :  { %v4518_v18 = vmul.f32 %v5558_v49, %v4514_v8 }
 0x9f5   :  { %v4522_v59 = vsel %vm13164_vm6, %v4518_v18, 0.0  ;;  %v5569_v18 = vld [vmem:[%s11153_s8 + $0x18] sm:$0xff] }
 0x9f6   :  { %v4523_v36 = vadd.f32 %v4522_v59, %v4521_v58 }
 0x9fe   :  { %v4509_v13 = vpop.xlane.xlu0 %4508 }
 0x9ff   :  { %v4515_v37 = vmul.f32 0.00390625, %v4509_v13 }
 0xa01   :  { %v4519_v10 = vmul.f32 %v5560_v46, %v4515_v37  ;;  %v5570_v37 = vld [vmem:[%s11153_s8 + $0x10] sm:$0xff] }
 0xa03   :  { %v4512_v39 = vpop.xlane.xlu0 %4511  ;;  %v4524_v53 = vsel %vm13166_vm8, %v4519_v10, 0.0 }
 0xa04   :  { %v4516_v5 = vmul.f32 0.00390625, %v4512_v39  ;;  %v4525_v55 = vadd.f32 %v4524_v53, %v4523_v36 }
 0xa06   :  { %v4520_v12 = vmul.f32 %v5561_v4, %v4516_v5 }
 0xa08   :  { %v4526_v2 = vsel %vm13167_vm14, %v4520_v12, 0.0 }
 0xa09   :  { %v4527_v45 = vadd.f32 %v4526_v2, %v4525_v55  ;;  %v78_v2 = vld [vmem:[%s11155_s10] sm:$0xff] }
 0xa0b   :  { %v4528_v62 = vrot.slane %v4527_v45, 4 }
 0xa0d   :  { %v4529_v43 = vadd.f32 %v4528_v62, %v4527_v45 }
 0xa0f   :  { %v4530_v3 = vrot.slane %v4529_v43, 2 }
 0xa11   :  { %v4531_v54 = vadd.f32 %v4530_v3, %v4529_v43  ;;  %v79_v43 = vld [vmem:[%s11155_s10 + $0x8] sm:$0xff] }
 0xa13   :  { %v4532_v28 = vrot.slane %v4531_v54, 1 }
 0xa15   :  { %v4533_v30 = vadd.f32 %v4532_v28, %v4531_v54 }
 0xa17   :  { %v4534_v42 = vadd.f32 %v5562_v29, %v4533_v30 }
 0xa19   :  { %v4771_v24 = vmul.f32 -1.442695, %v4534_v42 }
 0xa1b   :  { %5530 = vpow2.f32 %v4771_v24 }
 0xa25   :  { %v5531_v20 = vpop.eup %5530 }
 0xa26   :  { %v4538_v47 = vadd.f32 1.0, %v5531_v20 }
 0xa28   :  { %5532 = vrcp.f32 %v4538_v47 }
 0xa32   :  { %v5533_v41 = vpop.eup %5532 }
 0xa33   :  { %v4541_v52 = vmul.f32 %v5533_v41, %v4534_v42  ;;  %v13174_v41 = vld [vmem:[#allocation134_spill] sm:$0xff] }
 0xa35   :  { %v4545_v63 = vrot.slane %v4541_v52, %v13169_v60 }
 0xa37   :  { %v4547_v35 = vmul.f32 %v5563_v44, %v4545_v63  ;;  %v4546_v17 = vmul.f32 %v5564_v56, %v4545_v63  ;;  %v4549_v16 = vmul.f32 %v5565_v9, %v4545_v63  ;;  %v4548_v38 = vmul.f32 %v5566_v1, %v4545_v63  ;;  %v13176_v1 = vld [vmem:[#allocation140_spill] sm:$0xff] }
 0xa39   :  { %v4553_v27 = vsel %vm13170_vm4, %v4547_v35, 0.0  ;;  %v4550_v11 = vsel %vm13171_vm10, %v4546_v17, 0.0  ;;  %v4559_v7 = vsel %vm13172_vm3, %v4549_v16, 0.0  ;;  %v4556_v25 = vsel %vm13173_vm0, %v4548_v38, 0.0 }
 0xa3a   :  { %4554 = vadd.xlane.f32.xlu0 %v4553_v27  ;;  %4551 = vadd.xlane.f32.xlu1 %v4550_v11 }
 0xa3e   :  { %4560 = vadd.xlane.f32.xlu0 %v4559_v7  ;;  %4557 = vadd.xlane.f32.xlu1 %v4556_v25  ;;  %v13177_v7 = vld [vmem:[#allocation124_spill] sm:$0xff] }
 0xac7   :  { %v4555_v57 = vpop.xlane.xlu0 %4554  ;;  %v4552_v15 = vpop.xlane.xlu1 %4551 }
 0xac8   :  { %v4563_v61 = vadd.f32 %v5567_v48, %v4555_v57  ;;  %v4562_v50 = vadd.f32 %v5568_v31, %v4552_v15  ;;  %v5573_v57 = vld [vmem:[%s11145_s0 + $0x10] sm:$0xff]  ;;  %v13178_v15 = vmov 0.0   ;;  %v5576_v48 = vld [vmem:[%s11154_s9 + $0x8] sm:$0xff] }
 0xaca   :  { %v4773_v33 = vmul.f32 -1.442695, %v4563_v61  ;;  %v4772_v8 = vmul.f32 -1.442695, %v4562_v50 }
 0xacb   :  { %v4561_v26 = vpop.xlane.xlu0 %4560  ;;  %v4558_v49 = vpop.xlane.xlu1 %4557 }
 0xacc   :  { %5534 = vpow2.f32 %v4773_v33  ;;  %v4565_v13 = vadd.f32 %v5569_v18, %v4561_v26  ;;  %v4564_v21 = vadd.f32 %v5570_v37, %v4558_v49  ;;  %v5578_v49 = vld [vmem:[%s11145_s0 + $0x28] sm:$0xff] }
 0xacd   :  { %5536 = vpow2.f32 %v4772_v8  ;;  %v5577_v8 = vld [vmem:[%s11145_s0 + $0x20] sm:$0xff] }
 0xace   :  { %v4775_v14 = vmul.f32 -1.442695, %v4565_v13  ;;  %v4774_v46 = vmul.f32 -1.442695, %v4564_v21 }
 0xad0   :  { %5538 = vpow2.f32 %v4775_v14 }
 0xad1   :  { %5540 = vpow2.f32 %v4774_v46  ;;  %v5579_v46 = vld [vmem:[%s11145_s0 + $0x30] sm:$0xff] }
 0xad6   :  { %v5535_v10 = vpop.eup %5534 }
 0xad7   :  { %v5537_v59 = vpop.eup %5536  ;;  %v4579_v39 = vadd.f32 1.0, %v5535_v10 }
 0xad8   :  { %v4578_v58 = vadd.f32 1.0, %v5537_v59  ;;  %v5580_v59 = vld [vmem:[%s11145_s0 + $0x38] sm:$0xff] }
 0xad9   :  { %5542 = vrcp.f32 %v4579_v39 }
 0xada   :  { %v5539_v53 = vpop.eup %5538  ;;  %5544 = vrcp.f32 %v4578_v58 }
 0xadb   :  { %v5541_v5 = vpop.eup %5540  ;;  %v4581_v4 = vadd.f32 1.0, %v5539_v53 }
 0xadc   :  { %v4580_v36 = vadd.f32 1.0, %v5541_v5 }
 0xade   :  { %5546 = vrcp.f32 %v4580_v36 }
 0xadf   :  { %5548 = vrcp.f32 %v4581_v4 }
 0xae3   :  { %v5543_v12 = vpop.eup %5542 }
 0xae4   :  { %v5545_v55 = vpop.eup %5544  ;;  %4597 = vperm.xlu0 %5125, %v5543_v12  }
 0xae5   :  { %4592 = vperm.xlu1 %5136, %v5545_v55  }
 0xae8   :  { %v5547_v45 = vpop.eup %5546  ;;  %2572 = vperm.xlu0 %5125, %v78_v2  }
 0xae9   :  { %4602 = vperm.xlu1 %5136, %v5547_v45   ;;  %v5549_v62 = vpop.eup %5548 }
 0xaed   :  { %4607 = vperm.xlu1 %5136, %v5549_v62  }
 0xaf1   :  { %2577 = vperm.xlu1 %5136, %v79_v43  }
 0xb63   :  { %v4598_v3 = vpop.permute.xlu0 %4597 }
 0xb64   :  { %v4612_v54 = vmul.f32 %v4598_v3, %v11015_v32  ;;  %v4613_v28 = vmul.f32 %v4598_v3, %v11012_v40  ;;  %v4593_v30 = vpop.permute.xlu1 %4592  ;;  %v5571_v32 = vld [vmem:[%s11145_s0] sm:$0xff] }
 0xb65   :  { %v4610_v29 = vmul.f32 %v4593_v30, %v11004_v0  ;;  %v4611_v42 = vmul.f32 %v4593_v30, %v11007_v19  ;;  %v5572_v0 = vld [vmem:[%s11145_s0 + $0x8] sm:$0xff] }
 0xb67   :  { %v4794_v24 = vpack.c.bf16 %v4613_v28, %v4611_v42  ;;  %v4796_v20 = vpack.c.bf16 %v4612_v54, %v4610_v29  ;;  %v2573_v47 = vpop.permute.xlu0 %2572 }
 0xb68   :  { %v2653_v52 = vadd.f32 %v13174_v41, %v2573_v47  ;;  %v2655_v60 = vadd.f32 %v13175_v22, %v2573_v47  ;;  %v4603_v63 = vpop.permute.xlu1 %4602 }
 0xb69   :  { %4795 = vmatprep.subr.bf16.mxu0 %v4794_v24  ;;  %v4614_v35 = vmul.f32 %v4603_v63, %v11020_v34  ;;  %v4615_v56 = vmul.f32 %v4603_v63, %v11022_v6  ;;  %v5574_v6 = vld [vmem:[%s11145_s0 + $0x18] sm:$0xff] }
 0xb6a   :  { %v2663_v44 = vadd.f32 %v5571_v32, %v2653_v52  ;;  %v2664_v40 = vadd.f32 %v5572_v0, %v2655_v60  ;;  %4797 = vmatpush1.bf16.msra.mxu0 %v4796_v20 }
 0xb6c   :  { %2667 = vst [vmem:[#allocation3] sm:$0xff] %v2663_v44  ;;  %2668 = vst [vmem:[#allocation3 + $0x8] sm:$0xff] %v2664_v40  ;;  %v4608_v19 = vpop.permute.xlu1 %4607 }
 0xb6d   :  { %v4616_v17 = vmul.f32 %v4608_v19, %v11026_v23  ;;  %v4617_v27 = vmul.f32 %v4608_v19, %v11028_v51  ;;  %v5575_v51 = vld [vmem:[%s11154_s9] sm:$0xff]  ;;  %s5655_s9 = smov [#allocation3]  }
 0xb6e   :  { %s4709_s27 = sshll.u32 %s5655_s9, 4  ;;  %s4710_s27 = int_to_ptr.vmem [resolvable:$true] %s4709_s27 }
 0xb6f   :  { %v4798_v11 = vpack.c.bf16 %v4617_v27, %v4615_v56  ;;  %v4800_v9 = vpack.c.bf16 %v4616_v17, %v4614_v35  ;;  %s5581_s13 = scalar_lea.vmem %s4710_s27, 1024  ;;  %p5586_p1 = scmp.lt.s32.totalorder %s4710_s27, %s4710_s27 }
 0xb70   :  { %v2578_v16 = vpop.permute.xlu1 %2577  ;;  %p5582_p0 = scmp.ne.s32.totalorder %s4710_s27, %s5581_s13  ;;  %p5587_p2 = scmp.lt.s32.totalorder %s5581_s13, %s5581_s13 }
 0xb71   :  { %v2659_v38 = vadd.f32 %v13176_v1, %v2578_v16  ;;  %v2661_v25 = vadd.f32 %v13177_v7, %v2578_v16  ;;  %4799 = vmatprep.subr.bf16.mxu0 %v4798_v11 }
 0xb72   :  { %4801 = vmatpush1.bf16.msra.mxu0 %v4800_v9  ;;  %p5588_p3 = por %p5587_p2, %p5586_p1 }
 0xb73   :  { %v2665_v34 = vadd.f32 %v5573_v57, %v2659_v38  ;;  %v2666_v23 = vadd.f32 %v5574_v6, %v2661_v25 }
 0xb74   :  { %p5589_p4 = pnand %p5588_p3, %p5582_p0 }
 0xb75   :  { %2669 = vst [vmem:[#allocation3 + $0x10] sm:$0xff] %v2665_v34  ;;  %2670 = vst [vmem:[#allocation3 + $0x18] sm:$0xff] %v2666_v23  ;;  %4776 = vmatmul.mubr.msk.f32.vlgmr.msra.gmra.mrb[8].mxu0 %vm539_vm2, %v5575_v51 }
 0xb76   :  { %4688 = vmatprep.mubr.f32.mxu0 %v13178_v15 }
 0xb79   :  { %4777 = vmatmul.mubr.msk.f32.gmra.mrb[10].mxu0 %vm539_vm2, %v5576_v48 }
 0xc48   :  { %v4684_v61 = vpop.f32.mrb[8].mxu0 }
 0xc49   :  { %v4685_v31 = vadd.f32 %v4684_v61, %v2573_v47  ;;  %v4686_v50 = vpop.f32.mrb[9].mxu0 }
 0xc4a   :  { %v4687_v33 = vadd.f32 %v4686_v50, %v2573_v47 }
 0xc4b   :  { %v4695_v26 = vadd.f32 %v5577_v8, %v4685_v31 }
 0xc4c   :  { %v4696_v18 = vadd.f32 %v5578_v49, %v4687_v33  ;;  %v4690_v13 = vpop.f32.mrb[10].mxu0 }
 0xc4d   :  { %4700 = vst [vmem:[#allocation3 + $0x20] sm:$0xff] %v4695_v26  ;;  %v4691_v37 = vadd.f32 %v4690_v13, %v2578_v16  ;;  %v4692_v21 = vpop.f32.mrb[11].mxu0 }
 0xc4e   :  { %4701 = vst [vmem:[#allocation3 + $0x28] sm:$0xff] %v4696_v18  ;;  %v4693_v14 = vadd.f32 %v4692_v21, %v2578_v16 }
 0xc4f   :  { %v4697_v10 = vadd.f32 %v5579_v46, %v4691_v37 }
 0xc50   :  { %v4698_v39 = vadd.f32 %v5580_v59, %v4693_v14 }
 0xc51   :  { %4702 = vst [vmem:[#allocation3 + $0x30] sm:$0xff] %v4697_v10 }
 0xc52   :  { %4703 = vst [vmem:[#allocation3 + $0x38] sm:$0xff] %v4698_v39 }
 0xc53   :  { %5592 = shalt.err (!%p5589_p4)
}
 0xc54   :  { %s5593_s15 = scalar_lea.hbm %s11156_s11, 1024 }
 0xc55   :  { %p5594_p5 = scmp.ne.s32.totalorder %s11156_s11, %s5593_s15  ;;  %p5597_p6 = scmp.lt.u32.totalorder %s5593_s15, %s11156_s11 }
 0xc57   :  { %p5599_p7 = pnand %p5597_p6, %p5594_p5 }
 0xc59   :  { %5602 = shalt.err (!%p5599_p7)
}
 0xc5a   :  { %s5656_s19 = smov 256  }
 0xc5b   :  { %4715 = dma.vmem_to_hbm [thread:$0]  %s4710_s27, 1024, %s11156_s11, [#allocation4], %s5656_s19, %s5656_s19, %s5620_s17  }
 0xc5c   :  { %5603 = dma.done.wait [#allocation4], 1024  }
 0xc5d   :  { %5604 = vsyncadd [#allocation4], 4294966272 }
 0xc5e   :  { %4719 = vsyncpa [#allocation4], 1 }

</bundles_post_ra>
